<compile_context>
chip_gen: v7x
topology: tpu7x:2x2x1
jax: 0.10.0
libtpu: 0.0.40
codegen_flags: <defaults>
</compile_context>

<pallas_src>
import functools

import jax
import jax.numpy as jnp
from jax.experimental import pallas as pl
from jax.experimental.pallas import tpu as pltpu


LRELU_SLOPE = 0.2
BN_EPS = 1e-5
LANE = 128          # TPU lane width: channel slabs are padded to multiples of this
_TM_MAX = 512       # M-tile cap (multiple of 16, bf16-sublane friendly)


def _round_up(x, m):
    return ((x + m - 1) // m) * m


def _m_tiling(M):
    """Pick (tm, grid_m) with NO row padding.

    Splits M across >= 2 tiles (so the "parallel" grid axis shards across both
    v7x TensorCores) only when a nice tile divides M exactly; otherwise uses a
    single full-extent block, which is always a legal block shape.
    """
    if M >= 256:
        for tm in (_TM_MAX, _TM_MAX // 2, 128):
            if tm < M and M % tm == 0:
                return tm, M // tm
    return M, 1


# ------------------------------------------------------------------ kernels --

def _conv_bias_act_kernel(p_ref, w_ref, b_ref, o_ref, *, activation):
    """One M-tile of the im2col matmul, fused bias + activation (no BN stats).

    p_ref : (tm, Kp)  bf16 patches (tiled over M, pipelined)
    w_ref : (Kp, Np)  bf16 weights (VMEM-resident across the grid)
    b_ref : (1,  Np)  f32 bias     (VMEM-resident)
    o_ref : (tm, Np)  activation output (bf16 or f32), lane-dense
    """
    acc = jnp.dot(p_ref[...], w_ref[...], preferred_element_type=jnp.float32)
    acc = acc + b_ref[...]
    if activation == "leaky_relu":
        act = jnp.where(acc >= 0.0, acc, LRELU_SLOPE * acc)
    elif activation == "sigmoid":
        # Numerically stable sigmoid; exact divide keeps output strictly in [0,1].
        z = jnp.exp(-jnp.abs(acc))
        inv = 1.0 / (1.0 + z)
        act = jnp.where(acc >= 0.0, inv, z * inv)
    else:
        act = acc
    o_ref[...] = act.astype(o_ref.dtype)


def _conv_bn_lrelu_kernel(p_ref, w_ref, g_ref, bt_ref, o_ref):
    """Fused conv (bias=False) + train-mode BatchNorm + leaky_relu(0.2).

    Runs as a single full-M grid step, so batch statistics are exact and
    computed directly from the f32 MXU accumulator (no padded rows exist).
    Padded output channels have zero weights and zero gamma/beta, so they stay
    exactly zero and never pollute the next layer.
    """
    acc = jnp.dot(p_ref[...], w_ref[...], preferred_element_type=jnp.float32)
    mean = jnp.mean(acc, axis=0, keepdims=True)                        # (1, Np)
    var = jnp.maximum(jnp.mean(acc * acc, axis=0, keepdims=True)
                      - mean * mean, 0.0)                              # biased var
    inv_std = jax.lax.rsqrt(var + BN_EPS)                              # EUP
    scale = g_ref[...] * inv_std
    shift = bt_ref[...] - mean * scale
    y = acc * scale + shift
    o_ref[...] = jnp.where(y >= 0.0, y, LRELU_SLOPE * y).astype(o_ref.dtype)


# ----------------------------------------------------------------- JAX glue --

def _im2col_nhwc(x_nhwc, kh, kw, stride, padding):
    """NHWC patch extraction -> (N*Hout*Wout, kh*kw*C); K-order = (kh, kw, C)."""
    N, H, W, C = x_nhwc.shape
    xp = jnp.pad(x_nhwc, ((0, 0), (padding, padding), (padding, padding), (0, 0)))
    Hout = (H + 2 * padding - kh) // stride + 1
    Wout = (W + 2 * padding - kw) // stride + 1
    taps = [xp[:, i:i + stride * (Hout - 1) + 1:stride,
               j:j + stride * (Wout - 1) + 1:stride, :]
            for i in range(kh) for j in range(kw)]
    patches = jnp.concatenate(taps, axis=-1)
    return patches.reshape(N * Hout * Wout, kh * kw * C), Hout, Wout
    # TODO(synk): fold this into the kernel via in-kernel strided reads / manual
    # DMA so the patch tensor is never materialized in HBM for large images.


def _prep_weight(w_oikk, cin_p, cout_p):
    """PyTorch (Cout,Cin,kh,kw) -> lane-padded (kh*kw*Cin_p, Cout_p) bf16."""
    Cout, Cin, kh, kw = w_oikk.shape
    w = jnp.transpose(w_oikk, (2, 3, 1, 0))                 # (kh, kw, Cin, Cout)
    w = jnp.pad(w, ((0, 0), (0, 0), (0, cin_p - Cin), (0, cout_p - Cout)))
    return w.reshape(kh * kw * cin_p, cout_p).astype(jnp.bfloat16)


def _pad_vec(v, cout_p):
    return jnp.pad(v.astype(jnp.float32), (0, cout_p - v.shape[0])).reshape(1, cout_p)


def conv2d_act(x_nhwc_p, w_oikk, bias, stride, padding, activation, out_dtype):
    """Conv + bias + activation on a lane-padded bf16 NHWC slab (conv1 / conv5)."""
    Cout = w_oikk.shape[0]
    kh, kw = w_oikk.shape[2], w_oikk.shape[3]
    N, Cin_p = x_nhwc_p.shape[0], x_nhwc_p.shape[-1]
    Cout_p = _round_up(Cout, LANE)

    patches, Hout, Wout = _im2col_nhwc(x_nhwc_p, kh, kw, stride, padding)
    M, Kp = patches.shape
    w2d = _prep_weight(w_oikk, Cin_p, Cout_p)
    b2d = _pad_vec(bias, Cout_p)

    tm, grid_m = _m_tiling(M)
    cost = pl.CostEstimate(
        flops=2 * M * Kp * Cout_p,
        transcendentals=M * Cout_p if activation == "sigmoid" else 0,
        bytes_accessed=(M * Kp + Kp * Cout_p) * 2 + Cout_p * 4
        + M * Cout_p * jnp.dtype(out_dtype).itemsize,
    )
    out = pl.pallas_call(
        functools.partial(_conv_bias_act_kernel, activation=activation),
        out_shape=jax.ShapeDtypeStruct((M, Cout_p), out_dtype),
        grid=(grid_m,),
        in_specs=[
            pl.BlockSpec((tm, Kp), lambda i: (i, 0)),        # patches: tiled over M
            pl.BlockSpec((Kp, Cout_p), lambda i: (0, 0)),    # weights: resident
            pl.BlockSpec((1, Cout_p), lambda i: (0, 0)),     # bias: resident
        ],
        out_specs=pl.BlockSpec((tm, Cout_p), lambda i: (i, 0)),
        compiler_params=pltpu.CompilerParams(
            dimension_semantics=("parallel",)),              # megacore on v7x
        cost_estimate=cost,
    )(patches, w2d, b2d)
    return out.reshape(N, Hout, Wout, Cout_p)


def conv2d_bn_lrelu(x_nhwc_p, w_oikk, gamma, beta, stride, padding):
    """Conv (bias=False) + BatchNorm (batch stats) + leaky_relu, single fused kernel."""
    Cout = w_oikk.shape[0]
    kh, kw = w_oikk.shape[2], w_oikk.shape[3]
    N, Cin_p = x_nhwc_p.shape[0], x_nhwc_p.shape[-1]
    Cout_p = _round_up(Cout, LANE)

    patches, Hout, Wout = _im2col_nhwc(x_nhwc_p, kh, kw, stride, padding)
    M, Kp = patches.shape
    w2d = _prep_weight(w_oikk, Cin_p, Cout_p)
    g2d = _pad_vec(gamma, Cout_p)
    bt2d = _pad_vec(beta, Cout_p)

    # TODO(synk): single full-M grid step; very large M would need a two-pass
    # grid (stats pass + apply pass).  Fine for this network's shapes.
    cost = pl.CostEstimate(
        flops=2 * M * Kp * Cout_p + 8 * M * Cout_p,
        transcendentals=Cout_p,
        bytes_accessed=(M * Kp + Kp * Cout_p) * 2 + 2 * Cout_p * 4 + M * Cout_p * 2,
    )
    out = pl.pallas_call(
        _conv_bn_lrelu_kernel,
        out_shape=jax.ShapeDtypeStruct((M, Cout_p), jnp.bfloat16),
        grid=(1,),
        in_specs=[
            pl.BlockSpec((M, Kp), lambda i: (0, 0)),
            pl.BlockSpec((Kp, Cout_p), lambda i: (0, 0)),
            pl.BlockSpec((1, Cout_p), lambda i: (0, 0)),
            pl.BlockSpec((1, Cout_p), lambda i: (0, 0)),
        ],
        out_specs=pl.BlockSpec((M, Cout_p), lambda i: (0, 0)),
        compiler_params=pltpu.CompilerParams(
            dimension_semantics=("arbitrary",)),
        cost_estimate=cost,
    )(patches, w2d, g2d, bt2d)
    return out.reshape(N, Hout, Wout, Cout_p)


def patch_discriminator_forward(image_nchw, params):
    N, Cin, H, W = image_nchw.shape
    Cin_p = _round_up(Cin, LANE)
    # NCHW -> NHWC once at the API boundary; stay lane-padded bf16 NHWC inside.
    x = jnp.transpose(image_nchw, (0, 2, 3, 1))
    x = jnp.pad(x, ((0, 0), (0, 0), (0, 0), (0, Cin_p - Cin))).astype(jnp.bfloat16)

    # conv1 -> leaky_relu (bf16 slab feeds the next layer's im2col directly)
    x = conv2d_act(x, params["w1"], params["b1"], stride=2, padding=1,
                   activation="leaky_relu", out_dtype=jnp.bfloat16)

    # conv{2,3,4} (bias=False) -> BatchNorm (train-mode batch stats) -> leaky_relu
    x = conv2d_bn_lrelu(x, params["w2"], params["g2"], params["be2"], stride=2, padding=1)
    x = conv2d_bn_lrelu(x, params["w3"], params["g3"], params["be3"], stride=2, padding=1)
    x = conv2d_bn_lrelu(x, params["w4"], params["g4"], params["be4"], stride=1, padding=1)

    # conv5 -> sigmoid
    y = conv2d_act(x, params["w5"], params["b5"], stride=1, padding=1,
                   activation="sigmoid", out_dtype=jnp.float32)
    y = y[..., :params["w5"].shape[0]]                 # drop lane padding at boundary
    return jnp.transpose(y, (0, 3, 1, 2))              # back to NCHW


# ------------------------------------------------------------------- params --

def init_params(key, in_channels=3, oc=8, k=4, std=0.02):
    ks = jax.random.split(key, 8)
    return {
        "w1": std * jax.random.normal(ks[0], (oc, in_channels, k, k), jnp.float32),
        "b1": std * jax.random.normal(ks[1], (oc,), jnp.float32),
        "w2": std * jax.random.normal(ks[2], (oc * 2, oc, k, k), jnp.float32),
        "g2": jnp.ones((oc * 2,), jnp.float32),
        "be2": jnp.zeros((oc * 2,), jnp.float32),
        "w3": std * jax.random.normal(ks[3], (oc * 4, oc * 2, k, k), jnp.float32),
        "g3": jnp.ones((oc * 4,), jnp.float32),
        "be3": jnp.zeros((oc * 4,), jnp.float32),
        "w4": std * jax.random.normal(ks[4], (oc * 8, oc * 4, k, k), jnp.float32),
        "g4": jnp.ones((oc * 8,), jnp.float32),
        "be4": jnp.zeros((oc * 8,), jnp.float32),
        "w5": std * jax.random.normal(ks[5], (1, oc * 8, k, k), jnp.float32),
        "b5": std * jax.random.normal(ks[6], (1,), jnp.float32),
    }


# --------------------------------------------------------------------- main --

if __name__ == "__main__":
    key = jax.random.PRNGKey(0)
    pkey, xkey = jax.random.split(key)

    in_channels, oc = 3, 8        # small, shape-consistent with the module
    N, H, W = 2, 32, 32           # 32 -> 16 -> 8 -> 4 -> 3 -> 2

    params = init_params(pkey, in_channels=in_channels, oc=oc)
    image = jax.random.normal(xkey, (N, in_channels, H, W), jnp.float32)

    fwd = jax.jit(patch_discriminator_forward)
    out = jax.block_until_ready(fwd(image, params))

    assert out.shape == (N, 1, 2, 2), out.shape
    assert bool(jnp.all(jnp.isfinite(out)))
    assert bool(jnp.all((out >= 0.0) & (out <= 1.0)))   # exact sigmoid divide
    print("KERNEL_OK")
</pallas_src>

<mosaic_0001>
module attributes {stable_mosaic.version = 11 : i64} {
  func.func @_conv_bias_act_kernel(%arg0: i32, %arg1: memref<256x2048xbf16, #tpu.memory_space<vmem>>, %arg2: memref<2048x128xbf16, #tpu.memory_space<vmem>>, %arg3: memref<1x128xf32, #tpu.memory_space<vmem>>, %arg4: memref<256x128xbf16, #tpu.memory_space<vmem>>) attributes {dimension_semantics = [#tpu.dimension_semantics<parallel>], iteration_bounds = array<i64: 2>, scalar_prefetch = 0 : i64, scratch_operands = 0 : i64, tpu.core_type = #tpu.core_type<tc>, window_params = [{transform_indices = @transform_0, window_bounds = array<i64: 256, 2048>}, {pipeline_mode = #tpu.pipeline_mode<synchronous>, transform_indices = @transform_1, window_bounds = array<i64: 2048, 128>}, {pipeline_mode = #tpu.pipeline_mode<synchronous>, transform_indices = @transform_2, window_bounds = array<i64: 1, 128>}, {transform_indices = @transform_3, window_bounds = array<i64: 256, 128>}]} {
    %c0 = arith.constant 0 : index
    %c0_0 = arith.constant 0 : index
    %0 = vector.load %arg1[%c0, %c0_0] : memref<256x2048xbf16, #tpu.memory_space<vmem>>, vector<256x2048xbf16>
    %c0_1 = arith.constant 0 : index
    %c0_2 = arith.constant 0 : index
    %1 = vector.load %arg2[%c0_1, %c0_2] : memref<2048x128xbf16, #tpu.memory_space<vmem>>, vector<2048x128xbf16>
    %cst = arith.constant dense<0.000000e+00> : vector<256x128xf32>
    %2 = tpu.matmul %0, %1, %cst {dimension_numbers = #tpu.dot_dimension_numbers<[1], [0], [0], [1], [0, 0, 1, 1], [], []>} : vector<256x2048xbf16>, vector<2048x128xbf16>, vector<256x128xf32> -> vector<256x128xf32>
    %c0_3 = arith.constant 0 : index
    %c0_4 = arith.constant 0 : index
    %3 = vector.load %arg3[%c0_3, %c0_4] : memref<1x128xf32, #tpu.memory_space<vmem>>, vector<1x128xf32>
    %4 = vector.broadcast %3 : vector<1x128xf32> to vector<256x128xf32>
    %5 = arith.addf %2, %4 : vector<256x128xf32>
    %cst_5 = arith.constant 0.000000e+00 : f32
    %6 = vector.broadcast %cst_5 : f32 to vector<256x128xf32>
    %7 = arith.cmpf oge, %5, %6 : vector<256x128xf32>
    %cst_6 = arith.constant 2.000000e-01 : f32
    %8 = vector.broadcast %cst_6 : f32 to vector<256x128xf32>
    %9 = arith.mulf %8, %5 : vector<256x128xf32>
    %10 = arith.select %7, %5, %9 : vector<256x128xi1>, vector<256x128xf32>
    %11 = arith.truncf %10 : vector<256x128xf32> to vector<256x128xbf16>
    %c0_7 = arith.constant 0 : index
    %c0_8 = arith.constant 0 : index
    %12 = vector.load %arg4[%c0_7, %c0_8] : memref<256x128xbf16, #tpu.memory_space<vmem>>, vector<256x128xbf16>
    tpu.vector_store %arg4[%c0_7, %c0_8], %11 {strides = array<i32>} : memref<256x128xbf16, #tpu.memory_space<vmem>>, vector<256x128xbf16>,
    return
  }
  func.func @transform_0(%arg0: i32) -> (i32, i32) {
    %c0_i32 = arith.constant 0 : i32
    %c0_i32_0 = arith.constant 0 : i32
    return %arg0, %c0_i32 : i32, i32
  }
  func.func @transform_1(%arg0: i32) -> (i32, i32) {
    %c0_i32 = arith.constant 0 : i32
    %c0_i32_0 = arith.constant 0 : i32
    %c0_i32_1 = arith.constant 0 : i32
    return %c0_i32, %c0_i32_0 : i32, i32
  }
  func.func @transform_2(%arg0: i32) -> (i32, i32) {
    %c0_i32 = arith.constant 0 : i32
    %c0_i32_0 = arith.constant 0 : i32
    %c0_i32_1 = arith.constant 0 : i32
    return %c0_i32, %c0_i32_0 : i32, i32
  }
  func.func @transform_3(%arg0: i32) -> (i32, i32) {
    %c0_i32 = arith.constant 0 : i32
    %c0_i32_0 = arith.constant 0 : i32
    return %arg0, %c0_i32 : i32, i32
  }
}

module attributes {stable_mosaic.version = 11 : i64} {
  func.func @_conv_bn_lrelu_kernel(%arg0: i32, %arg1: memref<128x2048xbf16, #tpu.memory_space<vmem>>, %arg2: memref<2048x128xbf16, #tpu.memory_space<vmem>>, %arg3: memref<1x128xf32, #tpu.memory_space<vmem>>, %arg4: memref<1x128xf32, #tpu.memory_space<vmem>>, %arg5: memref<128x128xbf16, #tpu.memory_space<vmem>>) attributes {dimension_semantics = [#tpu.dimension_semantics<arbitrary>], iteration_bounds = array<i64: 1>, scalar_prefetch = 0 : i64, scratch_operands = 0 : i64, tpu.core_type = #tpu.core_type<tc>, window_params = [{pipeline_mode = #tpu.pipeline_mode<synchronous>, transform_indices = @transform_0, window_bounds = array<i64: 128, 2048>}, {pipeline_mode = #tpu.pipeline_mode<synchronous>, transform_indices = @transform_1, window_bounds = array<i64: 2048, 128>}, {pipeline_mode = #tpu.pipeline_mode<synchronous>, transform_indices = @transform_2, window_bounds = array<i64: 1, 128>}, {pipeline_mode = #tpu.pipeline_mode<synchronous>, transform_indices = @transform_3, window_bounds = array<i64: 1, 128>}, {pipeline_mode = #tpu.pipeline_mode<synchronous>, transform_indices = @transform_4, window_bounds = array<i64: 128, 128>}]} {
    %c0 = arith.constant 0 : index
    %c0_0 = arith.constant 0 : index
    %0 = vector.load %arg1[%c0, %c0_0] : memref<128x2048xbf16, #tpu.memory_space<vmem>>, vector<128x2048xbf16>
    %c0_1 = arith.constant 0 : index
    %c0_2 = arith.constant 0 : index
    %1 = vector.load %arg2[%c0_1, %c0_2] : memref<2048x128xbf16, #tpu.memory_space<vmem>>, vector<2048x128xbf16>
    %cst = arith.constant dense<0.000000e+00> : vector<128x128xf32>
    %2 = tpu.matmul %0, %1, %cst {dimension_numbers = #tpu.dot_dimension_numbers<[1], [0], [0], [1], [0, 0, 1, 1], [], []>} : vector<128x2048xbf16>, vector<2048x128xbf16>, vector<128x128xf32> -> vector<128x128xf32>
    %cst_3 = arith.constant dense<0.000000e+00> : vector<128xf32>
    %3 = vector.multi_reduction <add>, %2, %cst_3 [0] : vector<128x128xf32> to vector<128xf32>
    %4 = vector.shape_cast %3 : vector<128xf32> to vector<1x128xf32>
    %cst_4 = arith.constant 1.280000e+02 : f32
    %5 = vector.broadcast %cst_4 : f32 to vector<1x128xf32>
    %6 = arith.divf %4, %5 : vector<1x128xf32>
    %7 = arith.mulf %2, %2 : vector<128x128xf32>
    %cst_5 = arith.constant dense<0.000000e+00> : vector<128xf32>
    %8 = vector.multi_reduction <add>, %7, %cst_5 [0] : vector<128x128xf32> to vector<128xf32>
    %9 = vector.shape_cast %8 : vector<128xf32> to vector<1x128xf32>
    %cst_6 = arith.constant 1.280000e+02 : f32
    %10 = vector.broadcast %cst_6 : f32 to vector<1x128xf32>
    %11 = arith.divf %9, %10 : vector<1x128xf32>
    %12 = arith.mulf %6, %6 : vector<1x128xf32>
    %13 = arith.subf %11, %12 : vector<1x128xf32>
    %cst_7 = arith.constant 0.000000e+00 : f32
    %14 = vector.broadcast %cst_7 : f32 to vector<1x128xf32>
    %15 = arith.maximumf %13, %14 : vector<1x128xf32>
    %cst_8 = arith.constant 9.99999974E-6 : f32
    %16 = vector.broadcast %cst_8 : f32 to vector<1x128xf32>
    %17 = arith.addf %15, %16 : vector<1x128xf32>
    %18 = math.rsqrt %17 : vector<1x128xf32>
    %c0_9 = arith.constant 0 : index
    %c0_10 = arith.constant 0 : index
    %19 = vector.load %arg3[%c0_9, %c0_10] : memref<1x128xf32, #tpu.memory_space<vmem>>, vector<1x128xf32>
    %20 = arith.mulf %19, %18 : vector<1x128xf32>
    %c0_11 = arith.constant 0 : index
    %c0_12 = arith.constant 0 : index
    %21 = vector.load %arg4[%c0_11, %c0_12] : memref<1x128xf32, #tpu.memory_space<vmem>>, vector<1x128xf32>
    %22 = arith.mulf %6, %20 : vector<1x128xf32>
    %23 = arith.subf %21, %22 : vector<1x128xf32>
    %24 = vector.broadcast %20 : vector<1x128xf32> to vector<128x128xf32>
    %25 = arith.mulf %2, %24 : vector<128x128xf32>
    %26 = vector.broadcast %23 : vector<1x128xf32> to vector<128x128xf32>
    %27 = arith.addf %25, %26 : vector<128x128xf32>
    %cst_13 = arith.constant 0.000000e+00 : f32
    %28 = vector.broadcast %cst_13 : f32 to vector<128x128xf32>
    %29 = arith.cmpf oge, %27, %28 : vector<128x128xf32>
    %cst_14 = arith.constant 2.000000e-01 : f32
    %30 = vector.broadcast %cst_14 : f32 to vector<128x128xf32>
    %31 = arith.mulf %30, %27 : vector<128x128xf32>
    %32 = arith.select %29, %27, %31 : vector<128x128xi1>, vector<128x128xf32>
    %33 = arith.truncf %32 : vector<128x128xf32> to vector<128x128xbf16>
    %c0_15 = arith.constant 0 : index
    %c0_16 = arith.constant 0 : index
    %34 = vector.load %arg5[%c0_15, %c0_16] : memref<128x128xbf16, #tpu.memory_space<vmem>>, vector<128x128xbf16>
    tpu.vector_store %arg5[%c0_15, %c0_16], %33 {strides = array<i32>} : memref<128x128xbf16, #tpu.memory_space<vmem>>, vector<128x128xbf16>,
    return
  }
  func.func @transform_0(%arg0: i32) -> (i32, i32) {
    %c0_i32 = arith.constant 0 : i32
    %c0_i32_0 = arith.constant 0 : i32
    %c0_i32_1 = arith.constant 0 : i32
    return %c0_i32, %c0_i32_0 : i32, i32
  }
  func.func @transform_1(%arg0: i32) -> (i32, i32) {
    %c0_i32 = arith.constant 0 : i32
    %c0_i32_0 = arith.constant 0 : i32
    %c0_i32_1 = arith.constant 0 : i32
    return %c0_i32, %c0_i32_0 : i32, i32
  }
  func.func @transform_2(%arg0: i32) -> (i32, i32) {
    %c0_i32 = arith.constant 0 : i32
    %c0_i32_0 = arith.constant 0 : i32
    %c0_i32_1 = arith.constant 0 : i32
    return %c0_i32, %c0_i32_0 : i32, i32
  }
  func.func @transform_3(%arg0: i32) -> (i32, i32) {
    %c0_i32 = arith.constant 0 : i32
    %c0_i32_0 = arith.constant 0 : i32
    %c0_i32_1 = arith.constant 0 : i32
    return %c0_i32, %c0_i32_0 : i32, i32
  }
  func.func @transform_4(%arg0: i32) -> (i32, i32) {
    %c0_i32 = arith.constant 0 : i32
    %c0_i32_0 = arith.constant 0 : i32
    %c0_i32_1 = arith.constant 0 : i32
    return %c0_i32, %c0_i32_0 : i32, i32
  }
}

module attributes {stable_mosaic.version = 11 : i64} {
  func.func @_conv_bn_lrelu_kernel(%arg0: i32, %arg1: memref<32x2048xbf16, #tpu.memory_space<vmem>>, %arg2: memref<2048x128xbf16, #tpu.memory_space<vmem>>, %arg3: memref<1x128xf32, #tpu.memory_space<vmem>>, %arg4: memref<1x128xf32, #tpu.memory_space<vmem>>, %arg5: memref<32x128xbf16, #tpu.memory_space<vmem>>) attributes {dimension_semantics = [#tpu.dimension_semantics<arbitrary>], iteration_bounds = array<i64: 1>, scalar_prefetch = 0 : i64, scratch_operands = 0 : i64, tpu.core_type = #tpu.core_type<tc>, window_params = [{pipeline_mode = #tpu.pipeline_mode<synchronous>, transform_indices = @transform_0, window_bounds = array<i64: 32, 2048>}, {pipeline_mode = #tpu.pipeline_mode<synchronous>, transform_indices = @transform_1, window_bounds = array<i64: 2048, 128>}, {pipeline_mode = #tpu.pipeline_mode<synchronous>, transform_indices = @transform_2, window_bounds = array<i64: 1, 128>}, {pipeline_mode = #tpu.pipeline_mode<synchronous>, transform_indices = @transform_3, window_bounds = array<i64: 1, 128>}, {pipeline_mode = #tpu.pipeline_mode<synchronous>, transform_indices = @transform_4, window_bounds = array<i64: 32, 128>}]} {
    %c0 = arith.constant 0 : index
    %c0_0 = arith.constant 0 : index
    %0 = vector.load %arg1[%c0, %c0_0] : memref<32x2048xbf16, #tpu.memory_space<vmem>>, vector<32x2048xbf16>
    %c0_1 = arith.constant 0 : index
    %c0_2 = arith.constant 0 : index
    %1 = vector.load %arg2[%c0_1, %c0_2] : memref<2048x128xbf16, #tpu.memory_space<vmem>>, vector<2048x128xbf16>
    %cst = arith.constant dense<0.000000e+00> : vector<32x128xf32>
    %2 = tpu.matmul %0, %1, %cst {dimension_numbers = #tpu.dot_dimension_numbers<[1], [0], [0], [1], [0, 0, 1, 1], [], []>} : vector<32x2048xbf16>, vector<2048x128xbf16>, vector<32x128xf32> -> vector<32x128xf32>
    %cst_3 = arith.constant dense<0.000000e+00> : vector<128xf32>
    %3 = vector.multi_reduction <add>, %2, %cst_3 [0] : vector<32x128xf32> to vector<128xf32>
    %4 = vector.shape_cast %3 : vector<128xf32> to vector<1x128xf32>
    %cst_4 = arith.constant 3.200000e+01 : f32
    %5 = vector.broadcast %cst_4 : f32 to vector<1x128xf32>
    %6 = arith.divf %4, %5 : vector<1x128xf32>
    %7 = arith.mulf %2, %2 : vector<32x128xf32>
    %cst_5 = arith.constant dense<0.000000e+00> : vector<128xf32>
    %8 = vector.multi_reduction <add>, %7, %cst_5 [0] : vector<32x128xf32> to vector<128xf32>
    %9 = vector.shape_cast %8 : vector<128xf32> to vector<1x128xf32>
    %cst_6 = arith.constant 3.200000e+01 : f32
    %10 = vector.broadcast %cst_6 : f32 to vector<1x128xf32>
    %11 = arith.divf %9, %10 : vector<1x128xf32>
    %12 = arith.mulf %6, %6 : vector<1x128xf32>
    %13 = arith.subf %11, %12 : vector<1x128xf32>
    %cst_7 = arith.constant 0.000000e+00 : f32
    %14 = vector.broadcast %cst_7 : f32 to vector<1x128xf32>
    %15 = arith.maximumf %13, %14 : vector<1x128xf32>
    %cst_8 = arith.constant 9.99999974E-6 : f32
    %16 = vector.broadcast %cst_8 : f32 to vector<1x128xf32>
    %17 = arith.addf %15, %16 : vector<1x128xf32>
    %18 = math.rsqrt %17 : vector<1x128xf32>
    %c0_9 = arith.constant 0 : index
    %c0_10 = arith.constant 0 : index
    %19 = vector.load %arg3[%c0_9, %c0_10] : memref<1x128xf32, #tpu.memory_space<vmem>>, vector<1x128xf32>
    %20 = arith.mulf %19, %18 : vector<1x128xf32>
    %c0_11 = arith.constant 0 : index
    %c0_12 = arith.constant 0 : index
    %21 = vector.load %arg4[%c0_11, %c0_12] : memref<1x128xf32, #tpu.memory_space<vmem>>, vector<1x128xf32>
    %22 = arith.mulf %6, %20 : vector<1x128xf32>
    %23 = arith.subf %21, %22 : vector<1x128xf32>
    %24 = vector.broadcast %20 : vector<1x128xf32> to vector<32x128xf32>
    %25 = arith.mulf %2, %24 : vector<32x128xf32>
    %26 = vector.broadcast %23 : vector<1x128xf32> to vector<32x128xf32>
    %27 = arith.addf %25, %26 : vector<32x128xf32>
    %cst_13 = arith.constant 0.000000e+00 : f32
    %28 = vector.broadcast %cst_13 : f32 to vector<32x128xf32>
    %29 = arith.cmpf oge, %27, %28 : vector<32x128xf32>
    %cst_14 = arith.constant 2.000000e-01 : f32
    %30 = vector.broadcast %cst_14 : f32 to vector<32x128xf32>
    %31 = arith.mulf %30, %27 : vector<32x128xf32>
    %32 = arith.select %29, %27, %31 : vector<32x128xi1>, vector<32x128xf32>
    %33 = arith.truncf %32 : vector<32x128xf32> to vector<32x128xbf16>
    %c0_15 = arith.constant 0 : index
    %c0_16 = arith.constant 0 : index
    %34 = vector.load %arg5[%c0_15, %c0_16] : memref<32x128xbf16, #tpu.memory_space<vmem>>, vector<32x128xbf16>
    tpu.vector_store %arg5[%c0_15, %c0_16], %33 {strides = array<i32>} : memref<32x128xbf16, #tpu.memory_space<vmem>>, vector<32x128xbf16>,
    return
  }
  func.func @transform_0(%arg0: i32) -> (i32, i32) {
    %c0_i32 = arith.constant 0 : i32
    %c0_i32_0 = arith.constant 0 : i32
    %c0_i32_1 = arith.constant 0 : i32
    return %c0_i32, %c0_i32_0 : i32, i32
  }
  func.func @transform_1(%arg0: i32) -> (i32, i32) {
    %c0_i32 = arith.constant 0 : i32
    %c0_i32_0 = arith.constant 0 : i32
    %c0_i32_1 = arith.constant 0 : i32
    return %c0_i32, %c0_i32_0 : i32, i32
  }
  func.func @transform_2(%arg0: i32) -> (i32, i32) {
    %c0_i32 = arith.constant 0 : i32
    %c0_i32_0 = arith.constant 0 : i32
    %c0_i32_1 = arith.constant 0 : i32
    return %c0_i32, %c0_i32_0 : i32, i32
  }
  func.func @transform_3(%arg0: i32) -> (i32, i32) {
    %c0_i32 = arith.constant 0 : i32
    %c0_i32_0 = arith.constant 0 : i32
    %c0_i32_1 = arith.constant 0 : i32
    return %c0_i32, %c0_i32_0 : i32, i32
  }
  func.func @transform_4(%arg0: i32) -> (i32, i32) {
    %c0_i32 = arith.constant 0 : i32
    %c0_i32_0 = arith.constant 0 : i32
    %c0_i32_1 = arith.constant 0 : i32
    return %c0_i32, %c0_i32_0 : i32, i32
  }
}

module attributes {stable_mosaic.version = 11 : i64} {
  func.func @_conv_bn_lrelu_kernel(%arg0: i32, %arg1: memref<18x2048xbf16, #tpu.memory_space<vmem>>, %arg2: memref<2048x128xbf16, #tpu.memory_space<vmem>>, %arg3: memref<1x128xf32, #tpu.memory_space<vmem>>, %arg4: memref<1x128xf32, #tpu.memory_space<vmem>>, %arg5: memref<18x128xbf16, #tpu.memory_space<vmem>>) attributes {dimension_semantics = [#tpu.dimension_semantics<arbitrary>], iteration_bounds = array<i64: 1>, scalar_prefetch = 0 : i64, scratch_operands = 0 : i64, tpu.core_type = #tpu.core_type<tc>, window_params = [{pipeline_mode = #tpu.pipeline_mode<synchronous>, transform_indices = @transform_0, window_bounds = array<i64: 18, 2048>}, {pipeline_mode = #tpu.pipeline_mode<synchronous>, transform_indices = @transform_1, window_bounds = array<i64: 2048, 128>}, {pipeline_mode = #tpu.pipeline_mode<synchronous>, transform_indices = @transform_2, window_bounds = array<i64: 1, 128>}, {pipeline_mode = #tpu.pipeline_mode<synchronous>, transform_indices = @transform_3, window_bounds = array<i64: 1, 128>}, {pipeline_mode = #tpu.pipeline_mode<synchronous>, transform_indices = @transform_4, window_bounds = array<i64: 18, 128>}]} {
    %c0 = arith.constant 0 : index
    %c0_0 = arith.constant 0 : index
    %0 = vector.load %arg1[%c0, %c0_0] : memref<18x2048xbf16, #tpu.memory_space<vmem>>, vector<18x2048xbf16>
    %c0_1 = arith.constant 0 : index
    %c0_2 = arith.constant 0 : index
    %1 = vector.load %arg2[%c0_1, %c0_2] : memref<2048x128xbf16, #tpu.memory_space<vmem>>, vector<2048x128xbf16>
    %cst = arith.constant dense<0.000000e+00> : vector<18x128xf32>
    %2 = tpu.matmul %0, %1, %cst {dimension_numbers = #tpu.dot_dimension_numbers<[1], [0], [0], [1], [0, 0, 1, 1], [], []>} : vector<18x2048xbf16>, vector<2048x128xbf16>, vector<18x128xf32> -> vector<18x128xf32>
    %cst_3 = arith.constant dense<0.000000e+00> : vector<128xf32>
    %3 = vector.multi_reduction <add>, %2, %cst_3 [0] : vector<18x128xf32> to vector<128xf32>
    %4 = vector.shape_cast %3 : vector<128xf32> to vector<1x128xf32>
    %cst_4 = arith.constant 1.800000e+01 : f32
    %5 = vector.broadcast %cst_4 : f32 to vector<1x128xf32>
    %6 = arith.divf %4, %5 : vector<1x128xf32>
    %7 = arith.mulf %2, %2 : vector<18x128xf32>
    %cst_5 = arith.constant dense<0.000000e+00> : vector<128xf32>
    %8 = vector.multi_reduction <add>, %7, %cst_5 [0] : vector<18x128xf32> to vector<128xf32>
    %9 = vector.shape_cast %8 : vector<128xf32> to vector<1x128xf32>
    %cst_6 = arith.constant 1.800000e+01 : f32
    %10 = vector.broadcast %cst_6 : f32 to vector<1x128xf32>
    %11 = arith.divf %9, %10 : vector<1x128xf32>
    %12 = arith.mulf %6, %6 : vector<1x128xf32>
    %13 = arith.subf %11, %12 : vector<1x128xf32>
    %cst_7 = arith.constant 0.000000e+00 : f32
    %14 = vector.broadcast %cst_7 : f32 to vector<1x128xf32>
    %15 = arith.maximumf %13, %14 : vector<1x128xf32>
    %cst_8 = arith.constant 9.99999974E-6 : f32
    %16 = vector.broadcast %cst_8 : f32 to vector<1x128xf32>
    %17 = arith.addf %15, %16 : vector<1x128xf32>
    %18 = math.rsqrt %17 : vector<1x128xf32>
    %c0_9 = arith.constant 0 : index
    %c0_10 = arith.constant 0 : index
    %19 = vector.load %arg3[%c0_9, %c0_10] : memref<1x128xf32, #tpu.memory_space<vmem>>, vector<1x128xf32>
    %20 = arith.mulf %19, %18 : vector<1x128xf32>
    %c0_11 = arith.constant 0 : index
    %c0_12 = arith.constant 0 : index
    %21 = vector.load %arg4[%c0_11, %c0_12] : memref<1x128xf32, #tpu.memory_space<vmem>>, vector<1x128xf32>
    %22 = arith.mulf %6, %20 : vector<1x128xf32>
    %23 = arith.subf %21, %22 : vector<1x128xf32>
    %24 = vector.broadcast %20 : vector<1x128xf32> to vector<18x128xf32>
    %25 = arith.mulf %2, %24 : vector<18x128xf32>
    %26 = vector.broadcast %23 : vector<1x128xf32> to vector<18x128xf32>
    %27 = arith.addf %25, %26 : vector<18x128xf32>
    %cst_13 = arith.constant 0.000000e+00 : f32
    %28 = vector.broadcast %cst_13 : f32 to vector<18x128xf32>
    %29 = arith.cmpf oge, %27, %28 : vector<18x128xf32>
    %cst_14 = arith.constant 2.000000e-01 : f32
    %30 = vector.broadcast %cst_14 : f32 to vector<18x128xf32>
    %31 = arith.mulf %30, %27 : vector<18x128xf32>
    %32 = arith.select %29, %27, %31 : vector<18x128xi1>, vector<18x128xf32>
    %33 = arith.truncf %32 : vector<18x128xf32> to vector<18x128xbf16>
    %c0_15 = arith.constant 0 : index
    %c0_16 = arith.constant 0 : index
    %34 = vector.load %arg5[%c0_15, %c0_16] : memref<18x128xbf16, #tpu.memory_space<vmem>>, vector<18x128xbf16>
    tpu.vector_store %arg5[%c0_15, %c0_16], %33 {strides = array<i32>} : memref<18x128xbf16, #tpu.memory_space<vmem>>, vector<18x128xbf16>,
    return
  }
  func.func @transform_0(%arg0: i32) -> (i32, i32) {
    %c0_i32 = arith.constant 0 : i32
    %c0_i32_0 = arith.constant 0 : i32
    %c0_i32_1 = arith.constant 0 : i32
    return %c0_i32, %c0_i32_0 : i32, i32
  }
  func.func @transform_1(%arg0: i32) -> (i32, i32) {
    %c0_i32 = arith.constant 0 : i32
    %c0_i32_0 = arith.constant 0 : i32
    %c0_i32_1 = arith.constant 0 : i32
    return %c0_i32, %c0_i32_0 : i32, i32
  }
  func.func @transform_2(%arg0: i32) -> (i32, i32) {
    %c0_i32 = arith.constant 0 : i32
    %c0_i32_0 = arith.constant 0 : i32
    %c0_i32_1 = arith.constant 0 : i32
    return %c0_i32, %c0_i32_0 : i32, i32
  }
  func.func @transform_3(%arg0: i32) -> (i32, i32) {
    %c0_i32 = arith.constant 0 : i32
    %c0_i32_0 = arith.constant 0 : i32
    %c0_i32_1 = arith.constant 0 : i32
    return %c0_i32, %c0_i32_0 : i32, i32
  }
  func.func @transform_4(%arg0: i32) -> (i32, i32) {
    %c0_i32 = arith.constant 0 : i32
    %c0_i32_0 = arith.constant 0 : i32
    %c0_i32_1 = arith.constant 0 : i32
    return %c0_i32, %c0_i32_0 : i32, i32
  }
}

module attributes {stable_mosaic.version = 11 : i64} {
  func.func @_conv_bias_act_kernel(%arg0: i32, %arg1: memref<8x2048xbf16, #tpu.memory_space<vmem>>, %arg2: memref<2048x128xbf16, #tpu.memory_space<vmem>>, %arg3: memref<1x128xf32, #tpu.memory_space<vmem>>, %arg4: memref<8x128xf32, #tpu.memory_space<vmem>>) attributes {dimension_semantics = [#tpu.dimension_semantics<parallel>], iteration_bounds = array<i64: 1>, scalar_prefetch = 0 : i64, scratch_operands = 0 : i64, tpu.core_type = #tpu.core_type<tc>, window_params = [{transform_indices = @transform_0, window_bounds = array<i64: 8, 2048>}, {pipeline_mode = #tpu.pipeline_mode<synchronous>, transform_indices = @transform_1, window_bounds = array<i64: 2048, 128>}, {pipeline_mode = #tpu.pipeline_mode<synchronous>, transform_indices = @transform_2, window_bounds = array<i64: 1, 128>}, {transform_indices = @transform_3, window_bounds = array<i64: 8, 128>}]} {
    %c0 = arith.constant 0 : index
    %c0_0 = arith.constant 0 : index
    %0 = vector.load %arg1[%c0, %c0_0] : memref<8x2048xbf16, #tpu.memory_space<vmem>>, vector<8x2048xbf16>
    %c0_1 = arith.constant 0 : index
    %c0_2 = arith.constant 0 : index
    %1 = vector.load %arg2[%c0_1, %c0_2] : memref<2048x128xbf16, #tpu.memory_space<vmem>>, vector<2048x128xbf16>
    %cst = arith.constant dense<0.000000e+00> : vector<8x128xf32>
    %2 = tpu.matmul %0, %1, %cst {dimension_numbers = #tpu.dot_dimension_numbers<[1], [0], [0], [1], [0, 0, 1, 1], [], []>} : vector<8x2048xbf16>, vector<2048x128xbf16>, vector<8x128xf32> -> vector<8x128xf32>
    %c0_3 = arith.constant 0 : index
    %c0_4 = arith.constant 0 : index
    %3 = vector.load %arg3[%c0_3, %c0_4] : memref<1x128xf32, #tpu.memory_space<vmem>>, vector<1x128xf32>
    %4 = vector.broadcast %3 : vector<1x128xf32> to vector<8x128xf32>
    %5 = arith.addf %2, %4 : vector<8x128xf32>
    %6 = math.absf %5 : vector<8x128xf32>
    %cst_5 = arith.constant 0.000000e+00 : f32
    %7 = vector.broadcast %cst_5 : f32 to vector<8x128xf32>
    %8 = arith.subf %7, %6 : vector<8x128xf32>
    %9 = math.exp %8 : vector<8x128xf32>
    %cst_6 = arith.constant 1.000000e+00 : f32
    %10 = vector.broadcast %cst_6 : f32 to vector<8x128xf32>
    %11 = arith.addf %10, %9 : vector<8x128xf32>
    %cst_7 = arith.constant 1.000000e+00 : f32
    %12 = vector.broadcast %cst_7 : f32 to vector<8x128xf32>
    %13 = arith.divf %12, %11 : vector<8x128xf32>
    %cst_8 = arith.constant 0.000000e+00 : f32
    %14 = vector.broadcast %cst_8 : f32 to vector<8x128xf32>
    %15 = arith.cmpf oge, %5, %14 : vector<8x128xf32>
    %16 = arith.mulf %9, %13 : vector<8x128xf32>
    %17 = arith.select %15, %13, %16 : vector<8x128xi1>, vector<8x128xf32>
    %c0_9 = arith.constant 0 : index
    %c0_10 = arith.constant 0 : index
    %18 = vector.load %arg4[%c0_9, %c0_10] : memref<8x128xf32, #tpu.memory_space<vmem>>, vector<8x128xf32>
    tpu.vector_store %arg4[%c0_9, %c0_10], %17 {strides = array<i32>} : memref<8x128xf32, #tpu.memory_space<vmem>>, vector<8x128xf32>,
    return
  }
  func.func @transform_0(%arg0: i32) -> (i32, i32) {
    %c0_i32 = arith.constant 0 : i32
    %c0_i32_0 = arith.constant 0 : i32
    return %arg0, %c0_i32 : i32, i32
  }
  func.func @transform_1(%arg0: i32) -> (i32, i32) {
    %c0_i32 = arith.constant 0 : i32
    %c0_i32_0 = arith.constant 0 : i32
    %c0_i32_1 = arith.constant 0 : i32
    return %c0_i32, %c0_i32_0 : i32, i32
  }
  func.func @transform_2(%arg0: i32) -> (i32, i32) {
    %c0_i32 = arith.constant 0 : i32
    %c0_i32_0 = arith.constant 0 : i32
    %c0_i32_1 = arith.constant 0 : i32
    return %c0_i32, %c0_i32_0 : i32, i32
  }
  func.func @transform_3(%arg0: i32) -> (i32, i32) {
    %c0_i32 = arith.constant 0 : i32
    %c0_i32_0 = arith.constant 0 : i32
    return %arg0, %c0_i32 : i32, i32
  }
}

</mosaic_0001>

<bundles_post_ra>
// kernel: patch_discriminator_forward.5
= control target key start
LH: loop header
LB: loop body
LE: loop exit
PB: predicated region body
PF: predicated region fallthrough
CT: control target
= control target key end

     0   :  { %s5962_s12 = smov 0   ;;  %s7034_s0 = inlined_call_operand.vmem [shape: bf16[512,2048], index: 0, kind: input, shape index: {}]   ;;  %s7035_s1 = inlined_call_operand.vmem [shape: bf16[2048,128], index: 1, kind: input, shape index: {}]   ;;  %s7036_s2 = inlined_call_operand.vmem [shape: f32[1,128], index: 2, kind: input, shape index: {}]   ;;  %s7037_s3 = inlined_call_operand.vmem [shape: bf16[512,128], index: 3, kind: output, shape index: {}]  }
   0x1 LB: > { %s4345_s13 = sadd.s32 4294967295, %s5940_s12   ;;  %p4349_p0 = scmp.ge.s32.totalorder %s5940_s12, 1  ;;  %s5940_s12 = sphi %s5962_s12, %s13_s12  }
   0x2   : > { %p139_p1 = scmp.lt.s32.totalorder %s5940_s12, 3 }
   0x4   : > { %p140_p2 = pnand %p4349_p0, %p139_p1 }
   0x5   : > { %v5806_v0 = vld [vmem:[%s7035_s1 + $0x40] sm:$0xff] (!%p140_p2)   ;;  %v5810_v4 = vld [vmem:[%s7035_s1 + $0x48] sm:$0xff] (!%p140_p2)   ;;  %v5814_v8 = vld [vmem:[%s7035_s1 + $0x50] sm:$0xff] (!%p140_p2)   ;;  %s4350_s21 = sshll.u32 (!%p140_p2), %s4345_s13, 5 }
   0x6   : > { %143 = sbr.rel (%p140_p2) target bundleno = 770 (0x302), region = 32  ;;  %v5807_v1 = vld [vmem:[%s7035_s1 + $0xc0] sm:$0xff] (!%p140_p2)   ;;  %4902 = vmatprep.subr.bf16.mxu0 (!%p140_p2), %v5806_v0  ;;  %v5811_v5 = vld [vmem:[%s7035_s1 + $0xc8] sm:$0xff] (!%p140_p2)   ;;  %v5815_v9 = vld [vmem:[%s7035_s1 + $0xd0] sm:$0xff] (!%p140_p2)   ;;  %p165_p3 = scmp.lt.s32.totalorder (!%p140_p2), %s4350_s21, 63 }
   0x7   : > { %v5808_v2 = vld [vmem:[%s7035_s1] sm:$0xff] (!%p140_p2)   ;;  %5014 = vmatprep.subr.bf16.mxu1 (!%p140_p2), %v5807_v1  ;;  %v5812_v6 = vld [vmem:[%s7035_s1 + $0x8] sm:$0xff] (!%p140_p2)   ;;  %v5816_v10 = vld [vmem:[%s7035_s1 + $0x10] sm:$0xff] (!%p140_p2)  }
   0x8   : > { %v5809_v3 = vld [vmem:[%s7035_s1 + $0x80] sm:$0xff] (!%p140_p2)   ;;  %4903 = vmatpush3.bf16.msra.mxu0 (!%p140_p2), %v5808_v2  ;;  %v5813_v7 = vld [vmem:[%s7035_s1 + $0x88] sm:$0xff] (!%p140_p2)   ;;  %v5817_v11 = vld [vmem:[%s7035_s1 + $0x90] sm:$0xff] (!%p140_p2)  }
   0x9   : > { %5015 = vmatpush3.bf16.msra.mxu1 (!%p140_p2), %v5809_v3  ;;  %4904 = vmatprep.subr.bf16.mxu0 (!%p140_p2), %v5810_v4  ;;  %v5818_v12 = vld [vmem:[%s7035_s1 + $0x58] sm:$0xff] (!%p140_p2)   ;;  %v5822_v16 = vld [vmem:[%s7035_s1 + $0x60] sm:$0xff] (!%p140_p2)   ;;  %v5826_v20 = vld [vmem:[%s7035_s1 + $0x68] sm:$0xff] (!%p140_p2)  }
   0xa   : > { %5016 = vmatprep.subr.bf16.mxu1 (!%p140_p2), %v5811_v5  ;;  %v5819_v13 = vld [vmem:[%s7035_s1 + $0xd8] sm:$0xff] (!%p140_p2)   ;;  %v5823_v17 = vld [vmem:[%s7035_s1 + $0xe0] sm:$0xff] (!%p140_p2)   ;;  %v5827_v21 = vld [vmem:[%s7035_s1 + $0xe8] sm:$0xff] (!%p140_p2)  }
   0xb   : > { %v5820_v14 = vld [vmem:[%s7035_s1 + $0x18] sm:$0xff] (!%p140_p2)   ;;  %v5824_v18 = vld [vmem:[%s7035_s1 + $0x20] sm:$0xff] (!%p140_p2)   ;;  %v5828_v22 = vld [vmem:[%s7035_s1 + $0x28] sm:$0xff] (!%p140_p2)  }
   0xc   : > { %4905 = vmatpush3.bf16.msra.mxu0 (!%p140_p2), %v5812_v6  ;;  %v5821_v15 = vld [vmem:[%s7035_s1 + $0x98] sm:$0xff] (!%p140_p2)   ;;  %v5825_v19 = vld [vmem:[%s7035_s1 + $0xa0] sm:$0xff] (!%p140_p2)   ;;  %v5829_v23 = vld [vmem:[%s7035_s1 + $0xa8] sm:$0xff] (!%p140_p2)  }
   0xd   : > { %5017 = vmatpush3.bf16.msra.mxu1 %v5813_v7  ;;  %4906 = vmatprep.subr.bf16.mxu0 %v5814_v8  ;;  %s7039_s21 = smov (!%p165_p3, %s4350_s21), 63  ;;  %v5830_v24 = vld [vmem:[%s7035_s1 + $0x70] sm:$0xff]   ;;  %v5834_v28 = vld [vmem:[%s7035_s1 + $0x78] sm:$0xff]   ;;  %v5838_v40 = vld [vmem:[%s7035_s1 + $0x140] sm:$0xff]  }
   0xe   : > { %5018 = vmatprep.subr.bf16.mxu1 %v5815_v9  ;;  %v5831_v25 = vld [vmem:[%s7035_s1 + $0xf0] sm:$0xff]   ;;  %s4774_s18 = sshll.u32 %s7039_s21, 6  ;;  %v5835_v29 = vld [vmem:[%s7035_s1 + $0xf8] sm:$0xff]   ;;  %v5839_v41 = vld [vmem:[%s7035_s1 + $0x100] sm:$0xff]  }
   0xf   : > { %v5832_v26 = vld [vmem:[%s7035_s1 + $0x30] sm:$0xff]   ;;  %s6068_s28 = scalar_lea.vmem %s7034_s0, %s4774_s18  ;;  %v5836_v30 = vld [vmem:[%s7035_s1 + $0x38] sm:$0xff]   ;;  %v5840_v42 = vld [vmem:[%s7035_s1 + $0x1c0] sm:$0xff]  }
  0x10   : > { %4907 = vmatpush3.bf16.msra.mxu0 %v5816_v10  ;;  %v5833_v27 = vld [vmem:[%s7035_s1 + $0xb0] sm:$0xff]   ;;  %v5837_v31 = vld [vmem:[%s7035_s1 + $0xb8] sm:$0xff]   ;;  %v178_v32 = vld [vmem:[%s6068_s28] sm:$0xff] }
  0x11   : > { %5019 = vmatpush3.bf16.msra.mxu1 %v5817_v11  ;;  %4908 = vmatprep.subr.bf16.mxu0 %v5818_v12  ;;  %v186_v33 = vld [vmem:[%s6068_s28 + $0x40] sm:$0xff]  ;;  %v179_v34 = vld [vmem:[%s6068_s28 + $0x8] sm:$0xff]  ;;  %v5846_v2 = vld [vmem:[%s7035_s1 + $0x150] sm:$0xff]  }
  0x12   : > { %5020 = vmatprep.subr.bf16.mxu1 %v5819_v13  ;;  %v4356_v35 = vcombine.low %v178_v32, %v186_v33  ;;  %v4357_v36 = vcombine.high %v178_v32, %v186_v33  ;;  %v187_v37 = vld [vmem:[%s6068_s28 + $0x48] sm:$0xff]  ;;  %v5841_v43 = vld [vmem:[%s7035_s1 + $0x180] sm:$0xff]   ;;  %v5847_v4 = vld [vmem:[%s7035_s1 + $0x110] sm:$0xff]  }
  0x13   : > { %v4358_v38 = vcombine.low %v179_v34, %v187_v37  ;;  %v4359_v39 = vcombine.high %v179_v34, %v187_v37  ;;  %v194_v44 = vld [vmem:[%s6068_s28 + $0x80] sm:$0xff]  ;;  %v195_v47 = vld [vmem:[%s6068_s28 + $0x88] sm:$0xff]  ;;  %v5848_v7 = vld [vmem:[%s7035_s1 + $0x1d0] sm:$0xff]  }
  0x14   : > { %4909 = vmatpush3.bf16.msra.mxu0 %v5820_v14  ;;  %2777 = vmatprep.mubr.bf16.mxu0 %v4357_v36  ;;  %v202_v45 = vld [vmem:[%s6068_s28 + $0xc0] sm:$0xff]  ;;  %v203_v48 = vld [vmem:[%s6068_s28 + $0xc8] sm:$0xff]  ;;  %v5849_v9 = vld [vmem:[%s7035_s1 + $0x190] sm:$0xff]  }
  0x15   : > { %5021 = vmatpush3.bf16.msra.mxu1 %v5821_v15  ;;  %4910 = vmatprep.subr.bf16.mxu0 %v5822_v16  ;;  %v4373_v46 = vcombine.high %v194_v44, %v202_v45  ;;  %v210_v49 = vld [vmem:[%s6068_s28 + $0x100] sm:$0xff]  ;;  %v4375_v50 = vcombine.high %v195_v47, %v203_v48  ;;  %v211_v52 = vld [vmem:[%s6068_s28 + $0x108] sm:$0xff]  ;;  %v4372_v54 = vcombine.low %v194_v44, %v202_v45  ;;  %v5850_v14 = vld [vmem:[%s7035_s1 + $0x158] sm:$0xff]  }
  0x16   : > { %5022 = vmatprep.subr.bf16.mxu1 %v5823_v17  ;;  %2938 = vmatprep.mubr.bf16.mxu1 %v4359_v39  ;;  %v218_v51 = vld [vmem:[%s6068_s28 + $0x140] sm:$0xff]  ;;  %v219_v53 = vld [vmem:[%s6068_s28 + $0x148] sm:$0xff]  ;;  %v4374_v56 = vcombine.low %v195_v47, %v203_v48  ;;  %v5851_v15 = vld [vmem:[%s7035_s1 + $0x118] sm:$0xff]  }
  0x17   : > { %v5842_v55 = vld [vmem:[%s7035_s1 + $0x148] sm:$0xff]   ;;  %v4389_v57 = vcombine.high %v210_v49, %v218_v51  ;;  %v4391_v59 = vcombine.high %v211_v52, %v219_v53  ;;  %v226_v62 = vld [vmem:[%s6068_s28 + $0x180] sm:$0xff]  ;;  %v4388_v3 = vcombine.low %v210_v49, %v218_v51  ;;  %v4390_v5 = vcombine.low %v211_v52, %v219_v53  ;;  %v5852_v17 = vld [vmem:[%s7035_s1 + $0x1d8] sm:$0xff]  }
  0x18   : > { %4911 = vmatpush3.bf16.msra.mxu0 %v5824_v18  ;;  %v5843_v58 = vld [vmem:[%s7035_s1 + $0x108] sm:$0xff]   ;;  %v234_v63 = vld [vmem:[%s6068_s28 + $0x1c0] sm:$0xff]  ;;  %v5863_v47 = vld [vmem:[%s7035_s1 + $0x130] sm:$0xff]  }
  0x19   : > { %5023 = vmatpush3.bf16.msra.mxu1 %v5825_v19  ;;  %4912 = vmatprep.subr.bf16.mxu0 %v5826_v20  ;;  %v5844_v60 = vld [vmem:[%s7035_s1 + $0x1c8] sm:$0xff]   ;;  %v4405_v6 = vcombine.high %v226_v62, %v234_v63  ;;  %v242_v10 = vld [vmem:[%s6068_s28 + $0x200] sm:$0xff]  ;;  %v4404_v16 = vcombine.low %v226_v62, %v234_v63  ;;  %v5853_v20 = vld [vmem:[%s7035_s1 + $0x198] sm:$0xff]  }
  0x1a   : > { %5024 = vmatprep.subr.bf16.mxu1 %v5827_v21  ;;  %v5845_v61 = vld [vmem:[%s7035_s1 + $0x188] sm:$0xff]   ;;  %v250_v11 = vld [vmem:[%s6068_s28 + $0x240] sm:$0xff]  ;;  %v5864_v48 = vld [vmem:[%s7035_s1 + $0x1f0] sm:$0xff]  }
  0x1b   : > { %v227_v0 = vld [vmem:[%s6068_s28 + $0x188] sm:$0xff]  ;;  %v4421_v19 = vcombine.high %v242_v10, %v250_v11  ;;  %v5865_v49 = vld [vmem:[%s7035_s1 + $0x1b0] sm:$0xff]   ;;  %v298_v51 = vld [vmem:[%s6068_s28 + $0x3c0] sm:$0xff] }
  0x1c   : > { %4913 = vmatpush3.bf16.msra.mxu0 %v5828_v22  ;;  %v235_v1 = vld [vmem:[%s6068_s28 + $0x1c8] sm:$0xff]  ;;  %v258_v22 = vld [vmem:[%s6068_s28 + $0x280] sm:$0xff] }
  0x1d   : > { %5025 = vmatpush3.bf16.msra.mxu1 %v5829_v23  ;;  %4914 = vmatprep.subr.bf16.mxu0 %v5830_v24  ;;  %v4407_v8 = vcombine.high %v227_v0, %v235_v1  ;;  %v243_v12 = vld [vmem:[%s6068_s28 + $0x208] sm:$0xff]  ;;  %v4406_v18 = vcombine.low %v227_v0, %v235_v1  ;;  %v266_v23 = vld [vmem:[%s6068_s28 + $0x2c0] sm:$0xff] }
  0x1e   : > { %5026 = vmatprep.subr.bf16.mxu1 %v5831_v25  ;;  %v251_v13 = vld [vmem:[%s6068_s28 + $0x248] sm:$0xff]  ;;  %v5854_v24 = vld [vmem:[%s7035_s1 + $0x160] sm:$0xff]   ;;  %v4437_v32 = vcombine.high %v258_v22, %v266_v23 }
  0x1f   : > { %v4423_v21 = vcombine.high %v243_v12, %v251_v13  ;;  %v259_v25 = vld [vmem:[%s6068_s28 + $0x288] sm:$0xff]  ;;  %v306_v62 = vld [vmem:[%s6068_s28 + $0x400] sm:$0xff] }
  0x20   : > { %4915 = vmatpush3.bf16.msra.mxu0 %v5832_v26  ;;  %v267_v26 = vld [vmem:[%s6068_s28 + $0x2c8] sm:$0xff]  ;;  %v314_v63 = vld [vmem:[%s6068_s28 + $0x440] sm:$0xff] }
  0x21   : > { %5027 = vmatpush3.bf16.msra.mxu1 %v5833_v27  ;;  %4916 = vmatprep.subr.bf16.mxu0 %v5834_v28  ;;  %v5855_v27 = vld [vmem:[%s7035_s1 + $0x120] sm:$0xff]   ;;  %v4439_v33 = vcombine.high %v259_v25, %v267_v26  ;;  %v5858_v34 = vld [vmem:[%s7035_s1 + $0x168] sm:$0xff]  }
  0x22   : > { %5028 = vmatprep.subr.bf16.mxu1 %v5835_v29  ;;  %v5856_v28 = vld [vmem:[%s7035_s1 + $0x1e0] sm:$0xff]   ;;  %v5859_v36 = vld [vmem:[%s7035_s1 + $0x128] sm:$0xff]  }
  0x23   : > { %v5857_v29 = vld [vmem:[%s7035_s1 + $0x1a0] sm:$0xff]   ;;  %v5860_v37 = vld [vmem:[%s7035_s1 + $0x1e8] sm:$0xff]  }
  0x24   : > { %4917 = vmatpush3.bf16.msra.mxu0 %v5836_v30  ;;  %v4420_v30 = vcombine.low %v242_v10, %v250_v11  ;;  %v5861_v39 = vld [vmem:[%s7035_s1 + $0x1a8] sm:$0xff]  }
  0x25   : > { %5029 = vmatpush3.bf16.msra.mxu1 %v5837_v31  ;;  %5126 = vmatprep.subr.bf16.mxu0 %v5838_v40  ;;  %v4422_v31 = vcombine.low %v243_v12, %v251_v13  ;;  %v275_v40 = vld [vmem:[%s6068_s28 + $0x308] sm:$0xff]  ;;  %v4484_v12 = vcombine.low %v306_v62, %v314_v63 }
  0x26   : > { %5238 = vmatprep.subr.bf16.mxu1 %v5840_v42  ;;  %v4436_v42 = vcombine.low %v258_v22, %v266_v23  ;;  %v291_v52 = vld [vmem:[%s6068_s28 + $0x388] sm:$0xff] }
  0x27   : > { %2778 = vmatmul.mubr.bf16.vlgmr.msra.gmra.mrb[0].mxu0 %v4356_v35  ;;  %v274_v35 = vld [vmem:[%s6068_s28 + $0x300] sm:$0xff]  ;;  %v299_v53 = vld [vmem:[%s6068_s28 + $0x3c8] sm:$0xff] }
  0x28   : > { %2939 = vmatmul.mubr.bf16.vlgmr.msra.gmra.mrb[0].mxu1 %v4358_v38  ;;  %5127 = vmatpush3.bf16.msra.mxu0 %v5839_v41  ;;  %v282_v38 = vld [vmem:[%s6068_s28 + $0x340] sm:$0xff]  ;;  %v283_v41 = vld [vmem:[%s6068_s28 + $0x348] sm:$0xff] }
  0x29   : > { %5239 = vmatpush3.bf16.msra.mxu1 %v5841_v43  ;;  %2785 = vmatprep.mubr.bf16.mxu0 %v4373_v46  ;;  %v4438_v43 = vcombine.low %v259_v25, %v267_v26  ;;  %v4453_v44 = vcombine.high %v274_v35, %v282_v38  ;;  %v4455_v45 = vcombine.high %v275_v40, %v283_v41  ;;  %v5862_v46 = vld [vmem:[%s7035_s1 + $0x170] sm:$0xff]   ;;  %v307_v0 = vld [vmem:[%s6068_s28 + $0x408] sm:$0xff]  ;;  %v362_v25 = vld [vmem:[%s6068_s28 + $0x5c0] sm:$0xff] }
  0x2a   : > { %2946 = vmatprep.mubr.bf16.mxu1 %v4375_v50  ;;  %5128 = vmatprep.subr.bf16.mxu0 %v5842_v55  ;;  %v290_v50 = vld [vmem:[%s6068_s28 + $0x380] sm:$0xff]  ;;  %v5866_v55 = vld [vmem:[%s7035_s1 + $0x178] sm:$0xff]   ;;  %v315_v1 = vld [vmem:[%s6068_s28 + $0x448] sm:$0xff] }
  0x2b   : > { %5240 = vmatprep.subr.bf16.mxu1 %v5844_v60  ;;  %v5868_v60 = vld [vmem:[%s7035_s1 + $0x1f8] sm:$0xff]   ;;  %v323_v10 = vld [vmem:[%s6068_s28 + $0x488] sm:$0xff]  ;;  %v4486_v13 = vcombine.low %v307_v0, %v315_v1 }
  0x2c   : > { %5129 = vmatpush3.bf16.msra.mxu0 %v5843_v58  ;;  %v5867_v58 = vld [vmem:[%s7035_s1 + $0x138] sm:$0xff]   ;;  %v331_v11 = vld [vmem:[%s6068_s28 + $0x4c8] sm:$0xff] }
  0x2d   : > { %5241 = vmatpush3.bf16.msra.mxu1 %v5845_v61  ;;  %5130 = vmatprep.subr.bf16.mxu0 %v5846_v2  ;;  %v5869_v61 = vld [vmem:[%s7035_s1 + $0x1b8] sm:$0xff]   ;;  %v5870_v2 = vld [vmem:[%s7035_s1 + $0x240] sm:$0xff]   ;;  %v355_v26 = vld [vmem:[%s6068_s28 + $0x588] sm:$0xff] }
  0x2e   : > { %5242 = vmatprep.subr.bf16.mxu1 %v5848_v7  ;;  %v4487_v7 = vcombine.high %v307_v0, %v315_v1  ;;  %v180_v0 = vld [vmem:[%s6068_s28 + $0x10] sm:$0xff] }
  0x2f   : > { %2786 = vmatmul.mubr.bf16.gmra.mrb[4].mxu0 %v4372_v54  ;;  %v4452_v54 = vcombine.low %v274_v35, %v282_v38  ;;  %v379_v35 = vld [vmem:[%s6068_s28 + $0x648] sm:$0xff]  ;;  %v188_v1 = vld [vmem:[%s6068_s28 + $0x50] sm:$0xff] }
  0x30   : > { %2947 = vmatmul.mubr.bf16.gmra.mrb[4].mxu1 %v4374_v56  ;;  %2793 = vmatprep.mubr.bf16.mxu0 %v4389_v57  ;;  %v4454_v56 = vcombine.low %v275_v40, %v283_v41  ;;  %v4469_v57 = vcombine.high %v290_v50, %v298_v51  ;;  %v386_v40 = vld [vmem:[%s6068_s28 + $0x680] sm:$0xff] }
  0x31   : > { %2954 = vmatprep.mubr.bf16.mxu1 %v4391_v59  ;;  %5131 = vmatpush3.bf16.msra.mxu0 %v5847_v4  ;;  %v4471_v59 = vcombine.high %v291_v52, %v299_v53  ;;  %v4470_v4 = vcombine.low %v291_v52, %v299_v53  ;;  %v394_v41 = vld [vmem:[%s6068_s28 + $0x6c0] sm:$0xff] }
  0x32   : > { %5243 = vmatpush3.bf16.msra.mxu1 %v5849_v9  ;;  %5132 = vmatprep.subr.bf16.mxu0 %v5850_v14  ;;  %v330_v9 = vld [vmem:[%s6068_s28 + $0x4c0] sm:$0xff]  ;;  %v4564_v52 = vcombine.low %v386_v40, %v394_v41 }
  0x33   : > { %5244 = vmatprep.subr.bf16.mxu1 %v5852_v17  ;;  %v346_v17 = vld [vmem:[%s6068_s28 + $0x540] sm:$0xff] }
  0x35   : > { %5133 = vmatpush3.bf16.msra.mxu0 %v5851_v15  ;;  %v4503_v15 = vcombine.high %v323_v10, %v331_v11 }
  0x36   : > { %5245 = vmatpush3.bf16.msra.mxu1 %v5853_v20  ;;  %5134 = vmatprep.subr.bf16.mxu0 %v5854_v24  ;;  %v354_v24 = vld [vmem:[%s6068_s28 + $0x580] sm:$0xff] }
  0x37   : > { %2794 = vmatmul.mubr.bf16.gmra.mrb[8].mxu0 %v4388_v3  ;;  %5246 = vmatprep.subr.bf16.mxu1 %v5856_v28  ;;  %v4468_v3 = vcombine.low %v290_v50, %v298_v51  ;;  %v403_v50 = vld [vmem:[%s6068_s28 + $0x708] sm:$0xff] }
  0x38   : > { %2955 = vmatmul.mubr.bf16.gmra.mrb[8].mxu1 %v4390_v5  ;;  %2801 = vmatprep.mubr.bf16.mxu0 %v4405_v6  ;;  %v4485_v5 = vcombine.high %v306_v62, %v314_v63  ;;  %v5872_v6 = vld [vmem:[%s7035_s1 + $0x2c0] sm:$0xff]   ;;  %v411_v51 = vld [vmem:[%s6068_s28 + $0x748] sm:$0xff] }
  0x39   : > { %2962 = vmatprep.mubr.bf16.mxu1 %v4407_v8  ;;  %5135 = vmatpush3.bf16.msra.mxu0 %v5855_v27  ;;  %v322_v8 = vld [vmem:[%s6068_s28 + $0x480] sm:$0xff]  ;;  %v363_v27 = vld [vmem:[%s6068_s28 + $0x5c8] sm:$0xff] }
  0x3a   : > { %5247 = vmatpush3.bf16.msra.mxu1 %v5857_v29  ;;  %5136 = vmatprep.subr.bf16.mxu0 %v5858_v34  ;;  %v4501_v14 = vcombine.high %v322_v8, %v330_v9  ;;  %v4500_v20 = vcombine.low %v322_v8, %v330_v9  ;;  %v371_v34 = vld [vmem:[%s6068_s28 + $0x608] sm:$0xff]  ;;  %v196_v8 = vld [vmem:[%s6068_s28 + $0x90] sm:$0xff] }
  0x3b   : > { %5248 = vmatprep.subr.bf16.mxu1 %v5860_v37  ;;  %v4534_v37 = vcombine.low %v355_v26, %v363_v27  ;;  %v204_v9 = vld [vmem:[%s6068_s28 + $0xd0] sm:$0xff] }
  0x3d   : > { %5137 = vmatpush3.bf16.msra.mxu0 %v5859_v36  ;;  %v4532_v36 = vcombine.low %v354_v24, %v362_v25 }
  0x3e   : > { %5249 = vmatpush3.bf16.msra.mxu1 %v5861_v39  ;;  %5138 = vmatprep.subr.bf16.mxu0 %v5862_v46  ;;  %v4551_v39 = vcombine.high %v371_v34, %v379_v35  ;;  %v4565_v46 = vcombine.high %v386_v40, %v394_v41  ;;  %v237_v40 = vld [vmem:[%s6068_s28 + $0x1d8] sm:$0xff] }
  0x3f   : > { %2802 = vmatmul.mubr.bf16.gmra.mrb[12].mxu0 %v4404_v16  ;;  %5250 = vmatprep.subr.bf16.mxu1 %v5864_v48  ;;  %v338_v16 = vld [vmem:[%s6068_s28 + $0x500] sm:$0xff]  ;;  %v5885_v41 = vld [vmem:[%s7035_s1 + $0x298] sm:$0xff]  }
  0x40   : > { %2963 = vmatmul.mubr.bf16.gmra.mrb[12].mxu1 %v4406_v18  ;;  %2809 = vmatprep.mubr.bf16.mxu0 %v4421_v19  ;;  %v339_v18 = vld [vmem:[%s6068_s28 + $0x508] sm:$0xff]  ;;  %v4517_v22 = vcombine.high %v338_v16, %v346_v17  ;;  %v4516_v28 = vcombine.low %v338_v16, %v346_v17  ;;  %v402_v48 = vld [vmem:[%s6068_s28 + $0x700] sm:$0xff]  ;;  %v4377_v16 = vcombine.high %v196_v8, %v204_v9 }
  0x41   : > { %2970 = vmatprep.mubr.bf16.mxu1 %v4423_v21  ;;  %5139 = vmatpush3.bf16.msra.mxu0 %v5863_v47  ;;  %v347_v19 = vld [vmem:[%s6068_s28 + $0x548] sm:$0xff]  ;;  %v4502_v21 = vcombine.low %v323_v10, %v331_v11  ;;  %v4360_v10 = vcombine.low %v180_v0, %v188_v1  ;;  %v197_v11 = vld [vmem:[%s6068_s28 + $0x98] sm:$0xff] }
  0x42   : > { %5251 = vmatpush3.bf16.msra.mxu1 %v5865_v49  ;;  %5140 = vmatprep.subr.bf16.mxu0 %v5866_v55  ;;  %v4519_v23 = vcombine.high %v339_v18, %v347_v19  ;;  %v4518_v29 = vcombine.low %v339_v18, %v347_v19  ;;  %v410_v49 = vld [vmem:[%s6068_s28 + $0x740] sm:$0xff]  ;;  %v4583_v55 = vcombine.high %v403_v50, %v411_v51  ;;  %v5874_v18 = vld [vmem:[%s7035_s1 + $0x248] sm:$0xff]  }
  0x43   : > { %5252 = vmatprep.subr.bf16.mxu1 %v5868_v60  ;;  %v4580_v60 = vcombine.low %v402_v48, %v410_v49  ;;  %v5876_v19 = vld [vmem:[%s7035_s1 + $0x2c8] sm:$0xff]  }
  0x45   : > { %5141 = vmatpush3.bf16.msra.mxu0 %v5867_v58  ;;  %v419_v58 = vld [vmem:[%s6068_s28 + $0x788] sm:$0xff] }
  0x46   : > { %5253 = vmatpush3.bf16.msra.mxu1 %v5869_v61  ;;  %5350 = vmatprep.subr.bf16.mxu0 %v5870_v2  ;;  %v4582_v61 = vcombine.low %v403_v50, %v411_v51  ;;  %v181_v2 = vld [vmem:[%s6068_s28 + $0x18] sm:$0xff]  ;;  %v5890_v50 = vld [vmem:[%s7035_s1 + $0x268] sm:$0xff]  }
  0x47   : > { %2810 = vmatmul.mubr.bf16.gmra.mrb[16].mxu0 %v4420_v30  ;;  %5462 = vmatprep.subr.bf16.mxu1 %v5872_v6  ;;  %v4533_v30 = vcombine.high %v354_v24, %v362_v25  ;;  %v4361_v6 = vcombine.high %v180_v0, %v188_v1  ;;  %v5878_v24 = vld [vmem:[%s7035_s1 + $0x250] sm:$0xff]   ;;  %v213_v25 = vld [vmem:[%s6068_s28 + $0x118] sm:$0xff]  ;;  %v5892_v51 = vld [vmem:[%s7035_s1 + $0x2e8] sm:$0xff]  }
  0x48   : > { %2971 = vmatmul.mubr.bf16.gmra.mrb[16].mxu1 %v4422_v31  ;;  %2817 = vmatprep.mubr.bf16.mxu0 %v4437_v32  ;;  %v4535_v31 = vcombine.high %v355_v26, %v363_v27  ;;  %v370_v32 = vld [vmem:[%s6068_s28 + $0x600] sm:$0xff]  ;;  %v221_v26 = vld [vmem:[%s6068_s28 + $0x158] sm:$0xff]  ;;  %v5880_v27 = vld [vmem:[%s7035_s1 + $0x2d0] sm:$0xff]  }
  0x49   : > { %2978 = vmatprep.mubr.bf16.mxu1 %v4439_v33  ;;  %v378_v33 = vld [vmem:[%s6068_s28 + $0x640] sm:$0xff]  ;;  %v5895_v0 = vld [vmem:[%s7035_s1 + $0x230] sm:$0xff]  }
  0x4a   : > { %v4549_v38 = vcombine.high %v370_v32, %v378_v33  ;;  %v5897_v1 = vld [vmem:[%s7035_s1 + $0x2b0] sm:$0xff]  }
  0x4f   : > { %2818 = vmatmul.mubr.bf16.gmra.mrb[20].mxu0 %v4436_v42  ;;  %v387_v42 = vld [vmem:[%s6068_s28 + $0x688] sm:$0xff] }
  0x50   : > { %2979 = vmatmul.mubr.bf16.gmra.mrb[20].mxu1 %v4438_v43  ;;  %2825 = vmatprep.mubr.bf16.mxu0 %v4453_v44  ;;  %v395_v43 = vld [vmem:[%s6068_s28 + $0x6c8] sm:$0xff]  ;;  %v4548_v44 = vcombine.low %v370_v32, %v378_v33  ;;  %v5879_v32 = vld [vmem:[%s7035_s1 + $0x210] sm:$0xff]  }
  0x51   : > { %2986 = vmatprep.mubr.bf16.mxu1 %v4455_v45  ;;  %v4550_v45 = vcombine.low %v371_v34, %v379_v35  ;;  %v4567_v47 = vcombine.high %v387_v42, %v395_v43  ;;  %v4566_v53 = vcombine.low %v387_v42, %v395_v43  ;;  %v5881_v33 = vld [vmem:[%s7035_s1 + $0x290] sm:$0xff]   ;;  %v5882_v34 = vld [vmem:[%s7035_s1 + $0x258] sm:$0xff]   ;;  %v5886_v42 = vld [vmem:[%s7035_s1 + $0x260] sm:$0xff]  }
  0x52   : > { %v5884_v35 = vld [vmem:[%s7035_s1 + $0x2d8] sm:$0xff]  }
  0x57   : > { %2826 = vmatmul.mubr.bf16.gmra.mrb[24].mxu0 %v4452_v54  ;;  %v4581_v54 = vcombine.high %v402_v48, %v410_v49  ;;  %v5887_v48 = vld [vmem:[%s7035_s1 + $0x220] sm:$0xff]  }
  0x58   : > { %2987 = vmatmul.mubr.bf16.gmra.mrb[24].mxu1 %v4454_v56  ;;  %2833 = vmatprep.mubr.bf16.mxu0 %v4469_v57  ;;  %v418_v56 = vld [vmem:[%s6068_s28 + $0x780] sm:$0xff] }
  0x59   : > { %2994 = vmatprep.mubr.bf16.mxu1 %v4471_v59  ;;  %v426_v57 = vld [vmem:[%s6068_s28 + $0x7c0] sm:$0xff]  ;;  %v427_v59 = vld [vmem:[%s6068_s28 + $0x7c8] sm:$0xff] }
  0x5a   : > { %v4597_v62 = vcombine.high %v418_v56, %v426_v57  ;;  %v4599_v63 = vcombine.high %v419_v58, %v427_v59  ;;  %v5889_v49 = vld [vmem:[%s7035_s1 + $0x2a0] sm:$0xff]  }
  0x5f   : > { %2834 = vmatmul.mubr.bf16.gmra.mrb[28].mxu0 %v4468_v3  ;;  %v189_v3 = vld [vmem:[%s6068_s28 + $0x58] sm:$0xff] }
  0x60   : > { %2995 = vmatmul.mubr.bf16.gmra.mrb[28].mxu1 %v4470_v4  ;;  %2841 = vmatprep.mubr.bf16.mxu0 %v4485_v5  ;;  %v4596_v4 = vcombine.low %v418_v56, %v426_v57  ;;  %v4598_v5 = vcombine.low %v419_v58, %v427_v59  ;;  %v253_v56 = vld [vmem:[%s6068_s28 + $0x258] sm:$0xff]  ;;  %v5893_v57 = vld [vmem:[%s7035_s1 + $0x2a8] sm:$0xff]   ;;  %v5894_v58 = vld [vmem:[%s7035_s1 + $0x270] sm:$0xff]  }
  0x61   : > { %3002 = vmatprep.mubr.bf16.mxu1 %v4487_v7  ;;  %v4363_v7 = vcombine.high %v181_v2, %v189_v3 }
  0x67   : > { %2842 = vmatmul.mubr.bf16.gmra.mrb[32].mxu0 %v4484_v12  ;;  %v205_v12 = vld [vmem:[%s6068_s28 + $0xd8] sm:$0xff] }
  0x68   : > { %3003 = vmatmul.mubr.bf16.gmra.mrb[32].mxu1 %v4486_v13  ;;  %2849 = vmatprep.mubr.bf16.mxu0 %v4501_v14  ;;  %v4362_v13 = vcombine.low %v181_v2, %v189_v3  ;;  %v5871_v14 = vld [vmem:[%s7035_s1 + $0x200] sm:$0xff]   ;;  %v4379_v17 = vcombine.high %v197_v11, %v205_v12  ;;  %v5898_v2 = vld [vmem:[%s7035_s1 + $0x278] sm:$0xff]  }
  0x69   : > { %3010 = vmatprep.mubr.bf16.mxu1 %v4503_v15  ;;  %v5873_v15 = vld [vmem:[%s7035_s1 + $0x280] sm:$0xff]   ;;  %v5900_v3 = vld [vmem:[%s7035_s1 + $0x2f8] sm:$0xff]  }
  0x6f   : > { %2850 = vmatmul.mubr.bf16.gmra.mrb[36].mxu0 %v4500_v20  ;;  %v212_v20 = vld [vmem:[%s6068_s28 + $0x110] sm:$0xff] }
  0x70   : > { %3011 = vmatmul.mubr.bf16.gmra.mrb[36].mxu1 %v4502_v21  ;;  %2857 = vmatprep.mubr.bf16.mxu0 %v4517_v22  ;;  %v5875_v21 = vld [vmem:[%s7035_s1 + $0x208] sm:$0xff]   ;;  %v220_v22 = vld [vmem:[%s6068_s28 + $0x150] sm:$0xff] }
  0x71   : > { %3018 = vmatprep.mubr.bf16.mxu1 %v4519_v23  ;;  %v5877_v23 = vld [vmem:[%s7035_s1 + $0x288] sm:$0xff]   ;;  %v4392_v43 = vcombine.low %v212_v20, %v220_v22 }
  0x77   : > { %2858 = vmatmul.mubr.bf16.gmra.mrb[40].mxu0 %v4516_v28  ;;  %v4376_v28 = vcombine.low %v196_v8, %v204_v9  ;;  %v269_v8 = vld [vmem:[%s6068_s28 + $0x2d8] sm:$0xff] }
  0x78   : > { %3019 = vmatmul.mubr.bf16.gmra.mrb[40].mxu1 %v4518_v29  ;;  %2865 = vmatprep.mubr.bf16.mxu0 %v4533_v30  ;;  %v4378_v29 = vcombine.low %v197_v11, %v205_v12  ;;  %v4393_v30 = vcombine.high %v212_v20, %v220_v22  ;;  %v5901_v9 = vld [vmem:[%s7035_s1 + $0x2b8] sm:$0xff]   ;;  %v5904_v12 = vld [vmem:[%s7035_s1 + $0x3c0] sm:$0xff]  }
  0x79   : > { %3026 = vmatprep.mubr.bf16.mxu1 %v4535_v31  ;;  %v4395_v31 = vcombine.high %v213_v25, %v221_v26 }
  0x7f   : > { %2866 = vmatmul.mubr.bf16.gmra.mrb[44].mxu0 %v4532_v36  ;;  %v228_v36 = vld [vmem:[%s6068_s28 + $0x190] sm:$0xff] }
  0x80   : > { %3027 = vmatmul.mubr.bf16.gmra.mrb[44].mxu1 %v4534_v37  ;;  %2873 = vmatprep.mubr.bf16.mxu0 %v4549_v38  ;;  %v236_v37 = vld [vmem:[%s6068_s28 + $0x1d0] sm:$0xff]  ;;  %v229_v38 = vld [vmem:[%s6068_s28 + $0x198] sm:$0xff] }
  0x81   : > { %3034 = vmatprep.mubr.bf16.mxu1 %v4551_v39  ;;  %v5883_v39 = vld [vmem:[%s7035_s1 + $0x218] sm:$0xff]   ;;  %v4408_v59 = vcombine.low %v228_v36, %v236_v37 }
  0x87   : > { %2874 = vmatmul.mubr.bf16.gmra.mrb[48].mxu0 %v4548_v44  ;;  %v5888_v44 = vld [vmem:[%s7035_s1 + $0x2e0] sm:$0xff]  }
  0x88   : > { %3035 = vmatmul.mubr.bf16.gmra.mrb[48].mxu1 %v4550_v45  ;;  %2881 = vmatprep.mubr.bf16.mxu0 %v4565_v46  ;;  %v4394_v45 = vcombine.low %v213_v25, %v221_v26  ;;  %v4409_v46 = vcombine.high %v228_v36, %v236_v37  ;;  %v300_v25 = vld [vmem:[%s6068_s28 + $0x3d0] sm:$0xff]  ;;  %v293_v26 = vld [vmem:[%s6068_s28 + $0x398] sm:$0xff] }
  0x89   : > { %3042 = vmatprep.mubr.bf16.mxu1 %v4567_v47  ;;  %v4411_v47 = vcombine.high %v229_v38, %v237_v40 }
  0x8f   : > { %2882 = vmatmul.mubr.bf16.gmra.mrb[52].mxu0 %v4564_v52  ;;  %v244_v52 = vld [vmem:[%s6068_s28 + $0x210] sm:$0xff] }
  0x90   : > { %3043 = vmatmul.mubr.bf16.gmra.mrb[52].mxu1 %v4566_v53  ;;  %2889 = vmatprep.mubr.bf16.mxu0 %v4581_v54  ;;  %v252_v53 = vld [vmem:[%s6068_s28 + $0x250] sm:$0xff]  ;;  %v245_v54 = vld [vmem:[%s6068_s28 + $0x218] sm:$0xff] }
  0x91   : > { %3050 = vmatprep.mubr.bf16.mxu1 %v4583_v55  ;;  %v5891_v55 = vld [vmem:[%s7035_s1 + $0x228] sm:$0xff]   ;;  %v4424_v11 = vcombine.low %v244_v52, %v252_v53 }
  0x97   : > { %2890 = vmatmul.mubr.bf16.gmra.mrb[56].mxu0 %v4580_v60  ;;  %v5896_v60 = vld [vmem:[%s7035_s1 + $0x2f0] sm:$0xff]  }
  0x98   : > { %3051 = vmatmul.mubr.bf16.gmra.mrb[56].mxu1 %v4582_v61  ;;  %2897 = vmatprep.mubr.bf16.mxu0 %v4597_v62  ;;  %v4410_v61 = vcombine.low %v229_v38, %v237_v40  ;;  %v4425_v62 = vcombine.high %v244_v52, %v252_v53  ;;  %v324_v40 = vld [vmem:[%s6068_s28 + $0x490] sm:$0xff] }
  0x99   : > { %3058 = vmatprep.mubr.bf16.mxu1 %v4599_v63  ;;  %v4427_v63 = vcombine.high %v245_v54, %v253_v56 }
  0x9f   : > { %2898 = vmatmul.mubr.bf16.gmra.mrb[60].mxu0 %v4596_v4  ;;  %v260_v4 = vld [vmem:[%s6068_s28 + $0x290] sm:$0xff] }
  0xa0   : > { %3059 = vmatmul.mubr.bf16.gmra.mrb[60].mxu1 %v4598_v5  ;;  %3099 = vmatprep.mubr.bf16.mxu0 %v4361_v6  ;;  %v268_v5 = vld [vmem:[%s6068_s28 + $0x2d0] sm:$0xff]  ;;  %v261_v6 = vld [vmem:[%s6068_s28 + $0x298] sm:$0xff] }
  0xa1   : > { %3260 = vmatprep.mubr.bf16.mxu1 %v4363_v7  ;;  %v5899_v7 = vld [vmem:[%s7035_s1 + $0x238] sm:$0xff]   ;;  %v4440_v20 = vcombine.low %v260_v4, %v268_v5 }
  0xa7   : > { %3100 = vmatmul.mubr.bf16.vlgmr.msra.gmra.mrb[64].mxu0 %v4360_v10  ;;  %v5902_v10 = vld [vmem:[%s7035_s1 + $0x340] sm:$0xff]  }
  0xa8   : > { %3261 = vmatmul.mubr.bf16.vlgmr.msra.gmra.mrb[64].mxu1 %v4362_v13  ;;  %5351 = vmatpush3.bf16.msra.mxu0 %v5871_v14  ;;  %v4426_v13 = vcombine.low %v245_v54, %v253_v56  ;;  %v4441_v14 = vcombine.high %v260_v4, %v268_v5  ;;  %v356_v56 = vld [vmem:[%s6068_s28 + $0x590] sm:$0xff]  ;;  %v381_v4 = vld [vmem:[%s6068_s28 + $0x658] sm:$0xff] }
  0xa9   : > { %5463 = vmatpush3.bf16.msra.mxu1 %v5873_v15  ;;  %3107 = vmatprep.mubr.bf16.mxu0 %v4377_v16  ;;  %v4443_v15 = vcombine.high %v261_v6, %v269_v8  ;;  %v276_v16 = vld [vmem:[%s6068_s28 + $0x310] sm:$0xff] }
  0xaa   : > { %3268 = vmatprep.mubr.bf16.mxu1 %v4379_v17  ;;  %5352 = vmatprep.subr.bf16.mxu0 %v5874_v18  ;;  %v284_v17 = vld [vmem:[%s6068_s28 + $0x350] sm:$0xff]  ;;  %v277_v18 = vld [vmem:[%s6068_s28 + $0x318] sm:$0xff] }
  0xab   : > { %5464 = vmatprep.subr.bf16.mxu1 %v5876_v19  ;;  %v285_v19 = vld [vmem:[%s6068_s28 + $0x358] sm:$0xff]  ;;  %v4457_v22 = vcombine.high %v276_v16, %v284_v17 }
  0xac   : > { %5353 = vmatpush3.bf16.msra.mxu0 %v5875_v21  ;;  %v4442_v21 = vcombine.low %v261_v6, %v269_v8  ;;  %v6393_v6 = vld [vmem:[%s7036_s2] ss:$0 sm:$0xff] }
  0xad   : > { %5465 = vmatpush3.bf16.msra.mxu1 %v5877_v23  ;;  %5354 = vmatprep.subr.bf16.mxu0 %v5878_v24  ;;  %v4459_v23 = vcombine.high %v277_v18, %v285_v19  ;;  %v292_v24 = vld [vmem:[%s6068_s28 + $0x390] sm:$0xff] }
  0xae   : > { %5466 = vmatprep.subr.bf16.mxu1 %v5880_v27  ;;  %v301_v27 = vld [vmem:[%s6068_s28 + $0x3d8] sm:$0xff]  ;;  %v4472_v36 = vcombine.low %v292_v24, %v300_v25 }
  0xaf   : > { %3108 = vmatmul.mubr.bf16.gmra.mrb[68].mxu0 %v4376_v28  ;;  %v4456_v28 = vcombine.low %v276_v16, %v284_v17  ;;  %v4474_v37 = vcombine.low %v293_v26, %v301_v27 }
  0xb0   : > { %3269 = vmatmul.mubr.bf16.gmra.mrb[68].mxu1 %v4378_v29  ;;  %3115 = vmatprep.mubr.bf16.mxu0 %v4393_v30  ;;  %v4458_v29 = vcombine.low %v277_v18, %v285_v19  ;;  %v4473_v30 = vcombine.high %v292_v24, %v300_v25  ;;  %v388_v24 = vld [vmem:[%s6068_s28 + $0x690] sm:$0xff] }
  0xb1   : > { %3276 = vmatprep.mubr.bf16.mxu1 %v4395_v31  ;;  %5355 = vmatpush3.bf16.msra.mxu0 %v5879_v32  ;;  %v4475_v31 = vcombine.high %v293_v26, %v301_v27  ;;  %v308_v32 = vld [vmem:[%s6068_s28 + $0x410] sm:$0xff] }
  0xb2   : > { %5467 = vmatpush3.bf16.msra.mxu1 %v5881_v33  ;;  %5356 = vmatprep.subr.bf16.mxu0 %v5882_v34  ;;  %v316_v33 = vld [vmem:[%s6068_s28 + $0x450] sm:$0xff]  ;;  %v309_v34 = vld [vmem:[%s6068_s28 + $0x418] sm:$0xff] }
  0xb3   : > { %5468 = vmatprep.subr.bf16.mxu1 %v5884_v35  ;;  %v317_v35 = vld [vmem:[%s6068_s28 + $0x458] sm:$0xff]  ;;  %v4489_v38 = vcombine.high %v308_v32, %v316_v33  ;;  %v396_v25 = vld [vmem:[%s6068_s28 + $0x6d0] sm:$0xff] }
  0xb5   : > { %5357 = vmatpush3.bf16.msra.mxu0 %v5883_v39  ;;  %v4491_v39 = vcombine.high %v309_v34, %v317_v35 }
  0xb6   : > { %5469 = vmatpush3.bf16.msra.mxu1 %v5885_v41  ;;  %5358 = vmatprep.subr.bf16.mxu0 %v5886_v42  ;;  %v332_v41 = vld [vmem:[%s6068_s28 + $0x4d0] sm:$0xff]  ;;  %v325_v42 = vld [vmem:[%s6068_s28 + $0x498] sm:$0xff] }
  0xb7   : > { %3116 = vmatmul.mubr.bf16.gmra.mrb[72].mxu0 %v4392_v43  ;;  %5470 = vmatprep.subr.bf16.mxu1 %v5888_v44  ;;  %v333_v43 = vld [vmem:[%s6068_s28 + $0x4d8] sm:$0xff]  ;;  %v4488_v44 = vcombine.low %v308_v32, %v316_v33  ;;  %v4504_v52 = vcombine.low %v324_v40, %v332_v41 }
  0xb8   : > { %3277 = vmatmul.mubr.bf16.gmra.mrb[72].mxu1 %v4394_v45  ;;  %3123 = vmatprep.mubr.bf16.mxu0 %v4409_v46  ;;  %v4490_v45 = vcombine.low %v309_v34, %v317_v35  ;;  %v4505_v46 = vcombine.high %v324_v40, %v332_v41  ;;  %v4506_v53 = vcombine.low %v325_v42, %v333_v43 }
  0xb9   : > { %3284 = vmatprep.mubr.bf16.mxu1 %v4411_v47  ;;  %5359 = vmatpush3.bf16.msra.mxu0 %v5887_v48  ;;  %v4507_v47 = vcombine.high %v325_v42, %v333_v43  ;;  %v340_v48 = vld [vmem:[%s6068_s28 + $0x510] sm:$0xff] }
  0xba   : > { %5471 = vmatpush3.bf16.msra.mxu1 %v5889_v49  ;;  %5360 = vmatprep.subr.bf16.mxu0 %v5890_v50  ;;  %v348_v49 = vld [vmem:[%s6068_s28 + $0x550] sm:$0xff]  ;;  %v341_v50 = vld [vmem:[%s6068_s28 + $0x518] sm:$0xff] }
  0xbb   : > { %5472 = vmatprep.subr.bf16.mxu1 %v5892_v51  ;;  %v349_v51 = vld [vmem:[%s6068_s28 + $0x558] sm:$0xff]  ;;  %v4521_v54 = vcombine.high %v340_v48, %v348_v49 }
  0xbd   : > { %5361 = vmatpush3.bf16.msra.mxu0 %v5891_v55  ;;  %v4523_v55 = vcombine.high %v341_v50, %v349_v51 }
  0xbe   : > { %5473 = vmatpush3.bf16.msra.mxu1 %v5893_v57  ;;  %5362 = vmatprep.subr.bf16.mxu0 %v5894_v58  ;;  %v364_v57 = vld [vmem:[%s6068_s28 + $0x5d0] sm:$0xff]  ;;  %v357_v58 = vld [vmem:[%s6068_s28 + $0x598] sm:$0xff] }
  0xbf   : > { %3124 = vmatmul.mubr.bf16.gmra.mrb[76].mxu0 %v4408_v59  ;;  %5474 = vmatprep.subr.bf16.mxu1 %v5896_v60  ;;  %v365_v59 = vld [vmem:[%s6068_s28 + $0x5d8] sm:$0xff]  ;;  %v4520_v60 = vcombine.low %v340_v48, %v348_v49  ;;  %v4536_v8 = vcombine.low %v356_v56, %v364_v57  ;;  %v404_v48 = vld [vmem:[%s6068_s28 + $0x710] sm:$0xff] }
  0xc0   : > { %3285 = vmatmul.mubr.bf16.gmra.mrb[76].mxu1 %v4410_v61  ;;  %3131 = vmatprep.mubr.bf16.mxu0 %v4425_v62  ;;  %v4522_v61 = vcombine.low %v341_v50, %v349_v51  ;;  %v4537_v62 = vcombine.high %v356_v56, %v364_v57  ;;  %v412_v49 = vld [vmem:[%s6068_s28 + $0x750] sm:$0xff]  ;;  %v4568_v56 = vcombine.low %v388_v24, %v396_v25 }
  0xc1   : > { %3292 = vmatprep.mubr.bf16.mxu1 %v4427_v63  ;;  %5363 = vmatpush3.bf16.msra.mxu0 %v5895_v0  ;;  %v4539_v63 = vcombine.high %v357_v58, %v365_v59  ;;  %v372_v0 = vld [vmem:[%s6068_s28 + $0x610] sm:$0xff] }
  0xc2   : > { %5475 = vmatpush3.bf16.msra.mxu1 %v5897_v1  ;;  %5364 = vmatprep.subr.bf16.mxu0 %v5898_v2  ;;  %v380_v1 = vld [vmem:[%s6068_s28 + $0x650] sm:$0xff] }
  0xc3   : > { %5476 = vmatprep.subr.bf16.mxu1 %v5900_v3  ;;  %v373_v3 = vld [vmem:[%s6068_s28 + $0x618] sm:$0xff]  ;;  %v4552_v32 = vcombine.low %v372_v0, %v380_v1 }
  0xc4   : > { %v4555_v17 = vcombine.high %v373_v3, %v381_v4 }
  0xc5   : > { %5365 = vmatpush3.bf16.msra.mxu0 %v5899_v7 }
  0xc6   : > { %5477 = vmatpush3.bf16.msra.mxu1 %v5901_v9  ;;  %5574 = vmatprep.subr.bf16.mxu0 %v5902_v10 }
  0xc7   : > { %3132 = vmatmul.mubr.bf16.gmra.mrb[80].mxu0 %v4424_v11  ;;  %5686 = vmatprep.subr.bf16.mxu1 %v5904_v12  ;;  %v4538_v12 = vcombine.low %v357_v58, %v365_v59 }
  0xc8   : > { %3293 = vmatmul.mubr.bf16.gmra.mrb[80].mxu1 %v4426_v13  ;;  %3139 = vmatprep.mubr.bf16.mxu0 %v4441_v14  ;;  %v4553_v13 = vcombine.high %v372_v0, %v380_v1 }
  0xc9   : > { %3300 = vmatprep.mubr.bf16.mxu1 %v4443_v15 }
  0xcf   : > { %3140 = vmatmul.mubr.bf16.gmra.mrb[84].mxu0 %v4440_v20 }
  0xd0   : > { %3301 = vmatmul.mubr.bf16.gmra.mrb[84].mxu1 %v4442_v21  ;;  %3147 = vmatprep.mubr.bf16.mxu0 %v4457_v22 }
  0xd1   : > { %3308 = vmatprep.mubr.bf16.mxu1 %v4459_v23 }
  0xd7   : > { %3148 = vmatmul.mubr.bf16.gmra.mrb[88].mxu0 %v4456_v28  ;;  %v389_v28 = vld [vmem:[%s6068_s28 + $0x698] sm:$0xff] }
  0xd8   : > { %3309 = vmatmul.mubr.bf16.gmra.mrb[88].mxu1 %v4458_v29  ;;  %3155 = vmatprep.mubr.bf16.mxu0 %v4473_v30  ;;  %v397_v29 = vld [vmem:[%s6068_s28 + $0x6d8] sm:$0xff] }
  0xd9   : > { %3316 = vmatprep.mubr.bf16.mxu1 %v4475_v31  ;;  %v4571_v41 = vcombine.high %v389_v28, %v397_v29 }
  0xdf   : > { %3156 = vmatmul.mubr.bf16.gmra.mrb[92].mxu0 %v4472_v36  ;;  %v4554_v36 = vcombine.low %v373_v3, %v381_v4 }
  0xe0   : > { %3317 = vmatmul.mubr.bf16.gmra.mrb[92].mxu1 %v4474_v37  ;;  %3163 = vmatprep.mubr.bf16.mxu0 %v4489_v38  ;;  %v4569_v37 = vcombine.high %v388_v24, %v396_v25 }
  0xe1   : > { %3324 = vmatprep.mubr.bf16.mxu1 %v4491_v39 }
  0xe7   : > { %3164 = vmatmul.mubr.bf16.gmra.mrb[96].mxu0 %v4488_v44 }
  0xe8   : > { %3325 = vmatmul.mubr.bf16.gmra.mrb[96].mxu1 %v4490_v45  ;;  %3171 = vmatprep.mubr.bf16.mxu0 %v4505_v46 }
  0xe9   : > { %3332 = vmatprep.mubr.bf16.mxu1 %v4507_v47 }
  0xef   : > { %3172 = vmatmul.mubr.bf16.gmra.mrb[100].mxu0 %v4504_v52  ;;  %v405_v52 = vld [vmem:[%s6068_s28 + $0x718] sm:$0xff] }
  0xf0   : > { %3333 = vmatmul.mubr.bf16.gmra.mrb[100].mxu1 %v4506_v53  ;;  %3179 = vmatprep.mubr.bf16.mxu0 %v4521_v54  ;;  %v413_v53 = vld [vmem:[%s6068_s28 + $0x758] sm:$0xff] }
  0xf1   : > { %3340 = vmatprep.mubr.bf16.mxu1 %v4523_v55  ;;  %v4587_v1 = vcombine.high %v405_v52, %v413_v53 }
  0xf7   : > { %3180 = vmatmul.mubr.bf16.gmra.mrb[104].mxu0 %v4520_v60  ;;  %v4570_v60 = vcombine.low %v389_v28, %v397_v29 }
  0xf8   : > { %3341 = vmatmul.mubr.bf16.gmra.mrb[104].mxu1 %v4522_v61  ;;  %3187 = vmatprep.mubr.bf16.mxu0 %v4537_v62  ;;  %v4585_v61 = vcombine.high %v404_v48, %v412_v49 }
  0xf9   : > { %3348 = vmatprep.mubr.bf16.mxu1 %v4539_v63 }
  0xfa   : > { %v4918_v2 = vpop.f32.mrb[0].mxu0 }
  0xfb   : > { %v5030_v5 = vpop.f32.mrb[0].mxu1  ;;  %v4919_v7 = vpop.f32.mrb[1].mxu0 }
  0xfc   : > { %v4920_v9 = vadd.f32 %v4919_v7, %v4918_v2  ;;  %v5031_v10 = vpop.f32.mrb[1].mxu1  ;;  %v4921_v11 = vpop.f32.mrb[2].mxu0 }
  0xfd   : > { %v5032_v14 = vadd.f32 %v5031_v10, %v5030_v5  ;;  %v5033_v15 = vpop.f32.mrb[2].mxu1  ;;  %v4922_v16 = vpop.f32.mrb[3].mxu0  ;;  %v428_v10 = vld [vmem:[%s6068_s28 + $0x7d0] sm:$0xff] }
  0xfe   : > { %v2780_v18 = vadd.f32 %v4920_v9, %v6393_v6  ;;  %v4923_v19 = vadd.f32 %v4922_v16, %v4921_v11  ;;  %v5034_v20 = vpop.f32.mrb[3].mxu1  ;;  %v420_v9 = vld [vmem:[%s6068_s28 + $0x790] sm:$0xff] }
  0xff   : > { %v5035_v21 = vadd.f32 %v5034_v20, %v5033_v15  ;;  %3188 = vmatmul.mubr.bf16.gmra.mrb[108].mxu0 %v4536_v8 }
 0x100   : > { %v6396_v22 = vadd.f32 %v5032_v14, %v2780_v18  ;;  %v2783_v23 = vadd.f32 %v4923_v19, %v6393_v6  ;;  %3349 = vmatmul.mubr.bf16.gmra.mrb[108].mxu1 %v4538_v12  ;;  %3195 = vmatprep.mubr.bf16.mxu0 %v4553_v13  ;;  %v421_v13 = vld [vmem:[%s6068_s28 + $0x798] sm:$0xff] }
 0x101   : > { %3356 = vmatprep.mubr.bf16.mxu1 %v4555_v17  ;;  %v429_v14 = vld [vmem:[%s6068_s28 + $0x7d8] sm:$0xff]  ;;  %v4584_v17 = vcombine.low %v404_v48, %v412_v49 }
 0x102   : > { %v6401_v26 = vadd.f32 %v5035_v21, %v2783_v23  ;;  %v4924_v27 = vpop.f32.mrb[4].mxu0  ;;  %v4586_v21 = vcombine.low %v405_v52, %v413_v53  ;;  %v4601_v23 = vcombine.high %v420_v9, %v428_v10  ;;  %v4603_v28 = vcombine.high %v421_v13, %v429_v14 }
 0x103   : > { %v5036_v30 = vpop.f32.mrb[4].mxu1  ;;  %v4925_v31 = vpop.f32.mrb[5].mxu0  ;;  %v4602_v48 = vcombine.low %v421_v13, %v429_v14  ;;  %v5903_v13 = vld [vmem:[%s7035_s1 + $0x300] sm:$0xff]  }
 0x104   : > { %v4926_v33 = vadd.f32 %v4925_v31, %v4924_v27  ;;  %v5037_v34 = vpop.f32.mrb[5].mxu1  ;;  %v4927_v35 = vpop.f32.mrb[6].mxu0 }
 0x105   : > { %v5038_v38 = vadd.f32 %v5037_v34, %v5036_v30  ;;  %v5039_v39 = vpop.f32.mrb[6].mxu1  ;;  %v4928_v40 = vpop.f32.mrb[7].mxu0 }
 0x106   : > { %v2788_v42 = vadd.f32 %v4926_v33, %v6393_v6  ;;  %v4929_v43 = vadd.f32 %v4928_v40, %v4927_v35  ;;  %v5040_v44 = vpop.f32.mrb[7].mxu1  ;;  %v182_v35 = vld [vmem:[%s6068_s28 + $0x20] sm:$0xff]  ;;  %v191_v40 = vld [vmem:[%s6068_s28 + $0x68] sm:$0xff] }
 0x107   : > { %v5041_v45 = vadd.f32 %v5040_v44, %v5039_v39  ;;  %3196 = vmatmul.mubr.bf16.gmra.mrb[112].mxu0 %v4552_v32  ;;  %v183_v39 = vld [vmem:[%s6068_s28 + $0x28] sm:$0xff] }
 0x108   : > { %v6406_v46 = vadd.f32 %v5038_v38, %v2788_v42  ;;  %v2791_v47 = vadd.f32 %v4929_v43, %v6393_v6  ;;  %3357 = vmatmul.mubr.bf16.gmra.mrb[112].mxu1 %v4554_v36  ;;  %3203 = vmatprep.mubr.bf16.mxu0 %v4569_v37  ;;  %v190_v36 = vld [vmem:[%s6068_s28 + $0x60] sm:$0xff]  ;;  %v4600_v43 = vcombine.low %v420_v9, %v428_v10 }
 0x109   : > { %3364 = vmatprep.mubr.bf16.mxu1 %v4571_v41  ;;  %v4365_v49 = vcombine.high %v182_v35, %v190_v36 }
 0x10a   : > { %v6411_v50 = vadd.f32 %v5041_v45, %v2791_v47  ;;  %v4930_v51 = vpop.f32.mrb[8].mxu0 }
 0x10b   : > { %v5042_v54 = vpop.f32.mrb[8].mxu1  ;;  %v4931_v55 = vpop.f32.mrb[9].mxu0 }
 0x10c   : > { %v4932_v57 = vadd.f32 %v4931_v55, %v4930_v51  ;;  %v5043_v58 = vpop.f32.mrb[9].mxu1  ;;  %v4933_v59 = vpop.f32.mrb[10].mxu0 }
 0x10d   : > { %v5044_v62 = vadd.f32 %v5043_v58, %v5042_v54  ;;  %v5045_v63 = vpop.f32.mrb[10].mxu1  ;;  %v4934_v0 = vpop.f32.mrb[11].mxu0  ;;  %v4367_v54 = vcombine.high %v183_v39, %v191_v40 }
 0x10e   : > { %v2796_v2 = vadd.f32 %v4932_v57, %v6393_v6  ;;  %v4935_v3 = vadd.f32 %v4934_v0, %v4933_v59  ;;  %v5046_v4 = vpop.f32.mrb[11].mxu1  ;;  %v6445_v0 = vld [vmem:[%s6068_s28 + $0xe0] sm:$0xff] }
 0x10f   : > { %v5047_v5 = vadd.f32 %v5046_v4, %v5045_v63  ;;  %3204 = vmatmul.mubr.bf16.gmra.mrb[116].mxu0 %v4568_v56  ;;  %v6442_v63 = vld [vmem:[%s6068_s28 + $0xa0] sm:$0xff]  ;;  %v6448_v4 = vld [vmem:[%s6068_s28 + $0xa8] sm:$0xff] }
 0x110   : > { %v6416_v7 = vadd.f32 %v5044_v62, %v2796_v2  ;;  %v2799_v8 = vadd.f32 %v4935_v3, %v6393_v6  ;;  %3365 = vmatmul.mubr.bf16.gmra.mrb[116].mxu1 %v4570_v60  ;;  %3211 = vmatprep.mubr.bf16.mxu0 %v4585_v61  ;;  %v4364_v3 = vcombine.low %v182_v35, %v190_v36  ;;  %v5910_v35 = vld [vmem:[%s7035_s1 + $0x350] sm:$0xff]  }
 0x111   : > { %3372 = vmatprep.mubr.bf16.mxu1 %v4587_v1 }
 0x112   : > { %v6421_v11 = vadd.f32 %v5047_v5, %v2799_v8  ;;  %v4936_v12 = vpop.f32.mrb[12].mxu0  ;;  %v6451_v5 = vld [vmem:[%s6068_s28 + $0xe8] sm:$0xff] }
 0x113   : > { %v5048_v15 = vpop.f32.mrb[12].mxu1  ;;  %v4937_v16 = vpop.f32.mrb[13].mxu0 }
 0x114   : > { %v4938_v18 = vadd.f32 %v4937_v16, %v4936_v12  ;;  %v5049_v19 = vpop.f32.mrb[13].mxu1  ;;  %v4939_v20 = vpop.f32.mrb[14].mxu0  ;;  %v4366_v12 = vcombine.low %v183_v39, %v191_v40  ;;  %v6491_v39 = vld [vmem:[%s6068_s28 + $0x128] sm:$0xff] }
 0x115   : > { %v5050_v24 = vadd.f32 %v5049_v19, %v5048_v15  ;;  %v5051_v25 = vpop.f32.mrb[14].mxu1  ;;  %v4940_v27 = vpop.f32.mrb[15].mxu0  ;;  %v6494_v40 = vld [vmem:[%s6068_s28 + $0x168] sm:$0xff] }
 0x116   : > { %v2804_v29 = vadd.f32 %v4938_v18, %v6393_v6  ;;  %v4941_v30 = vadd.f32 %v4940_v27, %v4939_v20  ;;  %v5052_v31 = vpop.f32.mrb[15].mxu1  ;;  %v4381_v18 = vcombine.high %v6442_v63, %v6445_v0  ;;  %v5908_v27 = vld [vmem:[%s7035_s1 + $0x3c8] sm:$0xff]  }
 0x117   : > { %v5053_v32 = vadd.f32 %v5052_v31, %v5051_v25  ;;  %3212 = vmatmul.mubr.bf16.gmra.mrb[120].mxu0 %v4584_v17  ;;  %v5905_v17 = vld [vmem:[%s7035_s1 + $0x380] sm:$0xff]   ;;  %v5907_v31 = vld [vmem:[%s7035_s1 + $0x308] sm:$0xff]  }
 0x118   : > { %v6426_v33 = vadd.f32 %v5050_v24, %v2804_v29  ;;  %v2807_v34 = vadd.f32 %v4941_v30, %v6393_v6  ;;  %3373 = vmatmul.mubr.bf16.gmra.mrb[120].mxu1 %v4586_v21  ;;  %3219 = vmatprep.mubr.bf16.mxu0 %v4601_v23  ;;  %v4383_v23 = vcombine.high %v6448_v4, %v6451_v5  ;;  %v5906_v24 = vld [vmem:[%s7035_s1 + $0x348] sm:$0xff]   ;;  %v6474_v30 = vld [vmem:[%s6068_s28 + $0x120] sm:$0xff] }
 0x119   : > { %3380 = vmatprep.mubr.bf16.mxu1 %v4603_v28 }
 0x11a   : > { %v6431_v37 = vadd.f32 %v5053_v32, %v2807_v34  ;;  %v4942_v38 = vpop.f32.mrb[16].mxu0  ;;  %v6480_v32 = vld [vmem:[%s6068_s28 + $0x160] sm:$0xff]  ;;  %v5909_v34 = vld [vmem:[%s7035_s1 + $0x388] sm:$0xff]  }
 0x11b   : > { %v5054_v41 = vpop.f32.mrb[16].mxu1  ;;  %v4943_v42 = vpop.f32.mrb[17].mxu0 }
 0x11c   : > { %v4944_v44 = vadd.f32 %v4943_v42, %v4942_v38  ;;  %v5055_v45 = vpop.f32.mrb[17].mxu1  ;;  %v4945_v47 = vpop.f32.mrb[18].mxu0 }
 0x11d   : > { %v5056_v51 = vadd.f32 %v5055_v45, %v5054_v41  ;;  %v5057_v52 = vpop.f32.mrb[18].mxu1  ;;  %v4946_v53 = vpop.f32.mrb[19].mxu0  ;;  %v5912_v41 = vld [vmem:[%s7035_s1 + $0x3d0] sm:$0xff]  }
 0x11e   : > { %v2812_v55 = vadd.f32 %v4944_v44, %v6393_v6  ;;  %v4947_v56 = vadd.f32 %v4946_v53, %v4945_v47  ;;  %v5058_v57 = vpop.f32.mrb[19].mxu1  ;;  %v4380_v44 = vcombine.low %v6442_v63, %v6445_v0  ;;  %v5914_v63 = vld [vmem:[%s7035_s1 + $0x358] sm:$0xff]  }
 0x11f   : > { %v5059_v58 = vadd.f32 %v5058_v57, %v5057_v52  ;;  %3220 = vmatmul.mubr.bf16.gmra.mrb[124].mxu0 %v4600_v43 }
 0x120   : > { %v6436_v59 = vadd.f32 %v5056_v51, %v2812_v55  ;;  %v2815_v60 = vadd.f32 %v4947_v56, %v6393_v6  ;;  %3381 = vmatmul.mubr.bf16.gmra.mrb[124].mxu1 %v4602_v48  ;;  %3421 = vmatprep.mubr.bf16.mxu0 %v4365_v49  ;;  %v4382_v49 = vcombine.low %v6448_v4, %v6451_v5  ;;  %v5911_v56 = vld [vmem:[%s7035_s1 + $0x310] sm:$0xff]   ;;  %v6524_v4 = vld [vmem:[%s6068_s28 + $0x1a0] sm:$0xff] }
 0x121   : > { %3582 = vmatprep.mubr.bf16.mxu1 %v4367_v54  ;;  %v4397_v51 = vcombine.high %v6474_v30, %v6480_v32  ;;  %v4399_v55 = vcombine.high %v6491_v39, %v6494_v40  ;;  %v6527_v5 = vld [vmem:[%s6068_s28 + $0x1e0] sm:$0xff] }
 0x122   : > { %v6439_v61 = vadd.f32 %v5059_v58, %v2815_v60  ;;  %v4948_v62 = vpop.f32.mrb[20].mxu0 }
 0x123   : > { %v5060_v1 = vpop.f32.mrb[20].mxu1  ;;  %v4949_v2 = vpop.f32.mrb[21].mxu0 }
 0x124   : > { %v4950_v8 = vadd.f32 %v4949_v2, %v4948_v62  ;;  %v5061_v9 = vpop.f32.mrb[21].mxu1  ;;  %v4951_v10 = vpop.f32.mrb[22].mxu0  ;;  %v5913_v62 = vld [vmem:[%s7035_s1 + $0x390] sm:$0xff]  }
 0x125   : > { %v5062_v14 = vadd.f32 %v5061_v9, %v5060_v1  ;;  %v5063_v15 = vpop.f32.mrb[22].mxu1  ;;  %v4952_v16 = vpop.f32.mrb[23].mxu0  ;;  %v5916_v1 = vld [vmem:[%s7035_s1 + $0x3d8] sm:$0xff]  }
 0x126   : > { %v2820_v19 = vadd.f32 %v4950_v8, %v6393_v6  ;;  %v4953_v20 = vadd.f32 %v4952_v16, %v4951_v10  ;;  %v5064_v21 = vpop.f32.mrb[23].mxu1  ;;  %v6530_v8 = vld [vmem:[%s6068_s28 + $0x1a8] sm:$0xff]  ;;  %v5915_v9 = vld [vmem:[%s7035_s1 + $0x318] sm:$0xff]  }
 0x127   : > { %v5065_v25 = vadd.f32 %v5064_v21, %v5063_v15  ;;  %3422 = vmatmul.mubr.bf16.vlgmr.msra.gmra.mrb[128].mxu0 %v4364_v3  ;;  %v5918_v15 = vld [vmem:[%s7035_s1 + $0x360] sm:$0xff]  }
 0x128   : > { %v6470_v28 = vadd.f32 %v5062_v14, %v2820_v19  ;;  %v2823_v29 = vadd.f32 %v4953_v20, %v6393_v6  ;;  %3583 = vmatmul.mubr.bf16.vlgmr.msra.gmra.mrb[128].mxu1 %v4366_v12  ;;  %5575 = vmatpush3.bf16.msra.mxu0 %v5903_v13  ;;  %v6538_v13 = vld [vmem:[%s6068_s28 + $0x1e8] sm:$0xff]  ;;  %v5917_v14 = vld [vmem:[%s7035_s1 + $0x398] sm:$0xff]   ;;  %v5920_v19 = vld [vmem:[%s7035_s1 + $0x3e0] sm:$0xff]  }
 0x129   : > { %5687 = vmatpush3.bf16.msra.mxu1 %v5905_v17  ;;  %3429 = vmatprep.mubr.bf16.mxu0 %v4381_v18  ;;  %v4396_v18 = vcombine.low %v6474_v30, %v6480_v32  ;;  %v4415_v30 = vcombine.high %v6530_v8, %v6538_v13  ;;  %v5919_v32 = vld [vmem:[%s7035_s1 + $0x320] sm:$0xff]  }
 0x12a   : > { %v6488_v36 = vadd.f32 %v5065_v25, %v2823_v29  ;;  %v4954_v38 = vpop.f32.mrb[24].mxu0  ;;  %3590 = vmatprep.mubr.bf16.mxu1 %v4383_v23  ;;  %5576 = vmatprep.subr.bf16.mxu0 %v5906_v24  ;;  %v4398_v24 = vcombine.low %v6491_v39, %v6494_v40  ;;  %v4413_v25 = vcombine.high %v6524_v4, %v6527_v5  ;;  %v5921_v39 = vld [vmem:[%s7035_s1 + $0x3a0] sm:$0xff]   ;;  %v5922_v40 = vld [vmem:[%s7035_s1 + $0x368] sm:$0xff]  }
 0x12b   : > { %v5066_v42 = vpop.f32.mrb[24].mxu1  ;;  %v4955_v43 = vpop.f32.mrb[25].mxu0  ;;  %5688 = vmatprep.subr.bf16.mxu1 %v5908_v27 }
 0x12c   : > { %v4956_v45 = vadd.f32 %v4955_v43, %v4954_v38  ;;  %v5067_v47 = vpop.f32.mrb[25].mxu1  ;;  %v4957_v48 = vpop.f32.mrb[26].mxu0  ;;  %5577 = vmatpush3.bf16.msra.mxu0 %v5907_v31 }
 0x12d   : > { %v5068_v52 = vadd.f32 %v5067_v47, %v5066_v42  ;;  %v5069_v53 = vpop.f32.mrb[26].mxu1  ;;  %v4958_v54 = vpop.f32.mrb[27].mxu0  ;;  %5689 = vmatpush3.bf16.msra.mxu1 %v5909_v34  ;;  %5578 = vmatprep.subr.bf16.mxu0 %v5910_v35  ;;  %v5924_v42 = vld [vmem:[%s7035_s1 + $0x3e8] sm:$0xff]   ;;  %v6577_v47 = vld [vmem:[%s6068_s28 + $0x260] sm:$0xff] }
 0x12e   : > { %v2828_v57 = vadd.f32 %v4956_v45, %v6393_v6  ;;  %v4959_v58 = vadd.f32 %v4958_v54, %v4957_v48  ;;  %v5070_v60 = vpop.f32.mrb[27].mxu1  ;;  %5690 = vmatprep.subr.bf16.mxu1 %v5912_v41  ;;  %v6574_v45 = vld [vmem:[%s6068_s28 + $0x220] sm:$0xff]  ;;  %v6580_v48 = vld [vmem:[%s6068_s28 + $0x228] sm:$0xff] }
 0x12f   : > { %v5071_v0 = vadd.f32 %v5070_v60, %v5069_v53  ;;  %3430 = vmatmul.mubr.bf16.gmra.mrb[132].mxu0 %v4380_v44  ;;  %v6588_v53 = vld [vmem:[%s6068_s28 + $0x268] sm:$0xff]  ;;  %v5928_v60 = vld [vmem:[%s7035_s1 + $0x3f0] sm:$0xff]  }
 0x130   : > { %v6520_v2 = vadd.f32 %v5068_v52, %v2828_v57  ;;  %v2831_v3 = vadd.f32 %v4959_v58, %v6393_v6  ;;  %3591 = vmatmul.mubr.bf16.gmra.mrb[132].mxu1 %v4382_v49  ;;  %3437 = vmatprep.mubr.bf16.mxu0 %v4397_v51  ;;  %v5923_v49 = vld [vmem:[%s7035_s1 + $0x328] sm:$0xff]   ;;  %v4412_v58 = vcombine.low %v6524_v4, %v6527_v5  ;;  %v5927_v5 = vld [vmem:[%s7035_s1 + $0x330] sm:$0xff]  }
 0x131   : > { %3598 = vmatprep.mubr.bf16.mxu1 %v4399_v55  ;;  %5579 = vmatpush3.bf16.msra.mxu0 %v5911_v56  ;;  %v5925_v54 = vld [vmem:[%s7035_s1 + $0x3a8] sm:$0xff]   ;;  %v5926_v55 = vld [vmem:[%s7035_s1 + $0x370] sm:$0xff]   ;;  %v4431_v4 = vcombine.high %v6580_v48, %v6588_v53 }
 0x132   : > { %v6535_v10 = vadd.f32 %v5071_v0, %v2831_v3  ;;  %v4960_v12 = vpop.f32.mrb[28].mxu0  ;;  %5691 = vmatpush3.bf16.msra.mxu1 %v5913_v62  ;;  %5580 = vmatprep.subr.bf16.mxu0 %v5914_v63  ;;  %v4429_v3 = vcombine.high %v6574_v45, %v6577_v47 }
 0x133   : > { %v5072_v16 = vpop.f32.mrb[28].mxu1  ;;  %v4961_v17 = vpop.f32.mrb[29].mxu0  ;;  %5692 = vmatprep.subr.bf16.mxu1 %v5916_v1  ;;  %v4414_v1 = vcombine.low %v6530_v8, %v6538_v13  ;;  %v5929_v13 = vld [vmem:[%s7035_s1 + $0x3b0] sm:$0xff]  }
 0x134   : > { %v4962_v20 = vadd.f32 %v4961_v17, %v4960_v12  ;;  %v5073_v21 = vpop.f32.mrb[29].mxu1  ;;  %v4963_v23 = vpop.f32.mrb[30].mxu0  ;;  %v5930_v17 = vld [vmem:[%s7035_s1 + $0x378] sm:$0xff]  }
 0x135   : > { %v5074_v27 = vadd.f32 %v5073_v21, %v5072_v16  ;;  %v5075_v29 = vpop.f32.mrb[30].mxu1  ;;  %v4964_v31 = vpop.f32.mrb[31].mxu0  ;;  %5581 = vmatpush3.bf16.msra.mxu0 %v5915_v9 }
 0x136   : > { %v2836_v34 = vadd.f32 %v4962_v20, %v6393_v6  ;;  %v4965_v35 = vadd.f32 %v4964_v31, %v4963_v23  ;;  %v5076_v38 = vpop.f32.mrb[31].mxu1  ;;  %5693 = vmatpush3.bf16.msra.mxu1 %v5917_v14  ;;  %5582 = vmatprep.subr.bf16.mxu0 %v5918_v15  ;;  %v262_v23 = vld [vmem:[%s6068_s28 + $0x2a0] sm:$0xff]  ;;  %v263_v31 = vld [vmem:[%s6068_s28 + $0x2a8] sm:$0xff] }
 0x137   : > { %v5077_v41 = vadd.f32 %v5076_v38, %v5075_v29  ;;  %3438 = vmatmul.mubr.bf16.gmra.mrb[136].mxu0 %v4396_v18  ;;  %5694 = vmatprep.subr.bf16.mxu1 %v5920_v19  ;;  %v5932_v19 = vld [vmem:[%s7035_s1 + $0x3f8] sm:$0xff]   ;;  %v4428_v38 = vcombine.low %v6574_v45, %v6577_v47 }
 0x138   : > { %v6570_v43 = vadd.f32 %v5074_v27, %v2836_v34  ;;  %v2839_v44 = vadd.f32 %v4965_v35, %v6393_v6  ;;  %3599 = vmatmul.mubr.bf16.gmra.mrb[136].mxu1 %v4398_v24  ;;  %3445 = vmatprep.mubr.bf16.mxu0 %v4413_v25  ;;  %v270_v24 = vld [vmem:[%s6068_s28 + $0x2e0] sm:$0xff]  ;;  %v5931_v25 = vld [vmem:[%s7035_s1 + $0x338] sm:$0xff]  }
 0x139   : > { %3606 = vmatprep.mubr.bf16.mxu1 %v4415_v30  ;;  %5583 = vmatpush3.bf16.msra.mxu0 %v5919_v32  ;;  %v271_v30 = vld [vmem:[%s6068_s28 + $0x2e8] sm:$0xff]  ;;  %v5933_v32 = vld [vmem:[%s7035_s1 + $0x3b8] sm:$0xff]  }
 0x13a   : > { %v6585_v51 = vadd.f32 %v5077_v41, %v2839_v44  ;;  %v4966_v52 = vpop.f32.mrb[32].mxu0  ;;  %5695 = vmatpush3.bf16.msra.mxu1 %v5921_v39  ;;  %5584 = vmatprep.subr.bf16.mxu0 %v5922_v40  ;;  %v4445_v44 = vcombine.high %v262_v23, %v270_v24 }
 0x13b   : > { %v5078_v56 = vpop.f32.mrb[32].mxu1  ;;  %v4967_v57 = vpop.f32.mrb[33].mxu0  ;;  %5696 = vmatprep.subr.bf16.mxu1 %v5924_v42  ;;  %v4430_v42 = vcombine.low %v6580_v48, %v6588_v53  ;;  %v278_v53 = vld [vmem:[%s6068_s28 + $0x320] sm:$0xff] }
 0x13c   : > { %v4968_v62 = vadd.f32 %v4967_v57, %v4966_v52  ;;  %v5079_v63 = vpop.f32.mrb[33].mxu1  ;;  %v4969_v0 = vpop.f32.mrb[34].mxu0 }
 0x13d   : > { %v5080_v9 = vadd.f32 %v5079_v63, %v5078_v56  ;;  %v5081_v12 = vpop.f32.mrb[34].mxu1  ;;  %v4970_v14 = vpop.f32.mrb[35].mxu0  ;;  %5585 = vmatpush3.bf16.msra.mxu0 %v5923_v49 }
 0x13e   : > { %v2844_v15 = vadd.f32 %v4968_v62, %v6393_v6  ;;  %v4971_v16 = vadd.f32 %v4970_v14, %v4969_v0  ;;  %v5082_v8 = vpop.f32.mrb[35].mxu1  ;;  %5697 = vmatpush3.bf16.msra.mxu1 %v5925_v54  ;;  %5586 = vmatprep.subr.bf16.mxu0 %v5926_v55  ;;  %v4447_v55 = vcombine.high %v263_v31, %v271_v30  ;;  %v279_v0 = vld [vmem:[%s6068_s28 + $0x328] sm:$0xff] }
 0x13f   : > { %v5083_v18 = vadd.f32 %v5082_v8, %v5081_v12  ;;  %3446 = vmatmul.mubr.bf16.gmra.mrb[140].mxu0 %v4412_v58  ;;  %5698 = vmatprep.subr.bf16.mxu1 %v5928_v60  ;;  %v286_v60 = vld [vmem:[%s6068_s28 + $0x360] sm:$0xff]  ;;  %v4444_v12 = vcombine.low %v262_v23, %v270_v24 }
 0x140   : > { %v6620_v20 = vadd.f32 %v5080_v9, %v2844_v15  ;;  %v2847_v21 = vadd.f32 %v4971_v16, %v6393_v6  ;;  %3607 = vmatmul.mubr.bf16.gmra.mrb[140].mxu1 %v4414_v1  ;;  %3453 = vmatprep.mubr.bf16.mxu0 %v4429_v3  ;;  %v287_v1 = vld [vmem:[%s6068_s28 + $0x368] sm:$0xff]  ;;  %v4446_v15 = vcombine.low %v263_v31, %v271_v30  ;;  %v294_v31 = vld [vmem:[%s6068_s28 + $0x3a0] sm:$0xff] }
 0x141   : > { %3614 = vmatprep.mubr.bf16.mxu1 %v4431_v4  ;;  %5587 = vmatpush3.bf16.msra.mxu0 %v5927_v5  ;;  %v4461_v16 = vcombine.high %v278_v53, %v286_v60  ;;  %v302_v30 = vld [vmem:[%s6068_s28 + $0x3e0] sm:$0xff] }
 0x142   : > { %v6628_v27 = vadd.f32 %v5083_v18, %v2847_v21  ;;  %v4972_v29 = vpop.f32.mrb[36].mxu0  ;;  %5699 = vmatpush3.bf16.msra.mxu1 %v5929_v13  ;;  %5588 = vmatprep.subr.bf16.mxu0 %v5930_v17  ;;  %v4463_v18 = vcombine.high %v279_v0, %v287_v1 }
 0x143   : > { %v5084_v34 = vpop.f32.mrb[36].mxu1  ;;  %v4973_v35 = vpop.f32.mrb[37].mxu0  ;;  %5700 = vmatprep.subr.bf16.mxu1 %v5932_v19 }
 0x144   : > { %v4974_v39 = vadd.f32 %v4973_v35, %v4972_v29  ;;  %v5085_v40 = vpop.f32.mrb[37].mxu1  ;;  %v4975_v41 = vpop.f32.mrb[38].mxu0  ;;  %v295_v35 = vld [vmem:[%s6068_s28 + $0x3a8] sm:$0xff] }
 0x145   : > { %v5086_v49 = vadd.f32 %v5085_v40, %v5084_v34  ;;  %v5087_v52 = vpop.f32.mrb[38].mxu1  ;;  %v4976_v54 = vpop.f32.mrb[39].mxu0  ;;  %5589 = vmatpush3.bf16.msra.mxu0 %v5931_v25 }
 0x146   : > { %v2852_v56 = vadd.f32 %v4974_v39, %v6393_v6  ;;  %v4977_v45 = vadd.f32 %v4976_v54, %v4975_v41  ;;  %v5088_v47 = vpop.f32.mrb[39].mxu1  ;;  %5701 = vmatpush3.bf16.msra.mxu1 %v5933_v32  ;;  %v4460_v41 = vcombine.low %v278_v53, %v286_v60  ;;  %v4477_v54 = vcombine.high %v294_v31, %v302_v30 }
 0x147   : > { %v5089_v57 = vadd.f32 %v5088_v47, %v5087_v52  ;;  %3454 = vmatmul.mubr.bf16.gmra.mrb[144].mxu0 %v4428_v38  ;;  %v303_v38 = vld [vmem:[%s6068_s28 + $0x3e8] sm:$0xff]  ;;  %v4462_v52 = vcombine.low %v279_v0, %v287_v1  ;;  %v310_v0 = vld [vmem:[%s6068_s28 + $0x420] sm:$0xff] }
 0x148   : > { %v6640_v58 = vadd.f32 %v5086_v49, %v2852_v56  ;;  %v2855_v48 = vadd.f32 %v4977_v45, %v6393_v6  ;;  %3615 = vmatmul.mubr.bf16.gmra.mrb[144].mxu1 %v4430_v42  ;;  %3461 = vmatprep.mubr.bf16.mxu0 %v4445_v44  ;;  %v4479_v47 = vcombine.high %v295_v35, %v303_v38  ;;  %v318_v1 = vld [vmem:[%s6068_s28 + $0x460] sm:$0xff] }
 0x149   : > { %3622 = vmatprep.mubr.bf16.mxu1 %v4447_v55 }
 0x14a   : > { %v6645_v62 = vadd.f32 %v5089_v57, %v2855_v48  ;;  %v4978_v63 = vpop.f32.mrb[40].mxu0 }
 0x14b   : > { %v5090_v3 = vpop.f32.mrb[40].mxu1  ;;  %v4979_v9 = vpop.f32.mrb[41].mxu0 }
 0x14c   : > { %v4980_v14 = vadd.f32 %v4979_v9, %v4978_v63  ;;  %v5091_v4 = vpop.f32.mrb[41].mxu1  ;;  %v4981_v5 = vpop.f32.mrb[42].mxu0 }
 0x14d   : > { %v5092_v8 = vadd.f32 %v5091_v4, %v5090_v3  ;;  %v5093_v13 = vpop.f32.mrb[42].mxu1  ;;  %v4982_v17 = vpop.f32.mrb[43].mxu0  ;;  %v319_v4 = vld [vmem:[%s6068_s28 + $0x468] sm:$0xff] }
 0x14e   : > { %v2860_v19 = vadd.f32 %v4980_v14, %v6393_v6  ;;  %v4983_v21 = vadd.f32 %v4982_v17, %v4981_v5  ;;  %v5094_v25 = vpop.f32.mrb[43].mxu1  ;;  %v311_v14 = vld [vmem:[%s6068_s28 + $0x428] sm:$0xff] }
 0x14f   : > { %v5095_v29 = vadd.f32 %v5094_v25, %v5093_v13  ;;  %3462 = vmatmul.mubr.bf16.gmra.mrb[148].mxu0 %v4444_v12 }
 0x150   : > { %v6650_v23 = vadd.f32 %v5092_v8, %v2860_v19  ;;  %v2863_v24 = vadd.f32 %v4983_v21, %v6393_v6  ;;  %3623 = vmatmul.mubr.bf16.gmra.mrb[148].mxu1 %v4446_v15  ;;  %3469 = vmatprep.mubr.bf16.mxu0 %v4461_v16  ;;  %v4476_v16 = vcombine.low %v294_v31, %v302_v30 }
 0x151   : > { %3630 = vmatprep.mubr.bf16.mxu1 %v4463_v18  ;;  %v4478_v18 = vcombine.low %v295_v35, %v303_v38  ;;  %v4493_v19 = vcombine.high %v310_v0, %v318_v1  ;;  %v326_v35 = vld [vmem:[%s6068_s28 + $0x4a0] sm:$0xff] }
 0x152   : > { %v6655_v32 = vadd.f32 %v5095_v29, %v2863_v24  ;;  %v4984_v34 = vpop.f32.mrb[44].mxu0  ;;  %v4495_v24 = vcombine.high %v311_v14, %v319_v4  ;;  %v334_v38 = vld [vmem:[%s6068_s28 + $0x4e0] sm:$0xff] }
 0x153   : > { %v5096_v39 = vpop.f32.mrb[44].mxu1  ;;  %v4985_v40 = vpop.f32.mrb[45].mxu0 }
 0x154   : > { %v4986_v42 = vadd.f32 %v4985_v40, %v4984_v34  ;;  %v5097_v44 = vpop.f32.mrb[45].mxu1  ;;  %v4987_v49 = vpop.f32.mrb[46].mxu0 }
 0x155   : > { %v5098_v55 = vadd.f32 %v5097_v44, %v5096_v39  ;;  %v5099_v56 = vpop.f32.mrb[46].mxu1  ;;  %v4988_v45 = vpop.f32.mrb[47].mxu0 }
 0x156   : > { %v2868_v57 = vadd.f32 %v4986_v42, %v6393_v6  ;;  %v4989_v48 = vadd.f32 %v4988_v45, %v4987_v49  ;;  %v5100_v63 = vpop.f32.mrb[47].mxu1  ;;  %v327_v49 = vld [vmem:[%s6068_s28 + $0x4a8] sm:$0xff] }
 0x157   : > { %v5101_v3 = vadd.f32 %v5100_v63, %v5099_v56  ;;  %3470 = vmatmul.mubr.bf16.gmra.mrb[152].mxu0 %v4460_v41  ;;  %v4492_v56 = vcombine.low %v310_v0, %v318_v1  ;;  %v4509_v63 = vcombine.high %v326_v35, %v334_v38 }
 0x158   : > { %v6660_v53 = vadd.f32 %v5098_v55, %v2868_v57  ;;  %v2871_v60 = vadd.f32 %v4989_v48, %v6393_v6  ;;  %3631 = vmatmul.mubr.bf16.gmra.mrb[152].mxu1 %v4462_v52  ;;  %3477 = vmatprep.mubr.bf16.mxu0 %v4477_v54  ;;  %v335_v52 = vld [vmem:[%s6068_s28 + $0x4e8] sm:$0xff]  ;;  %v4494_v48 = vcombine.low %v311_v14, %v319_v4  ;;  %v342_v14 = vld [vmem:[%s6068_s28 + $0x520] sm:$0xff] }
 0x159   : > { %3638 = vmatprep.mubr.bf16.mxu1 %v4479_v47  ;;  %v350_v4 = vld [vmem:[%s6068_s28 + $0x560] sm:$0xff] }
 0x15a   : > { %v6665_v9 = vadd.f32 %v5101_v3, %v2871_v60  ;;  %v4990_v12 = vpop.f32.mrb[48].mxu0 }
 0x15b   : > { %v5102_v5 = vpop.f32.mrb[48].mxu1  ;;  %v4991_v15 = vpop.f32.mrb[49].mxu0 }
 0x15c   : > { %v4992_v8 = vadd.f32 %v4991_v15, %v4990_v12  ;;  %v5103_v13 = vpop.f32.mrb[49].mxu1  ;;  %v4993_v17 = vpop.f32.mrb[50].mxu0 }
 0x15d   : > { %v5104_v21 = vadd.f32 %v5103_v13, %v5102_v5  ;;  %v5105_v25 = vpop.f32.mrb[50].mxu1  ;;  %v4994_v29 = vpop.f32.mrb[51].mxu0  ;;  %v4511_v5 = vcombine.high %v327_v49, %v335_v52 }
 0x15e   : > { %v2876_v34 = vadd.f32 %v4992_v8, %v6393_v6  ;;  %v4995_v39 = vadd.f32 %v4994_v29, %v4993_v17  ;;  %v5106_v40 = vpop.f32.mrb[51].mxu1 }
 0x15f   : > { %v5107_v41 = vadd.f32 %v5106_v40, %v5105_v25  ;;  %3478 = vmatmul.mubr.bf16.gmra.mrb[156].mxu0 %v4476_v16 }
 0x160   : > { %v6670_v31 = vadd.f32 %v5104_v21, %v2876_v34  ;;  %v2879_v30 = vadd.f32 %v4995_v39, %v6393_v6  ;;  %3639 = vmatmul.mubr.bf16.gmra.mrb[156].mxu1 %v4478_v18  ;;  %3485 = vmatprep.mubr.bf16.mxu0 %v4493_v19  ;;  %v343_v19 = vld [vmem:[%s6068_s28 + $0x528] sm:$0xff] }
 0x161   : > { %3646 = vmatprep.mubr.bf16.mxu1 %v4495_v24  ;;  %v351_v21 = vld [vmem:[%s6068_s28 + $0x568] sm:$0xff]  ;;  %v4508_v24 = vcombine.low %v326_v35, %v334_v38 }
 0x162   : > { %v6675_v42 = vadd.f32 %v5107_v41, %v2879_v30  ;;  %v4996_v44 = vpop.f32.mrb[52].mxu0  ;;  %v4510_v41 = vcombine.low %v327_v49, %v335_v52  ;;  %v4525_v30 = vcombine.high %v342_v14, %v350_v4  ;;  %v358_v49 = vld [vmem:[%s6068_s28 + $0x5a0] sm:$0xff] }
 0x163   : > { %v5108_v54 = vpop.f32.mrb[52].mxu1  ;;  %v4997_v55 = vpop.f32.mrb[53].mxu0  ;;  %v366_v52 = vld [vmem:[%s6068_s28 + $0x5e0] sm:$0xff] }
 0x164   : > { %v4998_v45 = vadd.f32 %v4997_v55, %v4996_v44  ;;  %v5109_v47 = vpop.f32.mrb[53].mxu1  ;;  %v4999_v57 = vpop.f32.mrb[54].mxu0 }
 0x165   : > { %v5110_v3 = vadd.f32 %v5109_v47, %v5108_v54  ;;  %v5111_v60 = vpop.f32.mrb[54].mxu1  ;;  %v5000_v12 = vpop.f32.mrb[55].mxu0 }
 0x166   : > { %v2884_v15 = vadd.f32 %v4998_v45, %v6393_v6  ;;  %v5001_v16 = vadd.f32 %v5000_v12, %v4999_v57  ;;  %v5112_v8 = vpop.f32.mrb[55].mxu1  ;;  %v367_v12 = vld [vmem:[%s6068_s28 + $0x5e8] sm:$0xff] }
 0x167   : > { %v5113_v13 = vadd.f32 %v5112_v8, %v5111_v60  ;;  %3486 = vmatmul.mubr.bf16.gmra.mrb[160].mxu0 %v4492_v56  ;;  %v4527_v56 = vcombine.high %v343_v19, %v351_v21  ;;  %v359_v60 = vld [vmem:[%s6068_s28 + $0x5a8] sm:$0xff] }
 0x168   : > { %v6680_v0 = vadd.f32 %v5110_v3, %v2884_v15  ;;  %v2887_v1 = vadd.f32 %v5001_v16, %v6393_v6  ;;  %3647 = vmatmul.mubr.bf16.gmra.mrb[160].mxu1 %v4494_v48  ;;  %3493 = vmatprep.mubr.bf16.mxu0 %v4509_v63  ;;  %v4524_v16 = vcombine.low %v342_v14, %v350_v4 }
 0x169   : > { %3654 = vmatprep.mubr.bf16.mxu1 %v4511_v5 }
 0x16a   : > { %v6685_v17 = vadd.f32 %v5113_v13, %v2887_v1  ;;  %v5002_v18 = vpop.f32.mrb[56].mxu0 }
 0x16b   : > { %v5114_v25 = vpop.f32.mrb[56].mxu1  ;;  %v5003_v29 = vpop.f32.mrb[57].mxu0 }
 0x16c   : > { %v5004_v34 = vadd.f32 %v5003_v29, %v5002_v18  ;;  %v5115_v39 = vpop.f32.mrb[57].mxu1  ;;  %v5005_v40 = vpop.f32.mrb[58].mxu0  ;;  %v4526_v18 = vcombine.low %v343_v19, %v351_v21  ;;  %v374_v19 = vld [vmem:[%s6068_s28 + $0x620] sm:$0xff] }
 0x16d   : > { %v5116_v44 = vadd.f32 %v5115_v39, %v5114_v25  ;;  %v5117_v54 = vpop.f32.mrb[58].mxu1  ;;  %v5006_v55 = vpop.f32.mrb[59].mxu0  ;;  %v4541_v25 = vcombine.high %v358_v49, %v366_v52  ;;  %v4543_v39 = vcombine.high %v359_v60, %v367_v12  ;;  %v382_v21 = vld [vmem:[%s6068_s28 + $0x660] sm:$0xff] }
 0x16e   : > { %v2892_v45 = vadd.f32 %v5004_v34, %v6393_v6  ;;  %v5007_v47 = vadd.f32 %v5006_v55, %v5005_v40  ;;  %v5118_v57 = vpop.f32.mrb[59].mxu1 }
 0x16f   : > { %v5119_v48 = vadd.f32 %v5118_v57, %v5117_v54  ;;  %3494 = vmatmul.mubr.bf16.gmra.mrb[164].mxu0 %v4508_v24 }
 0x170   : > { %v6690_v35 = vadd.f32 %v5116_v44, %v2892_v45  ;;  %v2895_v38 = vadd.f32 %v5007_v47, %v6393_v6  ;;  %3655 = vmatmul.mubr.bf16.gmra.mrb[164].mxu1 %v4510_v41  ;;  %3501 = vmatprep.mubr.bf16.mxu0 %v4525_v30  ;;  %v383_v45 = vld [vmem:[%s6068_s28 + $0x668] sm:$0xff] }
 0x171   : > { %3662 = vmatprep.mubr.bf16.mxu1 %v4527_v56  ;;  %v375_v56 = vld [vmem:[%s6068_s28 + $0x628] sm:$0xff] }
 0x172   : > { %v6695_v63 = vadd.f32 %v5119_v48, %v2895_v38  ;;  %v5008_v3 = vpop.f32.mrb[60].mxu0  ;;  %v4540_v48 = vcombine.low %v358_v49, %v366_v52 }
 0x173   : > { %v5120_v5 = vpop.f32.mrb[60].mxu1  ;;  %v5009_v15 = vpop.f32.mrb[61].mxu0 }
 0x174   : > { %v5010_v8 = vadd.f32 %v5009_v15, %v5008_v3  ;;  %v5121_v13 = vpop.f32.mrb[61].mxu1  ;;  %v5011_v1 = vpop.f32.mrb[62].mxu0  ;;  %v4542_v15 = vcombine.low %v359_v60, %v367_v12  ;;  %v390_v60 = vld [vmem:[%s6068_s28 + $0x6a0] sm:$0xff] }
 0x175   : > { %v5122_v29 = vadd.f32 %v5121_v13, %v5120_v5  ;;  %v5123_v24 = vpop.f32.mrb[62].mxu1  ;;  %v5012_v34 = vpop.f32.mrb[63].mxu0  ;;  %v398_v12 = vld [vmem:[%s6068_s28 + $0x6e0] sm:$0xff] }
 0x176   : > { %v2900_v40 = vadd.f32 %v5010_v8, %v6393_v6  ;;  %v5013_v41 = vadd.f32 %v5012_v34, %v5011_v1  ;;  %v5124_v30 = vpop.f32.mrb[63].mxu1  ;;  %v4559_v1 = vcombine.high %v375_v56, %v383_v45 }
 0x177   : > { %v5125_v44 = vadd.f32 %v5124_v30, %v5123_v24  ;;  %3502 = vmatmul.mubr.bf16.gmra.mrb[168].mxu0 %v4524_v16  ;;  %v4557_v16 = vcombine.high %v374_v19, %v382_v21 }
 0x178   : > { %v6700_v14 = vadd.f32 %v5122_v29, %v2900_v40  ;;  %v2903_v4 = vadd.f32 %v5013_v41, %v6393_v6  ;;  %3663 = vmatmul.mubr.bf16.gmra.mrb[168].mxu1 %v4526_v18  ;;  %3509 = vmatprep.mubr.bf16.mxu0 %v4541_v25  ;;  %v391_v40 = vld [vmem:[%s6068_s28 + $0x6a8] sm:$0xff] }
 0x179   : > { %3670 = vmatprep.mubr.bf16.mxu1 %v4543_v39  ;;  %v399_v41 = vld [vmem:[%s6068_s28 + $0x6e8] sm:$0xff] }
 0x17a   : > { %v6705_v54 = vadd.f32 %v5125_v44, %v2903_v4  ;;  %v5142_v55 = vpop.f32.mrb[64].mxu0  ;;  %v4556_v44 = vcombine.low %v374_v19, %v382_v21 }
 0x17b   : > { %v5254_v47 = vpop.f32.mrb[64].mxu1  ;;  %v5143_v57 = vpop.f32.mrb[65].mxu0 }
 0x17c   : > { %v5144_v38 = vadd.f32 %v5143_v57, %v5142_v55  ;;  %v5255_v3 = vpop.f32.mrb[65].mxu1  ;;  %v5145_v5 = vpop.f32.mrb[66].mxu0  ;;  %v4558_v57 = vcombine.low %v375_v56, %v383_v45  ;;  %v406_v56 = vld [vmem:[%s6068_s28 + $0x720] sm:$0xff] }
 0x17d   : > { %v5256_v6 = vadd.f32 %v5255_v3, %v5254_v47  ;;  %v5257_v8 = vpop.f32.mrb[66].mxu1  ;;  %v5146_v13 = vpop.f32.mrb[67].mxu0  ;;  %v414_v45 = vld [vmem:[%s6068_s28 + $0x760] sm:$0xff] }
 0x17e   : > { %v3102_v18 = vadd.f32 %v5144_v38, %v6396_v22  ;;  %v5147_v25 = vadd.f32 %v5146_v13, %v5145_v5  ;;  %v5258_v29 = vpop.f32.mrb[67].mxu1  ;;  %v4575_v5 = vcombine.high %v391_v40, %v399_v41 }
 0x17f   : > { %v5259_v24 = vadd.f32 %v5258_v29, %v5257_v8  ;;  %3510 = vmatmul.mubr.bf16.gmra.mrb[172].mxu0 %v4540_v48  ;;  %v4573_v48 = vcombine.high %v390_v60, %v398_v12 }
 0x180   : > { %v6710_v49 = vadd.f32 %v5256_v6, %v3102_v18  ;;  %v3105_v52 = vadd.f32 %v5147_v25, %v6401_v26  ;;  %3671 = vmatmul.mubr.bf16.gmra.mrb[172].mxu1 %v4542_v15  ;;  %3517 = vmatprep.mubr.bf16.mxu0 %v4557_v16  ;;  %v407_v18 = vld [vmem:[%s6068_s28 + $0x728] sm:$0xff] }
 0x181   : > { %3678 = vmatprep.mubr.bf16.mxu1 %v4559_v1  ;;  %v415_v25 = vld [vmem:[%s6068_s28 + $0x768] sm:$0xff] }
 0x182   : > { %v6715_v34 = vadd.f32 %v5259_v24, %v3105_v52  ;;  %v5148_v39 = vpop.f32.mrb[68].mxu0  ;;  %v4572_v24 = vcombine.low %v390_v60, %v398_v12 }
 0x183   : > { %v5260_v30 = vpop.f32.mrb[68].mxu1  ;;  %v5149_v22 = vpop.f32.mrb[69].mxu0 }
 0x184   : > { %v5150_v4 = vadd.f32 %v5149_v22, %v5148_v39  ;;  %v5261_v55 = vpop.f32.mrb[69].mxu1  ;;  %v5151_v47 = vpop.f32.mrb[70].mxu0  ;;  %v4574_v22 = vcombine.low %v391_v40, %v399_v41  ;;  %v422_v40 = vld [vmem:[%s6068_s28 + $0x7a0] sm:$0xff] }
 0x185   : > { %v5262_v26 = vadd.f32 %v5261_v55, %v5260_v30  ;;  %v5263_v38 = vpop.f32.mrb[70].mxu1  ;;  %v5152_v3 = vpop.f32.mrb[71].mxu0  ;;  %v430_v41 = vld [vmem:[%s6068_s28 + $0x7e0] sm:$0xff] }
 0x186   : > { %v3110_v15 = vadd.f32 %v5150_v4, %v6406_v46  ;;  %v5153_v16 = vadd.f32 %v5152_v3, %v5151_v47  ;;  %v5264_v6 = vpop.f32.mrb[71].mxu1  ;;  %v4591_v47 = vcombine.high %v407_v18, %v415_v25 }
 0x187   : > { %v5265_v8 = vadd.f32 %v5264_v6, %v5263_v38  ;;  %3518 = vmatmul.mubr.bf16.gmra.mrb[176].mxu0 %v4556_v44  ;;  %v4589_v44 = vcombine.high %v406_v56, %v414_v45 }
 0x188   : > { %v6720_v19 = vadd.f32 %v5262_v26, %v3110_v15  ;;  %v3113_v21 = vadd.f32 %v5153_v16, %v6411_v50  ;;  %3679 = vmatmul.mubr.bf16.gmra.mrb[176].mxu1 %v4558_v57  ;;  %3525 = vmatprep.mubr.bf16.mxu0 %v4573_v48  ;;  %v423_v15 = vld [vmem:[%s6068_s28 + $0x7a8] sm:$0xff] }
 0x189   : > { %3686 = vmatprep.mubr.bf16.mxu1 %v4575_v5  ;;  %v431_v16 = vld [vmem:[%s6068_s28 + $0x7e8] sm:$0xff] }
 0x18a   : > { %v6725_v13 = vadd.f32 %v5265_v8, %v3113_v21  ;;  %v5154_v1 = vpop.f32.mrb[72].mxu0  ;;  %v4588_v8 = vcombine.low %v406_v56, %v414_v45 }
 0x18b   : > { %v5266_v29 = vpop.f32.mrb[72].mxu1  ;;  %v5155_v46 = vpop.f32.mrb[73].mxu0 }
 0x18c   : > { %v5156_v52 = vadd.f32 %v5155_v46, %v5154_v1  ;;  %v5267_v39 = vpop.f32.mrb[73].mxu1  ;;  %v5157_v30 = vpop.f32.mrb[74].mxu0  ;;  %v4590_v46 = vcombine.low %v407_v18, %v415_v25  ;;  %v184_v18 = vld [vmem:[%s6068_s28 + $0x30] sm:$0xff] }
 0x18d   : > { %v5268_v50 = vadd.f32 %v5267_v39, %v5266_v29  ;;  %v5269_v4 = vpop.f32.mrb[74].mxu1  ;;  %v5158_v55 = vpop.f32.mrb[75].mxu0  ;;  %v192_v25 = vld [vmem:[%s6068_s28 + $0x70] sm:$0xff] }
 0x18e   : > { %v3118_v57 = vadd.f32 %v5156_v52, %v6416_v7  ;;  %v5159_v48 = vadd.f32 %v5158_v55, %v5157_v30  ;;  %v5270_v26 = vpop.f32.mrb[75].mxu1  ;;  %v4607_v30 = vcombine.high %v423_v15, %v431_v16 }
 0x18f   : > { %v5271_v38 = vadd.f32 %v5270_v26, %v5269_v4  ;;  %3526 = vmatmul.mubr.bf16.gmra.mrb[180].mxu0 %v4572_v24  ;;  %v4605_v24 = vcombine.high %v422_v40, %v430_v41 }
 0x190   : > { %v6730_v60 = vadd.f32 %v5268_v50, %v3118_v57  ;;  %v3121_v12 = vadd.f32 %v5159_v48, %v6421_v11  ;;  %3687 = vmatmul.mubr.bf16.gmra.mrb[180].mxu1 %v4574_v22  ;;  %3533 = vmatprep.mubr.bf16.mxu0 %v4589_v44  ;;  %v185_v57 = vld [vmem:[%s6068_s28 + $0x38] sm:$0xff] }
 0x191   : > { %3694 = vmatprep.mubr.bf16.mxu1 %v4591_v47  ;;  %v193_v48 = vld [vmem:[%s6068_s28 + $0x78] sm:$0xff] }
 0x192   : > { %v6735_v3 = vadd.f32 %v5271_v38, %v3121_v12  ;;  %v5160_v5 = vpop.f32.mrb[76].mxu0  ;;  %v4604_v38 = vcombine.low %v422_v40, %v430_v41 }
 0x193   : > { %v5272_v6 = vpop.f32.mrb[76].mxu1  ;;  %v5161_v7 = vpop.f32.mrb[77].mxu0 }
 0x194   : > { %v5162_v21 = vadd.f32 %v5161_v7, %v5160_v5  ;;  %v5273_v1 = vpop.f32.mrb[77].mxu1  ;;  %v5163_v29 = vpop.f32.mrb[78].mxu0  ;;  %v4606_v7 = vcombine.low %v423_v15, %v431_v16  ;;  %v200_v15 = vld [vmem:[%s6068_s28 + $0xb0] sm:$0xff] }
 0x195   : > { %v5274_v11 = vadd.f32 %v5273_v1, %v5272_v6  ;;  %v5275_v52 = vpop.f32.mrb[78].mxu1  ;;  %v5164_v39 = vpop.f32.mrb[79].mxu0  ;;  %v208_v16 = vld [vmem:[%s6068_s28 + $0xf0] sm:$0xff] }
 0x196   : > { %v3126_v22 = vadd.f32 %v5162_v21, %v6426_v33  ;;  %v5165_v44 = vadd.f32 %v5164_v39, %v5163_v29  ;;  %v5276_v50 = vpop.f32.mrb[79].mxu1  ;;  %v4371_v29 = vcombine.high %v185_v57, %v193_v48 }
 0x197   : > { %v5277_v4 = vadd.f32 %v5276_v50, %v5275_v52  ;;  %3534 = vmatmul.mubr.bf16.gmra.mrb[184].mxu0 %v4588_v8  ;;  %v4369_v8 = vcombine.high %v184_v18, %v192_v25 }
 0x198   : > { %v6740_v56 = vadd.f32 %v5274_v11, %v3126_v22  ;;  %v3129_v45 = vadd.f32 %v5165_v44, %v6431_v37  ;;  %3695 = vmatmul.mubr.bf16.gmra.mrb[184].mxu1 %v4590_v46  ;;  %3541 = vmatprep.mubr.bf16.mxu0 %v4605_v24  ;;  %v201_v22 = vld [vmem:[%s6068_s28 + $0xb8] sm:$0xff] }
 0x199   : > { %3702 = vmatprep.mubr.bf16.mxu1 %v4607_v30  ;;  %v209_v44 = vld [vmem:[%s6068_s28 + $0xf8] sm:$0xff] }
 0x19a   : > { %v6745_v55 = vadd.f32 %v5277_v4, %v3129_v45  ;;  %v5166_v47 = vpop.f32.mrb[80].mxu0  ;;  %v4368_v4 = vcombine.low %v184_v18, %v192_v25 }
 0x19b   : > { %v5278_v26 = vpop.f32.mrb[80].mxu1  ;;  %v5167_v33 = vpop.f32.mrb[81].mxu0 }
 0x19c   : > { %v5168_v12 = vadd.f32 %v5167_v33, %v5166_v47  ;;  %v5279_v5 = vpop.f32.mrb[81].mxu1  ;;  %v5169_v6 = vpop.f32.mrb[82].mxu0  ;;  %v4370_v33 = vcombine.low %v185_v57, %v193_v48  ;;  %v216_v57 = vld [vmem:[%s6068_s28 + $0x130] sm:$0xff] }
 0x19d   : > { %v5280_v37 = vadd.f32 %v5279_v5, %v5278_v26  ;;  %v5281_v21 = vpop.f32.mrb[82].mxu1  ;;  %v5170_v1 = vpop.f32.mrb[83].mxu0  ;;  %v224_v48 = vld [vmem:[%s6068_s28 + $0x170] sm:$0xff] }
 0x19e   : > { %v3134_v46 = vadd.f32 %v5168_v12, %v6436_v59  ;;  %v5171_v24 = vadd.f32 %v5170_v1, %v5169_v6  ;;  %v5282_v11 = vpop.f32.mrb[83].mxu1  ;;  %v4387_v6 = vcombine.high %v201_v22, %v209_v44 }
 0x19f   : > { %v5283_v52 = vadd.f32 %v5282_v11, %v5281_v21  ;;  %3542 = vmatmul.mubr.bf16.gmra.mrb[188].mxu0 %v4604_v38  ;;  %v4385_v38 = vcombine.high %v200_v15, %v208_v16 }
 0x1a0   : > { %v6750_v40 = vadd.f32 %v5280_v37, %v3134_v46  ;;  %v3137_v41 = vadd.f32 %v5171_v24, %v6439_v61  ;;  %3703 = vmatmul.mubr.bf16.gmra.mrb[188].mxu1 %v4606_v7  ;;  %3743 = vmatprep.mubr.bf16.mxu0 %v4369_v8  ;;  %v217_v46 = vld [vmem:[%s6068_s28 + $0x138] sm:$0xff] }
 0x1a1   : > { %3904 = vmatprep.mubr.bf16.mxu1 %v4371_v29  ;;  %v225_v24 = vld [vmem:[%s6068_s28 + $0x178] sm:$0xff] }
 0x1a2   : > { %v6755_v39 = vadd.f32 %v5283_v52, %v3137_v41  ;;  %v5172_v30 = vpop.f32.mrb[84].mxu0  ;;  %v4384_v52 = vcombine.low %v200_v15, %v208_v16 }
 0x1a3   : > { %v5284_v50 = vpop.f32.mrb[84].mxu1  ;;  %v5173_v59 = vpop.f32.mrb[85].mxu0 }
 0x1a4   : > { %v5174_v45 = vadd.f32 %v5173_v59, %v5172_v30  ;;  %v5285_v47 = vpop.f32.mrb[85].mxu1  ;;  %v5175_v26 = vpop.f32.mrb[86].mxu0  ;;  %v4386_v59 = vcombine.low %v201_v22, %v209_v44  ;;  %v232_v22 = vld [vmem:[%s6068_s28 + $0x1b0] sm:$0xff] }
 0x1a5   : > { %v5286_v61 = vadd.f32 %v5285_v47, %v5284_v50  ;;  %v5287_v12 = vpop.f32.mrb[86].mxu1  ;;  %v5176_v5 = vpop.f32.mrb[87].mxu0  ;;  %v240_v44 = vld [vmem:[%s6068_s28 + $0x1f0] sm:$0xff] }
 0x1a6   : > { %v3142_v7 = vadd.f32 %v5174_v45, %v6470_v28  ;;  %v5177_v8 = vadd.f32 %v5176_v5, %v5175_v26  ;;  %v5288_v37 = vpop.f32.mrb[87].mxu1  ;;  %v4403_v26 = vcombine.high %v217_v46, %v225_v24 }
 0x1a7   : > { %v5289_v21 = vadd.f32 %v5288_v37, %v5287_v12  ;;  %3744 = vmatmul.mubr.bf16.vlgmr.msra.gmra.mrb[192].mxu0 %v4368_v4  ;;  %v4401_v4 = vcombine.high %v216_v57, %v224_v48 }
 0x1a8   : > { %v6760_v18 = vadd.f32 %v5286_v61, %v3142_v7  ;;  %v3145_v25 = vadd.f32 %v5177_v8, %v6488_v36  ;;  %3905 = vmatmul.mubr.bf16.vlgmr.msra.gmra.mrb[192].mxu1 %v4370_v33  ;;  %3751 = vmatprep.mubr.bf16.mxu0 %v4385_v38  ;;  %v233_v7 = vld [vmem:[%s6068_s28 + $0x1b8] sm:$0xff] }
 0x1a9   : > { %3912 = vmatprep.mubr.bf16.mxu1 %v4387_v6  ;;  %v241_v8 = vld [vmem:[%s6068_s28 + $0x1f8] sm:$0xff] }
 0x1aa   : > { %v6765_v1 = vadd.f32 %v5289_v21, %v3145_v25  ;;  %v5178_v29 = vpop.f32.mrb[88].mxu0  ;;  %v4400_v21 = vcombine.low %v216_v57, %v224_v48 }
 0x1ab   : > { %v5290_v11 = vpop.f32.mrb[88].mxu1  ;;  %v5179_v28 = vpop.f32.mrb[89].mxu0 }
 0x1ac   : > { %v5180_v41 = vadd.f32 %v5179_v28, %v5178_v29  ;;  %v5291_v30 = vpop.f32.mrb[89].mxu1  ;;  %v5181_v50 = vpop.f32.mrb[90].mxu0  ;;  %v4402_v28 = vcombine.low %v217_v46, %v225_v24  ;;  %v248_v46 = vld [vmem:[%s6068_s28 + $0x230] sm:$0xff] }
 0x1ad   : > { %v5292_v36 = vadd.f32 %v5291_v30, %v5290_v11  ;;  %v5293_v45 = vpop.f32.mrb[90].mxu1  ;;  %v5182_v47 = vpop.f32.mrb[91].mxu0  ;;  %v256_v24 = vld [vmem:[%s6068_s28 + $0x270] sm:$0xff] }
 0x1ae   : > { %v3150_v33 = vadd.f32 %v5180_v41, %v6520_v2  ;;  %v5183_v38 = vadd.f32 %v5182_v47, %v5181_v50  ;;  %v5294_v61 = vpop.f32.mrb[91].mxu1  ;;  %v4419_v50 = vcombine.high %v233_v7, %v241_v8 }
 0x1af   : > { %v5295_v12 = vadd.f32 %v5294_v61, %v5293_v45  ;;  %3752 = vmatmul.mubr.bf16.gmra.mrb[196].mxu0 %v4384_v52  ;;  %v4417_v52 = vcombine.high %v232_v22, %v240_v44 }
 0x1b0   : > { %v6770_v15 = vadd.f32 %v5292_v36, %v3150_v33  ;;  %v3153_v16 = vadd.f32 %v5183_v38, %v6535_v10  ;;  %3913 = vmatmul.mubr.bf16.gmra.mrb[196].mxu1 %v4386_v59  ;;  %3759 = vmatprep.mubr.bf16.mxu0 %v4401_v4  ;;  %v249_v33 = vld [vmem:[%s6068_s28 + $0x238] sm:$0xff] }
 0x1b1   : > { %3920 = vmatprep.mubr.bf16.mxu1 %v4403_v26  ;;  %v257_v38 = vld [vmem:[%s6068_s28 + $0x278] sm:$0xff] }
 0x1b2   : > { %v6775_v5 = vadd.f32 %v5295_v12, %v3153_v16  ;;  %v5184_v6 = vpop.f32.mrb[92].mxu0  ;;  %v4416_v12 = vcombine.low %v232_v22, %v240_v44 }
 0x1b3   : > { %v5296_v37 = vpop.f32.mrb[92].mxu1  ;;  %v5185_v2 = vpop.f32.mrb[93].mxu0 }
 0x1b4   : > { %v5186_v25 = vadd.f32 %v5185_v2, %v5184_v6  ;;  %v5297_v29 = vpop.f32.mrb[93].mxu1  ;;  %v5187_v11 = vpop.f32.mrb[94].mxu0  ;;  %v4418_v2 = vcombine.low %v233_v7, %v241_v8  ;;  %v264_v7 = vld [vmem:[%s6068_s28 + $0x2b0] sm:$0xff] }
 0x1b5   : > { %v5298_v10 = vadd.f32 %v5297_v29, %v5296_v37  ;;  %v5299_v41 = vpop.f32.mrb[94].mxu1  ;;  %v5188_v30 = vpop.f32.mrb[95].mxu0  ;;  %v272_v8 = vld [vmem:[%s6068_s28 + $0x2f0] sm:$0xff] }
 0x1b6   : > { %v3158_v59 = vadd.f32 %v5186_v25, %v6570_v43  ;;  %v5189_v4 = vadd.f32 %v5188_v30, %v5187_v11  ;;  %v5300_v36 = vpop.f32.mrb[95].mxu1  ;;  %v4435_v11 = vcombine.high %v249_v33, %v257_v38 }
 0x1b7   : > { %v5301_v45 = vadd.f32 %v5300_v36, %v5299_v41  ;;  %3760 = vmatmul.mubr.bf16.gmra.mrb[200].mxu0 %v4400_v21  ;;  %v4433_v21 = vcombine.high %v248_v46, %v256_v24 }
 0x1b8   : > { %v6780_v57 = vadd.f32 %v5298_v10, %v3158_v59  ;;  %v3161_v48 = vadd.f32 %v5189_v4, %v6585_v51  ;;  %3921 = vmatmul.mubr.bf16.gmra.mrb[200].mxu1 %v4402_v28  ;;  %3767 = vmatprep.mubr.bf16.mxu0 %v4417_v52  ;;  %v265_v59 = vld [vmem:[%s6068_s28 + $0x2b8] sm:$0xff] }
 0x1b9   : > { %3928 = vmatprep.mubr.bf16.mxu1 %v4419_v50  ;;  %v273_v4 = vld [vmem:[%s6068_s28 + $0x2f8] sm:$0xff] }
 0x1ba   : > { %v6785_v47 = vadd.f32 %v5301_v45, %v3161_v48  ;;  %v5190_v26 = vpop.f32.mrb[96].mxu0  ;;  %v4432_v45 = vcombine.low %v248_v46, %v256_v24 }
 0x1bb   : > { %v5302_v61 = vpop.f32.mrb[96].mxu1  ;;  %v5191_v43 = vpop.f32.mrb[97].mxu0 }
 0x1bc   : > { %v5192_v16 = vadd.f32 %v5191_v43, %v5190_v26  ;;  %v5303_v6 = vpop.f32.mrb[97].mxu1  ;;  %v5193_v37 = vpop.f32.mrb[98].mxu0  ;;  %v4434_v43 = vcombine.low %v249_v33, %v257_v38  ;;  %v280_v33 = vld [vmem:[%s6068_s28 + $0x330] sm:$0xff] }
 0x1bd   : > { %v5304_v51 = vadd.f32 %v5303_v6, %v5302_v61  ;;  %v5305_v25 = vpop.f32.mrb[98].mxu1  ;;  %v5194_v29 = vpop.f32.mrb[99].mxu0  ;;  %v288_v38 = vld [vmem:[%s6068_s28 + $0x370] sm:$0xff] }
 0x1be   : > { %v3166_v28 = vadd.f32 %v5192_v16, %v6620_v20  ;;  %v5195_v52 = vadd.f32 %v5194_v29, %v5193_v37  ;;  %v5306_v10 = vpop.f32.mrb[99].mxu1  ;;  %v4451_v37 = vcombine.high %v265_v59, %v273_v4 }
 0x1bf   : > { %v5307_v41 = vadd.f32 %v5306_v10, %v5305_v25  ;;  %3768 = vmatmul.mubr.bf16.gmra.mrb[204].mxu0 %v4416_v12  ;;  %v4449_v12 = vcombine.high %v264_v7, %v272_v8 }
 0x1c0   : > { %v6790_v22 = vadd.f32 %v5304_v51, %v3166_v28  ;;  %v3169_v44 = vadd.f32 %v5195_v52, %v6628_v27  ;;  %3929 = vmatmul.mubr.bf16.gmra.mrb[204].mxu1 %v4418_v2  ;;  %3775 = vmatprep.mubr.bf16.mxu0 %v4433_v21  ;;  %v281_v28 = vld [vmem:[%s6068_s28 + $0x338] sm:$0xff] }
 0x1c1   : > { %3936 = vmatprep.mubr.bf16.mxu1 %v4435_v11  ;;  %v289_v52 = vld [vmem:[%s6068_s28 + $0x378] sm:$0xff] }
 0x1c2   : > { %v6795_v30 = vadd.f32 %v5307_v41, %v3169_v44  ;;  %v5196_v50 = vpop.f32.mrb[100].mxu0  ;;  %v4448_v41 = vcombine.low %v264_v7, %v272_v8 }
 0x1c3   : > { %v5308_v36 = vpop.f32.mrb[100].mxu1  ;;  %v5197_v20 = vpop.f32.mrb[101].mxu0 }
 0x1c4   : > { %v5198_v48 = vadd.f32 %v5197_v20, %v5196_v50  ;;  %v5309_v26 = vpop.f32.mrb[101].mxu1  ;;  %v5199_v61 = vpop.f32.mrb[102].mxu0  ;;  %v4450_v20 = vcombine.low %v265_v59, %v273_v4  ;;  %v296_v59 = vld [vmem:[%s6068_s28 + $0x3b0] sm:$0xff] }
 0x1c5   : > { %v5310_v27 = vadd.f32 %v5309_v26, %v5308_v36  ;;  %v5311_v16 = vpop.f32.mrb[102].mxu1  ;;  %v5200_v6 = vpop.f32.mrb[103].mxu0  ;;  %v304_v4 = vld [vmem:[%s6068_s28 + $0x3f0] sm:$0xff] }
 0x1c6   : > { %v3174_v2 = vadd.f32 %v5198_v48, %v6640_v58  ;;  %v5201_v21 = vadd.f32 %v5200_v6, %v5199_v61  ;;  %v5312_v51 = vpop.f32.mrb[103].mxu1  ;;  %v4467_v61 = vcombine.high %v281_v28, %v289_v52 }
 0x1c7   : > { %v5313_v25 = vadd.f32 %v5312_v51, %v5311_v16  ;;  %3776 = vmatmul.mubr.bf16.gmra.mrb[208].mxu0 %v4432_v45  ;;  %v4465_v45 = vcombine.high %v280_v33, %v288_v38 }
 0x1c8   : > { %v6800_v46 = vadd.f32 %v5310_v27, %v3174_v2  ;;  %v3177_v24 = vadd.f32 %v5201_v21, %v6645_v62  ;;  %3937 = vmatmul.mubr.bf16.gmra.mrb[208].mxu1 %v4434_v43  ;;  %3783 = vmatprep.mubr.bf16.mxu0 %v4449_v12  ;;  %v297_v2 = vld [vmem:[%s6068_s28 + $0x3b8] sm:$0xff] }
 0x1c9   : > { %3944 = vmatprep.mubr.bf16.mxu1 %v4451_v37  ;;  %v305_v21 = vld [vmem:[%s6068_s28 + $0x3f8] sm:$0xff] }
 0x1ca   : > { %v6805_v29 = vadd.f32 %v5313_v25, %v3177_v24  ;;  %v5202_v11 = vpop.f32.mrb[104].mxu0  ;;  %v4464_v25 = vcombine.low %v280_v33, %v288_v38 }
 0x1cb   : > { %v5314_v10 = vpop.f32.mrb[104].mxu1  ;;  %v5203_v58 = vpop.f32.mrb[105].mxu0 }
 0x1cc   : > { %v5204_v44 = vadd.f32 %v5203_v58, %v5202_v11  ;;  %v5315_v50 = vpop.f32.mrb[105].mxu1  ;;  %v5205_v36 = vpop.f32.mrb[106].mxu0  ;;  %v4466_v58 = vcombine.low %v281_v28, %v289_v52  ;;  %v312_v28 = vld [vmem:[%s6068_s28 + $0x430] sm:$0xff] }
 0x1cd   : > { %v5316_v62 = vadd.f32 %v5315_v50, %v5314_v10  ;;  %v5317_v48 = vpop.f32.mrb[106].mxu1  ;;  %v5206_v26 = vpop.f32.mrb[107].mxu0  ;;  %v320_v52 = vld [vmem:[%s6068_s28 + $0x470] sm:$0xff] }
 0x1ce   : > { %v3182_v43 = vadd.f32 %v5204_v44, %v6650_v23  ;;  %v5207_v12 = vadd.f32 %v5206_v26, %v5205_v36  ;;  %v5318_v27 = vpop.f32.mrb[107].mxu1  ;;  %v4483_v36 = vcombine.high %v297_v2, %v305_v21 }
 0x1cf   : > { %v5319_v16 = vadd.f32 %v5318_v27, %v5317_v48  ;;  %3784 = vmatmul.mubr.bf16.gmra.mrb[212].mxu0 %v4448_v41  ;;  %v4481_v41 = vcombine.high %v296_v59, %v304_v4 }
 0x1d0   : > { %v6810_v7 = vadd.f32 %v5316_v62, %v3182_v43  ;;  %v3185_v8 = vadd.f32 %v5207_v12, %v6655_v32  ;;  %3945 = vmatmul.mubr.bf16.gmra.mrb[212].mxu1 %v4450_v20  ;;  %3791 = vmatprep.mubr.bf16.mxu0 %v4465_v45  ;;  %v313_v43 = vld [vmem:[%s6068_s28 + $0x438] sm:$0xff] }
 0x1d1   : > { %3952 = vmatprep.mubr.bf16.mxu1 %v4467_v61  ;;  %v321_v12 = vld [vmem:[%s6068_s28 + $0x478] sm:$0xff] }
 0x1d2   : > { %v6815_v6 = vadd.f32 %v5319_v16, %v3185_v8  ;;  %v5208_v37 = vpop.f32.mrb[108].mxu0  ;;  %v4480_v16 = vcombine.low %v296_v59, %v304_v4 }
 0x1d3   : > { %v5320_v51 = vpop.f32.mrb[108].mxu1  ;;  %v5209_v23 = vpop.f32.mrb[109].mxu0 }
 0x1d4   : > { %v5210_v24 = vadd.f32 %v5209_v23, %v5208_v37  ;;  %v5321_v11 = vpop.f32.mrb[109].mxu1  ;;  %v5211_v10 = vpop.f32.mrb[110].mxu0  ;;  %v4482_v23 = vcombine.low %v297_v2, %v305_v21  ;;  %v328_v2 = vld [vmem:[%s6068_s28 + $0x4b0] sm:$0xff] }
 0x1d5   : > { %v5322_v32 = vadd.f32 %v5321_v11, %v5320_v51  ;;  %v5323_v44 = vpop.f32.mrb[110].mxu1  ;;  %v5212_v50 = vpop.f32.mrb[111].mxu0  ;;  %v336_v21 = vld [vmem:[%s6068_s28 + $0x4f0] sm:$0xff] }
 0x1d6   : > { %v3190_v20 = vadd.f32 %v5210_v24, %v6660_v53  ;;  %v5213_v45 = vadd.f32 %v5212_v50, %v5211_v10  ;;  %v5324_v62 = vpop.f32.mrb[111].mxu1  ;;  %v4499_v10 = vcombine.high %v313_v43, %v321_v12 }
 0x1d7   : > { %v5325_v48 = vadd.f32 %v5324_v62, %v5323_v44  ;;  %3792 = vmatmul.mubr.bf16.gmra.mrb[216].mxu0 %v4464_v25  ;;  %v4497_v25 = vcombine.high %v312_v28, %v320_v52 }
 0x1d8   : > { %v6820_v33 = vadd.f32 %v5322_v32, %v3190_v20  ;;  %v3193_v38 = vadd.f32 %v5213_v45, %v6665_v9  ;;  %3953 = vmatmul.mubr.bf16.gmra.mrb[216].mxu1 %v4466_v58  ;;  %3799 = vmatprep.mubr.bf16.mxu0 %v4481_v41  ;;  %v329_v20 = vld [vmem:[%s6068_s28 + $0x4b8] sm:$0xff] }
 0x1d9   : > { %3960 = vmatprep.mubr.bf16.mxu1 %v4483_v36  ;;  %v337_v45 = vld [vmem:[%s6068_s28 + $0x4f8] sm:$0xff] }
 0x1da   : > { %v6825_v26 = vadd.f32 %v5325_v48, %v3193_v38  ;;  %v5214_v61 = vpop.f32.mrb[112].mxu0  ;;  %v4496_v48 = vcombine.low %v312_v28, %v320_v52 }
 0x1db   : > { %v5326_v27 = vpop.f32.mrb[112].mxu1  ;;  %v5215_v53 = vpop.f32.mrb[113].mxu0 }
 0x1dc   : > { %v5216_v8 = vadd.f32 %v5215_v53, %v5214_v61  ;;  %v5327_v37 = vpop.f32.mrb[113].mxu1  ;;  %v5217_v51 = vpop.f32.mrb[114].mxu0  ;;  %v4498_v53 = vcombine.low %v313_v43, %v321_v12  ;;  %v344_v43 = vld [vmem:[%s6068_s28 + $0x530] sm:$0xff] }
 0x1dd   : > { %v5328_v9 = vadd.f32 %v5327_v37, %v5326_v27  ;;  %v5329_v24 = vpop.f32.mrb[114].mxu1  ;;  %v5218_v11 = vpop.f32.mrb[115].mxu0  ;;  %v352_v12 = vld [vmem:[%s6068_s28 + $0x570] sm:$0xff] }
 0x1de   : > { %v3198_v58 = vadd.f32 %v5216_v8, %v6670_v31  ;;  %v5219_v41 = vadd.f32 %v5218_v11, %v5217_v51  ;;  %v5330_v32 = vpop.f32.mrb[115].mxu1  ;;  %v4515_v51 = vcombine.high %v329_v20, %v337_v45 }
 0x1df   : > { %v5331_v44 = vadd.f32 %v5330_v32, %v5329_v24  ;;  %3800 = vmatmul.mubr.bf16.gmra.mrb[220].mxu0 %v4480_v16  ;;  %v4513_v16 = vcombine.high %v328_v2, %v336_v21 }
 0x1e0   : > { %v6830_v59 = vadd.f32 %v5328_v9, %v3198_v58  ;;  %v3201_v4 = vadd.f32 %v5219_v41, %v6675_v42  ;;  %3961 = vmatmul.mubr.bf16.gmra.mrb[220].mxu1 %v4482_v23  ;;  %3807 = vmatprep.mubr.bf16.mxu0 %v4497_v25  ;;  %v345_v58 = vld [vmem:[%s6068_s28 + $0x538] sm:$0xff] }
 0x1e1   : > { %3968 = vmatprep.mubr.bf16.mxu1 %v4499_v10  ;;  %v353_v41 = vld [vmem:[%s6068_s28 + $0x578] sm:$0xff] }
 0x1e2   : > { %v6835_v50 = vadd.f32 %v5331_v44, %v3201_v4  ;;  %v5220_v36 = vpop.f32.mrb[116].mxu0  ;;  %v4512_v44 = vcombine.low %v328_v2, %v336_v21 }
 0x1e3   : > { %v5332_v62 = vpop.f32.mrb[116].mxu1  ;;  %v5221_v31 = vpop.f32.mrb[117].mxu0 }
 0x1e4   : > { %v5222_v38 = vadd.f32 %v5221_v31, %v5220_v36  ;;  %v5333_v61 = vpop.f32.mrb[117].mxu1  ;;  %v5223_v27 = vpop.f32.mrb[118].mxu0  ;;  %v4514_v31 = vcombine.low %v329_v20, %v337_v45  ;;  %v360_v20 = vld [vmem:[%s6068_s28 + $0x5b0] sm:$0xff] }
 0x1e5   : > { %v5334_v42 = vadd.f32 %v5333_v61, %v5332_v62  ;;  %v5335_v8 = vpop.f32.mrb[118].mxu1  ;;  %v5224_v37 = vpop.f32.mrb[119].mxu0  ;;  %v368_v45 = vld [vmem:[%s6068_s28 + $0x5f0] sm:$0xff] }
 0x1e6   : > { %v3206_v23 = vadd.f32 %v5222_v38, %v6680_v0  ;;  %v5225_v25 = vadd.f32 %v5224_v37, %v5223_v27  ;;  %v5336_v9 = vpop.f32.mrb[119].mxu1  ;;  %v4531_v27 = vcombine.high %v345_v58, %v353_v41 }
 0x1e7   : > { %v5337_v24 = vadd.f32 %v5336_v9, %v5335_v8  ;;  %3808 = vmatmul.mubr.bf16.gmra.mrb[224].mxu0 %v4496_v48  ;;  %v4529_v48 = vcombine.high %v344_v43, %v352_v12 }
 0x1e8   : > { %v6840_v28 = vadd.f32 %v5334_v42, %v3206_v23  ;;  %v3209_v52 = vadd.f32 %v5225_v25, %v6685_v17  ;;  %3969 = vmatmul.mubr.bf16.gmra.mrb[224].mxu1 %v4498_v53  ;;  %3815 = vmatprep.mubr.bf16.mxu0 %v4513_v16  ;;  %v361_v23 = vld [vmem:[%s6068_s28 + $0x5b8] sm:$0xff] }
 0x1e9   : > { %3976 = vmatprep.mubr.bf16.mxu1 %v4515_v51  ;;  %v369_v25 = vld [vmem:[%s6068_s28 + $0x5f8] sm:$0xff] }
 0x1ea   : > { %v6845_v11 = vadd.f32 %v5337_v24, %v3209_v52  ;;  %v5226_v10 = vpop.f32.mrb[120].mxu0  ;;  %v4528_v24 = vcombine.low %v344_v43, %v352_v12 }
 0x1eb   : > { %v5338_v32 = vpop.f32.mrb[120].mxu1  ;;  %v5227_v0 = vpop.f32.mrb[121].mxu0 }
 0x1ec   : > { %v5228_v4 = vadd.f32 %v5227_v0, %v5226_v10  ;;  %v5339_v36 = vpop.f32.mrb[121].mxu1  ;;  %v5229_v62 = vpop.f32.mrb[122].mxu0  ;;  %v4530_v0 = vcombine.low %v345_v58, %v353_v41  ;;  %v376_v58 = vld [vmem:[%s6068_s28 + $0x630] sm:$0xff] }
 0x1ed   : > { %v5340_v17 = vadd.f32 %v5339_v36, %v5338_v32  ;;  %v5341_v38 = vpop.f32.mrb[122].mxu1  ;;  %v5230_v61 = vpop.f32.mrb[123].mxu0  ;;  %v384_v41 = vld [vmem:[%s6068_s28 + $0x670] sm:$0xff] }
 0x1ee   : > { %v3214_v53 = vadd.f32 %v5228_v4, %v6690_v35  ;;  %v5231_v16 = vadd.f32 %v5230_v61, %v5229_v62  ;;  %v5342_v42 = vpop.f32.mrb[123].mxu1  ;;  %v4547_v62 = vcombine.high %v361_v23, %v369_v25 }
 0x1ef   : > { %v5343_v8 = vadd.f32 %v5342_v42, %v5341_v38  ;;  %3816 = vmatmul.mubr.bf16.gmra.mrb[228].mxu0 %v4512_v44  ;;  %v4545_v44 = vcombine.high %v360_v20, %v368_v45 }
 0x1f0   : > { %v6850_v2 = vadd.f32 %v5340_v17, %v3214_v53  ;;  %v3217_v21 = vadd.f32 %v5231_v16, %v6695_v63  ;;  %3977 = vmatmul.mubr.bf16.gmra.mrb[228].mxu1 %v4514_v31  ;;  %3823 = vmatprep.mubr.bf16.mxu0 %v4529_v48  ;;  %v377_v53 = vld [vmem:[%s6068_s28 + $0x638] sm:$0xff] }
 0x1f1   : > { %3984 = vmatprep.mubr.bf16.mxu1 %v4531_v27  ;;  %v385_v16 = vld [vmem:[%s6068_s28 + $0x678] sm:$0xff] }
 0x1f2   : > { %v6855_v37 = vadd.f32 %v5343_v8, %v3217_v21  ;;  %v5232_v51 = vpop.f32.mrb[124].mxu0  ;;  %v4544_v8 = vcombine.low %v360_v20, %v368_v45 }
 0x1f3   : > { %v5344_v9 = vpop.f32.mrb[124].mxu1  ;;  %v5233_v35 = vpop.f32.mrb[125].mxu0 }
 0x1f4   : > { %v5234_v52 = vadd.f32 %v5233_v35, %v5232_v51  ;;  %v5345_v10 = vpop.f32.mrb[125].mxu1  ;;  %v5235_v32 = vpop.f32.mrb[126].mxu0  ;;  %v4546_v35 = vcombine.low %v361_v23, %v369_v25  ;;  %v392_v23 = vld [vmem:[%s6068_s28 + $0x6b0] sm:$0xff] }
 0x1f5   : > { %v5346_v63 = vadd.f32 %v5345_v10, %v5344_v9  ;;  %v5347_v4 = vpop.f32.mrb[126].mxu1  ;;  %v5236_v36 = vpop.f32.mrb[127].mxu0  ;;  %v400_v25 = vld [vmem:[%s6068_s28 + $0x6f0] sm:$0xff] }
 0x1f6   : > { %v3222_v31 = vadd.f32 %v5234_v52, %v6700_v14  ;;  %v5237_v48 = vadd.f32 %v5236_v36, %v5235_v32  ;;  %v5348_v17 = vpop.f32.mrb[127].mxu1  ;;  %v4563_v32 = vcombine.high %v377_v53, %v385_v16 }
 0x1f7   : > { %v5349_v38 = vadd.f32 %v5348_v17, %v5347_v4  ;;  %3824 = vmatmul.mubr.bf16.gmra.mrb[232].mxu0 %v4528_v24  ;;  %v4561_v24 = vcombine.high %v376_v58, %v384_v41 }
 0x1f8   : > { %v6860_v43 = vadd.f32 %v5346_v63, %v3222_v31  ;;  %v3225_v12 = vadd.f32 %v5237_v48, %v6705_v54  ;;  %3985 = vmatmul.mubr.bf16.gmra.mrb[232].mxu1 %v4530_v0  ;;  %3831 = vmatprep.mubr.bf16.mxu0 %v4545_v44  ;;  %v393_v31 = vld [vmem:[%s6068_s28 + $0x6b8] sm:$0xff] }
 0x1f9   : > { %3992 = vmatprep.mubr.bf16.mxu1 %v4547_v62  ;;  %v401_v48 = vld [vmem:[%s6068_s28 + $0x6f8] sm:$0xff] }
 0x1fa   : > { %v6865_v61 = vadd.f32 %v5349_v38, %v3225_v12  ;;  %v5366_v27 = vpop.f32.mrb[128].mxu0  ;;  %v4560_v38 = vcombine.low %v376_v58, %v384_v41 }
 0x1fb   : > { %v5478_v42 = vpop.f32.mrb[128].mxu1  ;;  %v5367_v14 = vpop.f32.mrb[129].mxu0 }
 0x1fc   : > { %v5368_v21 = vadd.f32 %v5367_v14, %v5366_v27  ;;  %v5479_v51 = vpop.f32.mrb[129].mxu1  ;;  %v5369_v9 = vpop.f32.mrb[130].mxu0  ;;  %v4562_v14 = vcombine.low %v377_v53, %v385_v16  ;;  %v408_v53 = vld [vmem:[%s6068_s28 + $0x730] sm:$0xff] }
 0x1fd   : > { %v5480_v54 = vadd.f32 %v5479_v51, %v5478_v42  ;;  %v5481_v52 = vpop.f32.mrb[130].mxu1  ;;  %v5370_v10 = vpop.f32.mrb[131].mxu0  ;;  %v416_v16 = vld [vmem:[%s6068_s28 + $0x770] sm:$0xff] }
 0x1fe   : > { %v3424_v0 = vadd.f32 %v5368_v21, %v6710_v49  ;;  %v5371_v44 = vadd.f32 %v5370_v10, %v5369_v9  ;;  %v5482_v63 = vpop.f32.mrb[131].mxu1  ;;  %v4579_v9 = vcombine.high %v393_v31, %v401_v48 }
 0x1ff   : > { %v5483_v4 = vadd.f32 %v5482_v63, %v5481_v52  ;;  %3832 = vmatmul.mubr.bf16.gmra.mrb[236].mxu0 %v4544_v8  ;;  %v4577_v8 = vcombine.high %v392_v23, %v400_v25 }
 0x200   : > { %v6870_v20 = vadd.f32 %v5480_v54, %v3424_v0  ;;  %v3427_v45 = vadd.f32 %v5371_v44, %v6715_v34  ;;  %3993 = vmatmul.mubr.bf16.gmra.mrb[236].mxu1 %v4546_v35  ;;  %3839 = vmatprep.mubr.bf16.mxu0 %v4561_v24  ;;  %v409_v0 = vld [vmem:[%s6068_s28 + $0x738] sm:$0xff] }
 0x201   : > { %4000 = vmatprep.mubr.bf16.mxu1 %v4563_v32  ;;  %v417_v44 = vld [vmem:[%s6068_s28 + $0x778] sm:$0xff] }
 0x202   : > { %v6875_v36 = vadd.f32 %v5483_v4, %v3427_v45  ;;  %v5372_v62 = vpop.f32.mrb[132].mxu0  ;;  %v4576_v4 = vcombine.low %v392_v23, %v400_v25 }
 0x203   : > { %v5484_v17 = vpop.f32.mrb[132].mxu1  ;;  %v5373_v49 = vpop.f32.mrb[133].mxu0 }
 0x204   : > { %v5374_v12 = vadd.f32 %v5373_v49, %v5372_v62  ;;  %v5485_v27 = vpop.f32.mrb[133].mxu1  ;;  %v5375_v42 = vpop.f32.mrb[134].mxu0  ;;  %v4578_v49 = vcombine.low %v393_v31, %v401_v48  ;;  %v424_v31 = vld [vmem:[%s6068_s28 + $0x7b0] sm:$0xff] }
 0x205   : > { %v5486_v34 = vadd.f32 %v5485_v27, %v5484_v17  ;;  %v5487_v21 = vpop.f32.mrb[134].mxu1  ;;  %v5376_v51 = vpop.f32.mrb[135].mxu0  ;;  %v432_v48 = vld [vmem:[%s6068_s28 + $0x7f0] sm:$0xff] }
 0x206   : > { %v3432_v35 = vadd.f32 %v5374_v12, %v6720_v19  ;;  %v5377_v24 = vadd.f32 %v5376_v51, %v5375_v42  ;;  %v5488_v54 = vpop.f32.mrb[135].mxu1  ;;  %v4595_v42 = vcombine.high %v409_v0, %v417_v44 }
 0x207   : > { %v5489_v52 = vadd.f32 %v5488_v54, %v5487_v21  ;;  %3840 = vmatmul.mubr.bf16.gmra.mrb[240].mxu0 %v4560_v38  ;;  %v4593_v38 = vcombine.high %v408_v53, %v416_v16 }
 0x208   : > { %v6880_v58 = vadd.f32 %v5486_v34, %v3432_v35  ;;  %v3435_v41 = vadd.f32 %v5377_v24, %v6725_v13  ;;  %4001 = vmatmul.mubr.bf16.gmra.mrb[240].mxu1 %v4562_v14  ;;  %3847 = vmatprep.mubr.bf16.mxu0 %v4577_v8  ;;  %v425_v35 = vld [vmem:[%s6068_s28 + $0x7b8] sm:$0xff] }
 0x209   : > { %4008 = vmatprep.mubr.bf16.mxu1 %v4579_v9  ;;  %v433_v24 = vld [vmem:[%s6068_s28 + $0x7f8] sm:$0xff]  ;;  %s4354_s28 = sshll.u32 %s7039_s21, 2 }
 0x20a   : > { %v6885_v10 = vadd.f32 %v5489_v52, %v3435_v41  ;;  %v5378_v32 = vpop.f32.mrb[136].mxu0  ;;  %v4592_v52 = vcombine.low %v408_v53, %v416_v16  ;;  %s6983_s9 = scalar_lea.vmem %s7037_s3, %s4354_s28 }
 0x20b   : > { %v5490_v63 = vpop.f32.mrb[136].mxu1  ;;  %v5379_v19 = vpop.f32.mrb[137].mxu0 }
 0x20c   : > { %v5380_v45 = vadd.f32 %v5379_v19, %v5378_v32  ;;  %v5491_v62 = vpop.f32.mrb[137].mxu1  ;;  %v5381_v17 = vpop.f32.mrb[138].mxu0  ;;  %v4594_v19 = vcombine.low %v409_v0, %v417_v44 }
 0x20d   : > { %v5492_v13 = vadd.f32 %v5491_v62, %v5490_v63  ;;  %v5493_v12 = vpop.f32.mrb[138].mxu1  ;;  %v5382_v27 = vpop.f32.mrb[139].mxu0 }
 0x20e   : > { %v3440_v14 = vadd.f32 %v5380_v45, %v6730_v60  ;;  %v5383_v8 = vadd.f32 %v5382_v27, %v5381_v17  ;;  %v5494_v34 = vpop.f32.mrb[139].mxu1  ;;  %v4611_v17 = vcombine.high %v425_v35, %v433_v24 }
 0x20f   : > { %v5495_v21 = vadd.f32 %v5494_v34, %v5493_v12  ;;  %3848 = vmatmul.mubr.bf16.gmra.mrb[244].mxu0 %v4576_v4  ;;  %v4609_v4 = vcombine.high %v424_v31, %v432_v48 }
 0x210   : > { %v6890_v23 = vadd.f32 %v5492_v13, %v3440_v14  ;;  %v3443_v25 = vadd.f32 %v5383_v8, %v6735_v3  ;;  %4009 = vmatmul.mubr.bf16.gmra.mrb[244].mxu1 %v4578_v49  ;;  %3855 = vmatprep.mubr.bf16.mxu0 %v4593_v38  ;;  %v4608_v14 = vcombine.low %v424_v31, %v432_v48 }
 0x211   : > { %4016 = vmatprep.mubr.bf16.mxu1 %v4595_v42 }
 0x212   : > { %v6895_v51 = vadd.f32 %v5495_v21, %v3443_v25  ;;  %v5384_v9 = vpop.f32.mrb[140].mxu0  ;;  %v4610_v21 = vcombine.low %v425_v35, %v433_v24 }
 0x213   : > { %v5496_v54 = vpop.f32.mrb[140].mxu1  ;;  %v5385_v60 = vpop.f32.mrb[141].mxu0 }
 0x214   : > { %v5386_v41 = vadd.f32 %v5385_v60, %v5384_v9  ;;  %v5497_v32 = vpop.f32.mrb[141].mxu1  ;;  %v5387_v63 = vpop.f32.mrb[142].mxu0 }
 0x215   : > { %v5498_v45 = vadd.f32 %v5497_v32, %v5496_v54  ;;  %v5499_v3 = vpop.f32.mrb[142].mxu1  ;;  %v5388_v62 = vpop.f32.mrb[143].mxu0 }
 0x216   : > { %v3448_v49 = vadd.f32 %v5386_v41, %v6740_v56  ;;  %v5389_v38 = vadd.f32 %v5388_v62, %v5387_v63  ;;  %v5500_v13 = vpop.f32.mrb[143].mxu1 }
 0x217   : > { %v5501_v12 = vadd.f32 %v5500_v13, %v5499_v3  ;;  %3856 = vmatmul.mubr.bf16.gmra.mrb[248].mxu0 %v4592_v52 }
 0x218   : > { %v6900_v27 = vadd.f32 %v5498_v45, %v3448_v49  ;;  %v3451_v42 = vadd.f32 %v5389_v38, %v6745_v55  ;;  %4017 = vmatmul.mubr.bf16.gmra.mrb[248].mxu1 %v4594_v19  ;;  %3863 = vmatprep.mubr.bf16.mxu0 %v4609_v4 }
 0x219   : > { %4024 = vmatprep.mubr.bf16.mxu1 %v4611_v17 }
 0x21a   : > { %v6903_v53 = vadd.f32 %v5501_v12, %v3451_v42  ;;  %v5390_v16 = vpop.f32.mrb[144].mxu0 }
 0x21b   : > { %v5502_v0 = vpop.f32.mrb[144].mxu1  ;;  %v5391_v44 = vpop.f32.mrb[145].mxu0 }
 0x21c   : > { %v5392_v8 = vadd.f32 %v5391_v44, %v5390_v16  ;;  %v5503_v34 = vpop.f32.mrb[145].mxu1  ;;  %v5393_v56 = vpop.f32.mrb[146].mxu0 }
 0x21d   : > { %v5504_v25 = vadd.f32 %v5503_v34, %v5502_v0  ;;  %v5505_v9 = vpop.f32.mrb[146].mxu1  ;;  %v5394_v54 = vpop.f32.mrb[147].mxu0 }
 0x21e   : > { %v3456_v60 = vadd.f32 %v5392_v8, %v6750_v40  ;;  %v5395_v52 = vadd.f32 %v5394_v54, %v5393_v56  ;;  %v5506_v55 = vpop.f32.mrb[147].mxu1 }
 0x21f   : > { %v5507_v41 = vadd.f32 %v5506_v55, %v5505_v9  ;;  %3864 = vmatmul.mubr.bf16.gmra.mrb[252].mxu0 %v4608_v14 }
 0x220   : > { %v6906_v32 = vadd.f32 %v5504_v25, %v3456_v60  ;;  %v3459_v63 = vadd.f32 %v5395_v52, %v6755_v39  ;;  %4025 = vmatmul.mubr.bf16.gmra.mrb[252].mxu1 %v4610_v21 }
 0x222   : > { %v6909_v19 = vadd.f32 %v5507_v41, %v3459_v63  ;;  %v5396_v31 = vpop.f32.mrb[148].mxu0 }
 0x223   : > { %v5508_v48 = vpop.f32.mrb[148].mxu1  ;;  %v5397_v4 = vpop.f32.mrb[149].mxu0 }
 0x224   : > { %v5398_v35 = vadd.f32 %v5397_v4, %v5396_v31  ;;  %v5509_v24 = vpop.f32.mrb[149].mxu1  ;;  %v5399_v45 = vpop.f32.mrb[150].mxu0 }
 0x225   : > { %v5510_v3 = vadd.f32 %v5509_v24, %v5508_v48  ;;  %v5511_v62 = vpop.f32.mrb[150].mxu1  ;;  %v5400_v40 = vpop.f32.mrb[151].mxu0 }
 0x226   : > { %v3464_v17 = vadd.f32 %v5398_v35, %v6760_v18  ;;  %v5401_v49 = vadd.f32 %v5400_v40, %v5399_v45  ;;  %v5512_v38 = vpop.f32.mrb[151].mxu1 }
 0x227   : > { %v5513_v13 = vadd.f32 %v5512_v38, %v5511_v62 }
 0x228   : > { %v6912_v12 = vadd.f32 %v5510_v3, %v3464_v17  ;;  %v3467_v39 = vadd.f32 %v5401_v49, %v6765_v1 }
 0x22a   : > { %v6915_v42 = vadd.f32 %v5513_v13, %v3467_v39  ;;  %v5402_v16 = vpop.f32.mrb[152].mxu0 }
 0x22b   : > { %v5514_v0 = vpop.f32.mrb[152].mxu1  ;;  %v5403_v44 = vpop.f32.mrb[153].mxu0 }
 0x22c   : > { %v5404_v14 = vadd.f32 %v5403_v44, %v5402_v16  ;;  %v5515_v8 = vpop.f32.mrb[153].mxu1  ;;  %v5405_v34 = vpop.f32.mrb[154].mxu0 }
 0x22d   : > { %v5516_v56 = vadd.f32 %v5515_v8, %v5514_v0  ;;  %v5517_v21 = vpop.f32.mrb[154].mxu1  ;;  %v5406_v25 = vpop.f32.mrb[155].mxu0 }
 0x22e   : > { %v3472_v18 = vadd.f32 %v5404_v14, %v6770_v15  ;;  %v5407_v9 = vadd.f32 %v5406_v25, %v5405_v34  ;;  %v5518_v54 = vpop.f32.mrb[155].mxu1 }
 0x22f   : > { %v5519_v60 = vadd.f32 %v5518_v54, %v5517_v21 }
 0x230   : > { %v6918_v52 = vadd.f32 %v5516_v56, %v3472_v18  ;;  %v3475_v1 = vadd.f32 %v5407_v9, %v6775_v5 }
 0x232   : > { %v6921_v55 = vadd.f32 %v5519_v60, %v3475_v1  ;;  %v5408_v41 = vpop.f32.mrb[156].mxu0 }
 0x233   : > { %v5520_v63 = vpop.f32.mrb[156].mxu1  ;;  %v5409_v31 = vpop.f32.mrb[157].mxu0 }
 0x234   : > { %v5410_v48 = vadd.f32 %v5409_v31, %v5408_v41  ;;  %v5521_v4 = vpop.f32.mrb[157].mxu1  ;;  %v5411_v35 = vpop.f32.mrb[158].mxu0 }
 0x235   : > { %v5522_v24 = vadd.f32 %v5521_v4, %v5520_v63  ;;  %v5523_v45 = vpop.f32.mrb[158].mxu1  ;;  %v5412_v3 = vpop.f32.mrb[159].mxu0 }
 0x236   : > { %v3480_v15 = vadd.f32 %v5410_v48, %v6780_v57  ;;  %v5413_v62 = vadd.f32 %v5412_v3, %v5411_v35  ;;  %v5524_v40 = vpop.f32.mrb[159].mxu1 }
 0x237   : > { %v5525_v17 = vadd.f32 %v5524_v40, %v5523_v45 }
 0x238   : > { %v6924_v49 = vadd.f32 %v5522_v24, %v3480_v15  ;;  %v3483_v5 = vadd.f32 %v5413_v62, %v6785_v47 }
 0x23a   : > { %v6927_v38 = vadd.f32 %v5525_v17, %v3483_v5  ;;  %v5414_v13 = vpop.f32.mrb[160].mxu0 }
 0x23b   : > { %v5526_v39 = vpop.f32.mrb[160].mxu1  ;;  %v5415_v16 = vpop.f32.mrb[161].mxu0 }
 0x23c   : > { %v5416_v0 = vadd.f32 %v5415_v16, %v5414_v13  ;;  %v5527_v44 = vpop.f32.mrb[161].mxu1  ;;  %v5417_v14 = vpop.f32.mrb[162].mxu0 }
 0x23d   : > { %v5528_v8 = vadd.f32 %v5527_v44, %v5526_v39  ;;  %v5529_v34 = vpop.f32.mrb[162].mxu1  ;;  %v5418_v56 = vpop.f32.mrb[163].mxu0 }
 0x23e   : > { %v3488_v57 = vadd.f32 %v5416_v0, %v6790_v22  ;;  %v5419_v21 = vadd.f32 %v5418_v56, %v5417_v14  ;;  %v5530_v25 = vpop.f32.mrb[163].mxu1 }
 0x23f   : > { %v5531_v18 = vadd.f32 %v5530_v25, %v5529_v34 }
 0x240   : > { %v6930_v9 = vadd.f32 %v5528_v8, %v3488_v57  ;;  %v3491_v47 = vadd.f32 %v5419_v21, %v6795_v30 }
 0x242   : > { %v6933_v54 = vadd.f32 %v5531_v18, %v3491_v47  ;;  %v5420_v60 = vpop.f32.mrb[164].mxu0 }
 0x243   : > { %v5532_v1 = vpop.f32.mrb[164].mxu1  ;;  %v5421_v41 = vpop.f32.mrb[165].mxu0 }
 0x244   : > { %v5422_v63 = vadd.f32 %v5421_v41, %v5420_v60  ;;  %v5533_v31 = vpop.f32.mrb[165].mxu1  ;;  %v5423_v48 = vpop.f32.mrb[166].mxu0 }
 0x245   : > { %v5534_v4 = vadd.f32 %v5533_v31, %v5532_v1  ;;  %v5535_v35 = vpop.f32.mrb[166].mxu1  ;;  %v5424_v24 = vpop.f32.mrb[167].mxu0 }
 0x246   : > { %v3496_v22 = vadd.f32 %v5422_v63, %v6800_v46  ;;  %v5425_v45 = vadd.f32 %v5424_v24, %v5423_v48  ;;  %v5536_v3 = vpop.f32.mrb[167].mxu1 }
 0x247   : > { %v5537_v15 = vadd.f32 %v5536_v3, %v5535_v35 }
 0x248   : > { %v6936_v62 = vadd.f32 %v5534_v4, %v3496_v22  ;;  %v3499_v30 = vadd.f32 %v5425_v45, %v6805_v29 }
 0x24a   : > { %v6939_v40 = vadd.f32 %v5537_v15, %v3499_v30  ;;  %v5426_v17 = vpop.f32.mrb[168].mxu0 }
 0x24b   : > { %v5538_v5 = vpop.f32.mrb[168].mxu1  ;;  %v5427_v13 = vpop.f32.mrb[169].mxu0 }
 0x24c   : > { %v5428_v39 = vadd.f32 %v5427_v13, %v5426_v17  ;;  %v5539_v16 = vpop.f32.mrb[169].mxu1  ;;  %v5429_v0 = vpop.f32.mrb[170].mxu0 }
 0x24d   : > { %v5540_v44 = vadd.f32 %v5539_v16, %v5538_v5  ;;  %v5541_v14 = vpop.f32.mrb[170].mxu1  ;;  %v5430_v8 = vpop.f32.mrb[171].mxu0 }
 0x24e   : > { %v3504_v46 = vadd.f32 %v5428_v39, %v6810_v7  ;;  %v5431_v34 = vadd.f32 %v5430_v8, %v5429_v0  ;;  %v5542_v56 = vpop.f32.mrb[171].mxu1 }
 0x24f   : > { %v5543_v57 = vadd.f32 %v5542_v56, %v5541_v14 }
 0x250   : > { %v6942_v21 = vadd.f32 %v5540_v44, %v3504_v46  ;;  %v3507_v29 = vadd.f32 %v5431_v34, %v6815_v6 }
 0x252   : > { %v6945_v25 = vadd.f32 %v5543_v57, %v3507_v29  ;;  %v5432_v18 = vpop.f32.mrb[172].mxu0 }
 0x253   : > { %v5544_v47 = vpop.f32.mrb[172].mxu1  ;;  %v5433_v60 = vpop.f32.mrb[173].mxu0 }
 0x254   : > { %v5434_v1 = vadd.f32 %v5433_v60, %v5432_v18  ;;  %v5545_v41 = vpop.f32.mrb[173].mxu1  ;;  %v5435_v63 = vpop.f32.mrb[174].mxu0 }
 0x255   : > { %v5546_v31 = vadd.f32 %v5545_v41, %v5544_v47  ;;  %v5547_v48 = vpop.f32.mrb[174].mxu1  ;;  %v5436_v4 = vpop.f32.mrb[175].mxu0 }
 0x256   : > { %v3512_v7 = vadd.f32 %v5434_v1, %v6820_v33  ;;  %v5437_v35 = vadd.f32 %v5436_v4, %v5435_v63  ;;  %v5548_v24 = vpop.f32.mrb[175].mxu1 }
 0x257   : > { %v5549_v22 = vadd.f32 %v5548_v24, %v5547_v48 }
 0x258   : > { %v6948_v45 = vadd.f32 %v5546_v31, %v3512_v7  ;;  %v3515_v6 = vadd.f32 %v5437_v35, %v6825_v26 }
 0x25a   : > { %v6951_v3 = vadd.f32 %v5549_v22, %v3515_v6  ;;  %v5438_v15 = vpop.f32.mrb[176].mxu0 }
 0x25b   : > { %v5550_v30 = vpop.f32.mrb[176].mxu1  ;;  %v5439_v17 = vpop.f32.mrb[177].mxu0 }
 0x25c   : > { %v5440_v5 = vadd.f32 %v5439_v17, %v5438_v15  ;;  %v5551_v13 = vpop.f32.mrb[177].mxu1  ;;  %v5441_v39 = vpop.f32.mrb[178].mxu0 }
 0x25d   : > { %v5552_v16 = vadd.f32 %v5551_v13, %v5550_v30  ;;  %v5553_v0 = vpop.f32.mrb[178].mxu1  ;;  %v5442_v44 = vpop.f32.mrb[179].mxu0 }
 0x25e   : > { %v3520_v33 = vadd.f32 %v5440_v5, %v6830_v59  ;;  %v5443_v14 = vadd.f32 %v5442_v44, %v5441_v39  ;;  %v5554_v8 = vpop.f32.mrb[179].mxu1 }
 0x25f   : > { %v5555_v46 = vadd.f32 %v5554_v8, %v5553_v0 }
 0x260   : > { %v6954_v34 = vadd.f32 %v5552_v16, %v3520_v33  ;;  %v3523_v26 = vadd.f32 %v5443_v14, %v6835_v50 }
 0x262   : > { %v6957_v56 = vadd.f32 %v5555_v46, %v3523_v26  ;;  %v5444_v57 = vpop.f32.mrb[180].mxu0 }
 0x263   : > { %v5556_v29 = vpop.f32.mrb[180].mxu1  ;;  %v5445_v18 = vpop.f32.mrb[181].mxu0 }
 0x264   : > { %v5446_v47 = vadd.f32 %v5445_v18, %v5444_v57  ;;  %v5557_v60 = vpop.f32.mrb[181].mxu1  ;;  %v5447_v1 = vpop.f32.mrb[182].mxu0 }
 0x265   : > { %v5558_v41 = vadd.f32 %v5557_v60, %v5556_v29  ;;  %v5559_v63 = vpop.f32.mrb[182].mxu1  ;;  %v5448_v31 = vpop.f32.mrb[183].mxu0 }
 0x266   : > { %v3528_v59 = vadd.f32 %v5446_v47, %v6840_v28  ;;  %v5449_v48 = vadd.f32 %v5448_v31, %v5447_v1  ;;  %v5560_v4 = vpop.f32.mrb[183].mxu1 }
 0x267   : > { %v5561_v7 = vadd.f32 %v5560_v4, %v5559_v63 }
 0x268   : > { %v6960_v35 = vadd.f32 %v5558_v41, %v3528_v59  ;;  %v3531_v50 = vadd.f32 %v5449_v48, %v6845_v11 }
 0x26a   : > { %v6963_v24 = vadd.f32 %v5561_v7, %v3531_v50  ;;  %v5450_v22 = vpop.f32.mrb[184].mxu0 }
 0x26b   : > { %v5562_v6 = vpop.f32.mrb[184].mxu1  ;;  %v5451_v15 = vpop.f32.mrb[185].mxu0 }
 0x26c   : > { %v5452_v30 = vadd.f32 %v5451_v15, %v5450_v22  ;;  %v5563_v17 = vpop.f32.mrb[185].mxu1  ;;  %v5453_v5 = vpop.f32.mrb[186].mxu0 }
 0x26d   : > { %v5564_v13 = vadd.f32 %v5563_v17, %v5562_v6  ;;  %v5565_v39 = vpop.f32.mrb[186].mxu1  ;;  %v5454_v16 = vpop.f32.mrb[187].mxu0 }
 0x26e   : > { %v3536_v28 = vadd.f32 %v5452_v30, %v6850_v2  ;;  %v5455_v0 = vadd.f32 %v5454_v16, %v5453_v5  ;;  %v5566_v44 = vpop.f32.mrb[187].mxu1 }
 0x26f   : > { %v5567_v33 = vadd.f32 %v5566_v44, %v5565_v39 }
 0x270   : > { %v6966_v14 = vadd.f32 %v5564_v13, %v3536_v28  ;;  %v3539_v11 = vadd.f32 %v5455_v0, %v6855_v37 }
 0x272   : > { %v6969_v8 = vadd.f32 %v5567_v33, %v3539_v11  ;;  %v5456_v46 = vpop.f32.mrb[188].mxu0 }
 0x273   : > { %v5568_v26 = vpop.f32.mrb[188].mxu1  ;;  %v5457_v57 = vpop.f32.mrb[189].mxu0 }
 0x274   : > { %v5458_v29 = vadd.f32 %v5457_v57, %v5456_v46  ;;  %v5569_v18 = vpop.f32.mrb[189].mxu1  ;;  %v5459_v47 = vpop.f32.mrb[190].mxu0 }
 0x275   : > { %v5570_v60 = vadd.f32 %v5569_v18, %v5568_v26  ;;  %v5571_v1 = vpop.f32.mrb[190].mxu1  ;;  %v5460_v41 = vpop.f32.mrb[191].mxu0 }
 0x276   : > { %v3544_v2 = vadd.f32 %v5458_v29, %v6860_v43  ;;  %v5461_v63 = vadd.f32 %v5460_v41, %v5459_v47  ;;  %v5572_v31 = vpop.f32.mrb[191].mxu1 }
 0x277   : > { %v5573_v59 = vadd.f32 %v5572_v31, %v5571_v1 }
 0x278   : > { %v6972_v48 = vadd.f32 %v5570_v60, %v3544_v2  ;;  %v3547_v37 = vadd.f32 %v5461_v63, %v6865_v61 }
 0x27a   : > { %v6975_v4 = vadd.f32 %v5573_v59, %v3547_v37  ;;  %v5590_v7 = vpop.f32.mrb[192].mxu0 }
 0x27b   : > { %v5702_v50 = vpop.f32.mrb[192].mxu1  ;;  %v5591_v22 = vpop.f32.mrb[193].mxu0 }
 0x27c   : > { %v5592_v6 = vadd.f32 %v5591_v22, %v5590_v7  ;;  %v5703_v15 = vpop.f32.mrb[193].mxu1  ;;  %v5593_v30 = vpop.f32.mrb[194].mxu0 }
 0x27d   : > { %v5704_v17 = vadd.f32 %v5703_v15, %v5702_v50  ;;  %v5705_v5 = vpop.f32.mrb[194].mxu1  ;;  %v5594_v13 = vpop.f32.mrb[195].mxu0 }
 0x27e   : > { %v3746_v43 = vadd.f32 %v5592_v6, %v6870_v20  ;;  %v5595_v39 = vadd.f32 %v5594_v13, %v5593_v30  ;;  %v5706_v16 = vpop.f32.mrb[195].mxu1 }
 0x27f   : > { %v5707_v28 = vadd.f32 %v5706_v16, %v5705_v5 }
 0x280   : > { %v3907_v0 = vadd.f32 %v5704_v17, %v3746_v43  ;;  %v3749_v61 = vadd.f32 %v5595_v39, %v6875_v36 }
 0x282   : > { %v4065_v44 = vmul.f32 0.2, %v3907_v0  ;;  %v3910_v33 = vadd.f32 %v5707_v28, %v3749_v61  ;;  %v5596_v11 = vpop.f32.mrb[196].mxu0  ;;  %vm4033_vm0 = vcmp.ge.f32.partialorder %v3907_v0, 0.0 }
 0x283   : > { %v5708_v46 = vpop.f32.mrb[196].mxu1  ;;  %v5597_v26 = vpop.f32.mrb[197].mxu0 }
 0x284   : > { %vm4034_vm1 = vcmp.ge.f32.partialorder %v3910_v33, 0.0  ;;  %v4066_v57 = vmul.f32 0.2, %v3910_v33  ;;  %v5598_v29 = vadd.f32 %v5597_v26, %v5596_v11  ;;  %v5709_v18 = vpop.f32.mrb[197].mxu1  ;;  %v5599_v47 = vpop.f32.mrb[198].mxu0  ;;  %v4097_v41 = vsel %vm4033_vm0, %v3907_v0, %v4065_v44 }
 0x285   : > { %v5710_v60 = vadd.f32 %v5709_v18, %v5708_v46  ;;  %v5711_v20 = vpop.f32.mrb[198].mxu1  ;;  %v5600_v1 = vpop.f32.mrb[199].mxu0 }
 0x286   : > { %v4098_v36 = vsel %vm4034_vm1, %v3910_v33, %v4066_v57  ;;  %v3754_v2 = vadd.f32 %v5598_v29, %v6880_v58  ;;  %v5601_v63 = vadd.f32 %v5600_v1, %v5599_v47  ;;  %v5712_v31 = vpop.f32.mrb[199].mxu1 }
 0x287   : > { %v4810_v59 = vpack.c.bf16 %v4098_v36, %v4097_v41  ;;  %v5713_v37 = vadd.f32 %v5712_v31, %v5711_v20 }
 0x288   : > { %v3915_v7 = vadd.f32 %v5710_v60, %v3754_v2  ;;  %v3757_v50 = vadd.f32 %v5601_v63, %v6885_v10 }
 0x289   : > { %4811 = vst [vmem:[%s6983_s9] sm:$0xff] %v4810_v59  }
 0x28a   : > { %v4067_v22 = vmul.f32 0.2, %v3915_v7  ;;  %v3918_v6 = vadd.f32 %v5713_v37, %v3757_v50  ;;  %v5602_v15 = vpop.f32.mrb[200].mxu0  ;;  %vm4035_vm2 = vcmp.ge.f32.partialorder %v3915_v7, 0.0 }
 0x28b   : > { %v5714_v30 = vpop.f32.mrb[200].mxu1  ;;  %v5603_v17 = vpop.f32.mrb[201].mxu0 }
 0x28c   : > { %vm4036_vm3 = vcmp.ge.f32.partialorder %v3918_v6, 0.0  ;;  %v4068_v5 = vmul.f32 0.2, %v3918_v6  ;;  %v5604_v13 = vadd.f32 %v5603_v17, %v5602_v15  ;;  %v5715_v43 = vpop.f32.mrb[201].mxu1  ;;  %v5605_v58 = vpop.f32.mrb[202].mxu0  ;;  %v4099_v0 = vsel %vm4035_vm2, %v3915_v7, %v4067_v22 }
 0x28d   : > { %v5716_v39 = vadd.f32 %v5715_v43, %v5714_v30  ;;  %v5717_v16 = vpop.f32.mrb[202].mxu1  ;;  %v5606_v28 = vpop.f32.mrb[203].mxu0 }
 0x28e   : > { %v4100_v61 = vsel %vm4036_vm3, %v3918_v6, %v4068_v5  ;;  %v3762_v10 = vadd.f32 %v5604_v13, %v6890_v23  ;;  %v5607_v44 = vadd.f32 %v5606_v28, %v5605_v58  ;;  %v5718_v33 = vpop.f32.mrb[203].mxu1 }
 0x28f   : > { %v4815_v11 = vpack.c.bf16 %v4100_v61, %v4099_v0  ;;  %v5719_v46 = vadd.f32 %v5718_v33, %v5717_v16 }
 0x290   : > { %v3923_v26 = vadd.f32 %v5716_v39, %v3762_v10  ;;  %v3765_v57 = vadd.f32 %v5607_v44, %v6895_v51 }
 0x291   : > { %4887 = vst [vmem:[%s6983_s9 + $0x8] sm:$0xff] %v4815_v11  }
 0x292   : > { %v4069_v29 = vmul.f32 0.2, %v3923_v26  ;;  %v3926_v18 = vadd.f32 %v5719_v46, %v3765_v57  ;;  %v5608_v47 = vpop.f32.mrb[204].mxu0  ;;  %vm4037_vm4 = vcmp.ge.f32.partialorder %v3923_v26, 0.0 }
 0x293   : > { %v5720_v60 = vpop.f32.mrb[204].mxu1  ;;  %v5609_v20 = vpop.f32.mrb[205].mxu0 }
 0x294   : > { %vm4038_vm5 = vcmp.ge.f32.partialorder %v3926_v18, 0.0  ;;  %v4070_v1 = vmul.f32 0.2, %v3926_v18  ;;  %v5610_v41 = vadd.f32 %v5609_v20, %v5608_v47  ;;  %v5721_v36 = vpop.f32.mrb[205].mxu1  ;;  %v5611_v23 = vpop.f32.mrb[206].mxu0  ;;  %v4101_v59 = vsel %vm4037_vm4, %v3923_v26, %v4069_v29 }
 0x295   : > { %v5722_v2 = vadd.f32 %v5721_v36, %v5720_v60  ;;  %v5723_v63 = vpop.f32.mrb[206].mxu1  ;;  %v5612_v31 = vpop.f32.mrb[207].mxu0 }
 0x296   : > { %v4102_v37 = vsel %vm4038_vm5, %v3926_v18, %v4070_v1  ;;  %v3770_v51 = vadd.f32 %v5610_v41, %v6900_v27  ;;  %v5613_v7 = vadd.f32 %v5612_v31, %v5611_v23  ;;  %v5724_v50 = vpop.f32.mrb[207].mxu1 }
 0x297   : > { %v4820_v22 = vpack.c.bf16 %v4102_v37, %v4101_v59  ;;  %v5725_v6 = vadd.f32 %v5724_v50, %v5723_v63 }
 0x298   : > { %v3931_v15 = vadd.f32 %v5722_v2, %v3770_v51  ;;  %v3773_v30 = vadd.f32 %v5613_v7, %v6903_v53 }
 0x299   : > { %4888 = vst [vmem:[%s6983_s9 + $0x10] sm:$0xff] %v4820_v22  }
 0x29a   : > { %v4071_v17 = vmul.f32 0.2, %v3931_v15  ;;  %v3934_v5 = vadd.f32 %v5725_v6, %v3773_v30  ;;  %v5614_v13 = vpop.f32.mrb[208].mxu0  ;;  %vm4039_vm6 = vcmp.ge.f32.partialorder %v3931_v15, 0.0 }
 0x29b   : > { %v5726_v43 = vpop.f32.mrb[208].mxu1  ;;  %v5615_v58 = vpop.f32.mrb[209].mxu0 }
 0x29c   : > { %vm4040_vm7 = vcmp.ge.f32.partialorder %v3934_v5, 0.0  ;;  %v4072_v39 = vmul.f32 0.2, %v3934_v5  ;;  %v5616_v16 = vadd.f32 %v5615_v58, %v5614_v13  ;;  %v5727_v28 = vpop.f32.mrb[209].mxu1  ;;  %v5617_v27 = vpop.f32.mrb[210].mxu0  ;;  %v4103_v44 = vsel %vm4039_vm6, %v3931_v15, %v4071_v17 }
 0x29d   : > { %v5728_v0 = vadd.f32 %v5727_v28, %v5726_v43  ;;  %v5729_v61 = vpop.f32.mrb[210].mxu1  ;;  %v5618_v10 = vpop.f32.mrb[211].mxu0 }
 0x29e   : > { %v4104_v33 = vsel %vm4040_vm7, %v3934_v5, %v4072_v39  ;;  %v3778_v53 = vadd.f32 %v5616_v16, %v6906_v32  ;;  %v5619_v11 = vadd.f32 %v5618_v10, %v5617_v27  ;;  %v5730_v46 = vpop.f32.mrb[211].mxu1 }
 0x29f   : > { %v4825_v26 = vpack.c.bf16 %v4104_v33, %v4103_v44  ;;  %v5731_v57 = vadd.f32 %v5730_v46, %v5729_v61 }
 0x2a0   : > { %v3939_v29 = vadd.f32 %v5728_v0, %v3778_v53  ;;  %v3781_v18 = vadd.f32 %v5619_v11, %v6909_v19 }
 0x2a1   : > { %4889 = vst [vmem:[%s6983_s9 + $0x18] sm:$0xff] %v4825_v26  }
 0x2a2   : > { %v4073_v47 = vmul.f32 0.2, %v3939_v29  ;;  %v3942_v60 = vadd.f32 %v5731_v57, %v3781_v18  ;;  %v5620_v20 = vpop.f32.mrb[212].mxu0  ;;  %vm4041_vm8 = vcmp.ge.f32.partialorder %v3939_v29, 0.0 }
 0x2a3   : > { %v5732_v1 = vpop.f32.mrb[212].mxu1  ;;  %v5621_v41 = vpop.f32.mrb[213].mxu0 }
 0x2a4   : > { %vm4042_vm9 = vcmp.ge.f32.partialorder %v3942_v60, 0.0  ;;  %v4074_v36 = vmul.f32 0.2, %v3942_v60  ;;  %v5622_v23 = vadd.f32 %v5621_v41, %v5620_v20  ;;  %v5733_v2 = vpop.f32.mrb[213].mxu1  ;;  %v5623_v32 = vpop.f32.mrb[214].mxu0  ;;  %v4105_v37 = vsel %vm4041_vm8, %v3939_v29, %v4073_v47 }
 0x2a5   : > { %v5734_v63 = vadd.f32 %v5733_v2, %v5732_v1  ;;  %v5735_v31 = vpop.f32.mrb[214].mxu1  ;;  %v5624_v59 = vpop.f32.mrb[215].mxu0 }
 0x2a6   : > { %v4106_v51 = vsel %vm4042_vm9, %v3942_v60, %v4074_v36  ;;  %v3786_v19 = vadd.f32 %v5622_v23, %v6912_v12  ;;  %v5625_v7 = vadd.f32 %v5624_v59, %v5623_v32  ;;  %v5736_v50 = vpop.f32.mrb[215].mxu1 }
 0x2a7   : > { %v4830_v22 = vpack.c.bf16 %v4106_v51, %v4105_v37  ;;  %v5737_v6 = vadd.f32 %v5736_v50, %v5735_v31 }
 0x2a8   : > { %v3947_v15 = vadd.f32 %v5734_v63, %v3786_v19  ;;  %v3789_v30 = vadd.f32 %v5625_v7, %v6915_v42 }
 0x2a9   : > { %4890 = vst [vmem:[%s6983_s9 + $0x20] sm:$0xff] %v4830_v22  }
 0x2aa   : > { %v4075_v17 = vmul.f32 0.2, %v3947_v15  ;;  %v3950_v5 = vadd.f32 %v5737_v6, %v3789_v30  ;;  %v5626_v13 = vpop.f32.mrb[216].mxu0  ;;  %vm4043_vm10 = vcmp.ge.f32.partialorder %v3947_v15, 0.0 }
 0x2ab   : > { %v5738_v43 = vpop.f32.mrb[216].mxu1  ;;  %v5627_v58 = vpop.f32.mrb[217].mxu0 }
 0x2ac   : > { %vm4044_vm11 = vcmp.ge.f32.partialorder %v3950_v5, 0.0  ;;  %v4076_v39 = vmul.f32 0.2, %v3950_v5  ;;  %v5628_v16 = vadd.f32 %v5627_v58, %v5626_v13  ;;  %v5739_v28 = vpop.f32.mrb[217].mxu1  ;;  %v5629_v12 = vpop.f32.mrb[218].mxu0  ;;  %v4107_v10 = vsel %vm4043_vm10, %v3947_v15, %v4075_v17 }
 0x2ad   : > { %v5740_v27 = vadd.f32 %v5739_v28, %v5738_v43  ;;  %v5741_v0 = vpop.f32.mrb[218].mxu1  ;;  %v5630_v61 = vpop.f32.mrb[219].mxu0 }
 0x2ae   : > { %v4108_v44 = vsel %vm4044_vm11, %v3950_v5, %v4076_v39  ;;  %v3794_v42 = vadd.f32 %v5628_v16, %v6918_v52  ;;  %v5631_v33 = vadd.f32 %v5630_v61, %v5629_v12  ;;  %v5742_v53 = vpop.f32.mrb[219].mxu1 }
 0x2af   : > { %v4835_v11 = vpack.c.bf16 %v4108_v44, %v4107_v10  ;;  %v5743_v46 = vadd.f32 %v5742_v53, %v5741_v0 }
 0x2b0   : > { %v3955_v26 = vadd.f32 %v5740_v27, %v3794_v42  ;;  %v3797_v57 = vadd.f32 %v5631_v33, %v6921_v55 }
 0x2b1   : > { %4891 = vst [vmem:[%s6983_s9 + $0x28] sm:$0xff] %v4835_v11  }
 0x2b2   : > { %v4077_v29 = vmul.f32 0.2, %v3955_v26  ;;  %v3958_v18 = vadd.f32 %v5743_v46, %v3797_v57  ;;  %v5632_v47 = vpop.f32.mrb[220].mxu0  ;;  %vm4045_vm12 = vcmp.ge.f32.partialorder %v3955_v26, 0.0 }
 0x2b3   : > { %v5744_v60 = vpop.f32.mrb[220].mxu1  ;;  %v5633_v20 = vpop.f32.mrb[221].mxu0 }
 0x2b4   : > { %vm4046_vm13 = vcmp.ge.f32.partialorder %v3958_v18, 0.0  ;;  %v4078_v1 = vmul.f32 0.2, %v3958_v18  ;;  %v5634_v41 = vadd.f32 %v5633_v20, %v5632_v47  ;;  %v5745_v36 = vpop.f32.mrb[221].mxu1  ;;  %v5635_v52 = vpop.f32.mrb[222].mxu0  ;;  %v4109_v63 = vsel %vm4045_vm12, %v3955_v26, %v4077_v29 }
 0x2b5   : > { %v5746_v23 = vadd.f32 %v5745_v36, %v5744_v60  ;;  %v5747_v2 = vpop.f32.mrb[222].mxu1  ;;  %v5636_v32 = vpop.f32.mrb[223].mxu0 }
 0x2b6   : > { %v4110_v31 = vsel %vm4046_vm13, %v3958_v18, %v4078_v1  ;;  %v3802_v55 = vadd.f32 %v5634_v41, %v6924_v49  ;;  %v5637_v59 = vadd.f32 %v5636_v32, %v5635_v52  ;;  %v5748_v37 = vpop.f32.mrb[223].mxu1 }
 0x2b7   : > { %v4840_v51 = vpack.c.bf16 %v4110_v31, %v4109_v63  ;;  %v5749_v19 = vadd.f32 %v5748_v37, %v5747_v2 }
 0x2b8   : > { %v3963_v7 = vadd.f32 %v5746_v23, %v3802_v55  ;;  %v3805_v50 = vadd.f32 %v5637_v59, %v6927_v38 }
 0x2b9   : > { %4892 = vst [vmem:[%s6983_s9 + $0x30] sm:$0xff] %v4840_v51  }
 0x2ba   : > { %v4079_v22 = vmul.f32 0.2, %v3963_v7  ;;  %v3966_v6 = vadd.f32 %v5749_v19, %v3805_v50  ;;  %v5638_v15 = vpop.f32.mrb[224].mxu0  ;;  %vm4047_vm14 = vcmp.ge.f32.partialorder %v3963_v7, 0.0 }
 0x2bb   : > { %v5750_v30 = vpop.f32.mrb[224].mxu1  ;;  %v5639_v17 = vpop.f32.mrb[225].mxu0 }
 0x2bc   : > { %vm4048_vm15 = vcmp.ge.f32.partialorder %v3966_v6, 0.0  ;;  %v4080_v5 = vmul.f32 0.2, %v3966_v6  ;;  %v5640_v13 = vadd.f32 %v5639_v17, %v5638_v15  ;;  %v5751_v43 = vpop.f32.mrb[225].mxu1  ;;  %v5641_v49 = vpop.f32.mrb[226].mxu0  ;;  %v4111_v28 = vsel %vm4047_vm14, %v3963_v7, %v4079_v22 }
 0x2bd   : > { %v5752_v58 = vadd.f32 %v5751_v43, %v5750_v30  ;;  %v5753_v39 = vpop.f32.mrb[226].mxu1  ;;  %v5642_v16 = vpop.f32.mrb[227].mxu0 }
 0x2be   : > { %v4112_v12 = vsel %vm4048_vm15, %v3966_v6, %v4080_v5  ;;  %v3810_v38 = vadd.f32 %v5640_v13, %v6930_v9  ;;  %v5643_v27 = vadd.f32 %v5642_v16, %v5641_v49  ;;  %v5754_v0 = vpop.f32.mrb[227].mxu1 }
 0x2bf   : > { %v4845_v61 = vpack.c.bf16 %v4112_v12, %v4111_v28  ;;  %v5755_v10 = vadd.f32 %v5754_v0, %v5753_v39 }
 0x2c0   : > { %v3971_v44 = vadd.f32 %v5752_v58, %v3810_v38  ;;  %v3813_v42 = vadd.f32 %v5643_v27, %v6933_v54 }
 0x2c1   : > { %4893 = vst [vmem:[%s6983_s9 + $0x38] sm:$0xff] %v4845_v61  }
 0x2c2   : > { %v4081_v33 = vmul.f32 0.2, %v3971_v44  ;;  %v3974_v53 = vadd.f32 %v5755_v10, %v3813_v42  ;;  %v5644_v11 = vpop.f32.mrb[228].mxu0  ;;  %vm4049_vm0 = vcmp.ge.f32.partialorder %v3971_v44, 0.0 }
 0x2c3   : > { %v5756_v46 = vpop.f32.mrb[228].mxu1  ;;  %v5645_v26 = vpop.f32.mrb[229].mxu0 }
 0x2c4   : > { %vm4050_vm1 = vcmp.ge.f32.partialorder %v3974_v53, 0.0  ;;  %v4082_v57 = vmul.f32 0.2, %v3974_v53  ;;  %v5646_v29 = vadd.f32 %v5645_v26, %v5644_v11  ;;  %v5757_v18 = vpop.f32.mrb[229].mxu1  ;;  %v5647_v9 = vpop.f32.mrb[230].mxu0  ;;  %v4113_v1 = vsel %vm4049_vm0, %v3971_v44, %v4081_v33 }
 0x2c5   : > { %v5758_v47 = vadd.f32 %v5757_v18, %v5756_v46  ;;  %v5759_v60 = vpop.f32.mrb[230].mxu1  ;;  %v5648_v20 = vpop.f32.mrb[231].mxu0 }
 0x2c6   : > { %v4114_v41 = vsel %vm4050_vm1, %v3974_v53, %v4082_v57  ;;  %v3818_v54 = vadd.f32 %v5646_v29, %v6936_v62  ;;  %v5649_v36 = vadd.f32 %v5648_v20, %v5647_v9  ;;  %v5760_v52 = vpop.f32.mrb[231].mxu1 }
 0x2c7   : > { %v4850_v23 = vpack.c.bf16 %v4114_v41, %v4113_v1  ;;  %v5761_v2 = vadd.f32 %v5760_v52, %v5759_v60 }
 0x2c8   : > { %v3979_v32 = vadd.f32 %v5758_v47, %v3818_v54  ;;  %v3821_v63 = vadd.f32 %v5649_v36, %v6939_v40 }
 0x2c9   : > { %4894 = vst [vmem:[%s6983_s9 + $0x40] sm:$0xff] %v4850_v23  }
 0x2ca   : > { %v4083_v31 = vmul.f32 0.2, %v3979_v32  ;;  %v3982_v55 = vadd.f32 %v5761_v2, %v3821_v63  ;;  %v5650_v59 = vpop.f32.mrb[232].mxu0  ;;  %vm4051_vm2 = vcmp.ge.f32.partialorder %v3979_v32, 0.0 }
 0x2cb   : > { %v5762_v37 = vpop.f32.mrb[232].mxu1  ;;  %v5651_v51 = vpop.f32.mrb[233].mxu0 }
 0x2cc   : > { %vm4052_vm3 = vcmp.ge.f32.partialorder %v3982_v55, 0.0  ;;  %v4084_v19 = vmul.f32 0.2, %v3982_v55  ;;  %v5652_v7 = vadd.f32 %v5651_v51, %v5650_v59  ;;  %v5763_v50 = vpop.f32.mrb[233].mxu1  ;;  %v5653_v62 = vpop.f32.mrb[234].mxu0  ;;  %v4115_v30 = vsel %vm4051_vm2, %v3979_v32, %v4083_v31 }
 0x2cd   : > { %v5764_v22 = vadd.f32 %v5763_v50, %v5762_v37  ;;  %v5765_v6 = vpop.f32.mrb[234].mxu1  ;;  %v5654_v15 = vpop.f32.mrb[235].mxu0 }
 0x2ce   : > { %v4116_v17 = vsel %vm4052_vm3, %v3982_v55, %v4084_v19  ;;  %v3826_v40 = vadd.f32 %v5652_v7, %v6942_v21  ;;  %v5655_v5 = vadd.f32 %v5654_v15, %v5653_v62  ;;  %v5766_v13 = vpop.f32.mrb[235].mxu1 }
 0x2cf   : > { %v4855_v43 = vpack.c.bf16 %v4116_v17, %v4115_v30  ;;  %v5767_v49 = vadd.f32 %v5766_v13, %v5765_v6 }
 0x2d0   : > { %v3987_v58 = vadd.f32 %v5764_v22, %v3826_v40  ;;  %v3829_v39 = vadd.f32 %v5655_v5, %v6945_v25 }
 0x2d1   : > { %4895 = vst [vmem:[%s6983_s9 + $0x48] sm:$0xff] %v4855_v43  }
 0x2d2   : > { %v4085_v16 = vmul.f32 0.2, %v3987_v58  ;;  %v3990_v28 = vadd.f32 %v5767_v49, %v3829_v39  ;;  %v5656_v12 = vpop.f32.mrb[236].mxu0  ;;  %vm4053_vm4 = vcmp.ge.f32.partialorder %v3987_v58, 0.0 }
 0x2d3   : > { %v5768_v38 = vpop.f32.mrb[236].mxu1  ;;  %v5657_v27 = vpop.f32.mrb[237].mxu0 }
 0x2d4   : > { %vm4054_vm5 = vcmp.ge.f32.partialorder %v3990_v28, 0.0  ;;  %v4086_v0 = vmul.f32 0.2, %v3990_v28  ;;  %v5658_v61 = vadd.f32 %v5657_v27, %v5656_v12  ;;  %v5769_v10 = vpop.f32.mrb[237].mxu1  ;;  %v5659_v21 = vpop.f32.mrb[238].mxu0  ;;  %v4117_v53 = vsel %vm4053_vm4, %v3987_v58, %v4085_v16 }
 0x2d5   : > { %v5770_v44 = vadd.f32 %v5769_v10, %v5768_v38  ;;  %v5771_v42 = vpop.f32.mrb[238].mxu1  ;;  %v5660_v33 = vpop.f32.mrb[239].mxu0 }
 0x2d6   : > { %v4118_v11 = vsel %vm4054_vm5, %v3990_v28, %v4086_v0  ;;  %v3834_v25 = vadd.f32 %v5658_v61, %v6948_v45  ;;  %v5661_v46 = vadd.f32 %v5660_v33, %v5659_v21  ;;  %v5772_v26 = vpop.f32.mrb[239].mxu1 }
 0x2d7   : > { %v4860_v57 = vpack.c.bf16 %v4118_v11, %v4117_v53  ;;  %v5773_v29 = vadd.f32 %v5772_v26, %v5771_v42 }
 0x2d8   : > { %v3995_v18 = vadd.f32 %v5770_v44, %v3834_v25  ;;  %v3837_v9 = vadd.f32 %v5661_v46, %v6951_v3 }
 0x2d9   : > { %4896 = vst [vmem:[%s6983_s9 + $0x50] sm:$0xff] %v4860_v57  }
 0x2da   : > { %v4087_v47 = vmul.f32 0.2, %v3995_v18  ;;  %v3998_v60 = vadd.f32 %v5773_v29, %v3837_v9  ;;  %v5662_v20 = vpop.f32.mrb[240].mxu0  ;;  %vm4055_vm6 = vcmp.ge.f32.partialorder %v3995_v18, 0.0 }
 0x2db   : > { %v5774_v1 = vpop.f32.mrb[240].mxu1  ;;  %v5663_v41 = vpop.f32.mrb[241].mxu0 }
 0x2dc   : > { %vm4056_vm7 = vcmp.ge.f32.partialorder %v3998_v60, 0.0  ;;  %v4088_v54 = vmul.f32 0.2, %v3998_v60  ;;  %v5664_v36 = vadd.f32 %v5663_v41, %v5662_v20  ;;  %v5775_v52 = vpop.f32.mrb[241].mxu1  ;;  %v5665_v45 = vpop.f32.mrb[242].mxu0  ;;  %v4119_v63 = vsel %vm4055_vm6, %v3995_v18, %v4087_v47 }
 0x2dd   : > { %v5776_v23 = vadd.f32 %v5775_v52, %v5774_v1  ;;  %v5777_v2 = vpop.f32.mrb[242].mxu1  ;;  %v5666_v32 = vpop.f32.mrb[243].mxu0 }
 0x2de   : > { %v4120_v31 = vsel %vm4056_vm7, %v3998_v60, %v4088_v54  ;;  %v3842_v3 = vadd.f32 %v5664_v36, %v6954_v34  ;;  %v5667_v55 = vadd.f32 %v5666_v32, %v5665_v45  ;;  %v5778_v59 = vpop.f32.mrb[243].mxu1 }
 0x2df   : > { %v4865_v37 = vpack.c.bf16 %v4120_v31, %v4119_v63  ;;  %v5779_v51 = vadd.f32 %v5778_v59, %v5777_v2 }
 0x2e0   : > { %v4003_v19 = vadd.f32 %v5776_v23, %v3842_v3  ;;  %v3845_v7 = vadd.f32 %v5667_v55, %v6957_v56 }
 0x2e1   : > { %4897 = vst [vmem:[%s6983_s9 + $0x58] sm:$0xff] %v4865_v37  }
 0x2e2   : > { %v4089_v50 = vmul.f32 0.2, %v4003_v19  ;;  %v4006_v62 = vadd.f32 %v5779_v51, %v3845_v7  ;;  %v5668_v22 = vpop.f32.mrb[244].mxu0  ;;  %vm4057_vm8 = vcmp.ge.f32.partialorder %v4003_v19, 0.0 }
 0x2e3   : > { %v5780_v6 = vpop.f32.mrb[244].mxu1  ;;  %v5669_v15 = vpop.f32.mrb[245].mxu0 }
 0x2e4   : > { %vm4058_vm9 = vcmp.ge.f32.partialorder %v4006_v62, 0.0  ;;  %v4090_v30 = vmul.f32 0.2, %v4006_v62  ;;  %v5670_v17 = vadd.f32 %v5669_v15, %v5668_v22  ;;  %v5781_v40 = vpop.f32.mrb[245].mxu1  ;;  %v5671_v34 = vpop.f32.mrb[246].mxu0  ;;  %v4121_v49 = vsel %vm4057_vm8, %v4003_v19, %v4089_v50 }
 0x2e5   : > { %v5782_v5 = vadd.f32 %v5781_v40, %v5780_v6  ;;  %v5783_v13 = vpop.f32.mrb[246].mxu1  ;;  %v5672_v43 = vpop.f32.mrb[247].mxu0 }
 0x2e6   : > { %v4122_v58 = vsel %vm4058_vm9, %v4006_v62, %v4090_v30  ;;  %v3850_v56 = vadd.f32 %v5670_v17, %v6960_v35  ;;  %v5673_v39 = vadd.f32 %v5672_v43, %v5671_v34  ;;  %v5784_v16 = vpop.f32.mrb[247].mxu1 }
 0x2e7   : > { %v4870_v28 = vpack.c.bf16 %v4122_v58, %v4121_v49  ;;  %v5785_v12 = vadd.f32 %v5784_v16, %v5783_v13 }
 0x2e8   : > { %v4011_v38 = vadd.f32 %v5782_v5, %v3850_v56  ;;  %v3853_v27 = vadd.f32 %v5673_v39, %v6963_v24 }
 0x2e9   : > { %4898 = vst [vmem:[%s6983_s9 + $0x60] sm:$0xff] %v4870_v28  }
 0x2ea   : > { %v4091_v0 = vmul.f32 0.2, %v4011_v38  ;;  %v4014_v61 = vadd.f32 %v5785_v12, %v3853_v27  ;;  %v5674_v10 = vpop.f32.mrb[248].mxu0  ;;  %vm4059_vm10 = vcmp.ge.f32.partialorder %v4011_v38, 0.0 }
 0x2eb   : > { %v5786_v21 = vpop.f32.mrb[248].mxu1  ;;  %v5675_v44 = vpop.f32.mrb[249].mxu0 }
 0x2ec   : > { %vm4060_vm11 = vcmp.ge.f32.partialorder %v4014_v61, 0.0  ;;  %v4092_v42 = vmul.f32 0.2, %v4014_v61  ;;  %v5676_v33 = vadd.f32 %v5675_v44, %v5674_v10  ;;  %v5787_v53 = vpop.f32.mrb[249].mxu1  ;;  %v5677_v35 = vpop.f32.mrb[250].mxu0  ;;  %v4123_v26 = vsel %vm4059_vm10, %v4011_v38, %v4091_v0 }
 0x2ed   : > { %v5788_v11 = vadd.f32 %v5787_v53, %v5786_v21  ;;  %v5789_v25 = vpop.f32.mrb[250].mxu1  ;;  %v5678_v46 = vpop.f32.mrb[251].mxu0 }
 0x2ee   : > { %v4124_v57 = vsel %vm4060_vm11, %v4014_v61, %v4092_v42  ;;  %v3858_v24 = vadd.f32 %v5676_v33, %v6966_v14  ;;  %v5679_v29 = vadd.f32 %v5678_v46, %v5677_v35  ;;  %v5790_v18 = vpop.f32.mrb[251].mxu1 }
 0x2ef   : > { %v4875_v9 = vpack.c.bf16 %v4124_v57, %v4123_v26  ;;  %v5791_v47 = vadd.f32 %v5790_v18, %v5789_v25 }
 0x2f0   : > { %v4019_v60 = vadd.f32 %v5788_v11, %v3858_v24  ;;  %v3861_v20 = vadd.f32 %v5679_v29, %v6969_v8 }
 0x2f1   : > { %4899 = vst [vmem:[%s6983_s9 + $0x68] sm:$0xff] %v4875_v9  }
 0x2f2   : > { %v4093_v1 = vmul.f32 0.2, %v4019_v60  ;;  %v4022_v41 = vadd.f32 %v5791_v47, %v3861_v20  ;;  %v5680_v54 = vpop.f32.mrb[252].mxu0  ;;  %vm4061_vm12 = vcmp.ge.f32.partialorder %v4019_v60, 0.0 }
 0x2f3   : > { %v5792_v36 = vpop.f32.mrb[252].mxu1  ;;  %v5681_v52 = vpop.f32.mrb[253].mxu0 }
 0x2f4   : > { %vm4062_vm13 = vcmp.ge.f32.partialorder %v4022_v41, 0.0  ;;  %v4094_v45 = vmul.f32 0.2, %v4022_v41  ;;  %v5682_v23 = vadd.f32 %v5681_v52, %v5680_v54  ;;  %v5793_v2 = vpop.f32.mrb[253].mxu1  ;;  %v5683_v14 = vpop.f32.mrb[254].mxu0  ;;  %v4125_v3 = vsel %vm4061_vm12, %v4019_v60, %v4093_v1 }
 0x2f5   : > { %v5794_v32 = vadd.f32 %v5793_v2, %v5792_v36  ;;  %v5795_v63 = vpop.f32.mrb[254].mxu1  ;;  %v5684_v31 = vpop.f32.mrb[255].mxu0 }
 0x2f6   : > { %v4126_v55 = vsel %vm4062_vm13, %v4022_v41, %v4094_v45  ;;  %v3866_v8 = vadd.f32 %v5682_v23, %v6972_v48  ;;  %v5685_v59 = vadd.f32 %v5684_v31, %v5683_v14  ;;  %v5796_v37 = vpop.f32.mrb[255].mxu1 }
 0x2f7   : > { %v4880_v51 = vpack.c.bf16 %v4126_v55, %v4125_v3  ;;  %v5797_v19 = vadd.f32 %v5796_v37, %v5795_v63 }
 0x2f8   : > { %v4027_v7 = vadd.f32 %v5794_v32, %v3866_v8  ;;  %v3869_v50 = vadd.f32 %v5685_v59, %v6975_v4 }
 0x2f9   : > { %4900 = vst [vmem:[%s6983_s9 + $0x70] sm:$0xff] %v4880_v51  }
 0x2fa   : > { %v4095_v62 = vmul.f32 0.2, %v4027_v7  ;;  %v4030_v22 = vadd.f32 %v5797_v19, %v3869_v50  ;;  %vm4063_vm14 = vcmp.ge.f32.partialorder %v4027_v7, 0.0 }
 0x2fc   : > { %vm4064_vm15 = vcmp.ge.f32.partialorder %v4030_v22, 0.0  ;;  %v4096_v6 = vmul.f32 0.2, %v4030_v22  ;;  %v4127_v15 = vsel %vm4063_vm14, %v4027_v7, %v4095_v62 }
 0x2fe   : > { %v4128_v30 = vsel %vm4064_vm15, %v4030_v22, %v4096_v6 }
 0x2ff   : > { %v4885_v17 = vpack.c.bf16 %v4128_v30, %v4127_v15 }
 0x301   : > { %4901 = vst [vmem:[%s6983_s9 + $0x78] sm:$0xff] %v4885_v17  }
 0x302 PF: > { %s13_s12 = sadd.s32 1, %s5940_s12  }
 0x303   : > { %p10_p4 = scmp.ge.s32.totalorder %s13_s12, 4  }
 0x305   :  { %12 = sbr.rel (!%p10_p4) target bundleno = 1 (0x1), region = 62 }

// kernel: patch_discriminator_forward.6
= control target key start
LH: loop header
LB: loop body
LE: loop exit
PB: predicated region body
PF: predicated region fallthrough
CT: control target
= control target key end

     0   :  { %s4877_s1 = inlined_call_operand.vmem [shape: bf16[2048,128], index: 1, kind: input, shape index: {}]   ;;  %s4878_s0 = inlined_call_operand.vmem [shape: bf16[128,2048], index: 0, kind: input, shape index: {}]   ;;  %s4879_s2 = inlined_call_operand.vmem [shape: f32[1,128], index: 2, kind: input, shape index: {}]   ;;  %s4880_s3 = inlined_call_operand.vmem [shape: f32[1,128], index: 3, kind: input, shape index: {}]   ;;  %s4881_s4 = inlined_call_operand.vmem [shape: bf16[128,128], index: 4, kind: output, shape index: {}]  }
   0x1   :  { %v3680_v0 = vld [vmem:[%s4877_s1 + $0x40] sm:$0xff]   ;;  %v3684_v4 = vld [vmem:[%s4877_s1 + $0x48] sm:$0xff]   ;;  %v3688_v8 = vld [vmem:[%s4877_s1 + $0x50] sm:$0xff]  }
   0x2   :  { %v3681_v1 = vld [vmem:[%s4877_s1 + $0xc0] sm:$0xff]   ;;  %3168 = vmatprep.subr.bf16.mxu0 %v3680_v0  ;;  %v3685_v5 = vld [vmem:[%s4877_s1 + $0xc8] sm:$0xff]   ;;  %v3689_v9 = vld [vmem:[%s4877_s1 + $0xd0] sm:$0xff]  }
   0x3   :  { %v3682_v2 = vld [vmem:[%s4877_s1] sm:$0xff]   ;;  %3232 = vmatprep.subr.bf16.mxu1 %v3681_v1  ;;  %v3686_v6 = vld [vmem:[%s4877_s1 + $0x8] sm:$0xff]   ;;  %v3690_v10 = vld [vmem:[%s4877_s1 + $0x10] sm:$0xff]  }
   0x4   :  { %v3683_v3 = vld [vmem:[%s4877_s1 + $0x80] sm:$0xff]   ;;  %3169 = vmatpush3.bf16.msra.mxu0 %v3682_v2  ;;  %v3687_v7 = vld [vmem:[%s4877_s1 + $0x88] sm:$0xff]   ;;  %v3691_v11 = vld [vmem:[%s4877_s1 + $0x90] sm:$0xff]  }
   0x5   :  { %3233 = vmatpush3.bf16.msra.mxu1 %v3683_v3  ;;  %3170 = vmatprep.subr.bf16.mxu0 %v3684_v4  ;;  %v3692_v12 = vld [vmem:[%s4877_s1 + $0x58] sm:$0xff]   ;;  %v3696_v16 = vld [vmem:[%s4877_s1 + $0x60] sm:$0xff]   ;;  %v3700_v20 = vld [vmem:[%s4877_s1 + $0x68] sm:$0xff]  }
   0x6   :  { %3234 = vmatprep.subr.bf16.mxu1 %v3685_v5  ;;  %v3693_v13 = vld [vmem:[%s4877_s1 + $0xd8] sm:$0xff]   ;;  %v3697_v17 = vld [vmem:[%s4877_s1 + $0xe0] sm:$0xff]   ;;  %v3701_v21 = vld [vmem:[%s4877_s1 + $0xe8] sm:$0xff]  }
   0x7   :  { %v3694_v14 = vld [vmem:[%s4877_s1 + $0x18] sm:$0xff]   ;;  %v3698_v18 = vld [vmem:[%s4877_s1 + $0x20] sm:$0xff]   ;;  %v3702_v22 = vld [vmem:[%s4877_s1 + $0x28] sm:$0xff]  }
   0x8   :  { %3171 = vmatpush3.bf16.msra.mxu0 %v3686_v6  ;;  %v3695_v15 = vld [vmem:[%s4877_s1 + $0x98] sm:$0xff]   ;;  %v3699_v19 = vld [vmem:[%s4877_s1 + $0xa0] sm:$0xff]   ;;  %v3703_v23 = vld [vmem:[%s4877_s1 + $0xa8] sm:$0xff]  }
   0x9   :  { %3235 = vmatpush3.bf16.msra.mxu1 %v3687_v7  ;;  %3172 = vmatprep.subr.bf16.mxu0 %v3688_v8  ;;  %v3704_v24 = vld [vmem:[%s4877_s1 + $0x70] sm:$0xff]   ;;  %v3708_v28 = vld [vmem:[%s4877_s1 + $0x78] sm:$0xff]   ;;  %v18_v32 = vld [vmem:[%s4878_s0] sm:$0xff] }
   0xa   :  { %3236 = vmatprep.subr.bf16.mxu1 %v3689_v9  ;;  %v3705_v25 = vld [vmem:[%s4877_s1 + $0xf0] sm:$0xff]   ;;  %v3709_v29 = vld [vmem:[%s4877_s1 + $0xf8] sm:$0xff]   ;;  %v26_v33 = vld [vmem:[%s4878_s0 + $0x40] sm:$0xff] }
   0xb   :  { %v3706_v26 = vld [vmem:[%s4877_s1 + $0x30] sm:$0xff]   ;;  %v3710_v30 = vld [vmem:[%s4877_s1 + $0x38] sm:$0xff]   ;;  %v19_v34 = vld [vmem:[%s4878_s0 + $0x8] sm:$0xff]  ;;  %v2833_v35 = vcombine.low %v18_v32, %v26_v33  ;;  %v2834_v36 = vcombine.high %v18_v32, %v26_v33 }
   0xc   :  { %3173 = vmatpush3.bf16.msra.mxu0 %v3690_v10  ;;  %v3707_v27 = vld [vmem:[%s4877_s1 + $0xb0] sm:$0xff]   ;;  %v3711_v31 = vld [vmem:[%s4877_s1 + $0xb8] sm:$0xff]   ;;  %v27_v37 = vld [vmem:[%s4878_s0 + $0x48] sm:$0xff] }
   0xd   :  { %3237 = vmatpush3.bf16.msra.mxu1 %v3691_v11  ;;  %3174 = vmatprep.subr.bf16.mxu0 %v3692_v12  ;;  %v2835_v38 = vcombine.low %v19_v34, %v27_v37  ;;  %v2836_v39 = vcombine.high %v19_v34, %v27_v37  ;;  %v3712_v40 = vld [vmem:[%s4877_s1 + $0x140] sm:$0xff]   ;;  %v35_v47 = vld [vmem:[%s4878_s0 + $0x88] sm:$0xff]  ;;  %v3720_v62 = vld [vmem:[%s4877_s1 + $0x150] sm:$0xff]  }
   0xe   :  { %3238 = vmatprep.subr.bf16.mxu1 %v3693_v13  ;;  %1842 = vmatprep.mubr.bf16.mxu0 %v2834_v36  ;;  %v3713_v41 = vld [vmem:[%s4877_s1 + $0x100] sm:$0xff]   ;;  %v43_v48 = vld [vmem:[%s4878_s0 + $0xc8] sm:$0xff]  ;;  %v3721_v63 = vld [vmem:[%s4877_s1 + $0x110] sm:$0xff]  }
   0xf   :  { %1939 = vmatprep.mubr.bf16.mxu1 %v2836_v39  ;;  %v3714_v42 = vld [vmem:[%s4877_s1 + $0x1c0] sm:$0xff]   ;;  %v2852_v49 = vcombine.high %v35_v47, %v43_v48  ;;  %v3716_v50 = vld [vmem:[%s4877_s1 + $0x148] sm:$0xff]   ;;  %v2851_v53 = vcombine.low %v35_v47, %v43_v48  ;;  %v3722_v0 = vld [vmem:[%s4877_s1 + $0x1d0] sm:$0xff]  }
  0x10   :  { %3175 = vmatpush3.bf16.msra.mxu0 %v3694_v14  ;;  %v3715_v43 = vld [vmem:[%s4877_s1 + $0x180] sm:$0xff]   ;;  %v3717_v52 = vld [vmem:[%s4877_s1 + $0x108] sm:$0xff]   ;;  %v3723_v1 = vld [vmem:[%s4877_s1 + $0x190] sm:$0xff]  }
  0x11   :  { %3239 = vmatpush3.bf16.msra.mxu1 %v3695_v15  ;;  %3176 = vmatprep.subr.bf16.mxu0 %v3696_v16  ;;  %v34_v44 = vld [vmem:[%s4878_s0 + $0x80] sm:$0xff]  ;;  %v3718_v54 = vld [vmem:[%s4877_s1 + $0x1c8] sm:$0xff]   ;;  %v3724_v10 = vld [vmem:[%s4877_s1 + $0x158] sm:$0xff]  }
  0x12   :  { %3240 = vmatprep.subr.bf16.mxu1 %v3697_v17  ;;  %v42_v45 = vld [vmem:[%s4878_s0 + $0xc0] sm:$0xff]  ;;  %v3719_v55 = vld [vmem:[%s4877_s1 + $0x188] sm:$0xff]   ;;  %v3725_v11 = vld [vmem:[%s4877_s1 + $0x118] sm:$0xff]  }
  0x13   :  { %v2850_v46 = vcombine.high %v34_v44, %v42_v45  ;;  %v2849_v51 = vcombine.low %v34_v44, %v42_v45  ;;  %v50_v56 = vld [vmem:[%s4878_s0 + $0x100] sm:$0xff]  ;;  %v51_v58 = vld [vmem:[%s4878_s0 + $0x108] sm:$0xff]  ;;  %v3726_v12 = vld [vmem:[%s4877_s1 + $0x1d8] sm:$0xff]  }
  0x14   :  { %3177 = vmatpush3.bf16.msra.mxu0 %v3698_v18  ;;  %v58_v57 = vld [vmem:[%s4878_s0 + $0x140] sm:$0xff]  ;;  %v59_v59 = vld [vmem:[%s4878_s0 + $0x148] sm:$0xff]  ;;  %v3727_v13 = vld [vmem:[%s4877_s1 + $0x198] sm:$0xff]  }
  0x15   :  { %3241 = vmatpush3.bf16.msra.mxu1 %v3699_v19  ;;  %3178 = vmatprep.subr.bf16.mxu0 %v3700_v20  ;;  %v2866_v60 = vcombine.high %v50_v56, %v58_v57  ;;  %v2868_v61 = vcombine.high %v51_v58, %v59_v59  ;;  %v2865_v2 = vcombine.low %v50_v56, %v58_v57  ;;  %v66_v3 = vld [vmem:[%s4878_s0 + $0x180] sm:$0xff]  ;;  %v67_v5 = vld [vmem:[%s4878_s0 + $0x188] sm:$0xff]  ;;  %v3737_v39 = vld [vmem:[%s4877_s1 + $0x130] sm:$0xff]  }
  0x16   :  { %3242 = vmatprep.subr.bf16.mxu1 %v3701_v21  ;;  %v74_v4 = vld [vmem:[%s4878_s0 + $0x1c0] sm:$0xff]  ;;  %v2867_v6 = vcombine.low %v51_v58, %v59_v59  ;;  %v75_v8 = vld [vmem:[%s4878_s0 + $0x1c8] sm:$0xff]  ;;  %v3741_v48 = vld [vmem:[%s4877_s1 + $0x138] sm:$0xff]  }
  0x17   :  { %v2882_v7 = vcombine.high %v66_v3, %v74_v4  ;;  %v2884_v9 = vcombine.high %v67_v5, %v75_v8  ;;  %v82_v14 = vld [vmem:[%s4878_s0 + $0x200] sm:$0xff]  ;;  %v83_v16 = vld [vmem:[%s4878_s0 + $0x208] sm:$0xff]  ;;  %v2881_v19 = vcombine.low %v66_v3, %v74_v4  ;;  %v2883_v21 = vcombine.low %v67_v5, %v75_v8  ;;  %v29_v3 = vld [vmem:[%s4878_s0 + $0x58] sm:$0xff] }
  0x18   :  { %3179 = vmatpush3.bf16.msra.mxu0 %v3702_v22  ;;  %v90_v15 = vld [vmem:[%s4878_s0 + $0x240] sm:$0xff]  ;;  %v91_v17 = vld [vmem:[%s4878_s0 + $0x248] sm:$0xff]  ;;  %v36_v8 = vld [vmem:[%s4878_s0 + $0x90] sm:$0xff] }
  0x19   :  { %3243 = vmatpush3.bf16.msra.mxu1 %v3703_v23  ;;  %3180 = vmatprep.subr.bf16.mxu0 %v3704_v24  ;;  %v3728_v18 = vld [vmem:[%s4877_s1 + $0x160] sm:$0xff]   ;;  %v2898_v22 = vcombine.high %v82_v14, %v90_v15  ;;  %v2900_v24 = vcombine.high %v83_v16, %v91_v17  ;;  %v3734_v32 = vld [vmem:[%s4877_s1 + $0x1e8] sm:$0xff]   ;;  %v2897_v34 = vcombine.low %v82_v14, %v90_v15 }
  0x1a   :  { %3244 = vmatprep.subr.bf16.mxu1 %v3705_v25  ;;  %v3729_v20 = vld [vmem:[%s4877_s1 + $0x120] sm:$0xff]   ;;  %v3735_v33 = vld [vmem:[%s4877_s1 + $0x1a8] sm:$0xff]  }
  0x1b   :  { %v3730_v23 = vld [vmem:[%s4877_s1 + $0x1e0] sm:$0xff]   ;;  %v115_v44 = vld [vmem:[%s4878_s0 + $0x308] sm:$0xff] }
  0x1c   :  { %3181 = vmatpush3.bf16.msra.mxu0 %v3706_v26  ;;  %v3731_v25 = vld [vmem:[%s4877_s1 + $0x1a0] sm:$0xff]   ;;  %v123_v45 = vld [vmem:[%s4878_s0 + $0x348] sm:$0xff] }
  0x1d   :  { %3245 = vmatpush3.bf16.msra.mxu1 %v3707_v27  ;;  %3182 = vmatprep.subr.bf16.mxu0 %v3708_v28  ;;  %v98_v26 = vld [vmem:[%s4878_s0 + $0x280] sm:$0xff]  ;;  %v3732_v28 = vld [vmem:[%s4877_s1 + $0x168] sm:$0xff]  }
  0x1e   :  { %3246 = vmatprep.subr.bf16.mxu1 %v3709_v29  ;;  %v106_v27 = vld [vmem:[%s4878_s0 + $0x2c0] sm:$0xff]  ;;  %v99_v29 = vld [vmem:[%s4878_s0 + $0x288] sm:$0xff] }
  0x1f   :  { %v2914_v36 = vcombine.high %v98_v26, %v106_v27  ;;  %v2913_v47 = vcombine.low %v98_v26, %v106_v27  ;;  %v3744_v56 = vld [vmem:[%s4877_s1 + $0x240] sm:$0xff]   ;;  %v131_v57 = vld [vmem:[%s4878_s0 + $0x388] sm:$0xff]  ;;  %v3752_v26 = vld [vmem:[%s4877_s1 + $0x250] sm:$0xff]  }
  0x20   :  { %3183 = vmatpush3.bf16.msra.mxu0 %v3710_v30  ;;  %v107_v30 = vld [vmem:[%s4878_s0 + $0x2c8] sm:$0xff]  ;;  %v3746_v58 = vld [vmem:[%s4877_s1 + $0x2c0] sm:$0xff]   ;;  %v3754_v27 = vld [vmem:[%s4877_s1 + $0x2d0] sm:$0xff]  }
  0x21   :  { %3247 = vmatpush3.bf16.msra.mxu1 %v3711_v31  ;;  %3296 = vmatprep.subr.bf16.mxu0 %v3712_v40  ;;  %v3733_v31 = vld [vmem:[%s4877_s1 + $0x128] sm:$0xff]   ;;  %v2916_v37 = vcombine.high %v99_v29, %v107_v30  ;;  %v3738_v40 = vld [vmem:[%s4877_s1 + $0x1f0] sm:$0xff]   ;;  %v3747_v15 = vld [vmem:[%s4877_s1 + $0x280] sm:$0xff]  }
  0x22   :  { %3360 = vmatprep.subr.bf16.mxu1 %v3714_v42  ;;  %v122_v42 = vld [vmem:[%s4878_s0 + $0x340] sm:$0xff]  ;;  %v139_v59 = vld [vmem:[%s4878_s0 + $0x3c8] sm:$0xff] }
  0x23   :  { %1843 = vmatmul.mubr.bf16.vlgmr.msra.gmra.mrb[0].mxu0 %v2833_v35  ;;  %v2899_v35 = vcombine.low %v83_v16, %v91_v17  ;;  %v2947_v5 = vcombine.low %v131_v57, %v139_v59  ;;  %v3748_v17 = vld [vmem:[%s4877_s1 + $0x248] sm:$0xff]  }
  0x24   :  { %1940 = vmatmul.mubr.bf16.vlgmr.msra.gmra.mrb[0].mxu1 %v2835_v38  ;;  %3297 = vmatpush3.bf16.msra.mxu0 %v3713_v41  ;;  %v3736_v38 = vld [vmem:[%s4877_s1 + $0x170] sm:$0xff]   ;;  %v114_v41 = vld [vmem:[%s4878_s0 + $0x300] sm:$0xff] }
  0x25   :  { %3361 = vmatpush3.bf16.msra.mxu1 %v3715_v43  ;;  %1850 = vmatprep.mubr.bf16.mxu0 %v2850_v46  ;;  %v3739_v43 = vld [vmem:[%s4877_s1 + $0x1b0] sm:$0xff]   ;;  %v3740_v46 = vld [vmem:[%s4877_s1 + $0x178] sm:$0xff]  }
  0x26   :  { %1947 = vmatprep.mubr.bf16.mxu1 %v2852_v49  ;;  %3298 = vmatprep.subr.bf16.mxu0 %v3716_v50  ;;  %v2915_v49 = vcombine.low %v99_v29, %v107_v30  ;;  %v2930_v50 = vcombine.high %v114_v41, %v122_v42 }
  0x27   :  { %3362 = vmatprep.subr.bf16.mxu1 %v3718_v54  ;;  %v130_v54 = vld [vmem:[%s4878_s0 + $0x380] sm:$0xff] }
  0x28   :  { %3299 = vmatpush3.bf16.msra.mxu0 %v3717_v52  ;;  %v2932_v52 = vcombine.high %v115_v44, %v123_v45 }
  0x29   :  { %3363 = vmatpush3.bf16.msra.mxu1 %v3719_v55  ;;  %3300 = vmatprep.subr.bf16.mxu0 %v3720_v62  ;;  %v138_v55 = vld [vmem:[%s4878_s0 + $0x3c0] sm:$0xff] }
  0x2a   :  { %3364 = vmatprep.subr.bf16.mxu1 %v3722_v0  ;;  %v2946_v62 = vcombine.high %v130_v54, %v138_v55  ;;  %v20_v0 = vld [vmem:[%s4878_s0 + $0x10] sm:$0xff]  ;;  %v2945_v4 = vcombine.low %v130_v54, %v138_v55  ;;  %v85_v54 = vld [vmem:[%s4878_s0 + $0x218] sm:$0xff] }
  0x2b   :  { %1851 = vmatmul.mubr.bf16.gmra.mrb[4].mxu0 %v2849_v51  ;;  %v3742_v51 = vld [vmem:[%s4877_s1 + $0x1f8] sm:$0xff]  }
  0x2c   :  { %1948 = vmatmul.mubr.bf16.gmra.mrb[4].mxu1 %v2851_v53  ;;  %1858 = vmatprep.mubr.bf16.mxu0 %v2866_v60  ;;  %v3743_v53 = vld [vmem:[%s4877_s1 + $0x1b8] sm:$0xff]   ;;  %v2929_v60 = vcombine.low %v114_v41, %v122_v42  ;;  %v3760_v42 = vld [vmem:[%s4877_s1 + $0x260] sm:$0xff]  }
  0x2d   :  { %1955 = vmatprep.mubr.bf16.mxu1 %v2868_v61  ;;  %3301 = vmatpush3.bf16.msra.mxu0 %v3721_v63  ;;  %v2931_v61 = vcombine.low %v115_v44, %v123_v45  ;;  %v2948_v63 = vcombine.high %v131_v57, %v139_v59  ;;  %v3759_v41 = vld [vmem:[%s4877_s1 + $0x298] sm:$0xff]   ;;  %v3762_v44 = vld [vmem:[%s4877_s1 + $0x2e0] sm:$0xff]   ;;  %v3767_v57 = vld [vmem:[%s4877_s1 + $0x2a8] sm:$0xff]  }
  0x2e   :  { %3365 = vmatpush3.bf16.msra.mxu1 %v3723_v1  ;;  %3302 = vmatprep.subr.bf16.mxu0 %v3724_v10  ;;  %v28_v1 = vld [vmem:[%s4878_s0 + $0x50] sm:$0xff]  ;;  %v93_v55 = vld [vmem:[%s4878_s0 + $0x258] sm:$0xff] }
  0x2f   :  { %3366 = vmatprep.subr.bf16.mxu1 %v3726_v12  ;;  %v2837_v10 = vcombine.low %v20_v0, %v28_v1  ;;  %v37_v12 = vld [vmem:[%s4878_s0 + $0x98] sm:$0xff] }
  0x31   :  { %3303 = vmatpush3.bf16.msra.mxu0 %v3725_v11  ;;  %v3745_v11 = vld [vmem:[%s4877_s1 + $0x200] sm:$0xff]  }
  0x32   :  { %3367 = vmatpush3.bf16.msra.mxu1 %v3727_v13  ;;  %3304 = vmatprep.subr.bf16.mxu0 %v3728_v18  ;;  %v45_v13 = vld [vmem:[%s4878_s0 + $0xd8] sm:$0xff] }
  0x33   :  { %1859 = vmatmul.mubr.bf16.gmra.mrb[8].mxu0 %v2865_v2  ;;  %3368 = vmatprep.subr.bf16.mxu1 %v3730_v23  ;;  %v21_v2 = vld [vmem:[%s4878_s0 + $0x18] sm:$0xff]  ;;  %v2856_v18 = vcombine.high %v37_v12, %v45_v13  ;;  %v60_v23 = vld [vmem:[%s4878_s0 + $0x150] sm:$0xff]  ;;  %v2855_v29 = vcombine.low %v37_v12, %v45_v13  ;;  %v3778_v12 = vld [vmem:[%s4877_s1 + $0x3c0] sm:$0xff]   ;;  %v2903_v13 = vcombine.low %v85_v54, %v93_v55 }
  0x34   :  { %1956 = vmatmul.mubr.bf16.gmra.mrb[8].mxu1 %v2867_v6  ;;  %1866 = vmatprep.mubr.bf16.mxu0 %v2882_v7  ;;  %v2838_v6 = vcombine.high %v20_v0, %v28_v1  ;;  %v2840_v7 = vcombine.high %v21_v2, %v29_v3  ;;  %v2839_v14 = vcombine.low %v21_v2, %v29_v3  ;;  %v3769_v0 = vld [vmem:[%s4877_s1 + $0x230] sm:$0xff]   ;;  %v3772_v2 = vld [vmem:[%s4877_s1 + $0x278] sm:$0xff]  }
  0x35   :  { %1963 = vmatprep.mubr.bf16.mxu1 %v2884_v9  ;;  %3305 = vmatpush3.bf16.msra.mxu0 %v3729_v20  ;;  %v44_v9 = vld [vmem:[%s4878_s0 + $0xd0] sm:$0xff]  ;;  %v3750_v20 = vld [vmem:[%s4877_s1 + $0x2c8] sm:$0xff]  }
  0x36   :  { %3369 = vmatpush3.bf16.msra.mxu1 %v3731_v25  ;;  %3306 = vmatprep.subr.bf16.mxu0 %v3732_v28  ;;  %v2854_v16 = vcombine.high %v36_v8, %v44_v9  ;;  %v61_v25 = vld [vmem:[%s4878_s0 + $0x158] sm:$0xff]  ;;  %v2853_v28 = vcombine.low %v36_v8, %v44_v9  ;;  %v3771_v1 = vld [vmem:[%s4877_s1 + $0x2b0] sm:$0xff]  }
  0x37   :  { %3370 = vmatprep.subr.bf16.mxu1 %v3734_v32  ;;  %v3753_v32 = vld [vmem:[%s4877_s1 + $0x210] sm:$0xff]   ;;  %v3773_v8 = vld [vmem:[%s4877_s1 + $0x238] sm:$0xff]  }
  0x38   :  { %v100_v3 = vld [vmem:[%s4878_s0 + $0x290] sm:$0xff]  ;;  %v3775_v9 = vld [vmem:[%s4877_s1 + $0x2b8] sm:$0xff]  }
  0x39   :  { %3307 = vmatpush3.bf16.msra.mxu0 %v3733_v31 }
  0x3a   :  { %3371 = vmatpush3.bf16.msra.mxu1 %v3735_v33  ;;  %3308 = vmatprep.subr.bf16.mxu0 %v3736_v38  ;;  %v3755_v33 = vld [vmem:[%s4877_s1 + $0x290] sm:$0xff]   ;;  %v69_v38 = vld [vmem:[%s4878_s0 + $0x198] sm:$0xff] }
  0x3b   :  { %1867 = vmatmul.mubr.bf16.gmra.mrb[12].mxu0 %v2881_v19  ;;  %3372 = vmatprep.subr.bf16.mxu1 %v3738_v40  ;;  %v3749_v19 = vld [vmem:[%s4877_s1 + $0x208] sm:$0xff]   ;;  %v3757_v40 = vld [vmem:[%s4877_s1 + $0x218] sm:$0xff]  }
  0x3c   :  { %1964 = vmatmul.mubr.bf16.gmra.mrb[12].mxu1 %v2883_v21  ;;  %1874 = vmatprep.mubr.bf16.mxu0 %v2898_v22  ;;  %v3751_v21 = vld [vmem:[%s4877_s1 + $0x288] sm:$0xff]   ;;  %v52_v22 = vld [vmem:[%s4878_s0 + $0x110] sm:$0xff] }
  0x3d   :  { %1971 = vmatprep.mubr.bf16.mxu1 %v2900_v24  ;;  %3309 = vmatpush3.bf16.msra.mxu0 %v3737_v39  ;;  %v53_v24 = vld [vmem:[%s4878_s0 + $0x118] sm:$0xff]  ;;  %v2870_v30 = vcombine.high %v52_v22, %v60_v23 }
  0x3e   :  { %3373 = vmatpush3.bf16.msra.mxu1 %v3739_v43  ;;  %3310 = vmatprep.subr.bf16.mxu0 %v3740_v46  ;;  %v2872_v31 = vcombine.high %v53_v24, %v61_v25  ;;  %v77_v39 = vld [vmem:[%s4878_s0 + $0x1d8] sm:$0xff]  ;;  %v2869_v43 = vcombine.low %v52_v22, %v60_v23  ;;  %v2871_v45 = vcombine.low %v53_v24, %v61_v25  ;;  %v132_v24 = vld [vmem:[%s4878_s0 + $0x390] sm:$0xff] }
  0x3f   :  { %3374 = vmatprep.subr.bf16.mxu1 %v3742_v51  ;;  %v84_v51 = vld [vmem:[%s4878_s0 + $0x210] sm:$0xff] }
  0x40   :  { %v140_v25 = vld [vmem:[%s4878_s0 + $0x3d0] sm:$0xff] }
  0x41   :  { %3311 = vmatpush3.bf16.msra.mxu0 %v3741_v48  ;;  %v2888_v48 = vcombine.high %v69_v38, %v77_v39 }
  0x42   :  { %3375 = vmatpush3.bf16.msra.mxu1 %v3743_v53  ;;  %3424 = vmatprep.subr.bf16.mxu0 %v3744_v56  ;;  %v92_v53 = vld [vmem:[%s4878_s0 + $0x250] sm:$0xff]  ;;  %v3765_v56 = vld [vmem:[%s4877_s1 + $0x228] sm:$0xff]  }
  0x43   :  { %1875 = vmatmul.mubr.bf16.gmra.mrb[16].mxu0 %v2897_v34  ;;  %3488 = vmatprep.subr.bf16.mxu1 %v3746_v58  ;;  %v3756_v34 = vld [vmem:[%s4877_s1 + $0x258] sm:$0xff]   ;;  %v3768_v58 = vld [vmem:[%s4877_s1 + $0x270] sm:$0xff]  }
  0x44   :  { %1972 = vmatmul.mubr.bf16.gmra.mrb[16].mxu1 %v2899_v35  ;;  %1882 = vmatprep.mubr.bf16.mxu0 %v2914_v36  ;;  %v68_v35 = vld [vmem:[%s4878_s0 + $0x190] sm:$0xff] }
  0x45   :  { %1979 = vmatprep.mubr.bf16.mxu1 %v2916_v37  ;;  %v76_v36 = vld [vmem:[%s4878_s0 + $0x1d0] sm:$0xff]  ;;  %v3758_v37 = vld [vmem:[%s4877_s1 + $0x2d8] sm:$0xff]  }
  0x46   :  { %v2886_v46 = vcombine.high %v68_v35, %v76_v36  ;;  %v2885_v59 = vcombine.low %v68_v35, %v76_v36  ;;  %v31_v35 = vld [vmem:[%s4878_s0 + $0x68] sm:$0xff]  ;;  %v2949_v36 = vcombine.low %v132_v24, %v140_v25 }
  0x4b   :  { %1883 = vmatmul.mubr.bf16.gmra.mrb[20].mxu0 %v2913_v47  ;;  %v3761_v47 = vld [vmem:[%s4877_s1 + $0x220] sm:$0xff]  }
  0x4c   :  { %1980 = vmatmul.mubr.bf16.gmra.mrb[20].mxu1 %v2915_v49  ;;  %1890 = vmatprep.mubr.bf16.mxu0 %v2930_v50  ;;  %v3763_v49 = vld [vmem:[%s4877_s1 + $0x2a0] sm:$0xff]   ;;  %v3764_v50 = vld [vmem:[%s4877_s1 + $0x268] sm:$0xff]  }
  0x4d   :  { %1987 = vmatprep.mubr.bf16.mxu1 %v2932_v52  ;;  %v3766_v52 = vld [vmem:[%s4877_s1 + $0x2e8] sm:$0xff]  }
  0x53   :  { %1891 = vmatmul.mubr.bf16.gmra.mrb[24].mxu0 %v2929_v60  ;;  %v3770_v60 = vld [vmem:[%s4877_s1 + $0x2f0] sm:$0xff]  }
  0x54   :  { %1988 = vmatmul.mubr.bf16.gmra.mrb[24].mxu1 %v2931_v61  ;;  %1898 = vmatprep.mubr.bf16.mxu0 %v2946_v62  ;;  %v2887_v61 = vcombine.low %v69_v38, %v77_v39  ;;  %v2902_v62 = vcombine.high %v84_v51, %v92_v53 }
  0x55   :  { %1995 = vmatprep.mubr.bf16.mxu1 %v2948_v63  ;;  %v2904_v63 = vcombine.high %v85_v54, %v93_v55  ;;  %v54_v54 = vld [vmem:[%s4878_s0 + $0x120] sm:$0xff] }
  0x56   :  { %v62_v55 = vld [vmem:[%s4878_s0 + $0x160] sm:$0xff] }
  0x5b   :  { %1899 = vmatmul.mubr.bf16.gmra.mrb[28].mxu0 %v2945_v4  ;;  %v108_v4 = vld [vmem:[%s4878_s0 + $0x2d0] sm:$0xff] }
  0x5c   :  { %1996 = vmatmul.mubr.bf16.gmra.mrb[28].mxu1 %v2947_v5  ;;  %2036 = vmatprep.mubr.bf16.mxu0 %v2838_v6  ;;  %v3774_v5 = vld [vmem:[%s4877_s1 + $0x2f8] sm:$0xff]  }
  0x5d   :  { %2133 = vmatprep.mubr.bf16.mxu1 %v2840_v7  ;;  %v101_v6 = vld [vmem:[%s4878_s0 + $0x298] sm:$0xff] }
  0x5e   :  { %v109_v7 = vld [vmem:[%s4878_s0 + $0x2d8] sm:$0xff] }
  0x63   :  { %2037 = vmatmul.mubr.bf16.vlgmr.msra.gmra.mrb[32].mxu0 %v2837_v10  ;;  %v3776_v10 = vld [vmem:[%s4877_s1 + $0x340] sm:$0xff]  }
  0x64   :  { %2134 = vmatmul.mubr.bf16.vlgmr.msra.gmra.mrb[32].mxu1 %v2839_v14  ;;  %3425 = vmatpush3.bf16.msra.mxu0 %v3745_v11  ;;  %v2901_v11 = vcombine.low %v84_v51, %v92_v53  ;;  %v2918_v14 = vcombine.high %v100_v3, %v108_v4  ;;  %v3782_v51 = vld [vmem:[%s4877_s1 + $0x3c8] sm:$0xff]  }
  0x65   :  { %3489 = vmatpush3.bf16.msra.mxu1 %v3747_v15  ;;  %2044 = vmatprep.mubr.bf16.mxu0 %v2854_v16  ;;  %v2920_v15 = vcombine.high %v101_v6, %v109_v7  ;;  %v116_v16 = vld [vmem:[%s4878_s0 + $0x310] sm:$0xff]  ;;  %v3783_v53 = vld [vmem:[%s4877_s1 + $0x388] sm:$0xff]  }
  0x66   :  { %2141 = vmatprep.mubr.bf16.mxu1 %v2856_v18  ;;  %3426 = vmatprep.subr.bf16.mxu0 %v3748_v17  ;;  %v124_v17 = vld [vmem:[%s4878_s0 + $0x350] sm:$0xff]  ;;  %v117_v18 = vld [vmem:[%s4878_s0 + $0x318] sm:$0xff] }
  0x67   :  { %3490 = vmatprep.subr.bf16.mxu1 %v3750_v20  ;;  %v2917_v20 = vcombine.low %v100_v3, %v108_v4  ;;  %v2934_v22 = vcombine.high %v116_v16, %v124_v17  ;;  %v3790_v3 = vld [vmem:[%s4877_s1 + $0x3d8] sm:$0xff]   ;;  %v70_v4 = vld [vmem:[%s4878_s0 + $0x1a0] sm:$0xff] }
  0x68   :  { %3427 = vmatpush3.bf16.msra.mxu0 %v3749_v19  ;;  %v125_v19 = vld [vmem:[%s4878_s0 + $0x358] sm:$0xff] }
  0x69   :  { %3491 = vmatpush3.bf16.msra.mxu1 %v3751_v21  ;;  %3428 = vmatprep.subr.bf16.mxu0 %v3752_v26  ;;  %v2919_v21 = vcombine.low %v101_v6, %v109_v7  ;;  %v2936_v23 = vcombine.high %v117_v18, %v125_v19  ;;  %v133_v26 = vld [vmem:[%s4878_s0 + $0x398] sm:$0xff]  ;;  %v71_v6 = vld [vmem:[%s4878_s0 + $0x1a8] sm:$0xff] }
  0x6a   :  { %3492 = vmatprep.subr.bf16.mxu1 %v3754_v27  ;;  %v141_v27 = vld [vmem:[%s4878_s0 + $0x3d8] sm:$0xff] }
  0x6b   :  { %2045 = vmatmul.mubr.bf16.gmra.mrb[36].mxu0 %v2853_v28  ;;  %v2933_v28 = vcombine.low %v116_v16, %v124_v17  ;;  %v3789_v7 = vld [vmem:[%s4877_s1 + $0x318] sm:$0xff]   ;;  %v3793_v16 = vld [vmem:[%s4877_s1 + $0x320] sm:$0xff]  }
  0x6c   :  { %2142 = vmatmul.mubr.bf16.gmra.mrb[36].mxu1 %v2855_v29  ;;  %2052 = vmatprep.mubr.bf16.mxu0 %v2870_v30  ;;  %v2935_v29 = vcombine.low %v117_v18, %v125_v19  ;;  %v2950_v30 = vcombine.high %v132_v24, %v140_v25  ;;  %v3795_v17 = vld [vmem:[%s4877_s1 + $0x3a0] sm:$0xff]   ;;  %v3796_v18 = vld [vmem:[%s4877_s1 + $0x368] sm:$0xff]  }
  0x6d   :  { %2149 = vmatprep.mubr.bf16.mxu1 %v2872_v31  ;;  %3429 = vmatpush3.bf16.msra.mxu0 %v3753_v32  ;;  %v2952_v31 = vcombine.high %v133_v26, %v141_v27  ;;  %v22_v32 = vld [vmem:[%s4878_s0 + $0x20] sm:$0xff]  ;;  %v3798_v19 = vld [vmem:[%s4877_s1 + $0x3e8] sm:$0xff]  }
  0x6e   :  { %3493 = vmatpush3.bf16.msra.mxu1 %v3755_v33  ;;  %3430 = vmatprep.subr.bf16.mxu0 %v3756_v34  ;;  %v30_v33 = vld [vmem:[%s4878_s0 + $0x60] sm:$0xff]  ;;  %v23_v34 = vld [vmem:[%s4878_s0 + $0x28] sm:$0xff] }
  0x6f   :  { %3494 = vmatprep.subr.bf16.mxu1 %v3758_v37  ;;  %v2951_v37 = vcombine.low %v133_v26, %v141_v27  ;;  %v2842_v38 = vcombine.high %v22_v32, %v30_v33  ;;  %v2844_v39 = vcombine.high %v23_v34, %v31_v35  ;;  %v95_v24 = vld [vmem:[%s4878_s0 + $0x268] sm:$0xff]  ;;  %v3800_v26 = vld [vmem:[%s4877_s1 + $0x370] sm:$0xff]  }
  0x70   :  { %v3799_v25 = vld [vmem:[%s4877_s1 + $0x3a8] sm:$0xff]  }
  0x71   :  { %3431 = vmatpush3.bf16.msra.mxu0 %v3757_v40  ;;  %v38_v40 = vld [vmem:[%s4878_s0 + $0xa0] sm:$0xff] }
  0x72   :  { %3495 = vmatpush3.bf16.msra.mxu1 %v3759_v41  ;;  %3432 = vmatprep.subr.bf16.mxu0 %v3760_v42  ;;  %v46_v41 = vld [vmem:[%s4878_s0 + $0xe0] sm:$0xff]  ;;  %v2841_v42 = vcombine.low %v22_v32, %v30_v33  ;;  %v3801_v32 = vld [vmem:[%s4877_s1 + $0x330] sm:$0xff]  }
  0x73   :  { %2053 = vmatmul.mubr.bf16.gmra.mrb[40].mxu0 %v2869_v43  ;;  %3496 = vmatprep.subr.bf16.mxu1 %v3762_v44  ;;  %v39_v43 = vld [vmem:[%s4878_s0 + $0xa8] sm:$0xff]  ;;  %v3803_v33 = vld [vmem:[%s4877_s1 + $0x3b0] sm:$0xff]  }
  0x74   :  { %2150 = vmatmul.mubr.bf16.gmra.mrb[40].mxu1 %v2871_v45  ;;  %2060 = vmatprep.mubr.bf16.mxu0 %v2886_v46  ;;  %v47_v44 = vld [vmem:[%s4878_s0 + $0xe8] sm:$0xff]  ;;  %v2843_v45 = vcombine.low %v23_v34, %v31_v35  ;;  %v3777_v46 = vld [vmem:[%s4877_s1 + $0x300] sm:$0xff]   ;;  %v3804_v34 = vld [vmem:[%s4877_s1 + $0x378] sm:$0xff]  }
  0x75   :  { %2157 = vmatprep.mubr.bf16.mxu1 %v2888_v48  ;;  %3433 = vmatpush3.bf16.msra.mxu0 %v3761_v47  ;;  %v3779_v47 = vld [vmem:[%s4877_s1 + $0x380] sm:$0xff]   ;;  %v2858_v48 = vcombine.high %v38_v40, %v46_v41  ;;  %v3806_v35 = vld [vmem:[%s4877_s1 + $0x3f8] sm:$0xff]  }
  0x76   :  { %3497 = vmatpush3.bf16.msra.mxu1 %v3763_v49  ;;  %3434 = vmatprep.subr.bf16.mxu0 %v3764_v50  ;;  %v2860_v49 = vcombine.high %v39_v43, %v47_v44  ;;  %v3780_v50 = vld [vmem:[%s4877_s1 + $0x348] sm:$0xff]  }
  0x77   :  { %3498 = vmatprep.subr.bf16.mxu1 %v3766_v52  ;;  %v3781_v52 = vld [vmem:[%s4877_s1 + $0x308] sm:$0xff]  }
  0x79   :  { %3435 = vmatpush3.bf16.msra.mxu0 %v3765_v56  ;;  %v3784_v56 = vld [vmem:[%s4877_s1 + $0x350] sm:$0xff]  }
  0x7a   :  { %3499 = vmatpush3.bf16.msra.mxu1 %v3767_v57  ;;  %3436 = vmatprep.subr.bf16.mxu0 %v3768_v58  ;;  %v55_v57 = vld [vmem:[%s4878_s0 + $0x128] sm:$0xff] }
  0x7b   :  { %2061 = vmatmul.mubr.bf16.gmra.mrb[44].mxu0 %v2885_v59  ;;  %3500 = vmatprep.subr.bf16.mxu1 %v3770_v60  ;;  %v63_v58 = vld [vmem:[%s4878_s0 + $0x168] sm:$0xff]  ;;  %v3786_v59 = vld [vmem:[%s4877_s1 + $0x3d0] sm:$0xff]   ;;  %v2857_v60 = vcombine.low %v38_v40, %v46_v41  ;;  %v3807_v41 = vld [vmem:[%s4877_s1 + $0x3b8] sm:$0xff]  }
  0x7c   :  { %2158 = vmatmul.mubr.bf16.gmra.mrb[44].mxu1 %v2887_v61  ;;  %2068 = vmatprep.mubr.bf16.mxu0 %v2902_v62  ;;  %v2859_v61 = vcombine.low %v39_v43, %v47_v44  ;;  %v2874_v62 = vcombine.high %v54_v54, %v62_v55  ;;  %v111_v40 = vld [vmem:[%s4878_s0 + $0x2e8] sm:$0xff] }
  0x7d   :  { %2165 = vmatprep.mubr.bf16.mxu1 %v2904_v63  ;;  %3437 = vmatpush3.bf16.msra.mxu0 %v3769_v0  ;;  %v2876_v63 = vcombine.high %v55_v57, %v63_v58  ;;  %v3785_v0 = vld [vmem:[%s4877_s1 + $0x310] sm:$0xff]  }
  0x7e   :  { %3501 = vmatpush3.bf16.msra.mxu1 %v3771_v1  ;;  %3438 = vmatprep.subr.bf16.mxu0 %v3772_v2  ;;  %v3787_v1 = vld [vmem:[%s4877_s1 + $0x390] sm:$0xff]   ;;  %v3788_v2 = vld [vmem:[%s4877_s1 + $0x358] sm:$0xff]  }
  0x7f   :  { %3502 = vmatprep.subr.bf16.mxu1 %v3774_v5  ;;  %v78_v5 = vld [vmem:[%s4878_s0 + $0x1e0] sm:$0xff] }
  0x80   :  { %v2889_v27 = vcombine.low %v70_v4, %v78_v5 }
  0x81   :  { %3439 = vmatpush3.bf16.msra.mxu0 %v3773_v8  ;;  %v79_v8 = vld [vmem:[%s4878_s0 + $0x1e8] sm:$0xff] }
  0x82   :  { %3503 = vmatpush3.bf16.msra.mxu1 %v3775_v9  ;;  %3552 = vmatprep.subr.bf16.mxu0 %v3776_v10  ;;  %v3791_v9 = vld [vmem:[%s4877_s1 + $0x398] sm:$0xff]   ;;  %v3792_v10 = vld [vmem:[%s4877_s1 + $0x360] sm:$0xff]  }
  0x83   :  { %2069 = vmatmul.mubr.bf16.gmra.mrb[48].mxu0 %v2901_v11  ;;  %3616 = vmatprep.subr.bf16.mxu1 %v3778_v12  ;;  %v2873_v11 = vcombine.low %v54_v54, %v62_v55  ;;  %v3794_v12 = vld [vmem:[%s4877_s1 + $0x3e0] sm:$0xff]  }
  0x84   :  { %2166 = vmatmul.mubr.bf16.gmra.mrb[48].mxu1 %v2903_v13  ;;  %2076 = vmatprep.mubr.bf16.mxu0 %v2918_v14  ;;  %v2875_v13 = vcombine.low %v55_v57, %v63_v58  ;;  %v2890_v14 = vcombine.high %v70_v4, %v78_v5  ;;  %v134_v54 = vld [vmem:[%s4878_s0 + $0x3a0] sm:$0xff]  ;;  %v143_v57 = vld [vmem:[%s4878_s0 + $0x3e8] sm:$0xff] }
  0x85   :  { %2173 = vmatprep.mubr.bf16.mxu1 %v2920_v15  ;;  %v2892_v15 = vcombine.high %v71_v6, %v79_v8  ;;  %v142_v55 = vld [vmem:[%s4878_s0 + $0x3e0] sm:$0xff] }
  0x8b   :  { %2077 = vmatmul.mubr.bf16.gmra.mrb[52].mxu0 %v2917_v20  ;;  %v86_v20 = vld [vmem:[%s4878_s0 + $0x220] sm:$0xff] }
  0x8c   :  { %2174 = vmatmul.mubr.bf16.gmra.mrb[52].mxu1 %v2919_v21  ;;  %2084 = vmatprep.mubr.bf16.mxu0 %v2934_v22  ;;  %v94_v21 = vld [vmem:[%s4878_s0 + $0x260] sm:$0xff]  ;;  %v87_v22 = vld [vmem:[%s4878_s0 + $0x228] sm:$0xff] }
  0x8d   :  { %2181 = vmatprep.mubr.bf16.mxu1 %v2936_v23  ;;  %v3797_v23 = vld [vmem:[%s4877_s1 + $0x328] sm:$0xff]   ;;  %v2907_v43 = vcombine.low %v87_v22, %v95_v24 }
  0x93   :  { %2085 = vmatmul.mubr.bf16.gmra.mrb[56].mxu0 %v2933_v28  ;;  %v3802_v28 = vld [vmem:[%s4877_s1 + $0x3f0] sm:$0xff]  }
  0x94   :  { %2182 = vmatmul.mubr.bf16.gmra.mrb[56].mxu1 %v2935_v29  ;;  %2092 = vmatprep.mubr.bf16.mxu0 %v2950_v30  ;;  %v2891_v29 = vcombine.low %v71_v6, %v79_v8  ;;  %v2906_v30 = vcombine.high %v86_v20, %v94_v21  ;;  %v40_v6 = vld [vmem:[%s4878_s0 + $0xb0] sm:$0xff]  ;;  %v41_v8 = vld [vmem:[%s4878_s0 + $0xb8] sm:$0xff] }
  0x95   :  { %2189 = vmatprep.mubr.bf16.mxu1 %v2952_v31  ;;  %v2908_v31 = vcombine.high %v87_v22, %v95_v24  ;;  %v72_v22 = vld [vmem:[%s4878_s0 + $0x1b0] sm:$0xff]  ;;  %v73_v24 = vld [vmem:[%s4878_s0 + $0x1b8] sm:$0xff] }
  0x9b   :  { %2093 = vmatmul.mubr.bf16.gmra.mrb[60].mxu0 %v2949_v36  ;;  %v102_v36 = vld [vmem:[%s4878_s0 + $0x2a0] sm:$0xff] }
  0x9c   :  { %2190 = vmatmul.mubr.bf16.gmra.mrb[60].mxu1 %v2951_v37  ;;  %2230 = vmatprep.mubr.bf16.mxu0 %v2842_v38  ;;  %v110_v37 = vld [vmem:[%s4878_s0 + $0x2e0] sm:$0xff]  ;;  %v3805_v38 = vld [vmem:[%s4877_s1 + $0x338] sm:$0xff]  }
  0x9d   :  { %2327 = vmatprep.mubr.bf16.mxu1 %v2844_v39  ;;  %v103_v39 = vld [vmem:[%s4878_s0 + $0x2a8] sm:$0xff]  ;;  %v2922_v44 = vcombine.high %v102_v36, %v110_v37 }
  0xa3   :  { %2231 = vmatmul.mubr.bf16.vlgmr.msra.gmra.mrb[64].mxu0 %v2841_v42  ;;  %v2905_v42 = vcombine.low %v86_v20, %v94_v21 }
  0xa4   :  { %2328 = vmatmul.mubr.bf16.vlgmr.msra.gmra.mrb[64].mxu1 %v2843_v45  ;;  %3553 = vmatpush3.bf16.msra.mxu0 %v3777_v46  ;;  %v2924_v45 = vcombine.high %v103_v39, %v111_v40  ;;  %v118_v46 = vld [vmem:[%s4878_s0 + $0x320] sm:$0xff] }
  0xa5   :  { %3617 = vmatpush3.bf16.msra.mxu1 %v3779_v47  ;;  %2238 = vmatprep.mubr.bf16.mxu0 %v2858_v48  ;;  %v126_v47 = vld [vmem:[%s4878_s0 + $0x360] sm:$0xff]  ;;  %v119_v48 = vld [vmem:[%s4878_s0 + $0x328] sm:$0xff] }
  0xa6   :  { %2335 = vmatprep.mubr.bf16.mxu1 %v2860_v49  ;;  %3554 = vmatprep.subr.bf16.mxu0 %v3780_v50  ;;  %v127_v49 = vld [vmem:[%s4878_s0 + $0x368] sm:$0xff]  ;;  %v2921_v50 = vcombine.low %v102_v36, %v110_v37  ;;  %v2937_v58 = vcombine.low %v118_v46, %v126_v47 }
  0xa7   :  { %3618 = vmatprep.subr.bf16.mxu1 %v3782_v51  ;;  %v2923_v51 = vcombine.low %v103_v39, %v111_v40 }
  0xa8   :  { %3555 = vmatpush3.bf16.msra.mxu0 %v3781_v52  ;;  %v2938_v52 = vcombine.high %v118_v46, %v126_v47 }
  0xa9   :  { %3619 = vmatpush3.bf16.msra.mxu1 %v3783_v53  ;;  %3556 = vmatprep.subr.bf16.mxu0 %v3784_v56  ;;  %v2940_v53 = vcombine.high %v119_v48, %v127_v49  ;;  %v135_v56 = vld [vmem:[%s4878_s0 + $0x3a8] sm:$0xff] }
  0xaa   :  { %3620 = vmatprep.subr.bf16.mxu1 %v3786_v59  ;;  %v2939_v59 = vcombine.low %v119_v48, %v127_v49 }
  0xab   :  { %2239 = vmatmul.mubr.bf16.gmra.mrb[68].mxu0 %v2857_v60  ;;  %v2954_v60 = vcombine.high %v134_v54, %v142_v55 }
  0xac   :  { %2336 = vmatmul.mubr.bf16.gmra.mrb[68].mxu1 %v2859_v61  ;;  %2246 = vmatprep.mubr.bf16.mxu0 %v2874_v62  ;;  %v2956_v61 = vcombine.high %v135_v56, %v143_v57  ;;  %v24_v62 = vld [vmem:[%s4878_s0 + $0x30] sm:$0xff] }
  0xad   :  { %2343 = vmatprep.mubr.bf16.mxu1 %v2876_v63  ;;  %3557 = vmatpush3.bf16.msra.mxu0 %v3785_v0  ;;  %v32_v63 = vld [vmem:[%s4878_s0 + $0x70] sm:$0xff]  ;;  %v25_v0 = vld [vmem:[%s4878_s0 + $0x38] sm:$0xff] }
  0xae   :  { %3621 = vmatpush3.bf16.msra.mxu1 %v3787_v1  ;;  %3558 = vmatprep.subr.bf16.mxu0 %v3788_v2  ;;  %v33_v1 = vld [vmem:[%s4878_s0 + $0x78] sm:$0xff]  ;;  %v2953_v2 = vcombine.low %v134_v54, %v142_v55  ;;  %v2846_v4 = vcombine.high %v24_v62, %v32_v63 }
  0xaf   :  { %3622 = vmatprep.subr.bf16.mxu1 %v3790_v3  ;;  %v2955_v3 = vcombine.low %v135_v56, %v143_v57  ;;  %v2848_v5 = vcombine.high %v25_v0, %v33_v1  ;;  %v105_v55 = vld [vmem:[%s4878_s0 + $0x2b8] sm:$0xff] }
  0xb0   :  { %v113_v56 = vld [vmem:[%s4878_s0 + $0x2f8] sm:$0xff] }
  0xb1   :  { %3559 = vmatpush3.bf16.msra.mxu0 %v3789_v7  ;;  %v48_v7 = vld [vmem:[%s4878_s0 + $0xf0] sm:$0xff] }
  0xb2   :  { %3623 = vmatpush3.bf16.msra.mxu1 %v3791_v9  ;;  %3560 = vmatprep.subr.bf16.mxu0 %v3792_v10  ;;  %v49_v9 = vld [vmem:[%s4878_s0 + $0xf8] sm:$0xff]  ;;  %v2845_v10 = vcombine.low %v24_v62, %v32_v63 }
  0xb3   :  { %2247 = vmatmul.mubr.bf16.gmra.mrb[72].mxu0 %v2873_v11  ;;  %3624 = vmatprep.subr.bf16.mxu1 %v3794_v12  ;;  %v2847_v11 = vcombine.low %v25_v0, %v33_v1  ;;  %v2862_v12 = vcombine.high %v40_v6, %v48_v7 }
  0xb4   :  { %2344 = vmatmul.mubr.bf16.gmra.mrb[72].mxu1 %v2875_v13  ;;  %2254 = vmatprep.mubr.bf16.mxu0 %v2890_v14  ;;  %v2864_v13 = vcombine.high %v41_v8, %v49_v9  ;;  %v56_v14 = vld [vmem:[%s4878_s0 + $0x130] sm:$0xff] }
  0xb5   :  { %2351 = vmatprep.mubr.bf16.mxu1 %v2892_v15  ;;  %3561 = vmatpush3.bf16.msra.mxu0 %v3793_v16  ;;  %v64_v15 = vld [vmem:[%s4878_s0 + $0x170] sm:$0xff]  ;;  %v57_v16 = vld [vmem:[%s4878_s0 + $0x138] sm:$0xff] }
  0xb6   :  { %3625 = vmatpush3.bf16.msra.mxu1 %v3795_v17  ;;  %3562 = vmatprep.subr.bf16.mxu0 %v3796_v18  ;;  %v65_v17 = vld [vmem:[%s4878_s0 + $0x178] sm:$0xff]  ;;  %v2861_v18 = vcombine.low %v40_v6, %v48_v7  ;;  %v2878_v20 = vcombine.high %v56_v14, %v64_v15 }
  0xb7   :  { %3626 = vmatprep.subr.bf16.mxu1 %v3798_v19  ;;  %v2863_v19 = vcombine.low %v41_v8, %v49_v9  ;;  %v2880_v21 = vcombine.high %v57_v16, %v65_v17 }
  0xb9   :  { %3563 = vmatpush3.bf16.msra.mxu0 %v3797_v23  ;;  %v80_v23 = vld [vmem:[%s4878_s0 + $0x1f0] sm:$0xff] }
  0xba   :  { %3627 = vmatpush3.bf16.msra.mxu1 %v3799_v25  ;;  %3564 = vmatprep.subr.bf16.mxu0 %v3800_v26  ;;  %v81_v25 = vld [vmem:[%s4878_s0 + $0x1f8] sm:$0xff]  ;;  %v2877_v26 = vcombine.low %v56_v14, %v64_v15  ;;  %v2893_v37 = vcombine.low %v72_v22, %v80_v23 }
  0xbb   :  { %2255 = vmatmul.mubr.bf16.gmra.mrb[76].mxu0 %v2889_v27  ;;  %3628 = vmatprep.subr.bf16.mxu1 %v3802_v28  ;;  %v2879_v27 = vcombine.low %v57_v16, %v65_v17  ;;  %v2894_v28 = vcombine.high %v72_v22, %v80_v23  ;;  %v129_v14 = vld [vmem:[%s4878_s0 + $0x378] sm:$0xff] }
  0xbc   :  { %2352 = vmatmul.mubr.bf16.gmra.mrb[76].mxu1 %v2891_v29  ;;  %2262 = vmatprep.mubr.bf16.mxu0 %v2906_v30  ;;  %v2896_v29 = vcombine.high %v73_v24, %v81_v25  ;;  %v88_v30 = vld [vmem:[%s4878_s0 + $0x230] sm:$0xff] }
  0xbd   :  { %2359 = vmatprep.mubr.bf16.mxu1 %v2908_v31  ;;  %3565 = vmatpush3.bf16.msra.mxu0 %v3801_v32  ;;  %v96_v31 = vld [vmem:[%s4878_s0 + $0x270] sm:$0xff] }
  0xbe   :  { %3629 = vmatpush3.bf16.msra.mxu1 %v3803_v33  ;;  %3566 = vmatprep.subr.bf16.mxu0 %v3804_v34  ;;  %v89_v33 = vld [vmem:[%s4878_s0 + $0x238] sm:$0xff] }
  0xbf   :  { %3630 = vmatprep.subr.bf16.mxu1 %v3806_v35  ;;  %v97_v34 = vld [vmem:[%s4878_s0 + $0x278] sm:$0xff] }
  0xc0   :  { %v2912_v46 = vcombine.high %v89_v33, %v97_v34  ;;  %v2911_v63 = vcombine.low %v89_v33, %v97_v34  ;;  %v144_v33 = vld [vmem:[%s4878_s0 + $0x3f0] sm:$0xff] }
  0xc1   :  { %3567 = vmatpush3.bf16.msra.mxu0 %v3805_v38 }
  0xc2   :  { %3631 = vmatpush3.bf16.msra.mxu1 %v3807_v41  ;;  %v2895_v41 = vcombine.low %v73_v24, %v81_v25 }
  0xc3   :  { %2263 = vmatmul.mubr.bf16.gmra.mrb[80].mxu0 %v2905_v42  ;;  %v2910_v42 = vcombine.high %v88_v30, %v96_v31 }
  0xc4   :  { %2360 = vmatmul.mubr.bf16.gmra.mrb[80].mxu1 %v2907_v43  ;;  %2270 = vmatprep.mubr.bf16.mxu0 %v2922_v44 }
  0xc5   :  { %2367 = vmatprep.mubr.bf16.mxu1 %v2924_v45 }
  0xcb   :  { %2271 = vmatmul.mubr.bf16.gmra.mrb[84].mxu0 %v2921_v50 }
  0xcc   :  { %2368 = vmatmul.mubr.bf16.gmra.mrb[84].mxu1 %v2923_v51  ;;  %2278 = vmatprep.mubr.bf16.mxu0 %v2938_v52  ;;  %v104_v52 = vld [vmem:[%s4878_s0 + $0x2b0] sm:$0xff] }
  0xcd   :  { %2375 = vmatprep.mubr.bf16.mxu1 %v2940_v53  ;;  %v112_v53 = vld [vmem:[%s4878_s0 + $0x2f0] sm:$0xff] }
  0xce   :  { %v2926_v0 = vcombine.high %v104_v52, %v112_v53  ;;  %v2925_v17 = vcombine.low %v104_v52, %v112_v53 }
  0xd3   :  { %2279 = vmatmul.mubr.bf16.gmra.mrb[88].mxu0 %v2937_v58 }
  0xd4   :  { %2376 = vmatmul.mubr.bf16.gmra.mrb[88].mxu1 %v2939_v59  ;;  %2286 = vmatprep.mubr.bf16.mxu0 %v2954_v60  ;;  %v2909_v59 = vcombine.low %v88_v30, %v96_v31 }
  0xd5   :  { %2383 = vmatprep.mubr.bf16.mxu1 %v2956_v61 }
  0xdb   :  { %2287 = vmatmul.mubr.bf16.gmra.mrb[92].mxu0 %v2953_v2 }
  0xdc   :  { %2384 = vmatmul.mubr.bf16.gmra.mrb[92].mxu1 %v2955_v3  ;;  %2424 = vmatprep.mubr.bf16.mxu0 %v2846_v4  ;;  %v2928_v4 = vcombine.high %v105_v55, %v113_v56 }
  0xdd   :  { %2521 = vmatprep.mubr.bf16.mxu1 %v2848_v5 }
  0xe3   :  { %2425 = vmatmul.mubr.bf16.vlgmr.msra.gmra.mrb[96].mxu0 %v2845_v10  ;;  %v120_v10 = vld [vmem:[%s4878_s0 + $0x330] sm:$0xff] }
  0xe4   :  { %2522 = vmatmul.mubr.bf16.vlgmr.msra.gmra.mrb[96].mxu1 %v2847_v11  ;;  %2432 = vmatprep.mubr.bf16.mxu0 %v2862_v12  ;;  %v128_v11 = vld [vmem:[%s4878_s0 + $0x370] sm:$0xff] }
  0xe5   :  { %2529 = vmatprep.mubr.bf16.mxu1 %v2864_v13  ;;  %v121_v13 = vld [vmem:[%s4878_s0 + $0x338] sm:$0xff]  ;;  %v2942_v22 = vcombine.high %v120_v10, %v128_v11 }
  0xeb   :  { %2433 = vmatmul.mubr.bf16.gmra.mrb[100].mxu0 %v2861_v18 }
  0xec   :  { %2530 = vmatmul.mubr.bf16.gmra.mrb[100].mxu1 %v2863_v19  ;;  %2440 = vmatprep.mubr.bf16.mxu0 %v2878_v20 }
  0xed   :  { %2537 = vmatprep.mubr.bf16.mxu1 %v2880_v21  ;;  %v2927_v21 = vcombine.low %v105_v55, %v113_v56 }
  0xf3   :  { %2441 = vmatmul.mubr.bf16.gmra.mrb[104].mxu0 %v2877_v26  ;;  %v2944_v26 = vcombine.high %v121_v13, %v129_v14 }
  0xf4   :  { %2538 = vmatmul.mubr.bf16.gmra.mrb[104].mxu1 %v2879_v27  ;;  %2448 = vmatprep.mubr.bf16.mxu0 %v2894_v28 }
  0xf5   :  { %2545 = vmatprep.mubr.bf16.mxu1 %v2896_v29 }
  0xf6   :  { %v3184_v32 = vpop.f32.mrb[0].mxu0 }
  0xf7   :  { %v3248_v35 = vpop.f32.mrb[0].mxu1  ;;  %v3185_v36 = vpop.f32.mrb[1].mxu0 }
  0xf8   :  { %v3186_v38 = vadd.f32 %v3185_v36, %v3184_v32  ;;  %v3249_v39 = vpop.f32.mrb[1].mxu1  ;;  %v3187_v40 = vpop.f32.mrb[2].mxu0  ;;  %v136_v32 = vld [vmem:[%s4878_s0 + $0x3b0] sm:$0xff]  ;;  %v145_v36 = vld [vmem:[%s4878_s0 + $0x3f8] sm:$0xff] }
  0xf9   :  { %v3250_v43 = vadd.f32 %v3249_v39, %v3248_v35  ;;  %v3251_v44 = vpop.f32.mrb[2].mxu1  ;;  %v3188_v45 = vpop.f32.mrb[3].mxu0  ;;  %v137_v35 = vld [vmem:[%s4878_s0 + $0x3b8] sm:$0xff]  ;;  %v2941_v39 = vcombine.low %v120_v10, %v128_v11 }
  0xfa   :  { %v3189_v47 = vadd.f32 %v3188_v45, %v3187_v40  ;;  %v3252_v48 = vpop.f32.mrb[3].mxu1 }
  0xfb   :  { %v4567_v49 = vadd.f32 %v3250_v43, %v3186_v38  ;;  %v3253_v50 = vadd.f32 %v3252_v48, %v3251_v44  ;;  %2449 = vmatmul.mubr.bf16.gmra.mrb[108].mxu0 %v2893_v37  ;;  %v2943_v43 = vcombine.low %v121_v13, %v129_v14  ;;  %v2958_v44 = vcombine.high %v136_v32, %v144_v33 }
  0xfc   :  { %2546 = vmatmul.mubr.bf16.gmra.mrb[108].mxu1 %v2895_v41  ;;  %2456 = vmatprep.mubr.bf16.mxu0 %v2910_v42  ;;  %v2960_v48 = vcombine.high %v137_v35, %v145_v36 }
  0xfd   :  { %v4569_v51 = vadd.f32 %v3253_v50, %v3189_v47  ;;  %2553 = vmatprep.mubr.bf16.mxu1 %v2912_v46 }
  0xfe   :  { %v3190_v54 = vpop.f32.mrb[4].mxu0 }
  0xff   :  { %v3254_v57 = vpop.f32.mrb[4].mxu1  ;;  %v3191_v58 = vpop.f32.mrb[5].mxu0 }
 0x100   :  { %v3192_v60 = vadd.f32 %v3191_v58, %v3190_v54  ;;  %v3255_v61 = vpop.f32.mrb[5].mxu1  ;;  %v3193_v62 = vpop.f32.mrb[6].mxu0 }
 0x101   :  { %v3256_v1 = vadd.f32 %v3255_v61, %v3254_v57  ;;  %v3257_v2 = vpop.f32.mrb[6].mxu1  ;;  %v3194_v3 = vpop.f32.mrb[7].mxu0 }
 0x102   :  { %v3195_v5 = vadd.f32 %v3194_v3, %v3193_v62  ;;  %v3258_v6 = vpop.f32.mrb[7].mxu1 }
 0x103   :  { %v4583_v7 = vadd.f32 %v3256_v1, %v3192_v60  ;;  %v3259_v8 = vadd.f32 %v3258_v6, %v3257_v2  ;;  %2457 = vmatmul.mubr.bf16.gmra.mrb[112].mxu0 %v2909_v59  ;;  %v2957_v59 = vcombine.low %v136_v32, %v144_v33 }
 0x104   :  { %2554 = vmatmul.mubr.bf16.gmra.mrb[112].mxu1 %v2911_v63  ;;  %2464 = vmatprep.mubr.bf16.mxu0 %v2926_v0  ;;  %v2959_v63 = vcombine.low %v137_v35, %v145_v36 }
 0x105   :  { %v4585_v9 = vadd.f32 %v3259_v8, %v3195_v5  ;;  %2561 = vmatprep.mubr.bf16.mxu1 %v2928_v4 }
 0x106   :  { %v3196_v12 = vpop.f32.mrb[8].mxu0 }
 0x107   :  { %v3260_v15 = vpop.f32.mrb[8].mxu1  ;;  %v3197_v16 = vpop.f32.mrb[9].mxu0 }
 0x108   :  { %v3198_v18 = vadd.f32 %v3197_v16, %v3196_v12  ;;  %v3261_v19 = vpop.f32.mrb[9].mxu1  ;;  %v3199_v20 = vpop.f32.mrb[10].mxu0 }
 0x109   :  { %v3262_v23 = vadd.f32 %v3261_v19, %v3260_v15  ;;  %v3263_v24 = vpop.f32.mrb[10].mxu1  ;;  %v3200_v25 = vpop.f32.mrb[11].mxu0 }
 0x10a   :  { %v3201_v27 = vadd.f32 %v3200_v25, %v3199_v20  ;;  %v3264_v28 = vpop.f32.mrb[11].mxu1 }
 0x10b   :  { %v4599_v29 = vadd.f32 %v3262_v23, %v3198_v18  ;;  %v3265_v30 = vadd.f32 %v3264_v28, %v3263_v24  ;;  %2465 = vmatmul.mubr.bf16.gmra.mrb[116].mxu0 %v2925_v17 }
 0x10c   :  { %2562 = vmatmul.mubr.bf16.gmra.mrb[116].mxu1 %v2927_v21  ;;  %2472 = vmatprep.mubr.bf16.mxu0 %v2942_v22 }
 0x10d   :  { %v4601_v31 = vadd.f32 %v3265_v30, %v3201_v27  ;;  %2569 = vmatprep.mubr.bf16.mxu1 %v2944_v26 }
 0x10e   :  { %v3202_v34 = vpop.f32.mrb[12].mxu0 }
 0x10f   :  { %v3266_v37 = vpop.f32.mrb[12].mxu1  ;;  %v3203_v38 = vpop.f32.mrb[13].mxu0 }
 0x110   :  { %v3204_v40 = vadd.f32 %v3203_v38, %v3202_v34  ;;  %v3267_v41 = vpop.f32.mrb[13].mxu1  ;;  %v3205_v42 = vpop.f32.mrb[14].mxu0 }
 0x111   :  { %v3268_v45 = vadd.f32 %v3267_v41, %v3266_v37  ;;  %v3269_v46 = vpop.f32.mrb[14].mxu1  ;;  %v3206_v47 = vpop.f32.mrb[15].mxu0 }
 0x112   :  { %v3207_v50 = vadd.f32 %v3206_v47, %v3205_v42  ;;  %v3270_v52 = vpop.f32.mrb[15].mxu1 }
 0x113   :  { %v4615_v53 = vadd.f32 %v3268_v45, %v3204_v40  ;;  %v3271_v54 = vadd.f32 %v3270_v52, %v3269_v46  ;;  %2473 = vmatmul.mubr.bf16.gmra.mrb[120].mxu0 %v2941_v39 }
 0x114   :  { %2570 = vmatmul.mubr.bf16.gmra.mrb[120].mxu1 %v2943_v43  ;;  %2480 = vmatprep.mubr.bf16.mxu0 %v2958_v44 }
 0x115   :  { %v4617_v55 = vadd.f32 %v3271_v54, %v3207_v50  ;;  %2577 = vmatprep.mubr.bf16.mxu1 %v2960_v48 }
 0x116   :  { %v3208_v56 = vpop.f32.mrb[16].mxu0 }
 0x117   :  { %v3272_v57 = vpop.f32.mrb[16].mxu1  ;;  %v3209_v58 = vpop.f32.mrb[17].mxu0 }
 0x118   :  { %v3210_v60 = vadd.f32 %v3209_v58, %v3208_v56  ;;  %v3273_v61 = vpop.f32.mrb[17].mxu1  ;;  %v3211_v62 = vpop.f32.mrb[18].mxu0 }
 0x119   :  { %v3274_v0 = vadd.f32 %v3273_v61, %v3272_v57  ;;  %v3275_v1 = vpop.f32.mrb[18].mxu1  ;;  %v3212_v2 = vpop.f32.mrb[19].mxu0 }
 0x11a   :  { %v3213_v3 = vadd.f32 %v3212_v2, %v3211_v62  ;;  %v3276_v4 = vpop.f32.mrb[19].mxu1 }
 0x11b   :  { %v4619_v5 = vadd.f32 %v3274_v0, %v3210_v60  ;;  %v3277_v6 = vadd.f32 %v3276_v4, %v3275_v1  ;;  %2481 = vmatmul.mubr.bf16.gmra.mrb[124].mxu0 %v2957_v59 }
 0x11c   :  { %2578 = vmatmul.mubr.bf16.gmra.mrb[124].mxu1 %v2959_v63 }
 0x11d   :  { %v4621_v8 = vadd.f32 %v3277_v6, %v3213_v3 }
 0x11e   :  { %v3214_v10 = vpop.f32.mrb[20].mxu0 }
 0x11f   :  { %v3278_v11 = vpop.f32.mrb[20].mxu1  ;;  %v3215_v12 = vpop.f32.mrb[21].mxu0 }
 0x120   :  { %v3216_v13 = vadd.f32 %v3215_v12, %v3214_v10  ;;  %v3279_v14 = vpop.f32.mrb[21].mxu1  ;;  %v3217_v15 = vpop.f32.mrb[22].mxu0 }
 0x121   :  { %v3280_v16 = vadd.f32 %v3279_v14, %v3278_v11  ;;  %v3281_v17 = vpop.f32.mrb[22].mxu1  ;;  %v3218_v18 = vpop.f32.mrb[23].mxu0 }
 0x122   :  { %v3219_v19 = vadd.f32 %v3218_v18, %v3217_v15  ;;  %v3282_v20 = vpop.f32.mrb[23].mxu1 }
 0x123   :  { %v4623_v21 = vadd.f32 %v3280_v16, %v3216_v13  ;;  %v3283_v22 = vadd.f32 %v3282_v20, %v3281_v17 }
 0x125   :  { %v4625_v23 = vadd.f32 %v3283_v22, %v3219_v19 }
 0x126   :  { %v3220_v24 = vpop.f32.mrb[24].mxu0 }
 0x127   :  { %v3284_v25 = vpop.f32.mrb[24].mxu1  ;;  %v3221_v26 = vpop.f32.mrb[25].mxu0 }
 0x128   :  { %v3222_v27 = vadd.f32 %v3221_v26, %v3220_v24  ;;  %v3285_v28 = vpop.f32.mrb[25].mxu1  ;;  %v3223_v30 = vpop.f32.mrb[26].mxu0 }
 0x129   :  { %v3286_v32 = vadd.f32 %v3285_v28, %v3284_v25  ;;  %v3287_v33 = vpop.f32.mrb[26].mxu1  ;;  %v3224_v34 = vpop.f32.mrb[27].mxu0 }
 0x12a   :  { %v3225_v35 = vadd.f32 %v3224_v34, %v3223_v30  ;;  %v3288_v36 = vpop.f32.mrb[27].mxu1 }
 0x12b   :  { %v4627_v37 = vadd.f32 %v3286_v32, %v3222_v27  ;;  %v3289_v38 = vadd.f32 %v3288_v36, %v3287_v33 }
 0x12d   :  { %v4629_v39 = vadd.f32 %v3289_v38, %v3225_v35 }
 0x12e   :  { %v3226_v40 = vpop.f32.mrb[28].mxu0 }
 0x12f   :  { %v3290_v41 = vpop.f32.mrb[28].mxu1  ;;  %v3227_v42 = vpop.f32.mrb[29].mxu0 }
 0x130   :  { %v3228_v43 = vadd.f32 %v3227_v42, %v3226_v40  ;;  %v3291_v44 = vpop.f32.mrb[29].mxu1  ;;  %v3229_v45 = vpop.f32.mrb[30].mxu0 }
 0x131   :  { %v3292_v46 = vadd.f32 %v3291_v44, %v3290_v41  ;;  %v3293_v47 = vpop.f32.mrb[30].mxu1  ;;  %v3230_v48 = vpop.f32.mrb[31].mxu0 }
 0x132   :  { %v3231_v50 = vadd.f32 %v3230_v48, %v3229_v45  ;;  %v3294_v52 = vpop.f32.mrb[31].mxu1 }
 0x133   :  { %v4631_v54 = vadd.f32 %v3292_v46, %v3228_v43  ;;  %v3295_v56 = vadd.f32 %v3294_v52, %v3293_v47 }
 0x135   :  { %v4633_v57 = vadd.f32 %v3295_v56, %v3231_v50 }
 0x136   :  { %v3312_v58 = vpop.f32.mrb[32].mxu0 }
 0x137   :  { %v3376_v59 = vpop.f32.mrb[32].mxu1  ;;  %v3313_v60 = vpop.f32.mrb[33].mxu0 }
 0x138   :  { %v3314_v61 = vadd.f32 %v3313_v60, %v3312_v58  ;;  %v3377_v62 = vpop.f32.mrb[33].mxu1  ;;  %v3315_v63 = vpop.f32.mrb[34].mxu0 }
 0x139   :  { %v3378_v0 = vadd.f32 %v3377_v62, %v3376_v59  ;;  %v3379_v1 = vpop.f32.mrb[34].mxu1  ;;  %v3316_v2 = vpop.f32.mrb[35].mxu0 }
 0x13a   :  { %v2039_v3 = vadd.f32 %v3314_v61, %v4567_v49  ;;  %v3317_v4 = vadd.f32 %v3316_v2, %v3315_v63  ;;  %v3380_v6 = vpop.f32.mrb[35].mxu1 }
 0x13b   :  { %v3381_v10 = vadd.f32 %v3380_v6, %v3379_v1 }
 0x13c   :  { %v4636_v11 = vadd.f32 %v3378_v0, %v2039_v3  ;;  %v2042_v12 = vadd.f32 %v3317_v4, %v4569_v51 }
 0x13e   :  { %v4639_v13 = vadd.f32 %v3381_v10, %v2042_v12  ;;  %v3318_v14 = vpop.f32.mrb[36].mxu0 }
 0x13f   :  { %v3382_v15 = vpop.f32.mrb[36].mxu1  ;;  %v3319_v16 = vpop.f32.mrb[37].mxu0 }
 0x140   :  { %v3320_v17 = vadd.f32 %v3319_v16, %v3318_v14  ;;  %v3383_v18 = vpop.f32.mrb[37].mxu1  ;;  %v3321_v19 = vpop.f32.mrb[38].mxu0 }
 0x141   :  { %v3384_v20 = vadd.f32 %v3383_v18, %v3382_v15  ;;  %v3385_v22 = vpop.f32.mrb[38].mxu1  ;;  %v3322_v24 = vpop.f32.mrb[39].mxu0 }
 0x142   :  { %v2047_v49 = vadd.f32 %v3320_v17, %v4583_v7  ;;  %v3323_v25 = vadd.f32 %v3322_v24, %v3321_v19  ;;  %v3386_v26 = vpop.f32.mrb[39].mxu1 }
 0x143   :  { %v3387_v27 = vadd.f32 %v3386_v26, %v3385_v22 }
 0x144   :  { %v4642_v28 = vadd.f32 %v3384_v20, %v2047_v49  ;;  %v2050_v51 = vadd.f32 %v3323_v25, %v4585_v9 }
 0x146   :  { %v4645_v30 = vadd.f32 %v3387_v27, %v2050_v51  ;;  %v3324_v32 = vpop.f32.mrb[40].mxu0 }
 0x147   :  { %v3388_v33 = vpop.f32.mrb[40].mxu1  ;;  %v3325_v34 = vpop.f32.mrb[41].mxu0 }
 0x148   :  { %v3326_v35 = vadd.f32 %v3325_v34, %v3324_v32  ;;  %v3389_v36 = vpop.f32.mrb[41].mxu1  ;;  %v3327_v38 = vpop.f32.mrb[42].mxu0 }
 0x149   :  { %v3390_v40 = vadd.f32 %v3389_v36, %v3388_v33  ;;  %v3391_v41 = vpop.f32.mrb[42].mxu1  ;;  %v3328_v42 = vpop.f32.mrb[43].mxu0 }
 0x14a   :  { %v2055_v7 = vadd.f32 %v3326_v35, %v4599_v29  ;;  %v3329_v43 = vadd.f32 %v3328_v42, %v3327_v38  ;;  %v3392_v44 = vpop.f32.mrb[43].mxu1 }
 0x14b   :  { %v3393_v45 = vadd.f32 %v3392_v44, %v3391_v41 }
 0x14c   :  { %v4648_v46 = vadd.f32 %v3390_v40, %v2055_v7  ;;  %v2058_v9 = vadd.f32 %v3329_v43, %v4601_v31 }
 0x14e   :  { %v4651_v47 = vadd.f32 %v3393_v45, %v2058_v9  ;;  %v3330_v48 = vpop.f32.mrb[44].mxu0 }
 0x14f   :  { %v3394_v50 = vpop.f32.mrb[44].mxu1  ;;  %v3331_v52 = vpop.f32.mrb[45].mxu0 }
 0x150   :  { %v3332_v56 = vadd.f32 %v3331_v52, %v3330_v48  ;;  %v3395_v58 = vpop.f32.mrb[45].mxu1  ;;  %v3333_v59 = vpop.f32.mrb[46].mxu0 }
 0x151   :  { %v3396_v60 = vadd.f32 %v3395_v58, %v3394_v50  ;;  %v3397_v61 = vpop.f32.mrb[46].mxu1  ;;  %v3334_v62 = vpop.f32.mrb[47].mxu0 }
 0x152   :  { %v2063_v29 = vadd.f32 %v3332_v56, %v4615_v53  ;;  %v3335_v63 = vadd.f32 %v3334_v62, %v3333_v59  ;;  %v3398_v0 = vpop.f32.mrb[47].mxu1 }
 0x153   :  { %v3399_v1 = vadd.f32 %v3398_v0, %v3397_v61 }
 0x154   :  { %v4654_v2 = vadd.f32 %v3396_v60, %v2063_v29  ;;  %v2066_v31 = vadd.f32 %v3335_v63, %v4617_v55 }
 0x156   :  { %v4657_v3 = vadd.f32 %v3399_v1, %v2066_v31  ;;  %v3336_v4 = vpop.f32.mrb[48].mxu0 }
 0x157   :  { %v3400_v6 = vpop.f32.mrb[48].mxu1  ;;  %v3337_v10 = vpop.f32.mrb[49].mxu0 }
 0x158   :  { %v3338_v12 = vadd.f32 %v3337_v10, %v3336_v4  ;;  %v3401_v14 = vpop.f32.mrb[49].mxu1  ;;  %v3339_v15 = vpop.f32.mrb[50].mxu0 }
 0x159   :  { %v3402_v16 = vadd.f32 %v3401_v14, %v3400_v6  ;;  %v3403_v17 = vpop.f32.mrb[50].mxu1  ;;  %v3340_v18 = vpop.f32.mrb[51].mxu0 }
 0x15a   :  { %v2071_v53 = vadd.f32 %v3338_v12, %v4619_v5  ;;  %v3341_v19 = vadd.f32 %v3340_v18, %v3339_v15  ;;  %v3404_v20 = vpop.f32.mrb[51].mxu1 }
 0x15b   :  { %v3405_v22 = vadd.f32 %v3404_v20, %v3403_v17 }
 0x15c   :  { %v4660_v24 = vadd.f32 %v3402_v16, %v2071_v53  ;;  %v2074_v55 = vadd.f32 %v3341_v19, %v4621_v8 }
 0x15e   :  { %v4663_v49 = vadd.f32 %v3405_v22, %v2074_v55  ;;  %v3342_v25 = vpop.f32.mrb[52].mxu0 }
 0x15f   :  { %v3406_v26 = vpop.f32.mrb[52].mxu1  ;;  %v3343_v27 = vpop.f32.mrb[53].mxu0 }
 0x160   :  { %v3344_v51 = vadd.f32 %v3343_v27, %v3342_v25  ;;  %v3407_v32 = vpop.f32.mrb[53].mxu1  ;;  %v3345_v33 = vpop.f32.mrb[54].mxu0 }
 0x161   :  { %v3408_v34 = vadd.f32 %v3407_v32, %v3406_v26  ;;  %v3409_v35 = vpop.f32.mrb[54].mxu1  ;;  %v3346_v36 = vpop.f32.mrb[55].mxu0 }
 0x162   :  { %v2079_v5 = vadd.f32 %v3344_v51, %v4623_v21  ;;  %v3347_v38 = vadd.f32 %v3346_v36, %v3345_v33  ;;  %v3410_v40 = vpop.f32.mrb[55].mxu1 }
 0x163   :  { %v3411_v41 = vadd.f32 %v3410_v40, %v3409_v35 }
 0x164   :  { %v4666_v42 = vadd.f32 %v3408_v34, %v2079_v5  ;;  %v2082_v8 = vadd.f32 %v3347_v38, %v4625_v23 }
 0x166   :  { %v4669_v7 = vadd.f32 %v3411_v41, %v2082_v8  ;;  %v3348_v43 = vpop.f32.mrb[56].mxu0 }
 0x167   :  { %v3412_v44 = vpop.f32.mrb[56].mxu1  ;;  %v3349_v45 = vpop.f32.mrb[57].mxu0 }
 0x168   :  { %v3350_v9 = vadd.f32 %v3349_v45, %v3348_v43  ;;  %v3413_v48 = vpop.f32.mrb[57].mxu1  ;;  %v3351_v50 = vpop.f32.mrb[58].mxu0 }
 0x169   :  { %v3414_v52 = vadd.f32 %v3413_v48, %v3412_v44  ;;  %v3415_v56 = vpop.f32.mrb[58].mxu1  ;;  %v3352_v58 = vpop.f32.mrb[59].mxu0 }
 0x16a   :  { %v2087_v21 = vadd.f32 %v3350_v9, %v4627_v37  ;;  %v3353_v59 = vadd.f32 %v3352_v58, %v3351_v50  ;;  %v3416_v60 = vpop.f32.mrb[59].mxu1 }
 0x16b   :  { %v3417_v61 = vadd.f32 %v3416_v60, %v3415_v56 }
 0x16c   :  { %v4672_v62 = vadd.f32 %v3414_v52, %v2087_v21  ;;  %v2090_v23 = vadd.f32 %v3353_v59, %v4629_v39 }
 0x16e   :  { %v4675_v29 = vadd.f32 %v3417_v61, %v2090_v23  ;;  %v3354_v63 = vpop.f32.mrb[60].mxu0 }
 0x16f   :  { %v3418_v0 = vpop.f32.mrb[60].mxu1  ;;  %v3355_v1 = vpop.f32.mrb[61].mxu0 }
 0x170   :  { %v3356_v31 = vadd.f32 %v3355_v1, %v3354_v63  ;;  %v3419_v4 = vpop.f32.mrb[61].mxu1  ;;  %v3357_v6 = vpop.f32.mrb[62].mxu0 }
 0x171   :  { %v3420_v10 = vadd.f32 %v3419_v4, %v3418_v0  ;;  %v3421_v12 = vpop.f32.mrb[62].mxu1  ;;  %v3358_v14 = vpop.f32.mrb[63].mxu0 }
 0x172   :  { %v2095_v37 = vadd.f32 %v3356_v31, %v4631_v54  ;;  %v3359_v15 = vadd.f32 %v3358_v14, %v3357_v6  ;;  %v3422_v16 = vpop.f32.mrb[63].mxu1 }
 0x173   :  { %v3423_v17 = vadd.f32 %v3422_v16, %v3421_v12 }
 0x174   :  { %v4678_v18 = vadd.f32 %v3420_v10, %v2095_v37  ;;  %v2098_v39 = vadd.f32 %v3359_v15, %v4633_v57 }
 0x176   :  { %v4681_v53 = vadd.f32 %v3423_v17, %v2098_v39  ;;  %v3440_v19 = vpop.f32.mrb[64].mxu0 }
 0x177   :  { %v3504_v20 = vpop.f32.mrb[64].mxu1  ;;  %v3441_v22 = vpop.f32.mrb[65].mxu0 }
 0x178   :  { %v3442_v55 = vadd.f32 %v3441_v22, %v3440_v19  ;;  %v3505_v25 = vpop.f32.mrb[65].mxu1  ;;  %v3443_v26 = vpop.f32.mrb[66].mxu0 }
 0x179   :  { %v3506_v27 = vadd.f32 %v3505_v25, %v3504_v20  ;;  %v3507_v51 = vpop.f32.mrb[66].mxu1  ;;  %v3444_v32 = vpop.f32.mrb[67].mxu0 }
 0x17a   :  { %v2233_v54 = vadd.f32 %v3442_v55, %v4636_v11  ;;  %v3445_v33 = vadd.f32 %v3444_v32, %v3443_v26  ;;  %v3508_v34 = vpop.f32.mrb[67].mxu1 }
 0x17b   :  { %v3509_v35 = vadd.f32 %v3508_v34, %v3507_v51 }
 0x17c   :  { %v4684_v36 = vadd.f32 %v3506_v27, %v2233_v54  ;;  %v2236_v57 = vadd.f32 %v3445_v33, %v4639_v13 }
 0x17e   :  { %v4687_v5 = vadd.f32 %v3509_v35, %v2236_v57  ;;  %v3446_v38 = vpop.f32.mrb[68].mxu0 }
 0x17f   :  { %v3510_v40 = vpop.f32.mrb[68].mxu1  ;;  %v3447_v41 = vpop.f32.mrb[69].mxu0 }
 0x180   :  { %v3448_v8 = vadd.f32 %v3447_v41, %v3446_v38  ;;  %v3511_v43 = vpop.f32.mrb[69].mxu1  ;;  %v3449_v44 = vpop.f32.mrb[70].mxu0 }
 0x181   :  { %v3512_v45 = vadd.f32 %v3511_v43, %v3510_v40  ;;  %v3513_v9 = vpop.f32.mrb[70].mxu1  ;;  %v3450_v48 = vpop.f32.mrb[71].mxu0 }
 0x182   :  { %v2241_v11 = vadd.f32 %v3448_v8, %v4642_v28  ;;  %v3451_v50 = vadd.f32 %v3450_v48, %v3449_v44  ;;  %v3514_v52 = vpop.f32.mrb[71].mxu1 }
 0x183   :  { %v3515_v56 = vadd.f32 %v3514_v52, %v3513_v9 }
 0x184   :  { %v4690_v58 = vadd.f32 %v3512_v45, %v2241_v11  ;;  %v2244_v13 = vadd.f32 %v3451_v50, %v4645_v30 }
 0x186   :  { %v4693_v21 = vadd.f32 %v3515_v56, %v2244_v13  ;;  %v3452_v59 = vpop.f32.mrb[72].mxu0 }
 0x187   :  { %v3516_v60 = vpop.f32.mrb[72].mxu1  ;;  %v3453_v61 = vpop.f32.mrb[73].mxu0 }
 0x188   :  { %v3454_v23 = vadd.f32 %v3453_v61, %v3452_v59  ;;  %v3517_v63 = vpop.f32.mrb[73].mxu1  ;;  %v3455_v0 = vpop.f32.mrb[74].mxu0 }
 0x189   :  { %v3518_v1 = vadd.f32 %v3517_v63, %v3516_v60  ;;  %v3519_v31 = vpop.f32.mrb[74].mxu1  ;;  %v3456_v4 = vpop.f32.mrb[75].mxu0 }
 0x18a   :  { %v2249_v28 = vadd.f32 %v3454_v23, %v4648_v46  ;;  %v3457_v6 = vadd.f32 %v3456_v4, %v3455_v0  ;;  %v3520_v10 = vpop.f32.mrb[75].mxu1 }
 0x18b   :  { %v3521_v12 = vadd.f32 %v3520_v10, %v3519_v31 }
 0x18c   :  { %v4696_v14 = vadd.f32 %v3518_v1, %v2249_v28  ;;  %v2252_v30 = vadd.f32 %v3457_v6, %v4651_v47 }
 0x18e   :  { %v4699_v37 = vadd.f32 %v3521_v12, %v2252_v30  ;;  %v3458_v15 = vpop.f32.mrb[76].mxu0 }
 0x18f   :  { %v3522_v16 = vpop.f32.mrb[76].mxu1  ;;  %v3459_v17 = vpop.f32.mrb[77].mxu0 }
 0x190   :  { %v3460_v39 = vadd.f32 %v3459_v17, %v3458_v15  ;;  %v3523_v19 = vpop.f32.mrb[77].mxu1  ;;  %v3461_v20 = vpop.f32.mrb[78].mxu0 }
 0x191   :  { %v3524_v22 = vadd.f32 %v3523_v19, %v3522_v16  ;;  %v3525_v55 = vpop.f32.mrb[78].mxu1  ;;  %v3462_v25 = vpop.f32.mrb[79].mxu0 }
 0x192   :  { %v2257_v46 = vadd.f32 %v3460_v39, %v4654_v2  ;;  %v3463_v26 = vadd.f32 %v3462_v25, %v3461_v20  ;;  %v3526_v27 = vpop.f32.mrb[79].mxu1 }
 0x193   :  { %v3527_v51 = vadd.f32 %v3526_v27, %v3525_v55 }
 0x194   :  { %v4702_v32 = vadd.f32 %v3524_v22, %v2257_v46  ;;  %v2260_v47 = vadd.f32 %v3463_v26, %v4657_v3 }
 0x196   :  { %v4705_v54 = vadd.f32 %v3527_v51, %v2260_v47  ;;  %v3464_v33 = vpop.f32.mrb[80].mxu0 }
 0x197   :  { %v3528_v34 = vpop.f32.mrb[80].mxu1  ;;  %v3465_v35 = vpop.f32.mrb[81].mxu0 }
 0x198   :  { %v3466_v57 = vadd.f32 %v3465_v35, %v3464_v33  ;;  %v3529_v38 = vpop.f32.mrb[81].mxu1  ;;  %v3467_v40 = vpop.f32.mrb[82].mxu0 }
 0x199   :  { %v3530_v41 = vadd.f32 %v3529_v38, %v3528_v34  ;;  %v3531_v8 = vpop.f32.mrb[82].mxu1  ;;  %v3468_v43 = vpop.f32.mrb[83].mxu0 }
 0x19a   :  { %v2265_v2 = vadd.f32 %v3466_v57, %v4660_v24  ;;  %v3469_v44 = vadd.f32 %v3468_v43, %v3467_v40  ;;  %v3532_v45 = vpop.f32.mrb[83].mxu1 }
 0x19b   :  { %v3533_v9 = vadd.f32 %v3532_v45, %v3531_v8 }
 0x19c   :  { %v4708_v48 = vadd.f32 %v3530_v41, %v2265_v2  ;;  %v2268_v3 = vadd.f32 %v3469_v44, %v4663_v49 }
 0x19e   :  { %v4711_v11 = vadd.f32 %v3533_v9, %v2268_v3  ;;  %v3470_v50 = vpop.f32.mrb[84].mxu0 }
 0x19f   :  { %v3534_v52 = vpop.f32.mrb[84].mxu1  ;;  %v3471_v56 = vpop.f32.mrb[85].mxu0 }
 0x1a0   :  { %v3472_v13 = vadd.f32 %v3471_v56, %v3470_v50  ;;  %v3535_v59 = vpop.f32.mrb[85].mxu1  ;;  %v3473_v60 = vpop.f32.mrb[86].mxu0 }
 0x1a1   :  { %v3536_v61 = vadd.f32 %v3535_v59, %v3534_v52  ;;  %v3537_v23 = vpop.f32.mrb[86].mxu1  ;;  %v3474_v63 = vpop.f32.mrb[87].mxu0 }
 0x1a2   :  { %v2273_v24 = vadd.f32 %v3472_v13, %v4666_v42  ;;  %v3475_v0 = vadd.f32 %v3474_v63, %v3473_v60  ;;  %v3538_v1 = vpop.f32.mrb[87].mxu1 }
 0x1a3   :  { %v3539_v31 = vadd.f32 %v3538_v1, %v3537_v23 }
 0x1a4   :  { %v4714_v4 = vadd.f32 %v3536_v61, %v2273_v24  ;;  %v2276_v49 = vadd.f32 %v3475_v0, %v4669_v7 }
 0x1a6   :  { %v4717_v28 = vadd.f32 %v3539_v31, %v2276_v49  ;;  %v3476_v6 = vpop.f32.mrb[88].mxu0 }
 0x1a7   :  { %v3540_v10 = vpop.f32.mrb[88].mxu1  ;;  %v3477_v12 = vpop.f32.mrb[89].mxu0 }
 0x1a8   :  { %v3478_v30 = vadd.f32 %v3477_v12, %v3476_v6  ;;  %v3541_v15 = vpop.f32.mrb[89].mxu1  ;;  %v3479_v16 = vpop.f32.mrb[90].mxu0 }
 0x1a9   :  { %v3542_v17 = vadd.f32 %v3541_v15, %v3540_v10  ;;  %v3543_v39 = vpop.f32.mrb[90].mxu1  ;;  %v3480_v19 = vpop.f32.mrb[91].mxu0 }
 0x1aa   :  { %v2281_v42 = vadd.f32 %v3478_v30, %v4672_v62  ;;  %v3481_v20 = vadd.f32 %v3480_v19, %v3479_v16  ;;  %v3544_v22 = vpop.f32.mrb[91].mxu1 }
 0x1ab   :  { %v3545_v55 = vadd.f32 %v3544_v22, %v3543_v39 }
 0x1ac   :  { %v4720_v25 = vadd.f32 %v3542_v17, %v2281_v42  ;;  %v2284_v7 = vadd.f32 %v3481_v20, %v4675_v29 }
 0x1ae   :  { %v4723_v46 = vadd.f32 %v3545_v55, %v2284_v7  ;;  %v3482_v26 = vpop.f32.mrb[92].mxu0 }
 0x1af   :  { %v3546_v27 = vpop.f32.mrb[92].mxu1  ;;  %v3483_v51 = vpop.f32.mrb[93].mxu0 }
 0x1b0   :  { %v3484_v47 = vadd.f32 %v3483_v51, %v3482_v26  ;;  %v3547_v33 = vpop.f32.mrb[93].mxu1  ;;  %v3485_v34 = vpop.f32.mrb[94].mxu0 }
 0x1b1   :  { %v3548_v35 = vadd.f32 %v3547_v33, %v3546_v27  ;;  %v3549_v57 = vpop.f32.mrb[94].mxu1  ;;  %v3486_v38 = vpop.f32.mrb[95].mxu0 }
 0x1b2   :  { %v2289_v62 = vadd.f32 %v3484_v47, %v4678_v18  ;;  %v3487_v40 = vadd.f32 %v3486_v38, %v3485_v34  ;;  %v3550_v41 = vpop.f32.mrb[95].mxu1 }
 0x1b3   :  { %v3551_v8 = vadd.f32 %v3550_v41, %v3549_v57 }
 0x1b4   :  { %v4726_v43 = vadd.f32 %v3548_v35, %v2289_v62  ;;  %v2292_v29 = vadd.f32 %v3487_v40, %v4681_v53 }
 0x1b6   :  { %v4729_v2 = vadd.f32 %v3551_v8, %v2292_v29  ;;  %v3568_v44 = vpop.f32.mrb[96].mxu0 }
 0x1b7   :  { %v3632_v45 = vpop.f32.mrb[96].mxu1  ;;  %v3569_v9 = vpop.f32.mrb[97].mxu0 }
 0x1b8   :  { %v3570_v3 = vadd.f32 %v3569_v9, %v3568_v44  ;;  %v3633_v50 = vpop.f32.mrb[97].mxu1  ;;  %v3571_v52 = vpop.f32.mrb[98].mxu0 }
 0x1b9   :  { %v3634_v56 = vadd.f32 %v3633_v50, %v3632_v45  ;;  %v3635_v13 = vpop.f32.mrb[98].mxu1  ;;  %v3572_v59 = vpop.f32.mrb[99].mxu0 }
 0x1ba   :  { %v2427_v18 = vadd.f32 %v3570_v3, %v4684_v36  ;;  %v3573_v60 = vadd.f32 %v3572_v59, %v3571_v52  ;;  %v3636_v61 = vpop.f32.mrb[99].mxu1 }
 0x1bb   :  { %v3637_v23 = vadd.f32 %v3636_v61, %v3635_v13 }
 0x1bc   :  { %v4732_v63 = vadd.f32 %v3634_v56, %v2427_v18  ;;  %v2430_v53 = vadd.f32 %v3573_v60, %v4687_v5 }
 0x1be   :  { %v4735_v24 = vadd.f32 %v3637_v23, %v2430_v53  ;;  %v3574_v0 = vpop.f32.mrb[100].mxu0  ;;  %v2609_v20 = vmul.f32 %v4732_v63, %v4732_v63 }
 0x1bf   :  { %v3638_v1 = vpop.f32.mrb[100].mxu1  ;;  %v3575_v31 = vpop.f32.mrb[101].mxu0 }
 0x1c0   :  { %v3576_v49 = vadd.f32 %v3575_v31, %v3574_v0  ;;  %v3639_v6 = vpop.f32.mrb[101].mxu1  ;;  %v3577_v10 = vpop.f32.mrb[102].mxu0  ;;  %v2610_v19 = vmul.f32 %v4735_v24, %v4735_v24  ;;  %v2586_v22 = vadd.f32 %v4735_v24, %v4732_v63 }
 0x1c1   :  { %v3640_v12 = vadd.f32 %v3639_v6, %v3638_v1  ;;  %v3641_v30 = vpop.f32.mrb[102].mxu1  ;;  %v3578_v15 = vpop.f32.mrb[103].mxu0 }
 0x1c2   :  { %v2435_v36 = vadd.f32 %v3576_v49, %v4690_v58  ;;  %v3579_v16 = vadd.f32 %v3578_v15, %v3577_v10  ;;  %v3642_v17 = vpop.f32.mrb[103].mxu1  ;;  %v2625_v51 = vadd.f32 %v2610_v19, %v2609_v20 }
 0x1c3   :  { %v3643_v39 = vadd.f32 %v3642_v17, %v3641_v30 }
 0x1c4   :  { %v4740_v5 = vadd.f32 %v3640_v12, %v2435_v36  ;;  %v2438_v42 = vadd.f32 %v3579_v16, %v4693_v21 }
 0x1c6   :  { %v2611_v55 = vmul.f32 %v4740_v5, %v4740_v5  ;;  %v4749_v58 = vadd.f32 %v3643_v39, %v2438_v42  ;;  %v3580_v7 = vpop.f32.mrb[104].mxu0  ;;  %v2587_v47 = vadd.f32 %v2586_v22, %v4740_v5 }
 0x1c7   :  { %v3644_v26 = vpop.f32.mrb[104].mxu1  ;;  %v3581_v27 = vpop.f32.mrb[105].mxu0 }
 0x1c8   :  { %v3582_v33 = vadd.f32 %v3581_v27, %v3580_v7  ;;  %v3645_v34 = vpop.f32.mrb[105].mxu1  ;;  %v3583_v21 = vpop.f32.mrb[106].mxu0  ;;  %v2626_v62 = vadd.f32 %v2625_v51, %v2611_v55  ;;  %v2612_v40 = vmul.f32 %v4749_v58, %v4749_v58  ;;  %v2588_v45 = vadd.f32 %v2587_v47, %v4749_v58 }
 0x1c9   :  { %v3646_v35 = vadd.f32 %v3645_v34, %v3644_v26  ;;  %v3647_v57 = vpop.f32.mrb[106].mxu1  ;;  %v3584_v38 = vpop.f32.mrb[107].mxu0 }
 0x1ca   :  { %v2443_v41 = vadd.f32 %v3582_v33, %v4696_v14  ;;  %v3585_v8 = vadd.f32 %v3584_v38, %v3583_v21  ;;  %v3648_v29 = vpop.f32.mrb[107].mxu1  ;;  %v2627_v50 = vadd.f32 %v2626_v62, %v2612_v40 }
 0x1cb   :  { %v3649_v44 = vadd.f32 %v3648_v29, %v3647_v57 }
 0x1cc   :  { %v4756_v9 = vadd.f32 %v3646_v35, %v2443_v41  ;;  %v2446_v3 = vadd.f32 %v3585_v8, %v4699_v37 }
 0x1ce   :  { %v2589_v52 = vadd.f32 %v2588_v45, %v4756_v9  ;;  %v2613_v56 = vmul.f32 %v4756_v9, %v4756_v9  ;;  %v4762_v13 = vadd.f32 %v3649_v44, %v2446_v3  ;;  %v3586_v59 = vpop.f32.mrb[108].mxu0 }
 0x1cf   :  { %v3650_v18 = vpop.f32.mrb[108].mxu1  ;;  %v3587_v14 = vpop.f32.mrb[109].mxu0 }
 0x1d0   :  { %v2628_v60 = vadd.f32 %v2627_v50, %v2613_v56  ;;  %v2590_v61 = vadd.f32 %v2589_v52, %v4762_v13  ;;  %v2614_v23 = vmul.f32 %v4762_v13, %v4762_v13  ;;  %v3588_v53 = vadd.f32 %v3587_v14, %v3586_v59  ;;  %v3651_v0 = vpop.f32.mrb[109].mxu1  ;;  %v3589_v37 = vpop.f32.mrb[110].mxu0 }
 0x1d1   :  { %v3652_v1 = vadd.f32 %v3651_v0, %v3650_v18  ;;  %v3653_v31 = vpop.f32.mrb[110].mxu1  ;;  %v3590_v49 = vpop.f32.mrb[111].mxu0 }
 0x1d2   :  { %v2629_v6 = vadd.f32 %v2628_v60, %v2614_v23  ;;  %v2451_v10 = vadd.f32 %v3588_v53, %v4702_v32  ;;  %v3591_v12 = vadd.f32 %v3590_v49, %v3589_v37  ;;  %v3654_v30 = vpop.f32.mrb[111].mxu1 }
 0x1d3   :  { %v3655_v15 = vadd.f32 %v3654_v30, %v3653_v31 }
 0x1d4   :  { %v4768_v36 = vadd.f32 %v3652_v1, %v2451_v10  ;;  %v2454_v16 = vadd.f32 %v3591_v12, %v4705_v54 }
 0x1d6   :  { %v2591_v17 = vadd.f32 %v2590_v61, %v4768_v36  ;;  %v2615_v39 = vmul.f32 %v4768_v36, %v4768_v36  ;;  %v4774_v19 = vadd.f32 %v3655_v15, %v2454_v16  ;;  %v3592_v42 = vpop.f32.mrb[112].mxu0 }
 0x1d7   :  { %v3656_v20 = vpop.f32.mrb[112].mxu1  ;;  %v3593_v22 = vpop.f32.mrb[113].mxu0 }
 0x1d8   :  { %v2630_v55 = vadd.f32 %v2629_v6, %v2615_v39  ;;  %v2592_v32 = vadd.f32 %v2591_v17, %v4774_v19  ;;  %v2616_v7 = vmul.f32 %v4774_v19, %v4774_v19  ;;  %v3594_v26 = vadd.f32 %v3593_v22, %v3592_v42  ;;  %v3657_v27 = vpop.f32.mrb[113].mxu1  ;;  %v3595_v51 = vpop.f32.mrb[114].mxu0 }
 0x1d9   :  { %v3658_v54 = vadd.f32 %v3657_v27, %v3656_v20  ;;  %v3659_v47 = vpop.f32.mrb[114].mxu1  ;;  %v3596_v33 = vpop.f32.mrb[115].mxu0 }
 0x1da   :  { %v2631_v34 = vadd.f32 %v2630_v55, %v2616_v7  ;;  %v2459_v21 = vadd.f32 %v3594_v26, %v4708_v48  ;;  %v3597_v35 = vadd.f32 %v3596_v33, %v3595_v51  ;;  %v3660_v57 = vpop.f32.mrb[115].mxu1 }
 0x1db   :  { %v3661_v38 = vadd.f32 %v3660_v57, %v3659_v47 }
 0x1dc   :  { %v4780_v62 = vadd.f32 %v3658_v54, %v2459_v21  ;;  %v2462_v40 = vadd.f32 %v3597_v35, %v4711_v11 }
 0x1de   :  { %v2593_v41 = vadd.f32 %v2592_v32, %v4780_v62  ;;  %v2617_v8 = vmul.f32 %v4780_v62, %v4780_v62  ;;  %v4786_v29 = vadd.f32 %v3661_v38, %v2462_v40  ;;  %v3598_v44 = vpop.f32.mrb[116].mxu0 }
 0x1df   :  { %v3662_v45 = vpop.f32.mrb[116].mxu1  ;;  %v3599_v3 = vpop.f32.mrb[117].mxu0 }
 0x1e0   :  { %v2632_v50 = vadd.f32 %v2631_v34, %v2617_v8  ;;  %v2594_v48 = vadd.f32 %v2593_v41, %v4786_v29  ;;  %v2618_v52 = vmul.f32 %v4786_v29, %v4786_v29  ;;  %v3600_v56 = vadd.f32 %v3599_v3, %v3598_v44  ;;  %v3663_v59 = vpop.f32.mrb[117].mxu1  ;;  %v3601_v18 = vpop.f32.mrb[118].mxu0 }
 0x1e1   :  { %v3664_v11 = vadd.f32 %v3663_v59, %v3662_v45  ;;  %v3665_v14 = vpop.f32.mrb[118].mxu1  ;;  %v3602_v60 = vpop.f32.mrb[119].mxu0 }
 0x1e2   :  { %v2633_v61 = vadd.f32 %v2632_v50, %v2618_v52  ;;  %v2467_v23 = vadd.f32 %v3600_v56, %v4714_v4  ;;  %v3603_v53 = vadd.f32 %v3602_v60, %v3601_v18  ;;  %v3666_v0 = vpop.f32.mrb[119].mxu1 }
 0x1e3   :  { %v3667_v37 = vadd.f32 %v3666_v0, %v3665_v14 }
 0x1e4   :  { %v4792_v1 = vadd.f32 %v3664_v11, %v2467_v23  ;;  %v2470_v31 = vadd.f32 %v3603_v53, %v4717_v28 }
 0x1e6   :  { %v2595_v49 = vadd.f32 %v2594_v48, %v4792_v1  ;;  %v2619_v6 = vmul.f32 %v4792_v1, %v4792_v1  ;;  %v4798_v10 = vadd.f32 %v3667_v37, %v2470_v31  ;;  %v3604_v12 = vpop.f32.mrb[120].mxu0 }
 0x1e7   :  { %v3668_v30 = vpop.f32.mrb[120].mxu1  ;;  %v3605_v15 = vpop.f32.mrb[121].mxu0 }
 0x1e8   :  { %v2634_v16 = vadd.f32 %v2633_v61, %v2619_v6  ;;  %v2596_v4 = vadd.f32 %v2595_v49, %v4798_v10  ;;  %v2620_v17 = vmul.f32 %v4798_v10, %v4798_v10  ;;  %v3606_v39 = vadd.f32 %v3605_v15, %v3604_v12  ;;  %v3669_v42 = vpop.f32.mrb[121].mxu1  ;;  %v3607_v20 = vpop.f32.mrb[122].mxu0 }
 0x1e9   :  { %v3670_v28 = vadd.f32 %v3669_v42, %v3668_v30  ;;  %v3671_v22 = vpop.f32.mrb[122].mxu1  ;;  %v3608_v55 = vpop.f32.mrb[123].mxu0 }
 0x1ea   :  { %v2635_v32 = vadd.f32 %v2634_v16, %v2620_v17  ;;  %v2475_v7 = vadd.f32 %v3606_v39, %v4720_v25  ;;  %v3609_v26 = vadd.f32 %v3608_v55, %v3607_v20  ;;  %v3672_v27 = vpop.f32.mrb[123].mxu1 }
 0x1eb   :  { %v3673_v51 = vadd.f32 %v3672_v27, %v3671_v22 }
 0x1ec   :  { %v4804_v54 = vadd.f32 %v3670_v28, %v2475_v7  ;;  %v2478_v47 = vadd.f32 %v3609_v26, %v4723_v46  ;;  %v2658_v26 = vlaneseq }
 0x1ee   :  { %v2597_v33 = vadd.f32 %v2596_v4, %v4804_v54  ;;  %v2621_v34 = vmul.f32 %v4804_v54, %v4804_v54  ;;  %v4810_v21 = vadd.f32 %v3673_v51, %v2478_v47  ;;  %v3610_v35 = vpop.f32.mrb[124].mxu0  ;;  %v2659_v27 = vshrl.u32 %v2658_v26, 7  ;;  %v2652_v51 = vld [vmem:[%s4879_s2] sm:$0x1] }
 0x1ef   :  { %v3674_v57 = vpop.f32.mrb[124].mxu1  ;;  %v3611_v38 = vpop.f32.mrb[125].mxu0 }
 0x1f0   :  { %v2636_v40 = vadd.f32 %v2635_v32, %v2621_v34  ;;  %v2598_v25 = vadd.f32 %v2597_v33, %v4810_v21  ;;  %v2622_v41 = vmul.f32 %v4810_v21, %v4810_v21  ;;  %v3612_v8 = vadd.f32 %v3611_v38, %v3610_v35  ;;  %v3675_v44 = vpop.f32.mrb[125].mxu1  ;;  %v3613_v45 = vpop.f32.mrb[126].mxu0  ;;  %v2654_v35 = vld [vmem:[%s4880_s3] sm:$0x1] }
 0x1f1   :  { %v3676_v46 = vadd.f32 %v3675_v44, %v3674_v57  ;;  %v3677_v3 = vpop.f32.mrb[126].mxu1  ;;  %v3614_v50 = vpop.f32.mrb[127].mxu0  ;;  %v2660_v47 = vsub.s32 0, %v2659_v27 }
 0x1f2   :  { %v2637_v48 = vadd.f32 %v2636_v40, %v2622_v41  ;;  %v2483_v52 = vadd.f32 %v3612_v8, %v4726_v43  ;;  %v3615_v56 = vadd.f32 %v3614_v50, %v3613_v45  ;;  %v3678_v59 = vpop.f32.mrb[127].mxu1 }
 0x1f3   :  { %v3679_v18 = vadd.f32 %v3678_v59, %v3677_v3 }
 0x1f4   :  { %v2580_v11 = vadd.f32 %v3676_v46, %v2483_v52  ;;  %v2486_v14 = vadd.f32 %v3615_v56, %v4729_v2 }
 0x1f6   :  { %v2599_v60 = vadd.f32 %v2598_v25, %v2580_v11  ;;  %v2623_v61 = vmul.f32 %v2580_v11, %v2580_v11  ;;  %v2583_v23 = vadd.f32 %v3679_v18, %v2486_v14 }
 0x1f8   :  { %v2638_v53 = vadd.f32 %v2637_v48, %v2623_v61  ;;  %v2600_v0 = vadd.f32 %v2599_v60, %v2583_v23  ;;  %v2624_v37 = vmul.f32 %v2583_v23, %v2583_v23 }
 0x1fa   :  { %v2601_v31 = vrot.slane %v2600_v0, 4  ;;  %v2639_v49 = vadd.f32 %v2638_v53, %v2624_v37 }
 0x1fc   :  { %v2602_v6 = vadd.f32 %v2601_v31, %v2600_v0  ;;  %v2640_v12 = vrot.slane %v2639_v49, 4 }
 0x1fe   :  { %v2603_v30 = vrot.slane %v2602_v6, 2  ;;  %v2641_v15 = vadd.f32 %v2640_v12, %v2639_v49 }
 0x200   :  { %v2604_v16 = vadd.f32 %v2603_v30, %v2602_v6  ;;  %v2642_v43 = vrot.slane %v2641_v15, 2 }
 0x202   :  { %v2605_v4 = vrot.slane %v2604_v16, 1  ;;  %v2643_v17 = vadd.f32 %v2642_v43, %v2641_v15 }
 0x204   :  { %v2606_v39 = vadd.f32 %v2605_v4, %v2604_v16  ;;  %v2644_v42 = vrot.slane %v2643_v17, 1 }
 0x206   :  { %v2608_v20 = vmul.f32 0.0078125, %v2606_v39  ;;  %v2645_v2 = vadd.f32 %v2644_v42, %v2643_v17 }
 0x208   :  { %v2646_v28 = vmul.f32 0.0078125, %v2645_v2  ;;  %v2647_v22 = vmul.f32 %v2608_v20, %v2608_v20 }
 0x20a   :  { %v2648_v55 = vsub.f32 %v2646_v28, %v2647_v22 }
 0x20c   :  { %v2649_v32 = vmax.f32 %v2648_v55, 0.0 }
 0x20e   :  { %v2650_v7 = vadd.f32 1e-05, %v2649_v32 }
 0x210   :  { %3808 = vrsqrt.f32 %v2650_v7 }
 0x21a   :  { %v3809_v33 = vpop.eup %3808 }
 0x21b   :  { %v2653_v34 = vmul.f32 %v3809_v33, %v2652_v51 }
 0x21d   :  { %v2655_v57 = vmul.f32 %v2653_v34, %v2608_v20  ;;  %v2661_v38 = vrot.slane %v2653_v34, %v2660_v47 }
 0x21f   :  { %v2656_v40 = vsub.f32 %v2654_v35, %v2655_v57  ;;  %v2663_v25 = vmul.f32 %v2661_v38, %v4732_v63  ;;  %v2664_v41 = vmul.f32 %v2661_v38, %v4735_v24  ;;  %v2667_v8 = vmul.f32 %v2661_v38, %v4756_v9 }
 0x220   :  { %v2668_v44 = vmul.f32 %v2661_v38, %v4762_v13  ;;  %v2669_v45 = vmul.f32 %v2661_v38, %v4768_v36  ;;  %v2670_v46 = vmul.f32 %v2661_v38, %v4774_v19  ;;  %v2671_v3 = vmul.f32 %v2661_v38, %v4780_v62 }
 0x221   :  { %v2672_v50 = vmul.f32 %v2661_v38, %v4786_v29  ;;  %v2673_v48 = vmul.f32 %v2661_v38, %v4792_v1  ;;  %v2674_v52 = vmul.f32 %v2661_v38, %v4798_v10  ;;  %v2675_v63 = vmul.f32 %v2661_v38, %v4804_v54 }
 0x222   :  { %v2676_v24 = vmul.f32 %v2661_v38, %v4810_v21  ;;  %v2677_v56 = vmul.f32 %v2661_v38, %v2580_v11  ;;  %v2665_v9 = vmul.f32 %v2661_v38, %v4740_v5  ;;  %v2666_v13 = vmul.f32 %v2661_v38, %v4749_v58 }
 0x223   :  { %v2678_v36 = vmul.f32 %v2661_v38, %v2583_v23  ;;  %v2683_v59 = vrot.slane %v2656_v40, %v2660_v47 }
 0x225   :  { %v2685_v19 = vadd.f32 %v2683_v59, %v2663_v25  ;;  %v2686_v18 = vadd.f32 %v2683_v59, %v2664_v41  ;;  %v2687_v62 = vadd.f32 %v2683_v59, %v2665_v9  ;;  %v2688_v14 = vadd.f32 %v2683_v59, %v2666_v13 }
 0x226   :  { %v2689_v29 = vadd.f32 %v2683_v59, %v2667_v8  ;;  %v2690_v60 = vadd.f32 %v2683_v59, %v2668_v44  ;;  %v2691_v1 = vadd.f32 %v2683_v59, %v2669_v45  ;;  %v2692_v61 = vadd.f32 %v2683_v59, %v2670_v46 }
 0x227   :  { %v2693_v10 = vadd.f32 %v2683_v59, %v2671_v3  ;;  %v2694_v53 = vadd.f32 %v2683_v59, %v2672_v50  ;;  %v2695_v54 = vadd.f32 %v2683_v59, %v2673_v48  ;;  %v2696_v0 = vadd.f32 %v2683_v59, %v2674_v52 }
 0x228   :  { %v2697_v21 = vadd.f32 %v2683_v59, %v2675_v63  ;;  %v2698_v11 = vadd.f32 %v2683_v59, %v2676_v24  ;;  %v2699_v37 = vadd.f32 %v2683_v59, %v2677_v56  ;;  %v2700_v5 = vadd.f32 %v2683_v59, %v2678_v36 }
 0x229   :  { %vm2701_vm0 = vcmp.ge.f32.partialorder %v2685_v19, 0.0  ;;  %vm2702_vm1 = vcmp.ge.f32.partialorder %v2686_v18, 0.0  ;;  %vm2703_vm2 = vcmp.ge.f32.partialorder %v2687_v62, 0.0  ;;  %vm2704_vm3 = vcmp.ge.f32.partialorder %v2688_v14, 0.0 }
 0x22a   :  { %vm2705_vm4 = vcmp.ge.f32.partialorder %v2689_v29, 0.0  ;;  %vm2706_vm5 = vcmp.ge.f32.partialorder %v2690_v60, 0.0  ;;  %vm2707_vm6 = vcmp.ge.f32.partialorder %v2691_v1, 0.0  ;;  %vm2708_vm7 = vcmp.ge.f32.partialorder %v2692_v61, 0.0 }
 0x22b   :  { %vm2709_vm8 = vcmp.ge.f32.partialorder %v2693_v10, 0.0  ;;  %vm2710_vm9 = vcmp.ge.f32.partialorder %v2694_v53, 0.0  ;;  %vm2711_vm10 = vcmp.ge.f32.partialorder %v2695_v54, 0.0  ;;  %vm2712_vm11 = vcmp.ge.f32.partialorder %v2696_v0, 0.0 }
 0x22c   :  { %vm2713_vm12 = vcmp.ge.f32.partialorder %v2697_v21, 0.0  ;;  %vm2714_vm13 = vcmp.ge.f32.partialorder %v2698_v11, 0.0  ;;  %vm2715_vm14 = vcmp.ge.f32.partialorder %v2699_v37, 0.0  ;;  %vm2716_vm15 = vcmp.ge.f32.partialorder %v2700_v5, 0.0 }
 0x22d   :  { %v2717_v58 = vmul.f32 0.2, %v2685_v19  ;;  %v2718_v23 = vmul.f32 0.2, %v2686_v18  ;;  %v2719_v31 = vmul.f32 0.2, %v2687_v62 }
 0x22e   :  { %v2720_v49 = vmul.f32 0.2, %v2688_v14  ;;  %v2721_v6 = vmul.f32 0.2, %v2689_v29  ;;  %v2722_v12 = vmul.f32 0.2, %v2690_v60 }
 0x22f   :  { %v2723_v30 = vmul.f32 0.2, %v2691_v1  ;;  %v2724_v15 = vmul.f32 0.2, %v2692_v61  ;;  %v2725_v16 = vmul.f32 0.2, %v2693_v10  ;;  %v2733_v43 = vsel %vm2701_vm0, %v2685_v19, %v2717_v58 }
 0x230   :  { %v2726_v4 = vmul.f32 0.2, %v2694_v53  ;;  %v2727_v17 = vmul.f32 0.2, %v2695_v54  ;;  %v2728_v39 = vmul.f32 0.2, %v2696_v0  ;;  %v2734_v42 = vsel %vm2702_vm1, %v2686_v18, %v2718_v23 }
 0x231   :  { %v2729_v20 = vmul.f32 0.2, %v2697_v21  ;;  %v2730_v2 = vmul.f32 0.2, %v2698_v11  ;;  %v2731_v28 = vmul.f32 0.2, %v2699_v37  ;;  %v2735_v22 = vsel %vm2703_vm2, %v2687_v62, %v2719_v31 }
 0x232   :  { %v2732_v55 = vmul.f32 0.2, %v2700_v5  ;;  %v2736_v32 = vsel %vm2704_vm3, %v2688_v14, %v2720_v49  ;;  %v2737_v7 = vsel %vm2705_vm4, %v2689_v29, %v2721_v6  ;;  %v2738_v26 = vsel %vm2706_vm5, %v2690_v60, %v2722_v12 }
 0x233   :  { %v2739_v27 = vsel %vm2707_vm6, %v2691_v1, %v2723_v30  ;;  %v2740_v51 = vsel %vm2708_vm7, %v2692_v61, %v2724_v15  ;;  %v2741_v47 = vsel %vm2709_vm8, %v2693_v10, %v2725_v16  ;;  %v2742_v33 = vsel %vm2710_vm9, %v2694_v53, %v2726_v4 }
 0x234   :  { %v2743_v34 = vsel %vm2711_vm10, %v2695_v54, %v2727_v17  ;;  %v2744_v35 = vsel %vm2712_vm11, %v2696_v0, %v2728_v39  ;;  %v2745_v57 = vsel %vm2713_vm12, %v2697_v21, %v2729_v20  ;;  %v2746_v38 = vsel %vm2714_vm13, %v2698_v11, %v2730_v2 }
 0x235   :  { %v2747_v40 = vsel %vm2715_vm14, %v2699_v37, %v2731_v28  ;;  %v2748_v25 = vsel %vm2716_vm15, %v2700_v5, %v2732_v55  ;;  %v3124_v41 = vpack.c.bf16 %v2734_v42, %v2733_v43  ;;  %v3129_v8 = vpack.c.bf16 %v2736_v32, %v2735_v22 }
 0x236   :  { %v3134_v44 = vpack.c.bf16 %v2738_v26, %v2737_v7  ;;  %v3139_v45 = vpack.c.bf16 %v2740_v51, %v2739_v27  ;;  %v3144_v46 = vpack.c.bf16 %v2742_v33, %v2741_v47  ;;  %v3149_v3 = vpack.c.bf16 %v2744_v35, %v2743_v34 }
 0x237   :  { %3125 = vst [vmem:[%s4881_s4] sm:$0xff] %v3124_v41   ;;  %3161 = vst [vmem:[%s4881_s4 + $0x8] sm:$0xff] %v3129_v8   ;;  %v3154_v50 = vpack.c.bf16 %v2746_v38, %v2745_v57  ;;  %v3159_v48 = vpack.c.bf16 %v2748_v25, %v2747_v40 }
 0x238   :  { %3162 = vst [vmem:[%s4881_s4 + $0x10] sm:$0xff] %v3134_v44   ;;  %3163 = vst [vmem:[%s4881_s4 + $0x18] sm:$0xff] %v3139_v45  }
 0x239   :  { %3164 = vst [vmem:[%s4881_s4 + $0x20] sm:$0xff] %v3144_v46   ;;  %3165 = vst [vmem:[%s4881_s4 + $0x28] sm:$0xff] %v3149_v3  }
 0x23a   :  { %3166 = vst [vmem:[%s4881_s4 + $0x30] sm:$0xff] %v3154_v50   ;;  %3167 = vst [vmem:[%s4881_s4 + $0x38] sm:$0xff] %v3159_v48  }

// kernel: patch_discriminator_forward.7
= control target key start
LH: loop header
LB: loop body
LE: loop exit
PB: predicated region body
PF: predicated region fallthrough
CT: control target
= control target key end

     0   :  { %s2767_s1 = inlined_call_operand.vmem [shape: bf16[2048,128], index: 1, kind: input, shape index: {}]   ;;  %s2768_s0 = inlined_call_operand.vmem [shape: bf16[32,2048], index: 0, kind: input, shape index: {}]   ;;  %s2769_s2 = inlined_call_operand.vmem [shape: f32[1,128], index: 2, kind: input, shape index: {}]   ;;  %s2770_s3 = inlined_call_operand.vmem [shape: f32[1,128], index: 3, kind: input, shape index: {}]   ;;  %s2771_s4 = inlined_call_operand.vmem [shape: bf16[32,128], index: 4, kind: output, shape index: {}]  }
   0x1   :  { %v2120_v0 = vld [vmem:[%s2767_s1 + $0x40] sm:$0xff]   ;;  %v2124_v4 = vld [vmem:[%s2767_s1 + $0x48] sm:$0xff]   ;;  %v2128_v8 = vld [vmem:[%s2767_s1 + $0x50] sm:$0xff]  }
   0x2   :  { %v2121_v1 = vld [vmem:[%s2767_s1 + $0xc0] sm:$0xff]   ;;  %1896 = vmatprep.subr.bf16.mxu0 %v2120_v0  ;;  %v2125_v5 = vld [vmem:[%s2767_s1 + $0xc8] sm:$0xff]   ;;  %v2129_v9 = vld [vmem:[%s2767_s1 + $0xd0] sm:$0xff]  }
   0x3   :  { %v2122_v2 = vld [vmem:[%s2767_s1] sm:$0xff]   ;;  %1924 = vmatprep.subr.bf16.mxu1 %v2121_v1  ;;  %v2126_v6 = vld [vmem:[%s2767_s1 + $0x8] sm:$0xff]   ;;  %v2130_v10 = vld [vmem:[%s2767_s1 + $0x10] sm:$0xff]  }
   0x4   :  { %v2123_v3 = vld [vmem:[%s2767_s1 + $0x80] sm:$0xff]   ;;  %1897 = vmatpush3.bf16.msra.mxu0 %v2122_v2  ;;  %v2127_v7 = vld [vmem:[%s2767_s1 + $0x88] sm:$0xff]   ;;  %v2131_v11 = vld [vmem:[%s2767_s1 + $0x90] sm:$0xff]  }
   0x5   :  { %1925 = vmatpush3.bf16.msra.mxu1 %v2123_v3  ;;  %1898 = vmatprep.subr.bf16.mxu0 %v2124_v4  ;;  %v2132_v12 = vld [vmem:[%s2767_s1 + $0x58] sm:$0xff]   ;;  %v2136_v16 = vld [vmem:[%s2767_s1 + $0x60] sm:$0xff]   ;;  %v2140_v20 = vld [vmem:[%s2767_s1 + $0x68] sm:$0xff]  }
   0x6   :  { %1926 = vmatprep.subr.bf16.mxu1 %v2125_v5  ;;  %v2133_v13 = vld [vmem:[%s2767_s1 + $0xd8] sm:$0xff]   ;;  %v2137_v17 = vld [vmem:[%s2767_s1 + $0xe0] sm:$0xff]   ;;  %v2141_v21 = vld [vmem:[%s2767_s1 + $0xe8] sm:$0xff]  }
   0x7   :  { %v2134_v14 = vld [vmem:[%s2767_s1 + $0x18] sm:$0xff]   ;;  %v2138_v18 = vld [vmem:[%s2767_s1 + $0x20] sm:$0xff]   ;;  %v2142_v22 = vld [vmem:[%s2767_s1 + $0x28] sm:$0xff]  }
   0x8   :  { %1899 = vmatpush3.bf16.msra.mxu0 %v2126_v6  ;;  %v2135_v15 = vld [vmem:[%s2767_s1 + $0x98] sm:$0xff]   ;;  %v2139_v19 = vld [vmem:[%s2767_s1 + $0xa0] sm:$0xff]   ;;  %v2143_v23 = vld [vmem:[%s2767_s1 + $0xa8] sm:$0xff]  }
   0x9   :  { %1927 = vmatpush3.bf16.msra.mxu1 %v2127_v7  ;;  %1900 = vmatprep.subr.bf16.mxu0 %v2128_v8  ;;  %v2144_v24 = vld [vmem:[%s2767_s1 + $0x70] sm:$0xff]   ;;  %v2148_v28 = vld [vmem:[%s2767_s1 + $0x78] sm:$0xff]   ;;  %v18_v32 = vld [vmem:[%s2768_s0] sm:$0xff] }
   0xa   :  { %1928 = vmatprep.subr.bf16.mxu1 %v2129_v9  ;;  %v2145_v25 = vld [vmem:[%s2767_s1 + $0xf0] sm:$0xff]   ;;  %v2149_v29 = vld [vmem:[%s2767_s1 + $0xf8] sm:$0xff]   ;;  %v26_v33 = vld [vmem:[%s2768_s0 + $0x40] sm:$0xff] }
   0xb   :  { %v2146_v26 = vld [vmem:[%s2767_s1 + $0x30] sm:$0xff]   ;;  %v2150_v30 = vld [vmem:[%s2767_s1 + $0x38] sm:$0xff]   ;;  %v19_v34 = vld [vmem:[%s2768_s0 + $0x8] sm:$0xff]  ;;  %v1717_v35 = vcombine.low %v18_v32, %v26_v33  ;;  %v1718_v36 = vcombine.high %v18_v32, %v26_v33 }
   0xc   :  { %1901 = vmatpush3.bf16.msra.mxu0 %v2130_v10  ;;  %v2147_v27 = vld [vmem:[%s2767_s1 + $0xb0] sm:$0xff]   ;;  %v2151_v31 = vld [vmem:[%s2767_s1 + $0xb8] sm:$0xff]   ;;  %v27_v37 = vld [vmem:[%s2768_s0 + $0x48] sm:$0xff] }
   0xd   :  { %1929 = vmatpush3.bf16.msra.mxu1 %v2131_v11  ;;  %1902 = vmatprep.subr.bf16.mxu0 %v2132_v12  ;;  %v1719_v38 = vcombine.low %v19_v34, %v27_v37  ;;  %v1720_v39 = vcombine.high %v19_v34, %v27_v37  ;;  %v2152_v40 = vld [vmem:[%s2767_s1 + $0x140] sm:$0xff]   ;;  %v2156_v44 = vld [vmem:[%s2767_s1 + $0x148] sm:$0xff]   ;;  %v2160_v48 = vld [vmem:[%s2767_s1 + $0x150] sm:$0xff]  }
   0xe   :  { %1930 = vmatprep.subr.bf16.mxu1 %v2133_v13  ;;  %1266 = vmatprep.mubr.bf16.mxu0 %v1718_v36  ;;  %v2153_v41 = vld [vmem:[%s2767_s1 + $0x1c0] sm:$0xff]   ;;  %v2157_v45 = vld [vmem:[%s2767_s1 + $0x1c8] sm:$0xff]   ;;  %v2161_v49 = vld [vmem:[%s2767_s1 + $0x1d0] sm:$0xff]  }
   0xf   :  { %1315 = vmatprep.mubr.bf16.mxu1 %v1720_v39  ;;  %v2154_v42 = vld [vmem:[%s2767_s1 + $0x100] sm:$0xff]   ;;  %v2158_v46 = vld [vmem:[%s2767_s1 + $0x108] sm:$0xff]   ;;  %v2162_v50 = vld [vmem:[%s2767_s1 + $0x110] sm:$0xff]  }
  0x10   :  { %1903 = vmatpush3.bf16.msra.mxu0 %v2134_v14  ;;  %v2155_v43 = vld [vmem:[%s2767_s1 + $0x180] sm:$0xff]   ;;  %v2159_v47 = vld [vmem:[%s2767_s1 + $0x188] sm:$0xff]   ;;  %v2163_v51 = vld [vmem:[%s2767_s1 + $0x190] sm:$0xff]  }
  0x11   :  { %1931 = vmatpush3.bf16.msra.mxu1 %v2135_v15  ;;  %1904 = vmatprep.subr.bf16.mxu0 %v2136_v16  ;;  %v2164_v52 = vld [vmem:[%s2767_s1 + $0x158] sm:$0xff]   ;;  %v2168_v56 = vld [vmem:[%s2767_s1 + $0x160] sm:$0xff]   ;;  %v2172_v60 = vld [vmem:[%s2767_s1 + $0x168] sm:$0xff]  }
  0x12   :  { %1932 = vmatprep.subr.bf16.mxu1 %v2137_v17  ;;  %v2165_v53 = vld [vmem:[%s2767_s1 + $0x1d8] sm:$0xff]   ;;  %v2169_v57 = vld [vmem:[%s2767_s1 + $0x1e0] sm:$0xff]   ;;  %v2173_v61 = vld [vmem:[%s2767_s1 + $0x1e8] sm:$0xff]  }
  0x13   :  { %v2166_v54 = vld [vmem:[%s2767_s1 + $0x118] sm:$0xff]   ;;  %v2170_v58 = vld [vmem:[%s2767_s1 + $0x120] sm:$0xff]   ;;  %v35_v1 = vld [vmem:[%s2768_s0 + $0x88] sm:$0xff] }
  0x14   :  { %1905 = vmatpush3.bf16.msra.mxu0 %v2138_v18  ;;  %v2167_v55 = vld [vmem:[%s2767_s1 + $0x198] sm:$0xff]   ;;  %v2171_v59 = vld [vmem:[%s2767_s1 + $0x1a0] sm:$0xff]   ;;  %v43_v2 = vld [vmem:[%s2768_s0 + $0xc8] sm:$0xff] }
  0x15   :  { %1933 = vmatpush3.bf16.msra.mxu1 %v2139_v19  ;;  %1906 = vmatprep.subr.bf16.mxu0 %v2140_v20  ;;  %v34_v62 = vld [vmem:[%s2768_s0 + $0x80] sm:$0xff]  ;;  %v1736_v4 = vcombine.high %v35_v1, %v43_v2  ;;  %v2174_v5 = vld [vmem:[%s2767_s1 + $0x128] sm:$0xff]   ;;  %v1735_v6 = vcombine.low %v35_v1, %v43_v2  ;;  %v2176_v8 = vld [vmem:[%s2767_s1 + $0x170] sm:$0xff]  }
  0x16   :  { %1934 = vmatprep.subr.bf16.mxu1 %v2141_v21  ;;  %v42_v63 = vld [vmem:[%s2768_s0 + $0xc0] sm:$0xff]  ;;  %v2175_v7 = vld [vmem:[%s2767_s1 + $0x1a8] sm:$0xff]   ;;  %v2177_v9 = vld [vmem:[%s2767_s1 + $0x1f0] sm:$0xff]  }
  0x17   :  { %v1734_v0 = vcombine.high %v34_v62, %v42_v63  ;;  %v1733_v3 = vcombine.low %v34_v62, %v42_v63  ;;  %v2178_v10 = vld [vmem:[%s2767_s1 + $0x130] sm:$0xff]   ;;  %v2180_v12 = vld [vmem:[%s2767_s1 + $0x178] sm:$0xff]   ;;  %v30_v1 = vld [vmem:[%s2768_s0 + $0x60] sm:$0xff] }
  0x18   :  { %1907 = vmatpush3.bf16.msra.mxu0 %v2142_v22  ;;  %v2179_v11 = vld [vmem:[%s2767_s1 + $0x1b0] sm:$0xff]   ;;  %v2181_v13 = vld [vmem:[%s2767_s1 + $0x1f8] sm:$0xff]  }
  0x19   :  { %1935 = vmatpush3.bf16.msra.mxu1 %v2143_v23  ;;  %1908 = vmatprep.subr.bf16.mxu0 %v2144_v24  ;;  %v2182_v14 = vld [vmem:[%s2767_s1 + $0x138] sm:$0xff]   ;;  %v20_v16 = vld [vmem:[%s2768_s0 + $0x10] sm:$0xff]  ;;  %v2184_v24 = vld [vmem:[%s2767_s1 + $0x240] sm:$0xff]  }
  0x1a   :  { %1936 = vmatprep.subr.bf16.mxu1 %v2145_v25  ;;  %v2183_v15 = vld [vmem:[%s2767_s1 + $0x1b8] sm:$0xff]   ;;  %v28_v17 = vld [vmem:[%s2768_s0 + $0x50] sm:$0xff]  ;;  %v2185_v25 = vld [vmem:[%s2767_s1 + $0x2c0] sm:$0xff]  }
  0x1b   :  { %v21_v18 = vld [vmem:[%s2768_s0 + $0x18] sm:$0xff]  ;;  %v1721_v20 = vcombine.low %v20_v16, %v28_v17  ;;  %v1722_v21 = vcombine.high %v20_v16, %v28_v17  ;;  %v36_v32 = vld [vmem:[%s2768_s0 + $0x90] sm:$0xff]  ;;  %v38_v16 = vld [vmem:[%s2768_s0 + $0xa0] sm:$0xff] }
  0x1c   :  { %1909 = vmatpush3.bf16.msra.mxu0 %v2146_v26  ;;  %v29_v19 = vld [vmem:[%s2768_s0 + $0x58] sm:$0xff]  ;;  %v2186_v26 = vld [vmem:[%s2767_s1 + $0x200] sm:$0xff]   ;;  %v44_v33 = vld [vmem:[%s2768_s0 + $0xd0] sm:$0xff] }
  0x1d   :  { %1937 = vmatpush3.bf16.msra.mxu1 %v2147_v27  ;;  %1910 = vmatprep.subr.bf16.mxu0 %v2148_v28  ;;  %v1723_v22 = vcombine.low %v21_v18, %v29_v19  ;;  %v1724_v23 = vcombine.high %v21_v18, %v29_v19  ;;  %v2187_v27 = vld [vmem:[%s2767_s1 + $0x280] sm:$0xff]   ;;  %v2188_v28 = vld [vmem:[%s2767_s1 + $0x248] sm:$0xff]   ;;  %v1738_v34 = vcombine.high %v36_v32, %v44_v33  ;;  %v2192_v36 = vld [vmem:[%s2767_s1 + $0x250] sm:$0xff]  }
  0x1e   :  { %1938 = vmatprep.subr.bf16.mxu1 %v2149_v29  ;;  %v2189_v29 = vld [vmem:[%s2767_s1 + $0x2c8] sm:$0xff]   ;;  %v2193_v37 = vld [vmem:[%s2767_s1 + $0x2d0] sm:$0xff]   ;;  %v45_v39 = vld [vmem:[%s2768_s0 + $0xd8] sm:$0xff] }
  0x1f   :  { %v2214_v62 = vld [vmem:[%s2767_s1 + $0x238] sm:$0xff]   ;;  %v46_v17 = vld [vmem:[%s2768_s0 + $0xe0] sm:$0xff] }
  0x20   :  { %1911 = vmatpush3.bf16.msra.mxu0 %v2150_v30  ;;  %v2190_v30 = vld [vmem:[%s2767_s1 + $0x208] sm:$0xff]   ;;  %v2215_v63 = vld [vmem:[%s2767_s1 + $0x2b8] sm:$0xff]   ;;  %v1742_v18 = vcombine.high %v38_v16, %v46_v17  ;;  %v1741_v19 = vcombine.low %v38_v16, %v46_v17 }
  0x21   :  { %1939 = vmatpush3.bf16.msra.mxu1 %v2151_v31  ;;  %1952 = vmatprep.subr.bf16.mxu0 %v2152_v40  ;;  %v2191_v31 = vld [vmem:[%s2767_s1 + $0x288] sm:$0xff]  }
  0x22   :  { %1980 = vmatprep.subr.bf16.mxu1 %v2153_v41  ;;  %v2194_v41 = vld [vmem:[%s2767_s1 + $0x210] sm:$0xff]  }
  0x23   :  { %1267 = vmatmul.mubr.bf16.vlgmr.msra.gmra.mrb[0].mxu0 %v1717_v35  ;;  %v1737_v35 = vcombine.low %v36_v32, %v44_v33  ;;  %v2232_v32 = vld [vmem:[%s2767_s1 + $0x360] sm:$0xff]  }
  0x24   :  { %1316 = vmatmul.mubr.bf16.vlgmr.msra.gmra.mrb[0].mxu1 %v1719_v38  ;;  %1953 = vmatpush3.bf16.msra.mxu0 %v2154_v42  ;;  %v37_v38 = vld [vmem:[%s2768_s0 + $0x98] sm:$0xff]  ;;  %v2233_v33 = vld [vmem:[%s2767_s1 + $0x3e0] sm:$0xff]  }
  0x25   :  { %1981 = vmatpush3.bf16.msra.mxu1 %v2155_v43  ;;  %1954 = vmatprep.subr.bf16.mxu0 %v2156_v44  ;;  %v1740_v40 = vcombine.high %v37_v38, %v45_v39  ;;  %v1739_v42 = vcombine.low %v37_v38, %v45_v39  ;;  %v2195_v43 = vld [vmem:[%s2767_s1 + $0x290] sm:$0xff]   ;;  %v2196_v44 = vld [vmem:[%s2767_s1 + $0x258] sm:$0xff]   ;;  %v2238_v38 = vld [vmem:[%s2767_s1 + $0x328] sm:$0xff]  }
  0x26   :  { %1982 = vmatprep.subr.bf16.mxu1 %v2157_v45  ;;  %1274 = vmatprep.mubr.bf16.mxu0 %v1734_v0  ;;  %v2197_v45 = vld [vmem:[%s2767_s1 + $0x2d8] sm:$0xff]   ;;  %v22_v0 = vld [vmem:[%s2768_s0 + $0x20] sm:$0xff]  ;;  %v2239_v39 = vld [vmem:[%s2767_s1 + $0x3a8] sm:$0xff]  }
  0x27   :  { %1323 = vmatprep.mubr.bf16.mxu1 %v1736_v4  ;;  %v1725_v2 = vcombine.low %v22_v0, %v30_v1  ;;  %v23_v4 = vld [vmem:[%s2768_s0 + $0x28] sm:$0xff] }
  0x28   :  { %1955 = vmatpush3.bf16.msra.mxu0 %v2158_v46  ;;  %v2198_v46 = vld [vmem:[%s2767_s1 + $0x218] sm:$0xff]  }
  0x29   :  { %1983 = vmatpush3.bf16.msra.mxu1 %v2159_v47  ;;  %1956 = vmatprep.subr.bf16.mxu0 %v2160_v48  ;;  %v2199_v47 = vld [vmem:[%s2767_s1 + $0x298] sm:$0xff]   ;;  %v2200_v48 = vld [vmem:[%s2767_s1 + $0x260] sm:$0xff]  }
  0x2a   :  { %1984 = vmatprep.subr.bf16.mxu1 %v2161_v49  ;;  %v2201_v49 = vld [vmem:[%s2767_s1 + $0x2e0] sm:$0xff]  }
  0x2b   :  { %1275 = vmatmul.mubr.bf16.gmra.mrb[4].mxu0 %v1733_v3  ;;  %v1726_v3 = vcombine.high %v22_v0, %v30_v1 }
  0x2c   :  { %1957 = vmatpush3.bf16.msra.mxu0 %v2162_v50  ;;  %1324 = vmatmul.mubr.bf16.gmra.mrb[4].mxu1 %v1735_v6  ;;  %v2202_v50 = vld [vmem:[%s2767_s1 + $0x220] sm:$0xff]  }
  0x2d   :  { %1985 = vmatpush3.bf16.msra.mxu1 %v2163_v51  ;;  %1958 = vmatprep.subr.bf16.mxu0 %v2164_v52  ;;  %v2203_v51 = vld [vmem:[%s2767_s1 + $0x2a0] sm:$0xff]   ;;  %v2204_v52 = vld [vmem:[%s2767_s1 + $0x268] sm:$0xff]  }
  0x2e   :  { %1986 = vmatprep.subr.bf16.mxu1 %v2165_v53  ;;  %1364 = vmatprep.mubr.bf16.mxu0 %v1722_v21  ;;  %v2205_v53 = vld [vmem:[%s2767_s1 + $0x2e8] sm:$0xff]   ;;  %v2225_v21 = vld [vmem:[%s2767_s1 + $0x3d0] sm:$0xff]  }
  0x2f   :  { %1413 = vmatprep.mubr.bf16.mxu1 %v1724_v23  ;;  %v47_v23 = vld [vmem:[%s2768_s0 + $0xe8] sm:$0xff] }
  0x30   :  { %1959 = vmatpush3.bf16.msra.mxu0 %v2166_v54  ;;  %v2206_v54 = vld [vmem:[%s2767_s1 + $0x228] sm:$0xff]  }
  0x31   :  { %1987 = vmatpush3.bf16.msra.mxu1 %v2167_v55  ;;  %1960 = vmatprep.subr.bf16.mxu0 %v2168_v56  ;;  %v2207_v55 = vld [vmem:[%s2767_s1 + $0x2a8] sm:$0xff]   ;;  %v2208_v56 = vld [vmem:[%s2767_s1 + $0x270] sm:$0xff]  }
  0x32   :  { %1988 = vmatprep.subr.bf16.mxu1 %v2169_v57  ;;  %v2209_v57 = vld [vmem:[%s2767_s1 + $0x2f0] sm:$0xff]  }
  0x34   :  { %1961 = vmatpush3.bf16.msra.mxu0 %v2170_v58  ;;  %v2210_v58 = vld [vmem:[%s2767_s1 + $0x230] sm:$0xff]  }
  0x35   :  { %1989 = vmatpush3.bf16.msra.mxu1 %v2171_v59  ;;  %1962 = vmatprep.subr.bf16.mxu0 %v2172_v60  ;;  %v2211_v59 = vld [vmem:[%s2767_s1 + $0x2b0] sm:$0xff]   ;;  %v2212_v60 = vld [vmem:[%s2767_s1 + $0x278] sm:$0xff]  }
  0x36   :  { %1990 = vmatprep.subr.bf16.mxu1 %v2173_v61  ;;  %v2213_v61 = vld [vmem:[%s2767_s1 + $0x2f8] sm:$0xff]  }
  0x38   :  { %1963 = vmatpush3.bf16.msra.mxu0 %v2174_v5  ;;  %v31_v5 = vld [vmem:[%s2768_s0 + $0x68] sm:$0xff] }
  0x39   :  { %1991 = vmatpush3.bf16.msra.mxu1 %v2175_v7  ;;  %1964 = vmatprep.subr.bf16.mxu0 %v2176_v8  ;;  %v1727_v6 = vcombine.low %v23_v4, %v31_v5  ;;  %v1728_v7 = vcombine.high %v23_v4, %v31_v5  ;;  %v2216_v8 = vld [vmem:[%s2767_s1 + $0x340] sm:$0xff]  }
  0x3a   :  { %1992 = vmatprep.subr.bf16.mxu1 %v2177_v9  ;;  %v2217_v9 = vld [vmem:[%s2767_s1 + $0x3c0] sm:$0xff]  }
  0x3c   :  { %1965 = vmatpush3.bf16.msra.mxu0 %v2178_v10  ;;  %v2218_v10 = vld [vmem:[%s2767_s1 + $0x300] sm:$0xff]  }
  0x3d   :  { %1993 = vmatpush3.bf16.msra.mxu1 %v2179_v11  ;;  %1966 = vmatprep.subr.bf16.mxu0 %v2180_v12  ;;  %v2219_v11 = vld [vmem:[%s2767_s1 + $0x380] sm:$0xff]   ;;  %v2220_v12 = vld [vmem:[%s2767_s1 + $0x348] sm:$0xff]  }
  0x3e   :  { %1994 = vmatprep.subr.bf16.mxu1 %v2181_v13  ;;  %v2221_v13 = vld [vmem:[%s2767_s1 + $0x3c8] sm:$0xff]  }
  0x40   :  { %1967 = vmatpush3.bf16.msra.mxu0 %v2182_v14  ;;  %v2222_v14 = vld [vmem:[%s2767_s1 + $0x308] sm:$0xff]  }
  0x41   :  { %1995 = vmatpush3.bf16.msra.mxu1 %v2183_v15  ;;  %2008 = vmatprep.subr.bf16.mxu0 %v2184_v24  ;;  %v2223_v15 = vld [vmem:[%s2767_s1 + $0x388] sm:$0xff]  }
  0x42   :  { %2036 = vmatprep.subr.bf16.mxu1 %v2185_v25  ;;  %v2226_v25 = vld [vmem:[%s2767_s1 + $0x310] sm:$0xff]  }
  0x43   :  { %1365 = vmatmul.mubr.bf16.vlgmr.msra.gmra.mrb[8].mxu0 %v1721_v20  ;;  %v2224_v20 = vld [vmem:[%s2767_s1 + $0x350] sm:$0xff]  }
  0x44   :  { %1414 = vmatmul.mubr.bf16.vlgmr.msra.gmra.mrb[8].mxu1 %v1723_v22  ;;  %2009 = vmatpush3.bf16.msra.mxu0 %v2186_v26  ;;  %v39_v22 = vld [vmem:[%s2768_s0 + $0xa8] sm:$0xff] }
  0x45   :  { %2037 = vmatpush3.bf16.msra.mxu1 %v2187_v27  ;;  %2010 = vmatprep.subr.bf16.mxu0 %v2188_v28  ;;  %v1744_v24 = vcombine.high %v39_v22, %v47_v23  ;;  %v1743_v26 = vcombine.low %v39_v22, %v47_v23  ;;  %v2227_v27 = vld [vmem:[%s2767_s1 + $0x390] sm:$0xff]   ;;  %v2228_v28 = vld [vmem:[%s2767_s1 + $0x358] sm:$0xff]  }
  0x46   :  { %2038 = vmatprep.subr.bf16.mxu1 %v2189_v29  ;;  %1372 = vmatprep.mubr.bf16.mxu0 %v1738_v34  ;;  %v2229_v29 = vld [vmem:[%s2767_s1 + $0x3d8] sm:$0xff]   ;;  %v2234_v34 = vld [vmem:[%s2767_s1 + $0x320] sm:$0xff]  }
  0x47   :  { %1421 = vmatprep.mubr.bf16.mxu1 %v1740_v40  ;;  %v2240_v40 = vld [vmem:[%s2767_s1 + $0x370] sm:$0xff]  }
  0x48   :  { %2011 = vmatpush3.bf16.msra.mxu0 %v2190_v30  ;;  %v2230_v30 = vld [vmem:[%s2767_s1 + $0x318] sm:$0xff]  }
  0x49   :  { %2039 = vmatpush3.bf16.msra.mxu1 %v2191_v31  ;;  %2012 = vmatprep.subr.bf16.mxu0 %v2192_v36  ;;  %v2231_v31 = vld [vmem:[%s2767_s1 + $0x398] sm:$0xff]   ;;  %v2236_v36 = vld [vmem:[%s2767_s1 + $0x368] sm:$0xff]  }
  0x4a   :  { %2040 = vmatprep.subr.bf16.mxu1 %v2193_v37  ;;  %v2237_v37 = vld [vmem:[%s2767_s1 + $0x3e8] sm:$0xff]  }
  0x4b   :  { %1373 = vmatmul.mubr.bf16.gmra.mrb[12].mxu0 %v1737_v35  ;;  %v2235_v35 = vld [vmem:[%s2767_s1 + $0x3a0] sm:$0xff]  }
  0x4c   :  { %2013 = vmatpush3.bf16.msra.mxu0 %v2194_v41  ;;  %1422 = vmatmul.mubr.bf16.gmra.mrb[12].mxu1 %v1739_v42  ;;  %v2241_v41 = vld [vmem:[%s2767_s1 + $0x3f0] sm:$0xff]  }
  0x4d   :  { %2041 = vmatpush3.bf16.msra.mxu1 %v2195_v43  ;;  %2014 = vmatprep.subr.bf16.mxu0 %v2196_v44  ;;  %v2242_v42 = vld [vmem:[%s2767_s1 + $0x330] sm:$0xff]   ;;  %v2244_v44 = vld [vmem:[%s2767_s1 + $0x378] sm:$0xff]  }
  0x4e   :  { %2042 = vmatprep.subr.bf16.mxu1 %v2197_v45  ;;  %1462 = vmatprep.mubr.bf16.mxu0 %v1726_v3  ;;  %v2243_v43 = vld [vmem:[%s2767_s1 + $0x3b0] sm:$0xff]   ;;  %v2245_v45 = vld [vmem:[%s2767_s1 + $0x3f8] sm:$0xff]  }
  0x4f   :  { %1511 = vmatprep.mubr.bf16.mxu1 %v1728_v7 }
  0x50   :  { %2015 = vmatpush3.bf16.msra.mxu0 %v2198_v46  ;;  %v2246_v46 = vld [vmem:[%s2767_s1 + $0x338] sm:$0xff]  }
  0x51   :  { %2043 = vmatpush3.bf16.msra.mxu1 %v2199_v47  ;;  %2016 = vmatprep.subr.bf16.mxu0 %v2200_v48  ;;  %v2247_v47 = vld [vmem:[%s2767_s1 + $0x3b8] sm:$0xff]   ;;  %v24_v48 = vld [vmem:[%s2768_s0 + $0x30] sm:$0xff] }
  0x52   :  { %2044 = vmatprep.subr.bf16.mxu1 %v2201_v49  ;;  %v32_v49 = vld [vmem:[%s2768_s0 + $0x70] sm:$0xff] }
  0x54   :  { %2017 = vmatpush3.bf16.msra.mxu0 %v2202_v50  ;;  %v25_v50 = vld [vmem:[%s2768_s0 + $0x38] sm:$0xff] }
  0x55   :  { %2045 = vmatpush3.bf16.msra.mxu1 %v2203_v51  ;;  %2018 = vmatprep.subr.bf16.mxu0 %v2204_v52  ;;  %v1729_v51 = vcombine.low %v24_v48, %v32_v49  ;;  %v1730_v52 = vcombine.high %v24_v48, %v32_v49 }
  0x56   :  { %2046 = vmatprep.subr.bf16.mxu1 %v2205_v53  ;;  %v33_v53 = vld [vmem:[%s2768_s0 + $0x78] sm:$0xff] }
  0x58   :  { %2019 = vmatpush3.bf16.msra.mxu0 %v2206_v54  ;;  %v40_v54 = vld [vmem:[%s2768_s0 + $0xb0] sm:$0xff] }
  0x59   :  { %2047 = vmatpush3.bf16.msra.mxu1 %v2207_v55  ;;  %2020 = vmatprep.subr.bf16.mxu0 %v2208_v56  ;;  %v48_v55 = vld [vmem:[%s2768_s0 + $0xf0] sm:$0xff]  ;;  %v1731_v56 = vcombine.low %v25_v50, %v33_v53 }
  0x5a   :  { %2048 = vmatprep.subr.bf16.mxu1 %v2209_v57  ;;  %v1732_v57 = vcombine.high %v25_v50, %v33_v53 }
  0x5c   :  { %2021 = vmatpush3.bf16.msra.mxu0 %v2210_v58  ;;  %v1746_v58 = vcombine.high %v40_v54, %v48_v55 }
  0x5d   :  { %2049 = vmatpush3.bf16.msra.mxu1 %v2211_v59  ;;  %2022 = vmatprep.subr.bf16.mxu0 %v2212_v60  ;;  %v41_v59 = vld [vmem:[%s2768_s0 + $0xb8] sm:$0xff] }
  0x5e   :  { %2050 = vmatprep.subr.bf16.mxu1 %v2213_v61  ;;  %v49_v60 = vld [vmem:[%s2768_s0 + $0xf8] sm:$0xff] }
  0x5f   :  { %v1748_v61 = vcombine.high %v41_v59, %v49_v60 }
  0x60   :  { %2023 = vmatpush3.bf16.msra.mxu0 %v2214_v62  ;;  %v1745_v62 = vcombine.low %v40_v54, %v48_v55 }
  0x61   :  { %2051 = vmatpush3.bf16.msra.mxu1 %v2215_v63  ;;  %2064 = vmatprep.subr.bf16.mxu0 %v2216_v8  ;;  %v1747_v63 = vcombine.low %v41_v59, %v49_v60 }
  0x62   :  { %2092 = vmatprep.subr.bf16.mxu1 %v2217_v9 }
  0x63   :  { %1463 = vmatmul.mubr.bf16.vlgmr.msra.gmra.mrb[16].mxu0 %v1725_v2 }
  0x64   :  { %1512 = vmatmul.mubr.bf16.vlgmr.msra.gmra.mrb[16].mxu1 %v1727_v6  ;;  %2065 = vmatpush3.bf16.msra.mxu0 %v2218_v10 }
  0x65   :  { %2093 = vmatpush3.bf16.msra.mxu1 %v2219_v11  ;;  %2066 = vmatprep.subr.bf16.mxu0 %v2220_v12 }
  0x66   :  { %2094 = vmatprep.subr.bf16.mxu1 %v2221_v13  ;;  %1470 = vmatprep.mubr.bf16.mxu0 %v1742_v18 }
  0x67   :  { %1519 = vmatprep.mubr.bf16.mxu1 %v1744_v24 }
  0x68   :  { %2067 = vmatpush3.bf16.msra.mxu0 %v2222_v14 }
  0x69   :  { %2095 = vmatpush3.bf16.msra.mxu1 %v2223_v15  ;;  %2068 = vmatprep.subr.bf16.mxu0 %v2224_v20 }
  0x6a   :  { %2096 = vmatprep.subr.bf16.mxu1 %v2225_v21 }
  0x6b   :  { %1471 = vmatmul.mubr.bf16.gmra.mrb[20].mxu0 %v1741_v19 }
  0x6c   :  { %2069 = vmatpush3.bf16.msra.mxu0 %v2226_v25  ;;  %1520 = vmatmul.mubr.bf16.gmra.mrb[20].mxu1 %v1743_v26 }
  0x6d   :  { %2097 = vmatpush3.bf16.msra.mxu1 %v2227_v27  ;;  %2070 = vmatprep.subr.bf16.mxu0 %v2228_v28 }
  0x6e   :  { %2098 = vmatprep.subr.bf16.mxu1 %v2229_v29  ;;  %1560 = vmatprep.mubr.bf16.mxu0 %v1730_v52 }
  0x6f   :  { %1609 = vmatprep.mubr.bf16.mxu1 %v1732_v57 }
  0x70   :  { %2071 = vmatpush3.bf16.msra.mxu0 %v2230_v30 }
  0x71   :  { %2099 = vmatpush3.bf16.msra.mxu1 %v2231_v31  ;;  %2072 = vmatprep.subr.bf16.mxu0 %v2232_v32 }
  0x72   :  { %2100 = vmatprep.subr.bf16.mxu1 %v2233_v33 }
  0x74   :  { %2073 = vmatpush3.bf16.msra.mxu0 %v2234_v34 }
  0x75   :  { %2101 = vmatpush3.bf16.msra.mxu1 %v2235_v35  ;;  %2074 = vmatprep.subr.bf16.mxu0 %v2236_v36 }
  0x76   :  { %2102 = vmatprep.subr.bf16.mxu1 %v2237_v37 }
  0x78   :  { %2075 = vmatpush3.bf16.msra.mxu0 %v2238_v38 }
  0x79   :  { %2103 = vmatpush3.bf16.msra.mxu1 %v2239_v39  ;;  %2076 = vmatprep.subr.bf16.mxu0 %v2240_v40 }
  0x7a   :  { %2104 = vmatprep.subr.bf16.mxu1 %v2241_v41 }
  0x7c   :  { %2077 = vmatpush3.bf16.msra.mxu0 %v2242_v42 }
  0x7d   :  { %2105 = vmatpush3.bf16.msra.mxu1 %v2243_v43  ;;  %2078 = vmatprep.subr.bf16.mxu0 %v2244_v44 }
  0x7e   :  { %2106 = vmatprep.subr.bf16.mxu1 %v2245_v45 }
  0x80   :  { %2079 = vmatpush3.bf16.msra.mxu0 %v2246_v46 }
  0x81   :  { %2107 = vmatpush3.bf16.msra.mxu1 %v2247_v47 }
  0x83   :  { %1561 = vmatmul.mubr.bf16.vlgmr.msra.gmra.mrb[24].mxu0 %v1729_v51 }
  0x84   :  { %1610 = vmatmul.mubr.bf16.vlgmr.msra.gmra.mrb[24].mxu1 %v1731_v56  ;;  %1568 = vmatprep.mubr.bf16.mxu0 %v1746_v58 }
  0x85   :  { %1617 = vmatprep.mubr.bf16.mxu1 %v1748_v61 }
  0x8b   :  { %1569 = vmatmul.mubr.bf16.gmra.mrb[28].mxu0 %v1745_v62 }
  0x8c   :  { %1618 = vmatmul.mubr.bf16.gmra.mrb[28].mxu1 %v1747_v63 }
  0xf6   :  { %v1912_v0 = vpop.f32.mrb[0].mxu0 }
  0xf7   :  { %v1940_v1 = vpop.f32.mrb[0].mxu1  ;;  %v1913_v2 = vpop.f32.mrb[1].mxu0 }
  0xf8   :  { %v1914_v3 = vadd.f32 %v1913_v2, %v1912_v0  ;;  %v1941_v4 = vpop.f32.mrb[1].mxu1  ;;  %v1915_v5 = vpop.f32.mrb[2].mxu0 }
  0xf9   :  { %v1942_v6 = vadd.f32 %v1941_v4, %v1940_v1  ;;  %v1943_v7 = vpop.f32.mrb[2].mxu1  ;;  %v1916_v8 = vpop.f32.mrb[3].mxu0 }
  0xfa   :  { %v1917_v9 = vadd.f32 %v1916_v8, %v1915_v5  ;;  %v1944_v10 = vpop.f32.mrb[3].mxu1 }
  0xfb   :  { %v1318_v11 = vadd.f32 %v1942_v6, %v1914_v3  ;;  %v1945_v12 = vadd.f32 %v1944_v10, %v1943_v7 }
  0xfd   :  { %v1321_v13 = vadd.f32 %v1945_v12, %v1917_v9 }
  0xfe   :  { %v1918_v14 = vpop.f32.mrb[4].mxu0 }
  0xff   :  { %v1946_v15 = vpop.f32.mrb[4].mxu1  ;;  %v1919_v16 = vpop.f32.mrb[5].mxu0 }
 0x100   :  { %v1920_v17 = vadd.f32 %v1919_v16, %v1918_v14  ;;  %v1947_v18 = vpop.f32.mrb[5].mxu1  ;;  %v1921_v19 = vpop.f32.mrb[6].mxu0 }
 0x101   :  { %v1948_v20 = vadd.f32 %v1947_v18, %v1946_v15  ;;  %v1949_v21 = vpop.f32.mrb[6].mxu1  ;;  %v1922_v22 = vpop.f32.mrb[7].mxu0 }
 0x102   :  { %v1923_v23 = vadd.f32 %v1922_v22, %v1921_v19  ;;  %v1950_v24 = vpop.f32.mrb[7].mxu1 }
 0x103   :  { %v1326_v25 = vadd.f32 %v1948_v20, %v1920_v17  ;;  %v1951_v26 = vadd.f32 %v1950_v24, %v1949_v21 }
 0x105   :  { %v1329_v27 = vadd.f32 %v1951_v26, %v1923_v23 }
 0x116   :  { %v1968_v28 = vpop.f32.mrb[8].mxu0 }
 0x117   :  { %v1996_v29 = vpop.f32.mrb[8].mxu1  ;;  %v1969_v30 = vpop.f32.mrb[9].mxu0 }
 0x118   :  { %v1997_v31 = vpop.f32.mrb[9].mxu1  ;;  %v1970_v32 = vadd.f32 %v1969_v30, %v1968_v28  ;;  %v1971_v34 = vpop.f32.mrb[10].mxu0 }
 0x119   :  { %v1998_v33 = vadd.f32 %v1997_v31, %v1996_v29  ;;  %v1999_v35 = vpop.f32.mrb[10].mxu1  ;;  %v1972_v36 = vpop.f32.mrb[11].mxu0 }
 0x11a   :  { %v2000_v37 = vpop.f32.mrb[11].mxu1  ;;  %v1367_v38 = vadd.f32 %v1970_v32, %v1318_v11  ;;  %v1973_v39 = vadd.f32 %v1972_v36, %v1971_v34 }
 0x11b   :  { %v2001_v40 = vadd.f32 %v2000_v37, %v1999_v35 }
 0x11c   :  { %v1416_v41 = vadd.f32 %v1998_v33, %v1367_v38  ;;  %v1370_v42 = vadd.f32 %v1973_v39, %v1321_v13 }
 0x11e   :  { %v1419_v43 = vadd.f32 %v2001_v40, %v1370_v42  ;;  %v1974_v44 = vpop.f32.mrb[12].mxu0 }
 0x11f   :  { %v1975_v45 = vpop.f32.mrb[13].mxu0  ;;  %v2002_v50 = vpop.f32.mrb[12].mxu1 }
 0x120   :  { %v1976_v46 = vadd.f32 %v1975_v45, %v1974_v44  ;;  %v1977_v47 = vpop.f32.mrb[14].mxu0  ;;  %v2003_v52 = vpop.f32.mrb[13].mxu1 }
 0x121   :  { %v1978_v48 = vpop.f32.mrb[15].mxu0  ;;  %v2004_v54 = vadd.f32 %v2003_v52, %v2002_v50  ;;  %v2005_v55 = vpop.f32.mrb[14].mxu1 }
 0x122   :  { %v1375_v49 = vadd.f32 %v1976_v46, %v1326_v25  ;;  %v1979_v51 = vadd.f32 %v1978_v48, %v1977_v47  ;;  %v2006_v56 = vpop.f32.mrb[15].mxu1 }
 0x123   :  { %v2007_v58 = vadd.f32 %v2006_v56, %v2005_v55 }
 0x124   :  { %v1378_v53 = vadd.f32 %v1979_v51, %v1329_v27  ;;  %v1424_v57 = vadd.f32 %v2004_v54, %v1375_v49 }
 0x126   :  { %v1427_v59 = vadd.f32 %v2007_v58, %v1378_v53 }
 0x136   :  { %v2024_v60 = vpop.f32.mrb[16].mxu0 }
 0x137   :  { %v2052_v61 = vpop.f32.mrb[16].mxu1  ;;  %v2025_v62 = vpop.f32.mrb[17].mxu0 }
 0x138   :  { %v2026_v63 = vadd.f32 %v2025_v62, %v2024_v60  ;;  %v2053_v0 = vpop.f32.mrb[17].mxu1  ;;  %v2027_v1 = vpop.f32.mrb[18].mxu0 }
 0x139   :  { %v2054_v2 = vadd.f32 %v2053_v0, %v2052_v61  ;;  %v2055_v3 = vpop.f32.mrb[18].mxu1  ;;  %v2028_v4 = vpop.f32.mrb[19].mxu0 }
 0x13a   :  { %v1465_v5 = vadd.f32 %v2026_v63, %v1416_v41  ;;  %v2029_v6 = vadd.f32 %v2028_v4, %v2027_v1  ;;  %v2056_v7 = vpop.f32.mrb[19].mxu1 }
 0x13b   :  { %v2057_v8 = vadd.f32 %v2056_v7, %v2055_v3 }
 0x13c   :  { %v1514_v9 = vadd.f32 %v2054_v2, %v1465_v5  ;;  %v1468_v10 = vadd.f32 %v2029_v6, %v1419_v43 }
 0x13e   :  { %v1517_v11 = vadd.f32 %v2057_v8, %v1468_v10  ;;  %v2030_v12 = vpop.f32.mrb[20].mxu0 }
 0x13f   :  { %v2031_v13 = vpop.f32.mrb[21].mxu0  ;;  %v2058_v16 = vpop.f32.mrb[20].mxu1 }
 0x140   :  { %v2032_v14 = vadd.f32 %v2031_v13, %v2030_v12  ;;  %v2033_v15 = vpop.f32.mrb[22].mxu0  ;;  %v2059_v20 = vpop.f32.mrb[21].mxu1 }
 0x141   :  { %v2034_v17 = vpop.f32.mrb[23].mxu0  ;;  %v2060_v21 = vadd.f32 %v2059_v20, %v2058_v16  ;;  %v2061_v22 = vpop.f32.mrb[22].mxu1 }
 0x142   :  { %v1473_v18 = vadd.f32 %v2032_v14, %v1424_v57  ;;  %v2035_v19 = vadd.f32 %v2034_v17, %v2033_v15  ;;  %v2062_v24 = vpop.f32.mrb[23].mxu1 }
 0x143   :  { %v2063_v26 = vadd.f32 %v2062_v24, %v2061_v22  ;;  %v1662_v24 = vlaneseq }
 0x144   :  { %v1476_v23 = vadd.f32 %v2035_v19, %v1427_v59  ;;  %v1522_v25 = vadd.f32 %v2060_v21, %v1473_v18 }
 0x146   :  { %v1525_v27 = vadd.f32 %v2063_v26, %v1476_v23  ;;  %v1656_v26 = vld [vmem:[%s2769_s2] sm:$0x1] }
 0x156   :  { %v2080_v28 = vpop.f32.mrb[24].mxu0 }
 0x157   :  { %v2108_v29 = vpop.f32.mrb[24].mxu1  ;;  %v2081_v30 = vpop.f32.mrb[25].mxu0 }
 0x158   :  { %v2082_v31 = vadd.f32 %v2081_v30, %v2080_v28  ;;  %v2109_v32 = vpop.f32.mrb[25].mxu1  ;;  %v2083_v33 = vpop.f32.mrb[26].mxu0  ;;  %v1658_v30 = vld [vmem:[%s2770_s3] sm:$0x1] }
 0x159   :  { %v2110_v34 = vadd.f32 %v2109_v32, %v2108_v29  ;;  %v2111_v35 = vpop.f32.mrb[26].mxu1  ;;  %v2084_v36 = vpop.f32.mrb[27].mxu0 }
 0x15a   :  { %v1563_v37 = vadd.f32 %v2082_v31, %v1514_v9  ;;  %v2085_v38 = vadd.f32 %v2084_v36, %v2083_v33  ;;  %v2112_v39 = vpop.f32.mrb[27].mxu1 }
 0x15b   :  { %v2113_v40 = vadd.f32 %v2112_v39, %v2111_v35 }
 0x15c   :  { %v1612_v41 = vadd.f32 %v2110_v34, %v1563_v37  ;;  %v1566_v42 = vadd.f32 %v2085_v38, %v1517_v11 }
 0x15e   :  { %v1615_v43 = vadd.f32 %v2113_v40, %v1566_v42  ;;  %v2086_v44 = vpop.f32.mrb[28].mxu0  ;;  %v1637_v47 = vmul.f32 %v1612_v41, %v1612_v41 }
 0x15f   :  { %v2114_v45 = vpop.f32.mrb[28].mxu1  ;;  %v2087_v46 = vpop.f32.mrb[29].mxu0 }
 0x160   :  { %v1626_v48 = vadd.f32 %v1615_v43, %v1612_v41  ;;  %v1638_v49 = vmul.f32 %v1615_v43, %v1615_v43  ;;  %v2088_v50 = vadd.f32 %v2087_v46, %v2086_v44  ;;  %v2115_v51 = vpop.f32.mrb[29].mxu1  ;;  %v2089_v52 = vpop.f32.mrb[30].mxu0 }
 0x161   :  { %v2116_v53 = vadd.f32 %v2115_v51, %v2114_v45  ;;  %v2117_v54 = vpop.f32.mrb[30].mxu1  ;;  %v2090_v55 = vpop.f32.mrb[31].mxu0 }
 0x162   :  { %v1641_v56 = vadd.f32 %v1638_v49, %v1637_v47  ;;  %v1571_v57 = vadd.f32 %v2088_v50, %v1522_v25  ;;  %v2091_v58 = vadd.f32 %v2090_v55, %v2089_v52  ;;  %v2118_v59 = vpop.f32.mrb[31].mxu1  ;;  %v1663_v25 = vshrl.u32 %v1662_v24, 7 }
 0x163   :  { %v2119_v60 = vadd.f32 %v2118_v59, %v2117_v54 }
 0x164   :  { %v1620_v61 = vadd.f32 %v2116_v53, %v1571_v57  ;;  %v1574_v62 = vadd.f32 %v2091_v58, %v1525_v27  ;;  %v1664_v27 = vsub.s32 0, %v1663_v25 }
 0x166   :  { %v1627_v63 = vadd.f32 %v1626_v48, %v1620_v61  ;;  %v1639_v0 = vmul.f32 %v1620_v61, %v1620_v61  ;;  %v1623_v1 = vadd.f32 %v2119_v60, %v1574_v62 }
 0x168   :  { %v1642_v2 = vadd.f32 %v1641_v56, %v1639_v0  ;;  %v1628_v3 = vadd.f32 %v1627_v63, %v1623_v1  ;;  %v1640_v4 = vmul.f32 %v1623_v1, %v1623_v1 }
 0x16a   :  { %v1629_v5 = vrot.slane %v1628_v3, 4  ;;  %v1643_v6 = vadd.f32 %v1642_v2, %v1640_v4 }
 0x16c   :  { %v1630_v7 = vadd.f32 %v1629_v5, %v1628_v3  ;;  %v1644_v8 = vrot.slane %v1643_v6, 4 }
 0x16e   :  { %v1631_v9 = vrot.slane %v1630_v7, 2  ;;  %v1645_v10 = vadd.f32 %v1644_v8, %v1643_v6 }
 0x170   :  { %v1632_v11 = vadd.f32 %v1631_v9, %v1630_v7  ;;  %v1646_v12 = vrot.slane %v1645_v10, 2 }
 0x172   :  { %v1633_v13 = vrot.slane %v1632_v11, 1  ;;  %v1647_v14 = vadd.f32 %v1646_v12, %v1645_v10 }
 0x174   :  { %v1634_v15 = vadd.f32 %v1633_v13, %v1632_v11  ;;  %v1648_v16 = vrot.slane %v1647_v14, 1 }
 0x176   :  { %v1636_v17 = vmul.f32 0.03125, %v1634_v15  ;;  %v1649_v18 = vadd.f32 %v1648_v16, %v1647_v14 }
 0x178   :  { %v1650_v19 = vmul.f32 0.03125, %v1649_v18  ;;  %v1651_v20 = vmul.f32 %v1636_v17, %v1636_v17 }
 0x17a   :  { %v1652_v21 = vsub.f32 %v1650_v19, %v1651_v20 }
 0x17c   :  { %v1653_v22 = vmax.f32 %v1652_v21, 0.0 }
 0x17e   :  { %v1654_v23 = vadd.f32 1e-05, %v1653_v22 }
 0x180   :  { %2248 = vrsqrt.f32 %v1654_v23 }
 0x18a   :  { %v2249_v28 = vpop.eup %2248 }
 0x18b   :  { %v1657_v29 = vmul.f32 %v2249_v28, %v1656_v26 }
 0x18d   :  { %v1659_v31 = vmul.f32 %v1657_v29, %v1636_v17  ;;  %v1665_v32 = vrot.slane %v1657_v29, %v1664_v27 }
 0x18f   :  { %v1660_v33 = vsub.f32 %v1658_v30, %v1659_v31  ;;  %v1667_v34 = vmul.f32 %v1665_v32, %v1612_v41  ;;  %v1668_v35 = vmul.f32 %v1665_v32, %v1615_v43  ;;  %v1669_v36 = vmul.f32 %v1665_v32, %v1620_v61 }
 0x190   :  { %v1670_v37 = vmul.f32 %v1665_v32, %v1623_v1 }
 0x191   :  { %v1675_v38 = vrot.slane %v1660_v33, %v1664_v27 }
 0x193   :  { %v1677_v39 = vadd.f32 %v1675_v38, %v1667_v34  ;;  %v1678_v40 = vadd.f32 %v1675_v38, %v1668_v35  ;;  %v1679_v42 = vadd.f32 %v1675_v38, %v1669_v36  ;;  %v1680_v44 = vadd.f32 %v1675_v38, %v1670_v37 }
 0x195   :  { %vm1681_vm0 = vcmp.ge.f32.partialorder %v1677_v39, 0.0  ;;  %vm1682_vm1 = vcmp.ge.f32.partialorder %v1678_v40, 0.0  ;;  %vm1683_vm2 = vcmp.ge.f32.partialorder %v1679_v42, 0.0  ;;  %vm1684_vm3 = vcmp.ge.f32.partialorder %v1680_v44, 0.0 }
 0x196   :  { %v1685_v45 = vmul.f32 0.2, %v1677_v39  ;;  %v1686_v46 = vmul.f32 0.2, %v1678_v40  ;;  %v1687_v47 = vmul.f32 0.2, %v1679_v42 }
 0x197   :  { %v1688_v48 = vmul.f32 0.2, %v1680_v44 }
 0x198   :  { %v1689_v49 = vsel %vm1681_vm0, %v1677_v39, %v1685_v45  ;;  %v1690_v50 = vsel %vm1682_vm1, %v1678_v40, %v1686_v46  ;;  %v1691_v51 = vsel %vm1683_vm2, %v1679_v42, %v1687_v47 }
 0x199   :  { %v1692_v41 = vsel %vm1684_vm3, %v1680_v44, %v1688_v48  ;;  %v1888_v43 = vpack.c.bf16 %v1690_v50, %v1689_v49 }
 0x19a   :  { %v1893_v52 = vpack.c.bf16 %v1692_v41, %v1691_v51 }
 0x19b   :  { %1889 = vst [vmem:[%s2771_s4] sm:$0xff] %v1888_v43  }
 0x19c   :  { %1895 = vst [vmem:[%s2771_s4 + $0x8] sm:$0xff] %v1893_v52  }

// kernel: patch_discriminator_forward.8
= control target key start
LH: loop header
LB: loop body
LE: loop exit
PB: predicated region body
PF: predicated region fallthrough
CT: control target
= control target key end

     0   :  { %vm1587_vm0 = vcmask 1041408   ;;  %s2702_s1 = inlined_call_operand.vmem [shape: bf16[2048,128], index: 1, kind: input, shape index: {}]   ;;  %s2703_s0 = inlined_call_operand.vmem [shape: bf16[18,2048], index: 0, kind: input, shape index: {}]   ;;  %s2704_s2 = inlined_call_operand.vmem [shape: f32[1,128], index: 2, kind: input, shape index: {}]   ;;  %s2705_s3 = inlined_call_operand.vmem [shape: f32[1,128], index: 3, kind: input, shape index: {}]   ;;  %s2706_s4 = inlined_call_operand.vmem [shape: bf16[18,128], index: 4, kind: output, shape index: {}]  }
   0x1   :  { %v2063_v0 = vld [vmem:[%s2702_s1 + $0x40] sm:$0xff]   ;;  %v2067_v4 = vld [vmem:[%s2702_s1 + $0x48] sm:$0xff]   ;;  %v2071_v8 = vld [vmem:[%s2702_s1 + $0x50] sm:$0xff]  }
   0x2   :  { %v2064_v1 = vld [vmem:[%s2702_s1 + $0xc0] sm:$0xff]   ;;  %1839 = vmatprep.subr.bf16.mxu0 %v2063_v0  ;;  %v2068_v5 = vld [vmem:[%s2702_s1 + $0xc8] sm:$0xff]   ;;  %v2072_v9 = vld [vmem:[%s2702_s1 + $0xd0] sm:$0xff]  }
   0x3   :  { %v2065_v2 = vld [vmem:[%s2702_s1] sm:$0xff]   ;;  %1867 = vmatprep.subr.bf16.mxu1 %v2064_v1  ;;  %v2069_v6 = vld [vmem:[%s2702_s1 + $0x8] sm:$0xff]   ;;  %v2073_v10 = vld [vmem:[%s2702_s1 + $0x10] sm:$0xff]  }
   0x4   :  { %v2066_v3 = vld [vmem:[%s2702_s1 + $0x80] sm:$0xff]   ;;  %1840 = vmatpush3.bf16.msra.mxu0 %v2065_v2  ;;  %v2070_v7 = vld [vmem:[%s2702_s1 + $0x88] sm:$0xff]   ;;  %v2074_v11 = vld [vmem:[%s2702_s1 + $0x90] sm:$0xff]  }
   0x5   :  { %1868 = vmatpush3.bf16.msra.mxu1 %v2066_v3  ;;  %1841 = vmatprep.subr.bf16.mxu0 %v2067_v4  ;;  %v2075_v12 = vld [vmem:[%s2702_s1 + $0x58] sm:$0xff]   ;;  %v2079_v16 = vld [vmem:[%s2702_s1 + $0x60] sm:$0xff]   ;;  %v2083_v20 = vld [vmem:[%s2702_s1 + $0x68] sm:$0xff]  }
   0x6   :  { %1869 = vmatprep.subr.bf16.mxu1 %v2068_v5  ;;  %v2076_v13 = vld [vmem:[%s2702_s1 + $0xd8] sm:$0xff]   ;;  %v2080_v17 = vld [vmem:[%s2702_s1 + $0xe0] sm:$0xff]   ;;  %v2084_v21 = vld [vmem:[%s2702_s1 + $0xe8] sm:$0xff]  }
   0x7   :  { %v2077_v14 = vld [vmem:[%s2702_s1 + $0x18] sm:$0xff]   ;;  %v2081_v18 = vld [vmem:[%s2702_s1 + $0x20] sm:$0xff]   ;;  %v2085_v22 = vld [vmem:[%s2702_s1 + $0x28] sm:$0xff]  }
   0x8   :  { %1842 = vmatpush3.bf16.msra.mxu0 %v2069_v6  ;;  %v2078_v15 = vld [vmem:[%s2702_s1 + $0x98] sm:$0xff]   ;;  %v2082_v19 = vld [vmem:[%s2702_s1 + $0xa0] sm:$0xff]   ;;  %v2086_v23 = vld [vmem:[%s2702_s1 + $0xa8] sm:$0xff]  }
   0x9   :  { %1870 = vmatpush3.bf16.msra.mxu1 %v2070_v7  ;;  %1843 = vmatprep.subr.bf16.mxu0 %v2071_v8  ;;  %v2087_v24 = vld [vmem:[%s2702_s1 + $0x70] sm:$0xff]   ;;  %v2091_v28 = vld [vmem:[%s2702_s1 + $0x78] sm:$0xff]   ;;  %v18_v32 = vld [vmem:[%s2703_s0] sm:$0xff] }
   0xa   :  { %1871 = vmatprep.subr.bf16.mxu1 %v2072_v9  ;;  %v2088_v25 = vld [vmem:[%s2702_s1 + $0xf0] sm:$0xff]   ;;  %v2092_v29 = vld [vmem:[%s2702_s1 + $0xf8] sm:$0xff]   ;;  %v26_v33 = vld [vmem:[%s2703_s0 + $0x40] sm:$0xff] }
   0xb   :  { %v2089_v26 = vld [vmem:[%s2702_s1 + $0x30] sm:$0xff]   ;;  %v2093_v30 = vld [vmem:[%s2702_s1 + $0x38] sm:$0xff]   ;;  %v19_v34 = vld [vmem:[%s2703_s0 + $0x8] sm:$0xff]  ;;  %v1668_v35 = vcombine.low %v18_v32, %v26_v33  ;;  %v1669_v36 = vcombine.high %v18_v32, %v26_v33 }
   0xc   :  { %1844 = vmatpush3.bf16.msra.mxu0 %v2073_v10  ;;  %v2090_v27 = vld [vmem:[%s2702_s1 + $0xb0] sm:$0xff]   ;;  %v2094_v31 = vld [vmem:[%s2702_s1 + $0xb8] sm:$0xff]   ;;  %v27_v37 = vld [vmem:[%s2703_s0 + $0x48] sm:$0xff] }
   0xd   :  { %1872 = vmatpush3.bf16.msra.mxu1 %v2074_v11  ;;  %1845 = vmatprep.subr.bf16.mxu0 %v2075_v12  ;;  %v1670_v38 = vcombine.low %v19_v34, %v27_v37  ;;  %v1671_v39 = vcombine.high %v19_v34, %v27_v37  ;;  %v2095_v40 = vld [vmem:[%s2702_s1 + $0x140] sm:$0xff]   ;;  %v2099_v44 = vld [vmem:[%s2702_s1 + $0x148] sm:$0xff]   ;;  %v2103_v48 = vld [vmem:[%s2702_s1 + $0x150] sm:$0xff]  }
   0xe   :  { %1873 = vmatprep.subr.bf16.mxu1 %v2076_v13  ;;  %1234 = vmatprep.mubr.bf16.mxu0 %v1669_v36  ;;  %v2096_v41 = vld [vmem:[%s2702_s1 + $0x1c0] sm:$0xff]   ;;  %v2100_v45 = vld [vmem:[%s2702_s1 + $0x1c8] sm:$0xff]   ;;  %v2104_v49 = vld [vmem:[%s2702_s1 + $0x1d0] sm:$0xff]  }
   0xf   :  { %1282 = vmatprep.mubr.bf16.mxu1 %v1671_v39  ;;  %v2097_v42 = vld [vmem:[%s2702_s1 + $0x100] sm:$0xff]   ;;  %v2101_v46 = vld [vmem:[%s2702_s1 + $0x108] sm:$0xff]   ;;  %v2105_v50 = vld [vmem:[%s2702_s1 + $0x110] sm:$0xff]  }
  0x10   :  { %1846 = vmatpush3.bf16.msra.mxu0 %v2077_v14  ;;  %v2098_v43 = vld [vmem:[%s2702_s1 + $0x180] sm:$0xff]   ;;  %v2102_v47 = vld [vmem:[%s2702_s1 + $0x188] sm:$0xff]   ;;  %v2106_v51 = vld [vmem:[%s2702_s1 + $0x190] sm:$0xff]  }
  0x11   :  { %1874 = vmatpush3.bf16.msra.mxu1 %v2078_v15  ;;  %1847 = vmatprep.subr.bf16.mxu0 %v2079_v16  ;;  %v2107_v52 = vld [vmem:[%s2702_s1 + $0x158] sm:$0xff]   ;;  %v2111_v56 = vld [vmem:[%s2702_s1 + $0x160] sm:$0xff]   ;;  %v2115_v60 = vld [vmem:[%s2702_s1 + $0x168] sm:$0xff]  }
  0x12   :  { %1875 = vmatprep.subr.bf16.mxu1 %v2080_v17  ;;  %v2108_v53 = vld [vmem:[%s2702_s1 + $0x1d8] sm:$0xff]   ;;  %v2112_v57 = vld [vmem:[%s2702_s1 + $0x1e0] sm:$0xff]   ;;  %v2116_v61 = vld [vmem:[%s2702_s1 + $0x1e8] sm:$0xff]  }
  0x13   :  { %v2109_v54 = vld [vmem:[%s2702_s1 + $0x118] sm:$0xff]   ;;  %v2113_v58 = vld [vmem:[%s2702_s1 + $0x120] sm:$0xff]   ;;  %v2118_v0 = vld [vmem:[%s2702_s1 + $0x128] sm:$0xff]  }
  0x14   :  { %1848 = vmatpush3.bf16.msra.mxu0 %v2081_v18  ;;  %v2110_v55 = vld [vmem:[%s2702_s1 + $0x198] sm:$0xff]   ;;  %v2114_v59 = vld [vmem:[%s2702_s1 + $0x1a0] sm:$0xff]   ;;  %v2119_v2 = vld [vmem:[%s2702_s1 + $0x1a8] sm:$0xff]  }
  0x15   :  { %1876 = vmatpush3.bf16.msra.mxu1 %v2082_v19  ;;  %1849 = vmatprep.subr.bf16.mxu0 %v2083_v20  ;;  %v34_v62 = vld [vmem:[%s2703_s0 + $0x80] sm:$0x11]  ;;  %v35_v3 = vld [vmem:[%s2703_s0 + $0x88] sm:$0x11]  ;;  %v2123_v6 = vld [vmem:[%s2702_s1 + $0x170] sm:$0xff]  }
  0x16   :  { %1877 = vmatprep.subr.bf16.mxu1 %v2084_v21  ;;  %v1685_v63 = vcombine.high %v34_v62, %v34_v62  ;;  %v1684_v1 = vcombine.low %v34_v62, %v34_v62  ;;  %v1687_v4 = vcombine.high %v35_v3, %v35_v3  ;;  %v1686_v5 = vcombine.low %v35_v3, %v35_v3  ;;  %v2124_v7 = vld [vmem:[%s2702_s1 + $0x1f0] sm:$0xff]   ;;  %v2127_v10 = vld [vmem:[%s2702_s1 + $0x178] sm:$0xff]   ;;  %v23_v62 = vld [vmem:[%s2703_s0 + $0x28] sm:$0xff] }
  0x17   :  { %v2125_v8 = vld [vmem:[%s2702_s1 + $0x130] sm:$0xff]   ;;  %v2128_v11 = vld [vmem:[%s2702_s1 + $0x1f8] sm:$0xff]  }
  0x18   :  { %1850 = vmatpush3.bf16.msra.mxu0 %v2085_v22  ;;  %v2126_v9 = vld [vmem:[%s2702_s1 + $0x1b0] sm:$0xff]   ;;  %v2129_v12 = vld [vmem:[%s2702_s1 + $0x138] sm:$0xff]   ;;  %v2131_v22 = vld [vmem:[%s2702_s1 + $0x240] sm:$0xff]  }
  0x19   :  { %1878 = vmatpush3.bf16.msra.mxu1 %v2086_v23  ;;  %1851 = vmatprep.subr.bf16.mxu0 %v2087_v24  ;;  %v2130_v13 = vld [vmem:[%s2702_s1 + $0x1b8] sm:$0xff]   ;;  %v20_v14 = vld [vmem:[%s2703_s0 + $0x10] sm:$0xff]  ;;  %v2132_v23 = vld [vmem:[%s2702_s1 + $0x2c0] sm:$0xff]  }
  0x1a   :  { %1879 = vmatprep.subr.bf16.mxu1 %v2088_v25  ;;  %v28_v15 = vld [vmem:[%s2703_s0 + $0x50] sm:$0xff]  ;;  %v21_v16 = vld [vmem:[%s2703_s0 + $0x18] sm:$0xff]  ;;  %v2133_v24 = vld [vmem:[%s2702_s1 + $0x200] sm:$0xff]  }
  0x1b   :  { %v1672_v17 = vcombine.low %v20_v14, %v28_v15  ;;  %v1673_v18 = vcombine.high %v20_v14, %v28_v15  ;;  %v29_v19 = vld [vmem:[%s2703_s0 + $0x58] sm:$0xff]  ;;  %v2134_v25 = vld [vmem:[%s2702_s1 + $0x280] sm:$0xff]   ;;  %v2141_v33 = vld [vmem:[%s2702_s1 + $0x250] sm:$0xff]  }
  0x1c   :  { %1852 = vmatpush3.bf16.msra.mxu0 %v2089_v26  ;;  %v1674_v20 = vcombine.low %v21_v16, %v29_v19  ;;  %v1675_v21 = vcombine.high %v21_v16, %v29_v19  ;;  %v2135_v26 = vld [vmem:[%s2702_s1 + $0x248] sm:$0xff]   ;;  %v2142_v34 = vld [vmem:[%s2702_s1 + $0x2d0] sm:$0xff]  }
  0x1d   :  { %1880 = vmatpush3.bf16.msra.mxu1 %v2090_v27  ;;  %1853 = vmatprep.subr.bf16.mxu0 %v2091_v28  ;;  %v2136_v27 = vld [vmem:[%s2702_s1 + $0x2c8] sm:$0xff]   ;;  %v2144_v37 = vld [vmem:[%s2702_s1 + $0x210] sm:$0xff]  }
  0x1e   :  { %1881 = vmatprep.subr.bf16.mxu1 %v2092_v29  ;;  %v2137_v28 = vld [vmem:[%s2702_s1 + $0x208] sm:$0xff]   ;;  %v2145_v39 = vld [vmem:[%s2702_s1 + $0x290] sm:$0xff]  }
  0x1f   :  { %v2138_v29 = vld [vmem:[%s2702_s1 + $0x288] sm:$0xff]   ;;  %v2177_v15 = vld [vmem:[%s2702_s1 + $0x350] sm:$0xff]  }
  0x20   :  { %1854 = vmatpush3.bf16.msra.mxu0 %v2093_v30  ;;  %v36_v30 = vld [vmem:[%s2703_s0 + $0x90] sm:$0x11] }
  0x21   :  { %1882 = vmatpush3.bf16.msra.mxu1 %v2094_v31  ;;  %1895 = vmatprep.subr.bf16.mxu0 %v2095_v40  ;;  %v1689_v31 = vcombine.high %v36_v30, %v36_v30  ;;  %v1688_v32 = vcombine.low %v36_v30, %v36_v30  ;;  %v2147_v40 = vld [vmem:[%s2702_s1 + $0x258] sm:$0xff]   ;;  %v2178_v16 = vld [vmem:[%s2702_s1 + $0x3d0] sm:$0xff]   ;;  %v2191_v30 = vld [vmem:[%s2702_s1 + $0x368] sm:$0xff]  }
  0x22   :  { %1923 = vmatprep.subr.bf16.mxu1 %v2096_v41  ;;  %v2148_v41 = vld [vmem:[%s2702_s1 + $0x2d8] sm:$0xff]   ;;  %v2180_v19 = vld [vmem:[%s2702_s1 + $0x310] sm:$0xff]  }
  0x23   :  { %1235 = vmatmul.mubr.bf16.vlgmr.msra.gmra.mrb[0].mxu0 %v1668_v35  ;;  %v37_v35 = vld [vmem:[%s2703_s0 + $0x98] sm:$0x11] }
  0x24   :  { %1283 = vmatmul.mubr.bf16.vlgmr.msra.gmra.mrb[0].mxu1 %v1670_v38  ;;  %1896 = vmatpush3.bf16.msra.mxu0 %v2097_v42  ;;  %v1691_v36 = vcombine.high %v37_v35, %v37_v35  ;;  %v1690_v38 = vcombine.low %v37_v35, %v37_v35  ;;  %v2149_v42 = vld [vmem:[%s2702_s1 + $0x218] sm:$0xff]   ;;  %v2196_v35 = vld [vmem:[%s2702_s1 + $0x3f0] sm:$0xff]  }
  0x25   :  { %1924 = vmatpush3.bf16.msra.mxu1 %v2098_v43  ;;  %1897 = vmatprep.subr.bf16.mxu0 %v2099_v44  ;;  %v2150_v43 = vld [vmem:[%s2702_s1 + $0x298] sm:$0xff]   ;;  %v2151_v44 = vld [vmem:[%s2702_s1 + $0x260] sm:$0xff]  }
  0x26   :  { %1925 = vmatprep.subr.bf16.mxu1 %v2100_v45  ;;  %1242 = vmatprep.mubr.bf16.mxu0 %v1685_v63  ;;  %v2152_v45 = vld [vmem:[%s2702_s1 + $0x2e0] sm:$0xff]  }
  0x27   :  { %1290 = vmatprep.mubr.bf16.mxu1 %v1687_v4  ;;  %v2167_v4 = vld [vmem:[%s2702_s1 + $0x340] sm:$0xff]  }
  0x28   :  { %1898 = vmatpush3.bf16.msra.mxu0 %v2101_v46  ;;  %v2153_v46 = vld [vmem:[%s2702_s1 + $0x220] sm:$0xff]  }
  0x29   :  { %1926 = vmatpush3.bf16.msra.mxu1 %v2102_v47  ;;  %1899 = vmatprep.subr.bf16.mxu0 %v2103_v48  ;;  %v2154_v47 = vld [vmem:[%s2702_s1 + $0x2a0] sm:$0xff]   ;;  %v2155_v48 = vld [vmem:[%s2702_s1 + $0x268] sm:$0xff]  }
  0x2a   :  { %1927 = vmatprep.subr.bf16.mxu1 %v2104_v49  ;;  %v2156_v49 = vld [vmem:[%s2702_s1 + $0x2e8] sm:$0xff]  }
  0x2b   :  { %1243 = vmatmul.mubr.bf16.gmra.mrb[4].mxu0 %v1684_v1  ;;  %v31_v1 = vld [vmem:[%s2703_s0 + $0x68] sm:$0xff] }
  0x2c   :  { %1900 = vmatpush3.bf16.msra.mxu0 %v2105_v50  ;;  %1291 = vmatmul.mubr.bf16.gmra.mrb[4].mxu1 %v1686_v5  ;;  %v2157_v50 = vld [vmem:[%s2702_s1 + $0x228] sm:$0xff]   ;;  %v1679_v3 = vcombine.high %v23_v62, %v31_v1  ;;  %v2168_v5 = vld [vmem:[%s2702_s1 + $0x3c0] sm:$0xff]  }
  0x2d   :  { %1928 = vmatpush3.bf16.msra.mxu1 %v2106_v51  ;;  %1901 = vmatprep.subr.bf16.mxu0 %v2107_v52  ;;  %v2158_v51 = vld [vmem:[%s2702_s1 + $0x2a8] sm:$0xff]   ;;  %v2159_v52 = vld [vmem:[%s2702_s1 + $0x270] sm:$0xff]  }
  0x2e   :  { %1929 = vmatprep.subr.bf16.mxu1 %v2108_v53  ;;  %1330 = vmatprep.mubr.bf16.mxu0 %v1673_v18  ;;  %v2160_v53 = vld [vmem:[%s2702_s1 + $0x2f0] sm:$0xff]  }
  0x2f   :  { %1378 = vmatprep.mubr.bf16.mxu1 %v1675_v21  ;;  %v2181_v21 = vld [vmem:[%s2702_s1 + $0x390] sm:$0xff]  }
  0x30   :  { %1902 = vmatpush3.bf16.msra.mxu0 %v2109_v54  ;;  %v2161_v54 = vld [vmem:[%s2702_s1 + $0x230] sm:$0xff]  }
  0x31   :  { %1930 = vmatpush3.bf16.msra.mxu1 %v2110_v55  ;;  %1903 = vmatprep.subr.bf16.mxu0 %v2111_v56  ;;  %v2162_v55 = vld [vmem:[%s2702_s1 + $0x2b0] sm:$0xff]   ;;  %v2163_v56 = vld [vmem:[%s2702_s1 + $0x278] sm:$0xff]  }
  0x32   :  { %1931 = vmatprep.subr.bf16.mxu1 %v2112_v57  ;;  %v2164_v57 = vld [vmem:[%s2702_s1 + $0x2f8] sm:$0xff]  }
  0x34   :  { %1904 = vmatpush3.bf16.msra.mxu0 %v2113_v58  ;;  %v2165_v58 = vld [vmem:[%s2702_s1 + $0x238] sm:$0xff]  }
  0x35   :  { %1932 = vmatpush3.bf16.msra.mxu1 %v2114_v59  ;;  %1905 = vmatprep.subr.bf16.mxu0 %v2115_v60  ;;  %v2166_v59 = vld [vmem:[%s2702_s1 + $0x2b8] sm:$0xff]   ;;  %v22_v60 = vld [vmem:[%s2703_s0 + $0x20] sm:$0xff] }
  0x36   :  { %1933 = vmatprep.subr.bf16.mxu1 %v2116_v61  ;;  %v30_v61 = vld [vmem:[%s2703_s0 + $0x60] sm:$0xff] }
  0x37   :  { %v1676_v63 = vcombine.low %v22_v60, %v30_v61 }
  0x38   :  { %1906 = vmatpush3.bf16.msra.mxu0 %v2118_v0  ;;  %v1677_v0 = vcombine.high %v22_v60, %v30_v61 }
  0x39   :  { %1934 = vmatpush3.bf16.msra.mxu1 %v2119_v2  ;;  %1907 = vmatprep.subr.bf16.mxu0 %v2123_v6  ;;  %v1678_v2 = vcombine.low %v23_v62, %v31_v1  ;;  %v2169_v6 = vld [vmem:[%s2702_s1 + $0x300] sm:$0xff]  }
  0x3a   :  { %1935 = vmatprep.subr.bf16.mxu1 %v2124_v7  ;;  %v2170_v7 = vld [vmem:[%s2702_s1 + $0x380] sm:$0xff]  }
  0x3c   :  { %1908 = vmatpush3.bf16.msra.mxu0 %v2125_v8  ;;  %v2171_v8 = vld [vmem:[%s2702_s1 + $0x348] sm:$0xff]  }
  0x3d   :  { %1936 = vmatpush3.bf16.msra.mxu1 %v2126_v9  ;;  %1909 = vmatprep.subr.bf16.mxu0 %v2127_v10  ;;  %v2172_v9 = vld [vmem:[%s2702_s1 + $0x3c8] sm:$0xff]  }
  0x3e   :  { %1937 = vmatprep.subr.bf16.mxu1 %v2128_v11  ;;  %v2173_v10 = vld [vmem:[%s2702_s1 + $0x308] sm:$0xff]  }
  0x3f   :  { %v2174_v11 = vld [vmem:[%s2702_s1 + $0x388] sm:$0xff]  }
  0x40   :  { %1910 = vmatpush3.bf16.msra.mxu0 %v2129_v12  ;;  %v38_v12 = vld [vmem:[%s2703_s0 + $0xa0] sm:$0x11] }
  0x41   :  { %1938 = vmatpush3.bf16.msra.mxu1 %v2130_v13  ;;  %1951 = vmatprep.subr.bf16.mxu0 %v2131_v22  ;;  %v1693_v13 = vcombine.high %v38_v12, %v38_v12  ;;  %v1692_v14 = vcombine.low %v38_v12, %v38_v12  ;;  %v2183_v22 = vld [vmem:[%s2702_s1 + $0x358] sm:$0xff]  }
  0x42   :  { %1979 = vmatprep.subr.bf16.mxu1 %v2132_v23  ;;  %v2184_v23 = vld [vmem:[%s2702_s1 + $0x3d8] sm:$0xff]  }
  0x43   :  { %1331 = vmatmul.mubr.bf16.vlgmr.msra.gmra.mrb[8].mxu0 %v1672_v17  ;;  %v39_v17 = vld [vmem:[%s2703_s0 + $0xa8] sm:$0x11] }
  0x44   :  { %1379 = vmatmul.mubr.bf16.vlgmr.msra.gmra.mrb[8].mxu1 %v1674_v20  ;;  %1952 = vmatpush3.bf16.msra.mxu0 %v2133_v24  ;;  %v1695_v18 = vcombine.high %v39_v17, %v39_v17  ;;  %v1694_v20 = vcombine.low %v39_v17, %v39_v17  ;;  %v2185_v24 = vld [vmem:[%s2702_s1 + $0x318] sm:$0xff]  }
  0x45   :  { %1980 = vmatpush3.bf16.msra.mxu1 %v2134_v25  ;;  %1953 = vmatprep.subr.bf16.mxu0 %v2135_v26  ;;  %v2186_v25 = vld [vmem:[%s2702_s1 + $0x398] sm:$0xff]   ;;  %v2187_v26 = vld [vmem:[%s2702_s1 + $0x360] sm:$0xff]  }
  0x46   :  { %1981 = vmatprep.subr.bf16.mxu1 %v2136_v27  ;;  %1338 = vmatprep.mubr.bf16.mxu0 %v1689_v31  ;;  %v2188_v27 = vld [vmem:[%s2702_s1 + $0x3e0] sm:$0xff]   ;;  %v2192_v31 = vld [vmem:[%s2702_s1 + $0x3e8] sm:$0xff]  }
  0x47   :  { %1386 = vmatprep.mubr.bf16.mxu1 %v1691_v36  ;;  %v2197_v36 = vld [vmem:[%s2702_s1 + $0x330] sm:$0xff]  }
  0x48   :  { %1954 = vmatpush3.bf16.msra.mxu0 %v2137_v28  ;;  %v2189_v28 = vld [vmem:[%s2702_s1 + $0x320] sm:$0xff]  }
  0x49   :  { %1982 = vmatpush3.bf16.msra.mxu1 %v2138_v29  ;;  %1955 = vmatprep.subr.bf16.mxu0 %v2141_v33  ;;  %v2190_v29 = vld [vmem:[%s2702_s1 + $0x3a0] sm:$0xff]   ;;  %v2194_v33 = vld [vmem:[%s2702_s1 + $0x3a8] sm:$0xff]  }
  0x4a   :  { %1983 = vmatprep.subr.bf16.mxu1 %v2142_v34  ;;  %v2195_v34 = vld [vmem:[%s2702_s1 + $0x370] sm:$0xff]  }
  0x4b   :  { %1339 = vmatmul.mubr.bf16.gmra.mrb[12].mxu0 %v1688_v32  ;;  %v2193_v32 = vld [vmem:[%s2702_s1 + $0x328] sm:$0xff]  }
  0x4c   :  { %1956 = vmatpush3.bf16.msra.mxu0 %v2144_v37  ;;  %1387 = vmatmul.mubr.bf16.gmra.mrb[12].mxu1 %v1690_v38  ;;  %v2198_v37 = vld [vmem:[%s2702_s1 + $0x3b0] sm:$0xff]   ;;  %v2199_v38 = vld [vmem:[%s2702_s1 + $0x378] sm:$0xff]  }
  0x4d   :  { %1984 = vmatpush3.bf16.msra.mxu1 %v2145_v39  ;;  %1957 = vmatprep.subr.bf16.mxu0 %v2147_v40  ;;  %v2200_v39 = vld [vmem:[%s2702_s1 + $0x3f8] sm:$0xff]  }
  0x4e   :  { %1985 = vmatprep.subr.bf16.mxu1 %v2148_v41  ;;  %1426 = vmatprep.mubr.bf16.mxu0 %v1677_v0  ;;  %v2201_v40 = vld [vmem:[%s2702_s1 + $0x338] sm:$0xff]  }
  0x4f   :  { %1474 = vmatprep.mubr.bf16.mxu1 %v1679_v3  ;;  %v2202_v41 = vld [vmem:[%s2702_s1 + $0x3b8] sm:$0xff]  }
  0x50   :  { %1958 = vmatpush3.bf16.msra.mxu0 %v2149_v42  ;;  %v24_v42 = vld [vmem:[%s2703_s0 + $0x30] sm:$0xff] }
  0x51   :  { %1986 = vmatpush3.bf16.msra.mxu1 %v2150_v43  ;;  %1959 = vmatprep.subr.bf16.mxu0 %v2151_v44  ;;  %v32_v43 = vld [vmem:[%s2703_s0 + $0x70] sm:$0xff]  ;;  %v25_v44 = vld [vmem:[%s2703_s0 + $0x38] sm:$0xff] }
  0x52   :  { %1987 = vmatprep.subr.bf16.mxu1 %v2152_v45  ;;  %v1680_v45 = vcombine.low %v24_v42, %v32_v43 }
  0x54   :  { %1960 = vmatpush3.bf16.msra.mxu0 %v2153_v46  ;;  %v1681_v46 = vcombine.high %v24_v42, %v32_v43 }
  0x55   :  { %1988 = vmatpush3.bf16.msra.mxu1 %v2154_v47  ;;  %1961 = vmatprep.subr.bf16.mxu0 %v2155_v48  ;;  %v33_v47 = vld [vmem:[%s2703_s0 + $0x78] sm:$0xff]  ;;  %v40_v48 = vld [vmem:[%s2703_s0 + $0xb0] sm:$0x11] }
  0x56   :  { %1989 = vmatprep.subr.bf16.mxu1 %v2156_v49  ;;  %v41_v49 = vld [vmem:[%s2703_s0 + $0xb8] sm:$0x11] }
  0x58   :  { %1962 = vmatpush3.bf16.msra.mxu0 %v2157_v50  ;;  %v1682_v50 = vcombine.low %v25_v44, %v33_v47 }
  0x59   :  { %1990 = vmatpush3.bf16.msra.mxu1 %v2158_v51  ;;  %1963 = vmatprep.subr.bf16.mxu0 %v2159_v52  ;;  %v1683_v51 = vcombine.high %v25_v44, %v33_v47  ;;  %v1697_v52 = vcombine.high %v40_v48, %v40_v48 }
  0x5a   :  { %1991 = vmatprep.subr.bf16.mxu1 %v2160_v53  ;;  %v1699_v53 = vcombine.high %v41_v49, %v41_v49 }
  0x5c   :  { %1964 = vmatpush3.bf16.msra.mxu0 %v2161_v54  ;;  %v1696_v54 = vcombine.low %v40_v48, %v40_v48 }
  0x5d   :  { %1992 = vmatpush3.bf16.msra.mxu1 %v2162_v55  ;;  %1965 = vmatprep.subr.bf16.mxu0 %v2163_v56  ;;  %v1698_v55 = vcombine.low %v41_v49, %v41_v49 }
  0x5e   :  { %1993 = vmatprep.subr.bf16.mxu1 %v2164_v57 }
  0x60   :  { %1966 = vmatpush3.bf16.msra.mxu0 %v2165_v58 }
  0x61   :  { %1994 = vmatpush3.bf16.msra.mxu1 %v2166_v59  ;;  %2007 = vmatprep.subr.bf16.mxu0 %v2167_v4 }
  0x62   :  { %2035 = vmatprep.subr.bf16.mxu1 %v2168_v5 }
  0x63   :  { %1427 = vmatmul.mubr.bf16.vlgmr.msra.gmra.mrb[16].mxu0 %v1676_v63 }
  0x64   :  { %1475 = vmatmul.mubr.bf16.vlgmr.msra.gmra.mrb[16].mxu1 %v1678_v2  ;;  %2008 = vmatpush3.bf16.msra.mxu0 %v2169_v6 }
  0x65   :  { %2036 = vmatpush3.bf16.msra.mxu1 %v2170_v7  ;;  %2009 = vmatprep.subr.bf16.mxu0 %v2171_v8 }
  0x66   :  { %2037 = vmatprep.subr.bf16.mxu1 %v2172_v9  ;;  %1434 = vmatprep.mubr.bf16.mxu0 %v1693_v13 }
  0x67   :  { %1482 = vmatprep.mubr.bf16.mxu1 %v1695_v18 }
  0x68   :  { %2010 = vmatpush3.bf16.msra.mxu0 %v2173_v10 }
  0x69   :  { %2038 = vmatpush3.bf16.msra.mxu1 %v2174_v11  ;;  %2011 = vmatprep.subr.bf16.mxu0 %v2177_v15 }
  0x6a   :  { %2039 = vmatprep.subr.bf16.mxu1 %v2178_v16 }
  0x6b   :  { %1435 = vmatmul.mubr.bf16.gmra.mrb[20].mxu0 %v1692_v14 }
  0x6c   :  { %2012 = vmatpush3.bf16.msra.mxu0 %v2180_v19  ;;  %1483 = vmatmul.mubr.bf16.gmra.mrb[20].mxu1 %v1694_v20 }
  0x6d   :  { %2040 = vmatpush3.bf16.msra.mxu1 %v2181_v21  ;;  %2013 = vmatprep.subr.bf16.mxu0 %v2183_v22 }
  0x6e   :  { %2041 = vmatprep.subr.bf16.mxu1 %v2184_v23  ;;  %1522 = vmatprep.mubr.bf16.mxu0 %v1681_v46 }
  0x6f   :  { %1570 = vmatprep.mubr.bf16.mxu1 %v1683_v51 }
  0x70   :  { %2014 = vmatpush3.bf16.msra.mxu0 %v2185_v24 }
  0x71   :  { %2042 = vmatpush3.bf16.msra.mxu1 %v2186_v25  ;;  %2015 = vmatprep.subr.bf16.mxu0 %v2187_v26 }
  0x72   :  { %2043 = vmatprep.subr.bf16.mxu1 %v2188_v27 }
  0x74   :  { %2016 = vmatpush3.bf16.msra.mxu0 %v2189_v28 }
  0x75   :  { %2044 = vmatpush3.bf16.msra.mxu1 %v2190_v29  ;;  %2017 = vmatprep.subr.bf16.mxu0 %v2191_v30 }
  0x76   :  { %2045 = vmatprep.subr.bf16.mxu1 %v2192_v31 }
  0x78   :  { %2018 = vmatpush3.bf16.msra.mxu0 %v2193_v32 }
  0x79   :  { %2046 = vmatpush3.bf16.msra.mxu1 %v2194_v33  ;;  %2019 = vmatprep.subr.bf16.mxu0 %v2195_v34 }
  0x7a   :  { %2047 = vmatprep.subr.bf16.mxu1 %v2196_v35 }
  0x7c   :  { %2020 = vmatpush3.bf16.msra.mxu0 %v2197_v36 }
  0x7d   :  { %2048 = vmatpush3.bf16.msra.mxu1 %v2198_v37  ;;  %2021 = vmatprep.subr.bf16.mxu0 %v2199_v38 }
  0x7e   :  { %2049 = vmatprep.subr.bf16.mxu1 %v2200_v39 }
  0x80   :  { %2022 = vmatpush3.bf16.msra.mxu0 %v2201_v40 }
  0x81   :  { %2050 = vmatpush3.bf16.msra.mxu1 %v2202_v41 }
  0x83   :  { %1523 = vmatmul.mubr.bf16.vlgmr.msra.gmra.mrb[24].mxu0 %v1680_v45 }
  0x84   :  { %1571 = vmatmul.mubr.bf16.vlgmr.msra.gmra.mrb[24].mxu1 %v1682_v50  ;;  %1530 = vmatprep.mubr.bf16.mxu0 %v1697_v52 }
  0x85   :  { %1578 = vmatprep.mubr.bf16.mxu1 %v1699_v53 }
  0x8b   :  { %1531 = vmatmul.mubr.bf16.gmra.mrb[28].mxu0 %v1696_v54 }
  0x8c   :  { %1579 = vmatmul.mubr.bf16.gmra.mrb[28].mxu1 %v1698_v55 }
  0xf6   :  { %v1855_v56 = vpop.f32.mrb[0].mxu0 }
  0xf7   :  { %v1883_v57 = vpop.f32.mrb[0].mxu1  ;;  %v1856_v58 = vpop.f32.mrb[1].mxu0 }
  0xf8   :  { %v1857_v59 = vadd.f32 %v1856_v58, %v1855_v56  ;;  %v1884_v60 = vpop.f32.mrb[1].mxu1  ;;  %v1858_v61 = vpop.f32.mrb[2].mxu0 }
  0xf9   :  { %v1885_v62 = vadd.f32 %v1884_v60, %v1883_v57  ;;  %v1886_v63 = vpop.f32.mrb[2].mxu1  ;;  %v1859_v0 = vpop.f32.mrb[3].mxu0 }
  0xfa   :  { %v1860_v1 = vadd.f32 %v1859_v0, %v1858_v61  ;;  %v1887_v2 = vpop.f32.mrb[3].mxu1 }
  0xfb   :  { %v1285_v3 = vadd.f32 %v1885_v62, %v1857_v59  ;;  %v1888_v4 = vadd.f32 %v1887_v2, %v1886_v63 }
  0xfd   :  { %v1288_v5 = vadd.f32 %v1888_v4, %v1860_v1 }
  0xfe   :  { %v1861_v6 = vpop.f32.mrb[4].mxu0 }
  0xff   :  { %v1862_v7 = vpop.f32.mrb[5].mxu0  ;;  %v1889_v10 = vpop.f32.mrb[4].mxu1 }
 0x100   :  { %v1863_v8 = vadd.f32 %v1862_v7, %v1861_v6  ;;  %v1864_v9 = vpop.f32.mrb[6].mxu0  ;;  %v1890_v12 = vpop.f32.mrb[5].mxu1 }
 0x101   :  { %v1865_v11 = vpop.f32.mrb[7].mxu0  ;;  %v1891_v13 = vadd.f32 %v1890_v12, %v1889_v10  ;;  %v1892_v14 = vpop.f32.mrb[6].mxu1 }
 0x102   :  { %v1893_v15 = vpop.f32.mrb[7].mxu1 }
 0x103   :  { %v1293_v16 = vadd.f32 %v1891_v13, %v1863_v8 }
 0x116   :  { %v1911_v17 = vpop.f32.mrb[8].mxu0 }
 0x117   :  { %v1939_v18 = vpop.f32.mrb[8].mxu1  ;;  %v1912_v19 = vpop.f32.mrb[9].mxu0 }
 0x118   :  { %v1913_v20 = vadd.f32 %v1912_v19, %v1911_v17  ;;  %v1940_v21 = vpop.f32.mrb[9].mxu1  ;;  %v1914_v22 = vpop.f32.mrb[10].mxu0 }
 0x119   :  { %v1941_v23 = vadd.f32 %v1940_v21, %v1939_v18  ;;  %v1942_v24 = vpop.f32.mrb[10].mxu1  ;;  %v1915_v25 = vpop.f32.mrb[11].mxu0 }
 0x11a   :  { %v1333_v26 = vadd.f32 %v1913_v20, %v1285_v3  ;;  %v1916_v27 = vadd.f32 %v1915_v25, %v1914_v22  ;;  %v1943_v28 = vpop.f32.mrb[11].mxu1 }
 0x11b   :  { %v1944_v29 = vadd.f32 %v1943_v28, %v1942_v24 }
 0x11c   :  { %v1381_v30 = vadd.f32 %v1941_v23, %v1333_v26  ;;  %v1336_v31 = vadd.f32 %v1916_v27, %v1288_v5 }
 0x11e   :  { %v1384_v32 = vadd.f32 %v1944_v29, %v1336_v31  ;;  %v1917_v33 = vpop.f32.mrb[12].mxu0 }
 0x11f   :  { %v1918_v34 = vpop.f32.mrb[13].mxu0  ;;  %v1945_v37 = vpop.f32.mrb[12].mxu1 }
 0x120   :  { %v1919_v35 = vadd.f32 %v1918_v34, %v1917_v33  ;;  %v1920_v36 = vpop.f32.mrb[14].mxu0  ;;  %v1946_v40 = vpop.f32.mrb[13].mxu1 }
 0x121   :  { %v1921_v38 = vpop.f32.mrb[15].mxu0  ;;  %v1947_v41 = vadd.f32 %v1946_v40, %v1945_v37  ;;  %v1948_v42 = vpop.f32.mrb[14].mxu1 }
 0x122   :  { %v1341_v39 = vadd.f32 %v1919_v35, %v1293_v16  ;;  %v1949_v43 = vpop.f32.mrb[15].mxu1 }
 0x124   :  { %v1389_v44 = vadd.f32 %v1947_v41, %v1341_v39 }
 0x136   :  { %v1967_v45 = vpop.f32.mrb[16].mxu0 }
 0x137   :  { %v1995_v46 = vpop.f32.mrb[16].mxu1  ;;  %v1968_v47 = vpop.f32.mrb[17].mxu0 }
 0x138   :  { %v1969_v48 = vadd.f32 %v1968_v47, %v1967_v45  ;;  %v1996_v49 = vpop.f32.mrb[17].mxu1  ;;  %v1970_v50 = vpop.f32.mrb[18].mxu0 }
 0x139   :  { %v1997_v51 = vadd.f32 %v1996_v49, %v1995_v46  ;;  %v1998_v52 = vpop.f32.mrb[18].mxu1  ;;  %v1971_v53 = vpop.f32.mrb[19].mxu0 }
 0x13a   :  { %v1429_v54 = vadd.f32 %v1969_v48, %v1381_v30  ;;  %v1972_v55 = vadd.f32 %v1971_v53, %v1970_v50  ;;  %v1999_v56 = vpop.f32.mrb[19].mxu1 }
 0x13b   :  { %v2000_v57 = vadd.f32 %v1999_v56, %v1998_v52 }
 0x13c   :  { %v1477_v58 = vadd.f32 %v1997_v51, %v1429_v54  ;;  %v1432_v59 = vadd.f32 %v1972_v55, %v1384_v32 }
 0x13e   :  { %v1480_v60 = vadd.f32 %v2000_v57, %v1432_v59  ;;  %v1973_v61 = vpop.f32.mrb[20].mxu0 }
 0x13f   :  { %v1974_v62 = vpop.f32.mrb[21].mxu0  ;;  %v2001_v1 = vpop.f32.mrb[20].mxu1 }
 0x140   :  { %v1975_v63 = vadd.f32 %v1974_v62, %v1973_v61  ;;  %v1976_v0 = vpop.f32.mrb[22].mxu0  ;;  %v2002_v4 = vpop.f32.mrb[21].mxu1 }
 0x141   :  { %v1977_v2 = vpop.f32.mrb[23].mxu0  ;;  %v2003_v5 = vadd.f32 %v2002_v4, %v2001_v1  ;;  %v2004_v6 = vpop.f32.mrb[22].mxu1  ;;  %v1622_v0 = vlaneseq }
 0x142   :  { %v1437_v3 = vadd.f32 %v1975_v63, %v1389_v44  ;;  %v2005_v7 = vpop.f32.mrb[23].mxu1  ;;  %v1616_v2 = vld [vmem:[%s2704_s2] sm:$0x1] }
 0x143   :  { %v1623_v1 = vshrl.u32 %v1622_v0, 7  ;;  %v1618_v6 = vld [vmem:[%s2705_s3] sm:$0x1] }
 0x144   :  { %v1485_v8 = vadd.f32 %v2003_v5, %v1437_v3 }
 0x145   :  { %v1624_v3 = vsub.s32 0, %v1623_v1 }
 0x156   :  { %v2023_v9 = vpop.f32.mrb[24].mxu0 }
 0x157   :  { %v2051_v10 = vpop.f32.mrb[24].mxu1  ;;  %v2024_v11 = vpop.f32.mrb[25].mxu0 }
 0x158   :  { %v2025_v12 = vadd.f32 %v2024_v11, %v2023_v9  ;;  %v2052_v13 = vpop.f32.mrb[25].mxu1  ;;  %v2026_v14 = vpop.f32.mrb[26].mxu0 }
 0x159   :  { %v2053_v15 = vadd.f32 %v2052_v13, %v2051_v10  ;;  %v2054_v16 = vpop.f32.mrb[26].mxu1  ;;  %v2027_v17 = vpop.f32.mrb[27].mxu0 }
 0x15a   :  { %v1525_v18 = vadd.f32 %v2025_v12, %v1477_v58  ;;  %v2028_v19 = vadd.f32 %v2027_v17, %v2026_v14  ;;  %v2055_v20 = vpop.f32.mrb[27].mxu1 }
 0x15b   :  { %v2056_v21 = vadd.f32 %v2055_v20, %v2054_v16 }
 0x15c   :  { %v1573_v22 = vadd.f32 %v2053_v15, %v1525_v18  ;;  %v1528_v23 = vadd.f32 %v2028_v19, %v1480_v60 }
 0x15e   :  { %v1576_v24 = vadd.f32 %v2056_v21, %v1528_v23  ;;  %v2029_v25 = vpop.f32.mrb[28].mxu0  ;;  %v1598_v28 = vmul.f32 %v1573_v22, %v1573_v22 }
 0x15f   :  { %v2057_v26 = vpop.f32.mrb[28].mxu1  ;;  %v2030_v27 = vpop.f32.mrb[29].mxu0 }
 0x160   :  { %v1586_v29 = vadd.f32 %v1576_v24, %v1573_v22  ;;  %v1599_v30 = vmul.f32 %v1576_v24, %v1576_v24  ;;  %v2031_v31 = vadd.f32 %v2030_v27, %v2029_v25  ;;  %v2058_v32 = vpop.f32.mrb[29].mxu1  ;;  %v2032_v33 = vpop.f32.mrb[30].mxu0 }
 0x161   :  { %v2059_v34 = vadd.f32 %v2058_v32, %v2057_v26  ;;  %v2060_v35 = vpop.f32.mrb[30].mxu1  ;;  %v2033_v36 = vpop.f32.mrb[31].mxu0 }
 0x162   :  { %v1601_v37 = vadd.f32 %v1599_v30, %v1598_v28  ;;  %v1533_v38 = vadd.f32 %v2031_v31, %v1485_v8  ;;  %v2061_v39 = vpop.f32.mrb[31].mxu1 }
 0x164   :  { %v1581_v40 = vadd.f32 %v2059_v34, %v1533_v38 }
 0x166   :  { %v1588_v41 = vsel %vm1587_vm0, %v1581_v40, 0.0  ;;  %v1600_v42 = vmul.f32 %v1581_v40, %v1581_v40 }
 0x167   :  { %v1589_v43 = vadd.f32 %v1588_v41, %v1586_v29 }
 0x168   :  { %v1602_v44 = vsel %vm1587_vm0, %v1600_v42, 0.0 }
 0x169   :  { %v1590_v45 = vrot.slane %v1589_v43, 4  ;;  %v1603_v46 = vadd.f32 %v1602_v44, %v1601_v37 }
 0x16b   :  { %v1591_v47 = vadd.f32 %v1590_v45, %v1589_v43  ;;  %v1604_v48 = vrot.slane %v1603_v46, 4 }
 0x16d   :  { %v1592_v49 = vrot.slane %v1591_v47, 2  ;;  %v1605_v50 = vadd.f32 %v1604_v48, %v1603_v46 }
 0x16f   :  { %v1593_v51 = vadd.f32 %v1592_v49, %v1591_v47  ;;  %v1606_v52 = vrot.slane %v1605_v50, 2 }
 0x171   :  { %v1594_v53 = vrot.slane %v1593_v51, 1  ;;  %v1607_v54 = vadd.f32 %v1606_v52, %v1605_v50 }
 0x173   :  { %v1595_v55 = vadd.f32 %v1594_v53, %v1593_v51  ;;  %v1608_v56 = vrot.slane %v1607_v54, 1 }
 0x175   :  { %v1597_v57 = vmul.f32 0.055555556, %v1595_v55  ;;  %v1609_v58 = vadd.f32 %v1608_v56, %v1607_v54 }
 0x177   :  { %v1610_v59 = vmul.f32 0.055555556, %v1609_v58  ;;  %v1611_v60 = vmul.f32 %v1597_v57, %v1597_v57 }
 0x179   :  { %v1612_v61 = vsub.f32 %v1610_v59, %v1611_v60 }
 0x17b   :  { %v1613_v62 = vmax.f32 %v1612_v61, 0.0 }
 0x17d   :  { %v1614_v63 = vadd.f32 1e-05, %v1613_v62 }
 0x17f   :  { %2207 = vrsqrt.f32 %v1614_v63 }
 0x189   :  { %v2208_v4 = vpop.eup %2207 }
 0x18a   :  { %v1617_v5 = vmul.f32 %v2208_v4, %v1616_v2 }
 0x18c   :  { %v1619_v7 = vmul.f32 %v1617_v5, %v1597_v57  ;;  %v1625_v8 = vrot.slane %v1617_v5, %v1624_v3 }
 0x18e   :  { %v1620_v9 = vsub.f32 %v1618_v6, %v1619_v7  ;;  %v1627_v10 = vmul.f32 %v1625_v8, %v1573_v22  ;;  %v1628_v11 = vmul.f32 %v1625_v8, %v1576_v24  ;;  %v1629_v12 = vmul.f32 %v1625_v8, %v1581_v40 }
 0x190   :  { %v1634_v13 = vrot.slane %v1620_v9, %v1624_v3 }
 0x192   :  { %v1636_v14 = vadd.f32 %v1634_v13, %v1627_v10  ;;  %v1637_v15 = vadd.f32 %v1634_v13, %v1628_v11  ;;  %v1638_v16 = vadd.f32 %v1634_v13, %v1629_v12 }
 0x194   :  { %vm1639_vm1 = vcmp.ge.f32.partialorder %v1636_v14, 0.0  ;;  %vm1640_vm2 = vcmp.ge.f32.partialorder %v1637_v15, 0.0  ;;  %vm1641_vm3 = vcmp.ge.f32.partialorder %v1638_v16, 0.0  ;;  %v1642_v17 = vmul.f32 0.2, %v1636_v14 }
 0x195   :  { %v1643_v18 = vmul.f32 0.2, %v1637_v15  ;;  %v1644_v19 = vmul.f32 0.2, %v1638_v16 }
 0x196   :  { %v1645_v20 = vsel %vm1639_vm1, %v1636_v14, %v1642_v17 }
 0x197   :  { %v1646_v21 = vsel %vm1640_vm2, %v1637_v15, %v1643_v18  ;;  %v1647_v23 = vsel %vm1641_vm3, %v1638_v16, %v1644_v19 }
 0x198   :  { %v1833_v25 = vpack.c.bf16 %v1647_v23, %v1647_v23  ;;  %v1837_v26 = vpack.c.bf16 %v1646_v21, %v1645_v20 }
 0x19a   :  { %1838 = vst [vmem:[%s2706_s4] sm:$0xff] %v1837_v26   ;;  %1663 = vst [vmem:[%s2706_s4 + $0x8] sm:$0x1] %v1833_v25 }

// kernel: patch_discriminator_forward.9
= control target key start
LH: loop header
LB: loop body
LE: loop exit
PB: predicated region body
PF: predicated region fallthrough
CT: control target
= control target key end

     0   :  { %s2348_s1 = inlined_call_operand.vmem [shape: bf16[2048,128], index: 1, kind: input, shape index: {}]   ;;  %s2349_s0 = inlined_call_operand.vmem [shape: bf16[8,2048], index: 0, kind: input, shape index: {}]   ;;  %s2350_s2 = inlined_call_operand.vmem [shape: f32[1,128], index: 2, kind: input, shape index: {}]   ;;  %s2351_s3 = inlined_call_operand.vmem [shape: f32[8,128], index: 3, kind: output, shape index: {}]  }
   0x1   :  { %v1766_v0 = vld [vmem:[%s2348_s1 + $0x40] sm:$0xff]   ;;  %v1770_v4 = vld [vmem:[%s2348_s1 + $0x48] sm:$0xff]   ;;  %v1774_v8 = vld [vmem:[%s2348_s1 + $0x50] sm:$0xff]  }
   0x2   :  { %v1767_v1 = vld [vmem:[%s2348_s1 + $0xc0] sm:$0xff]   ;;  %1590 = vmatprep.subr.bf16.mxu0 %v1766_v0  ;;  %v1771_v5 = vld [vmem:[%s2348_s1 + $0xc8] sm:$0xff]   ;;  %v1775_v9 = vld [vmem:[%s2348_s1 + $0xd0] sm:$0xff]  }
   0x3   :  { %v1768_v2 = vld [vmem:[%s2348_s1] sm:$0xff]   ;;  %1612 = vmatprep.subr.bf16.mxu1 %v1767_v1  ;;  %v1772_v6 = vld [vmem:[%s2348_s1 + $0x8] sm:$0xff]   ;;  %v1776_v10 = vld [vmem:[%s2348_s1 + $0x10] sm:$0xff]  }
   0x4   :  { %v1769_v3 = vld [vmem:[%s2348_s1 + $0x80] sm:$0xff]   ;;  %1591 = vmatpush3.bf16.msra.mxu0 %v1768_v2  ;;  %v1773_v7 = vld [vmem:[%s2348_s1 + $0x88] sm:$0xff]   ;;  %v1777_v11 = vld [vmem:[%s2348_s1 + $0x90] sm:$0xff]  }
   0x5   :  { %1613 = vmatpush3.bf16.msra.mxu1 %v1769_v3  ;;  %1592 = vmatprep.subr.bf16.mxu0 %v1770_v4  ;;  %v1778_v12 = vld [vmem:[%s2348_s1 + $0x58] sm:$0xff]   ;;  %v1782_v16 = vld [vmem:[%s2348_s1 + $0x60] sm:$0xff]   ;;  %v1786_v20 = vld [vmem:[%s2348_s1 + $0x68] sm:$0xff]  }
   0x6   :  { %1614 = vmatprep.subr.bf16.mxu1 %v1771_v5  ;;  %v1779_v13 = vld [vmem:[%s2348_s1 + $0xd8] sm:$0xff]   ;;  %v1783_v17 = vld [vmem:[%s2348_s1 + $0xe0] sm:$0xff]   ;;  %v1787_v21 = vld [vmem:[%s2348_s1 + $0xe8] sm:$0xff]  }
   0x7   :  { %v1780_v14 = vld [vmem:[%s2348_s1 + $0x18] sm:$0xff]   ;;  %v1784_v18 = vld [vmem:[%s2348_s1 + $0x20] sm:$0xff]   ;;  %v1788_v22 = vld [vmem:[%s2348_s1 + $0x28] sm:$0xff]  }
   0x8   :  { %1593 = vmatpush3.bf16.msra.mxu0 %v1772_v6  ;;  %v1781_v15 = vld [vmem:[%s2348_s1 + $0x98] sm:$0xff]   ;;  %v1785_v19 = vld [vmem:[%s2348_s1 + $0xa0] sm:$0xff]   ;;  %v1789_v23 = vld [vmem:[%s2348_s1 + $0xa8] sm:$0xff]  }
   0x9   :  { %1615 = vmatpush3.bf16.msra.mxu1 %v1773_v7  ;;  %1594 = vmatprep.subr.bf16.mxu0 %v1774_v8  ;;  %v1790_v24 = vld [vmem:[%s2348_s1 + $0x70] sm:$0xff]   ;;  %v1794_v28 = vld [vmem:[%s2348_s1 + $0x78] sm:$0xff]   ;;  %v15_v32 = vld [vmem:[%s2349_s0] sm:$0xff] }
   0xa   :  { %1616 = vmatprep.subr.bf16.mxu1 %v1775_v9  ;;  %v1791_v25 = vld [vmem:[%s2348_s1 + $0xf0] sm:$0xff]   ;;  %v1795_v29 = vld [vmem:[%s2348_s1 + $0xf8] sm:$0xff]   ;;  %v16_v33 = vld [vmem:[%s2349_s0 + $0x8] sm:$0xff]  ;;  %v1446_v34 = vcombine.low %v15_v32, %v15_v32  ;;  %v1447_v35 = vcombine.high %v15_v32, %v15_v32 }
   0xb   :  { %v1792_v26 = vld [vmem:[%s2348_s1 + $0x30] sm:$0xff]   ;;  %v1796_v30 = vld [vmem:[%s2348_s1 + $0x38] sm:$0xff]   ;;  %v1448_v36 = vcombine.low %v16_v33, %v16_v33  ;;  %v1449_v37 = vcombine.high %v16_v33, %v16_v33  ;;  %v1802_v38 = vld [vmem:[%s2348_s1 + $0x140] sm:$0xff]  }
   0xc   :  { %1595 = vmatpush3.bf16.msra.mxu0 %v1776_v10  ;;  %v1793_v27 = vld [vmem:[%s2348_s1 + $0xb0] sm:$0xff]   ;;  %v1797_v31 = vld [vmem:[%s2348_s1 + $0xb8] sm:$0xff]   ;;  %v1803_v39 = vld [vmem:[%s2348_s1 + $0x1c0] sm:$0xff]   ;;  %1142 = vmatprep.mubr.bf16.mxu0 %v1447_v35 }
   0xd   :  { %1617 = vmatpush3.bf16.msra.mxu1 %v1777_v11  ;;  %1596 = vmatprep.subr.bf16.mxu0 %v1778_v12  ;;  %v1804_v40 = vld [vmem:[%s2348_s1 + $0x100] sm:$0xff]   ;;  %v1806_v42 = vld [vmem:[%s2348_s1 + $0x148] sm:$0xff]   ;;  %v1810_v46 = vld [vmem:[%s2348_s1 + $0x150] sm:$0xff]  }
   0xe   :  { %1618 = vmatprep.subr.bf16.mxu1 %v1779_v13  ;;  %1182 = vmatprep.mubr.bf16.mxu1 %v1449_v37  ;;  %v1805_v41 = vld [vmem:[%s2348_s1 + $0x180] sm:$0xff]   ;;  %v1807_v43 = vld [vmem:[%s2348_s1 + $0x1c8] sm:$0xff]   ;;  %v1811_v47 = vld [vmem:[%s2348_s1 + $0x1d0] sm:$0xff]  }
   0xf   :  { %v1808_v44 = vld [vmem:[%s2348_s1 + $0x108] sm:$0xff]   ;;  %v1812_v48 = vld [vmem:[%s2348_s1 + $0x110] sm:$0xff]   ;;  %v1814_v50 = vld [vmem:[%s2348_s1 + $0x158] sm:$0xff]  }
  0x10   :  { %1597 = vmatpush3.bf16.msra.mxu0 %v1780_v14  ;;  %v1809_v45 = vld [vmem:[%s2348_s1 + $0x188] sm:$0xff]   ;;  %v1813_v49 = vld [vmem:[%s2348_s1 + $0x190] sm:$0xff]   ;;  %v1815_v51 = vld [vmem:[%s2348_s1 + $0x1d8] sm:$0xff]  }
  0x11   :  { %1619 = vmatpush3.bf16.msra.mxu1 %v1781_v15  ;;  %1598 = vmatprep.subr.bf16.mxu0 %v1782_v16  ;;  %v1816_v52 = vld [vmem:[%s2348_s1 + $0x118] sm:$0xff]   ;;  %v1818_v54 = vld [vmem:[%s2348_s1 + $0x160] sm:$0xff]   ;;  %v1822_v58 = vld [vmem:[%s2348_s1 + $0x168] sm:$0xff]  }
  0x12   :  { %1620 = vmatprep.subr.bf16.mxu1 %v1783_v17  ;;  %v1817_v53 = vld [vmem:[%s2348_s1 + $0x198] sm:$0xff]   ;;  %v1819_v55 = vld [vmem:[%s2348_s1 + $0x1e0] sm:$0xff]   ;;  %v1823_v59 = vld [vmem:[%s2348_s1 + $0x1e8] sm:$0xff]  }
  0x13   :  { %v1820_v56 = vld [vmem:[%s2348_s1 + $0x120] sm:$0xff]   ;;  %v1824_v60 = vld [vmem:[%s2348_s1 + $0x128] sm:$0xff]   ;;  %v1826_v62 = vld [vmem:[%s2348_s1 + $0x170] sm:$0xff]  }
  0x14   :  { %1599 = vmatpush3.bf16.msra.mxu0 %v1784_v18  ;;  %v1821_v57 = vld [vmem:[%s2348_s1 + $0x1a0] sm:$0xff]   ;;  %v1825_v61 = vld [vmem:[%s2348_s1 + $0x1a8] sm:$0xff]   ;;  %v1827_v63 = vld [vmem:[%s2348_s1 + $0x1f0] sm:$0xff]  }
  0x15   :  { %1621 = vmatpush3.bf16.msra.mxu1 %v1785_v19  ;;  %1600 = vmatprep.subr.bf16.mxu0 %v1786_v20  ;;  %v1828_v0 = vld [vmem:[%s2348_s1 + $0x130] sm:$0xff]   ;;  %v1830_v2 = vld [vmem:[%s2348_s1 + $0x178] sm:$0xff]   ;;  %v1838_v12 = vld [vmem:[%s2348_s1 + $0x240] sm:$0xff]  }
  0x16   :  { %1622 = vmatprep.subr.bf16.mxu1 %v1787_v21  ;;  %v1829_v1 = vld [vmem:[%s2348_s1 + $0x1b0] sm:$0xff]   ;;  %v1831_v3 = vld [vmem:[%s2348_s1 + $0x1f8] sm:$0xff]   ;;  %v1839_v13 = vld [vmem:[%s2348_s1 + $0x2c0] sm:$0xff]  }
  0x17   :  { %v1832_v4 = vld [vmem:[%s2348_s1 + $0x138] sm:$0xff]   ;;  %v17_v6 = vld [vmem:[%s2349_s0 + $0x10] sm:$0xff]  ;;  %v1840_v14 = vld [vmem:[%s2348_s1 + $0x200] sm:$0xff]  }
  0x18   :  { %1601 = vmatpush3.bf16.msra.mxu0 %v1788_v22  ;;  %v1833_v5 = vld [vmem:[%s2348_s1 + $0x1b8] sm:$0xff]   ;;  %v1450_v7 = vcombine.low %v17_v6, %v17_v6  ;;  %v1451_v8 = vcombine.high %v17_v6, %v17_v6  ;;  %v1841_v15 = vld [vmem:[%s2348_s1 + $0x280] sm:$0xff]   ;;  %v1842_v16 = vld [vmem:[%s2348_s1 + $0x248] sm:$0xff]  }
  0x19   :  { %1623 = vmatpush3.bf16.msra.mxu1 %v1789_v23  ;;  %1602 = vmatprep.subr.bf16.mxu0 %v1790_v24  ;;  %v18_v9 = vld [vmem:[%s2349_s0 + $0x18] sm:$0xff]  ;;  %v1843_v17 = vld [vmem:[%s2348_s1 + $0x2c8] sm:$0xff]   ;;  %v1846_v20 = vld [vmem:[%s2348_s1 + $0x250] sm:$0xff]  }
  0x1a   :  { %1624 = vmatprep.subr.bf16.mxu1 %v1791_v25  ;;  %v1452_v10 = vcombine.low %v18_v9, %v18_v9  ;;  %v1453_v11 = vcombine.high %v18_v9, %v18_v9  ;;  %v1844_v18 = vld [vmem:[%s2348_s1 + $0x208] sm:$0xff]   ;;  %v1847_v21 = vld [vmem:[%s2348_s1 + $0x2d0] sm:$0xff]   ;;  %v1850_v24 = vld [vmem:[%s2348_s1 + $0x258] sm:$0xff]  }
  0x1b   :  { %v1845_v19 = vld [vmem:[%s2348_s1 + $0x288] sm:$0xff]   ;;  %v1848_v22 = vld [vmem:[%s2348_s1 + $0x210] sm:$0xff]   ;;  %v1851_v25 = vld [vmem:[%s2348_s1 + $0x2d8] sm:$0xff]  }
  0x1c   :  { %1603 = vmatpush3.bf16.msra.mxu0 %v1792_v26  ;;  %v1849_v23 = vld [vmem:[%s2348_s1 + $0x290] sm:$0xff]   ;;  %v1852_v26 = vld [vmem:[%s2348_s1 + $0x218] sm:$0xff]   ;;  %v1858_v32 = vld [vmem:[%s2348_s1 + $0x268] sm:$0xff]  }
  0x1d   :  { %1625 = vmatpush3.bf16.msra.mxu1 %v1793_v27  ;;  %1604 = vmatprep.subr.bf16.mxu0 %v1794_v28  ;;  %v1853_v27 = vld [vmem:[%s2348_s1 + $0x298] sm:$0xff]   ;;  %v1854_v28 = vld [vmem:[%s2348_s1 + $0x260] sm:$0xff]   ;;  %v1859_v33 = vld [vmem:[%s2348_s1 + $0x2e8] sm:$0xff]  }
  0x1e   :  { %1626 = vmatprep.subr.bf16.mxu1 %v1795_v29  ;;  %v1855_v29 = vld [vmem:[%s2348_s1 + $0x2e0] sm:$0xff]   ;;  %v1861_v35 = vld [vmem:[%s2348_s1 + $0x2a8] sm:$0xff]   ;;  %v1863_v37 = vld [vmem:[%s2348_s1 + $0x2f0] sm:$0xff]  }
  0x1f   :  { %v1894_v6 = vld [vmem:[%s2348_s1 + $0x368] sm:$0xff]  }
  0x20   :  { %1605 = vmatpush3.bf16.msra.mxu0 %v1796_v30  ;;  %v1856_v30 = vld [vmem:[%s2348_s1 + $0x220] sm:$0xff]   ;;  %v1897_v9 = vld [vmem:[%s2348_s1 + $0x3a8] sm:$0xff]  }
  0x21   :  { %1627 = vmatpush3.bf16.msra.mxu1 %v1797_v31  ;;  %1634 = vmatprep.subr.bf16.mxu0 %v1802_v38  ;;  %v1857_v31 = vld [vmem:[%s2348_s1 + $0x2a0] sm:$0xff]   ;;  %v1864_v38 = vld [vmem:[%s2348_s1 + $0x230] sm:$0xff]  }
  0x22   :  { %1656 = vmatprep.subr.bf16.mxu1 %v1803_v39  ;;  %v1865_v39 = vld [vmem:[%s2348_s1 + $0x2b0] sm:$0xff]  }
  0x23   :  { %1143 = vmatmul.mubr.bf16.vlgmr.msra.gmra.mrb[0].mxu0 %v1446_v34  ;;  %v1860_v34 = vld [vmem:[%s2348_s1 + $0x228] sm:$0xff]  }
  0x24   :  { %1183 = vmatmul.mubr.bf16.vlgmr.msra.gmra.mrb[0].mxu1 %v1448_v36  ;;  %1635 = vmatpush3.bf16.msra.mxu0 %v1804_v40  ;;  %v1862_v36 = vld [vmem:[%s2348_s1 + $0x270] sm:$0xff]   ;;  %v1866_v40 = vld [vmem:[%s2348_s1 + $0x278] sm:$0xff]  }
  0x25   :  { %1657 = vmatpush3.bf16.msra.mxu1 %v1805_v41  ;;  %1636 = vmatprep.subr.bf16.mxu0 %v1806_v42  ;;  %v1867_v41 = vld [vmem:[%s2348_s1 + $0x2f8] sm:$0xff]  }
  0x26   :  { %1658 = vmatprep.subr.bf16.mxu1 %v1807_v43  ;;  %1222 = vmatprep.mubr.bf16.mxu0 %v1451_v8  ;;  %v1868_v42 = vld [vmem:[%s2348_s1 + $0x238] sm:$0xff]   ;;  %v1896_v8 = vld [vmem:[%s2348_s1 + $0x328] sm:$0xff]  }
  0x27   :  { %1262 = vmatprep.mubr.bf16.mxu1 %v1453_v11  ;;  %v1869_v43 = vld [vmem:[%s2348_s1 + $0x2b8] sm:$0xff]   ;;  %v1899_v11 = vld [vmem:[%s2348_s1 + $0x3f0] sm:$0xff]  }
  0x28   :  { %1637 = vmatpush3.bf16.msra.mxu0 %v1808_v44  ;;  %v19_v44 = vld [vmem:[%s2349_s0 + $0x20] sm:$0xff] }
  0x29   :  { %1659 = vmatpush3.bf16.msra.mxu1 %v1809_v45  ;;  %1638 = vmatprep.subr.bf16.mxu0 %v1810_v46  ;;  %v20_v45 = vld [vmem:[%s2349_s0 + $0x28] sm:$0xff]  ;;  %v1454_v46 = vcombine.low %v19_v44, %v19_v44 }
  0x2a   :  { %1660 = vmatprep.subr.bf16.mxu1 %v1811_v47  ;;  %v1455_v47 = vcombine.high %v19_v44, %v19_v44 }
  0x2c   :  { %1639 = vmatpush3.bf16.msra.mxu0 %v1812_v48  ;;  %v1456_v48 = vcombine.low %v20_v45, %v20_v45 }
  0x2d   :  { %1661 = vmatpush3.bf16.msra.mxu1 %v1813_v49  ;;  %1640 = vmatprep.subr.bf16.mxu0 %v1814_v50  ;;  %v1457_v49 = vcombine.high %v20_v45, %v20_v45  ;;  %v1874_v50 = vld [vmem:[%s2348_s1 + $0x340] sm:$0xff]  }
  0x2e   :  { %1662 = vmatprep.subr.bf16.mxu1 %v1815_v51  ;;  %v1875_v51 = vld [vmem:[%s2348_s1 + $0x3c0] sm:$0xff]  }
  0x30   :  { %1641 = vmatpush3.bf16.msra.mxu0 %v1816_v52  ;;  %v1876_v52 = vld [vmem:[%s2348_s1 + $0x300] sm:$0xff]  }
  0x31   :  { %1663 = vmatpush3.bf16.msra.mxu1 %v1817_v53  ;;  %1642 = vmatprep.subr.bf16.mxu0 %v1818_v54  ;;  %v1877_v53 = vld [vmem:[%s2348_s1 + $0x380] sm:$0xff]   ;;  %v1878_v54 = vld [vmem:[%s2348_s1 + $0x348] sm:$0xff]  }
  0x32   :  { %1664 = vmatprep.subr.bf16.mxu1 %v1819_v55  ;;  %v1879_v55 = vld [vmem:[%s2348_s1 + $0x3c8] sm:$0xff]  }
  0x34   :  { %1643 = vmatpush3.bf16.msra.mxu0 %v1820_v56  ;;  %v1880_v56 = vld [vmem:[%s2348_s1 + $0x308] sm:$0xff]  }
  0x35   :  { %1665 = vmatpush3.bf16.msra.mxu1 %v1821_v57  ;;  %1644 = vmatprep.subr.bf16.mxu0 %v1822_v58  ;;  %v1881_v57 = vld [vmem:[%s2348_s1 + $0x388] sm:$0xff]   ;;  %v1882_v58 = vld [vmem:[%s2348_s1 + $0x350] sm:$0xff]  }
  0x36   :  { %1666 = vmatprep.subr.bf16.mxu1 %v1823_v59  ;;  %v1883_v59 = vld [vmem:[%s2348_s1 + $0x3d0] sm:$0xff]  }
  0x38   :  { %1645 = vmatpush3.bf16.msra.mxu0 %v1824_v60  ;;  %v1884_v60 = vld [vmem:[%s2348_s1 + $0x310] sm:$0xff]  }
  0x39   :  { %1667 = vmatpush3.bf16.msra.mxu1 %v1825_v61  ;;  %1646 = vmatprep.subr.bf16.mxu0 %v1826_v62  ;;  %v1885_v61 = vld [vmem:[%s2348_s1 + $0x390] sm:$0xff]   ;;  %v1886_v62 = vld [vmem:[%s2348_s1 + $0x358] sm:$0xff]  }
  0x3a   :  { %1668 = vmatprep.subr.bf16.mxu1 %v1827_v63  ;;  %v1887_v63 = vld [vmem:[%s2348_s1 + $0x3d8] sm:$0xff]  }
  0x3c   :  { %1647 = vmatpush3.bf16.msra.mxu0 %v1828_v0  ;;  %v1888_v0 = vld [vmem:[%s2348_s1 + $0x318] sm:$0xff]  }
  0x3d   :  { %1669 = vmatpush3.bf16.msra.mxu1 %v1829_v1  ;;  %1648 = vmatprep.subr.bf16.mxu0 %v1830_v2  ;;  %v1889_v1 = vld [vmem:[%s2348_s1 + $0x398] sm:$0xff]   ;;  %v1890_v2 = vld [vmem:[%s2348_s1 + $0x360] sm:$0xff]  }
  0x3e   :  { %1670 = vmatprep.subr.bf16.mxu1 %v1831_v3  ;;  %v1891_v3 = vld [vmem:[%s2348_s1 + $0x3e0] sm:$0xff]  }
  0x40   :  { %1649 = vmatpush3.bf16.msra.mxu0 %v1832_v4  ;;  %v1892_v4 = vld [vmem:[%s2348_s1 + $0x320] sm:$0xff]  }
  0x41   :  { %1671 = vmatpush3.bf16.msra.mxu1 %v1833_v5  ;;  %1678 = vmatprep.subr.bf16.mxu0 %v1838_v12  ;;  %v1893_v5 = vld [vmem:[%s2348_s1 + $0x3a0] sm:$0xff]   ;;  %v1900_v12 = vld [vmem:[%s2348_s1 + $0x330] sm:$0xff]  }
  0x42   :  { %1700 = vmatprep.subr.bf16.mxu1 %v1839_v13  ;;  %v1901_v13 = vld [vmem:[%s2348_s1 + $0x3b0] sm:$0xff]  }
  0x43   :  { %1223 = vmatmul.mubr.bf16.vlgmr.msra.gmra.mrb[4].mxu0 %v1450_v7  ;;  %v1895_v7 = vld [vmem:[%s2348_s1 + $0x3e8] sm:$0xff]  }
  0x44   :  { %1263 = vmatmul.mubr.bf16.vlgmr.msra.gmra.mrb[4].mxu1 %v1452_v10  ;;  %1679 = vmatpush3.bf16.msra.mxu0 %v1840_v14  ;;  %v1898_v10 = vld [vmem:[%s2348_s1 + $0x370] sm:$0xff]   ;;  %v1902_v14 = vld [vmem:[%s2348_s1 + $0x378] sm:$0xff]  }
  0x45   :  { %1701 = vmatpush3.bf16.msra.mxu1 %v1841_v15  ;;  %1680 = vmatprep.subr.bf16.mxu0 %v1842_v16  ;;  %v1903_v15 = vld [vmem:[%s2348_s1 + $0x3f8] sm:$0xff]  }
  0x46   :  { %1702 = vmatprep.subr.bf16.mxu1 %v1843_v17  ;;  %1302 = vmatprep.mubr.bf16.mxu0 %v1455_v47  ;;  %v1904_v16 = vld [vmem:[%s2348_s1 + $0x338] sm:$0xff]  }
  0x47   :  { %1342 = vmatprep.mubr.bf16.mxu1 %v1457_v49  ;;  %v1905_v17 = vld [vmem:[%s2348_s1 + $0x3b8] sm:$0xff]  }
  0x48   :  { %1681 = vmatpush3.bf16.msra.mxu0 %v1844_v18  ;;  %v21_v18 = vld [vmem:[%s2349_s0 + $0x30] sm:$0xff] }
  0x49   :  { %1703 = vmatpush3.bf16.msra.mxu1 %v1845_v19  ;;  %1682 = vmatprep.subr.bf16.mxu0 %v1846_v20  ;;  %v22_v19 = vld [vmem:[%s2349_s0 + $0x38] sm:$0xff]  ;;  %v1458_v20 = vcombine.low %v21_v18, %v21_v18 }
  0x4a   :  { %1704 = vmatprep.subr.bf16.mxu1 %v1847_v21  ;;  %v1459_v21 = vcombine.high %v21_v18, %v21_v18 }
  0x4c   :  { %1683 = vmatpush3.bf16.msra.mxu0 %v1848_v22  ;;  %v1460_v22 = vcombine.low %v22_v19, %v22_v19 }
  0x4d   :  { %1705 = vmatpush3.bf16.msra.mxu1 %v1849_v23  ;;  %1684 = vmatprep.subr.bf16.mxu0 %v1850_v24  ;;  %v1461_v23 = vcombine.high %v22_v19, %v22_v19 }
  0x4e   :  { %1706 = vmatprep.subr.bf16.mxu1 %v1851_v25 }
  0x50   :  { %1685 = vmatpush3.bf16.msra.mxu0 %v1852_v26  ;;  %v1445_v26 = vld [vmem:[%s2350_s2] ss:$0 sm:$0xff] }
  0x51   :  { %1707 = vmatpush3.bf16.msra.mxu1 %v1853_v27  ;;  %1686 = vmatprep.subr.bf16.mxu0 %v1854_v28 }
  0x52   :  { %1708 = vmatprep.subr.bf16.mxu1 %v1855_v29 }
  0x54   :  { %1687 = vmatpush3.bf16.msra.mxu0 %v1856_v30 }
  0x55   :  { %1709 = vmatpush3.bf16.msra.mxu1 %v1857_v31  ;;  %1688 = vmatprep.subr.bf16.mxu0 %v1858_v32 }
  0x56   :  { %1710 = vmatprep.subr.bf16.mxu1 %v1859_v33 }
  0x58   :  { %1689 = vmatpush3.bf16.msra.mxu0 %v1860_v34 }
  0x59   :  { %1711 = vmatpush3.bf16.msra.mxu1 %v1861_v35  ;;  %1690 = vmatprep.subr.bf16.mxu0 %v1862_v36 }
  0x5a   :  { %1712 = vmatprep.subr.bf16.mxu1 %v1863_v37 }
  0x5c   :  { %1691 = vmatpush3.bf16.msra.mxu0 %v1864_v38 }
  0x5d   :  { %1713 = vmatpush3.bf16.msra.mxu1 %v1865_v39  ;;  %1692 = vmatprep.subr.bf16.mxu0 %v1866_v40 }
  0x5e   :  { %1714 = vmatprep.subr.bf16.mxu1 %v1867_v41 }
  0x60   :  { %1693 = vmatpush3.bf16.msra.mxu0 %v1868_v42 }
  0x61   :  { %1715 = vmatpush3.bf16.msra.mxu1 %v1869_v43  ;;  %1722 = vmatprep.subr.bf16.mxu0 %v1874_v50 }
  0x62   :  { %1744 = vmatprep.subr.bf16.mxu1 %v1875_v51 }
  0x63   :  { %1303 = vmatmul.mubr.bf16.vlgmr.msra.gmra.mrb[8].mxu0 %v1454_v46 }
  0x64   :  { %1343 = vmatmul.mubr.bf16.vlgmr.msra.gmra.mrb[8].mxu1 %v1456_v48  ;;  %1723 = vmatpush3.bf16.msra.mxu0 %v1876_v52 }
  0x65   :  { %1745 = vmatpush3.bf16.msra.mxu1 %v1877_v53  ;;  %1724 = vmatprep.subr.bf16.mxu0 %v1878_v54 }
  0x66   :  { %1746 = vmatprep.subr.bf16.mxu1 %v1879_v55  ;;  %1382 = vmatprep.mubr.bf16.mxu0 %v1459_v21 }
  0x67   :  { %1422 = vmatprep.mubr.bf16.mxu1 %v1461_v23 }
  0x68   :  { %1725 = vmatpush3.bf16.msra.mxu0 %v1880_v56 }
  0x69   :  { %1747 = vmatpush3.bf16.msra.mxu1 %v1881_v57  ;;  %1726 = vmatprep.subr.bf16.mxu0 %v1882_v58 }
  0x6a   :  { %1748 = vmatprep.subr.bf16.mxu1 %v1883_v59 }
  0x6c   :  { %1727 = vmatpush3.bf16.msra.mxu0 %v1884_v60 }
  0x6d   :  { %1749 = vmatpush3.bf16.msra.mxu1 %v1885_v61  ;;  %1728 = vmatprep.subr.bf16.mxu0 %v1886_v62 }
  0x6e   :  { %1750 = vmatprep.subr.bf16.mxu1 %v1887_v63 }
  0x70   :  { %1729 = vmatpush3.bf16.msra.mxu0 %v1888_v0 }
  0x71   :  { %1751 = vmatpush3.bf16.msra.mxu1 %v1889_v1  ;;  %1730 = vmatprep.subr.bf16.mxu0 %v1890_v2 }
  0x72   :  { %1752 = vmatprep.subr.bf16.mxu1 %v1891_v3 }
  0x74   :  { %1731 = vmatpush3.bf16.msra.mxu0 %v1892_v4 }
  0x75   :  { %1753 = vmatpush3.bf16.msra.mxu1 %v1893_v5  ;;  %1732 = vmatprep.subr.bf16.mxu0 %v1894_v6 }
  0x76   :  { %1754 = vmatprep.subr.bf16.mxu1 %v1895_v7 }
  0x78   :  { %1733 = vmatpush3.bf16.msra.mxu0 %v1896_v8 }
  0x79   :  { %1755 = vmatpush3.bf16.msra.mxu1 %v1897_v9  ;;  %1734 = vmatprep.subr.bf16.mxu0 %v1898_v10 }
  0x7a   :  { %1756 = vmatprep.subr.bf16.mxu1 %v1899_v11 }
  0x7c   :  { %1735 = vmatpush3.bf16.msra.mxu0 %v1900_v12 }
  0x7d   :  { %1757 = vmatpush3.bf16.msra.mxu1 %v1901_v13  ;;  %1736 = vmatprep.subr.bf16.mxu0 %v1902_v14 }
  0x7e   :  { %1758 = vmatprep.subr.bf16.mxu1 %v1903_v15 }
  0x80   :  { %1737 = vmatpush3.bf16.msra.mxu0 %v1904_v16 }
  0x81   :  { %1759 = vmatpush3.bf16.msra.mxu1 %v1905_v17 }
  0x83   :  { %1383 = vmatmul.mubr.bf16.vlgmr.msra.gmra.mrb[12].mxu0 %v1458_v20 }
  0x84   :  { %1423 = vmatmul.mubr.bf16.vlgmr.msra.gmra.mrb[12].mxu1 %v1460_v22 }
  0xf6   :  { %v1606_v24 = vpop.f32.mrb[0].mxu0 }
  0xf7   :  { %v1628_v25 = vpop.f32.mrb[0].mxu1  ;;  %v1607_v27 = vpop.f32.mrb[1].mxu0 }
  0xf8   :  { %v1629_v28 = vpop.f32.mrb[1].mxu1  ;;  %v1608_v29 = vadd.f32 %v1607_v27, %v1606_v24  ;;  %v1609_v31 = vpop.f32.mrb[2].mxu0 }
  0xf9   :  { %v1630_v30 = vadd.f32 %v1629_v28, %v1628_v25  ;;  %v1631_v32 = vpop.f32.mrb[2].mxu1  ;;  %v1610_v33 = vpop.f32.mrb[3].mxu0 }
  0xfa   :  { %v1632_v34 = vpop.f32.mrb[3].mxu1  ;;  %v1145_v35 = vadd.f32 %v1608_v29, %v1445_v26 }
  0xfc   :  { %v1185_v36 = vadd.f32 %v1630_v30, %v1145_v35 }
 0x116   :  { %v1650_v37 = vpop.f32.mrb[4].mxu0 }
 0x117   :  { %v1672_v38 = vpop.f32.mrb[4].mxu1  ;;  %v1651_v39 = vpop.f32.mrb[5].mxu0 }
 0x118   :  { %v1673_v40 = vpop.f32.mrb[5].mxu1  ;;  %v1652_v41 = vadd.f32 %v1651_v39, %v1650_v37  ;;  %v1653_v43 = vpop.f32.mrb[6].mxu0 }
 0x119   :  { %v1674_v42 = vadd.f32 %v1673_v40, %v1672_v38  ;;  %v1675_v44 = vpop.f32.mrb[6].mxu1  ;;  %v1654_v45 = vpop.f32.mrb[7].mxu0 }
 0x11a   :  { %v1676_v46 = vpop.f32.mrb[7].mxu1  ;;  %v1225_v47 = vadd.f32 %v1652_v41, %v1185_v36 }
 0x11c   :  { %v1265_v48 = vadd.f32 %v1674_v42, %v1225_v47 }
 0x136   :  { %v1694_v49 = vpop.f32.mrb[8].mxu0 }
 0x137   :  { %v1716_v50 = vpop.f32.mrb[8].mxu1  ;;  %v1695_v51 = vpop.f32.mrb[9].mxu0 }
 0x138   :  { %v1696_v52 = vadd.f32 %v1695_v51, %v1694_v49  ;;  %v1717_v53 = vpop.f32.mrb[9].mxu1  ;;  %v1697_v54 = vpop.f32.mrb[10].mxu0 }
 0x139   :  { %v1718_v55 = vadd.f32 %v1717_v53, %v1716_v50  ;;  %v1719_v56 = vpop.f32.mrb[10].mxu1  ;;  %v1698_v57 = vpop.f32.mrb[11].mxu0 }
 0x13a   :  { %v1305_v58 = vadd.f32 %v1696_v52, %v1265_v48  ;;  %v1720_v59 = vpop.f32.mrb[11].mxu1 }
 0x13c   :  { %v1345_v60 = vadd.f32 %v1718_v55, %v1305_v58 }
 0x156   :  { %v1738_v61 = vpop.f32.mrb[12].mxu0 }
 0x157   :  { %v1760_v62 = vpop.f32.mrb[12].mxu1  ;;  %v1739_v63 = vpop.f32.mrb[13].mxu0 }
 0x158   :  { %v1740_v0 = vadd.f32 %v1739_v63, %v1738_v61  ;;  %v1761_v1 = vpop.f32.mrb[13].mxu1  ;;  %v1741_v2 = vpop.f32.mrb[14].mxu0 }
 0x159   :  { %v1762_v3 = vadd.f32 %v1761_v1, %v1760_v62  ;;  %v1763_v4 = vpop.f32.mrb[14].mxu1  ;;  %v1742_v5 = vpop.f32.mrb[15].mxu0 }
 0x15a   :  { %v1385_v6 = vadd.f32 %v1740_v0, %v1345_v60  ;;  %v1764_v7 = vpop.f32.mrb[15].mxu1 }
 0x15c   :  { %v1425_v8 = vadd.f32 %v1762_v3, %v1385_v6 }
 0x15e   :  { %v1430_v9 = vand.u32 2147483647, %v1425_v8  ;;  %vm1437_vm0 = vcmp.ge.f32.partialorder %v1425_v8, 0.0 }
 0x160   :  { %v1431_v10 = vsub.f32 0.0, %v1430_v9 }
 0x162   :  { %v1432_v11 = vmul.f32 1.442695, %v1431_v10 }
 0x164   :  { %1910 = vpow2.f32 %v1432_v11 }
 0x16e   :  { %v1911_v12 = vpop.eup %1910 }
 0x16f   :  { %v1434_v13 = vadd.f32 1.0, %v1911_v12 }
 0x171   :  { %1912 = vrcp.f32 %v1434_v13 }
 0x17b   :  { %v1913_v14 = vpop.eup %1912 }
 0x17c   :  { %v1438_v15 = vmul.f32 %v1913_v14, %v1911_v12 }
 0x17e   :  { %v1439_v16 = vsel %vm1437_vm0, %v1913_v14, %v1438_v15 }
 0x17f   :  { %1440 = vst [vmem:[%s2351_s3] sm:$0xff] %v1439_v16 }

</bundles_post_ra>
